<compile_context>
chip_gen: v7x
topology: tpu7x:2x2x1
jax: 0.10.0
libtpu: 0.0.40
codegen_flags: <defaults>
</compile_context>

<pallas_src>
import math

import jax
import jax.numpy as jnp
from jax import lax
from jax.experimental import pallas as pl
from jax.experimental.pallas import tpu as pltpu


# ----------------------------------------------------------------------------
# Pallas kernel: 2-layer bidirectional LSTM (final hidden states) + hist_linear
#                + positional embedding + layer norm, for all bs*num_rounds rows.
# ----------------------------------------------------------------------------
def _make_lstm_kernel():
    def kernel(x2d_ref, m_ref,
               wih1_ref, b1_ref, whh1f_ref, whh1b_ref,
               wih2_ref, b2_ref, whh2f_ref, whh2b_ref,
               wlin_ref, blin_ref, pe_ref, gamma_ref, beta_ref,
               o_ref, gx_s, y1_s):
        T, Bp, _ = m_ref.shape               # time-major mask [T, Bp, 1]
        H = whh1f_ref.shape[0]
        G = 4 * H                            # gates per direction

        whh1f = whh1f_ref[...]
        whh1b = whh1b_ref[...]
        whh2f = whh2f_ref[...]
        whh2b = whh2b_ref[...]

        # ---- layer-1 input projection: both directions in ONE batched matmul,
        #      bias folded in. gx_s layout: [:, :G] fwd gates, [:, G:] bwd gates.
        gx_s[...] = (jnp.dot(x2d_ref[...], wih1_ref[...],
                             preferred_element_type=jnp.float32) + b1_ref[...])

        def act(gates, c):
            i = jax.nn.sigmoid(gates[:, 0:H])
            f = jax.nn.sigmoid(gates[:, H:2 * H])
            g = jnp.tanh(gates[:, 2 * H:3 * H])
            o = jax.nn.sigmoid(gates[:, 3 * H:4 * H])
            cn = f * c + i * g
            hn = o * jnp.tanh(cn)
            return hn, cn

        zeros = jnp.zeros((Bp, H), jnp.float32)

        def make_step(whf, whb, write_y):
            # One interleaved step: forward direction at t=s, backward at t=T-1-s.
            def step(s, carry):
                hf, cf, hb, cb = carry
                tf = s
                tb = T - 1 - s
                of = pl.multiple_of(tf * Bp, 8)
                ob = pl.multiple_of(tb * Bp, 8)
                gxf = gx_s[pl.ds(of, Bp), :]                 # [Bp, 8H]
                gxb = gx_s[pl.ds(ob, Bp), :]
                gf = gxf[:, 0:G] + jnp.dot(hf, whf, preferred_element_type=jnp.float32)
                gb = gxb[:, G:2 * G] + jnp.dot(hb, whb, preferred_element_type=jnp.float32)
                hfn, cfn = act(gf, cf)
                hbn, cbn = act(gb, cb)
                mf = m_ref[tf]                               # [Bp, 1]
                mb = m_ref[tb]
                hf = hf + mf * (hfn - hf)
                cf = cf + mf * (cfn - cf)
                hb = hb + mb * (hbn - hb)
                cb = cb + mb * (cbn - cb)
                if write_y:
                    # layer-2 input laid out as [fwd | bwd] along the feature dim
                    y1_s[pl.ds(of, Bp), 0:H] = hf
                    y1_s[pl.ds(ob, Bp), H:2 * H] = hb
                return (hf, cf, hb, cb)
            return step

        # ---- layer 1 (interleaved fwd/bwd), writes per-step outputs for layer 2
        lax.fori_loop(0, T, make_step(whh1f, whh1b, True),
                      (zeros, zeros, zeros, zeros), unroll=True)

        # ---- layer-2 input projection: one batched matmul over the whole sequence,
        #      W_ih2 already concatenated for both directions in the wrapper.
        gx_s[...] = (jnp.dot(y1_s[...], wih2_ref[...],
                             preferred_element_type=jnp.float32) + b2_ref[...])

        # ---- layer 2 (interleaved fwd/bwd), only final hidden states needed
        h2f, _, h2b, _ = lax.fori_loop(0, T, make_step(whh2f, whh2b, False),
                                       (zeros, zeros, zeros, zeros), unroll=True)

        # ---- hist_linear(cat(hn_fwd, hn_bwd)) + pos-embedding + layer norm
        #      (W_lin split by input half to avoid a lane-dim concatenate)
        wlin = wlin_ref[...]
        out = (jnp.dot(h2f, wlin[0:H, :], preferred_element_type=jnp.float32)
               + jnp.dot(h2b, wlin[H:2 * H, :], preferred_element_type=jnp.float32)
               + blin_ref[...])
        out = out + pe_ref[...]
        mu = jnp.mean(out, axis=-1, keepdims=True)
        var = jnp.mean(jnp.square(out - mu), axis=-1, keepdims=True)
        out = (out - mu) * lax.rsqrt(var + 1e-5)
        o_ref[...] = out * gamma_ref[...] + beta_ref[...]

    return kernel


# ----------------------------------------------------------------------------
# Wrapper (glue in plain JAX)
# ----------------------------------------------------------------------------
def hist_encoder_forward(hist, hist_len, params, NH=10):
    bs, R, T, E = hist.shape
    H = params['w_hh1f'].shape[0]
    B = bs * R
    Bp = ((B + 7) // 8) * 8                 # pad batch to a multiple of 8 sublanes

    x = hist.reshape(B, T, E).astype(jnp.float32)
    lens = hist_len.reshape(B).astype(jnp.int32)

    # time-major activations, flattened to [T*Bp, E] (batch-padded with zeros)
    x_tm = jnp.transpose(x, (1, 0, 2))                                      # [T, B, E]
    x_tm = jnp.pad(x_tm, ((0, 0), (0, Bp - B), (0, 0)))
    x2d = x_tm.reshape(T * Bp, E)

    # per-step validity mask [T, Bp, 1] (padded rows have len 0 -> state stays 0)
    valid = (jnp.arange(T)[None, :] < lens[:, None]).astype(jnp.float32)    # [B, T]
    m_tm = jnp.pad(valid.T, ((0, 0), (0, Bp - B)))[:, :, None]              # [T, Bp, 1]

    # per-row positional embedding: row b corresponds to round (b % R)
    pe_rows = jnp.tile(params['pe'][:R], (bs, 1))                           # [B, H]
    pe_rows = jnp.pad(pe_rows, ((0, Bp - B), (0, 0)))                       # [Bp, H]

    # fuse both directions' input-projection weights / biases into single matmuls
    wih1 = jnp.concatenate([params['w_ih1f'], params['w_ih1b']], axis=1)    # [E, 8H]
    b1 = jnp.concatenate([params['b1f'], params['b1b']], axis=1)            # [1, 8H]
    wih2 = jnp.concatenate([params['w_ih2f'], params['w_ih2b']], axis=1)    # [2H, 8H]
    b2 = jnp.concatenate([params['b2f'], params['b2b']], axis=1)            # [1, 8H]

    args = (x2d, m_tm,
            wih1, b1, params['w_hh1f'], params['w_hh1b'],
            wih2, b2, params['w_hh2f'], params['w_hh2b'],
            params['w_lin'], params['b_lin'], pe_rows,
            params['gamma'], params['beta'])

    in_specs = [pl.BlockSpec(a.shape, (lambda nd: (lambda i: (0,) * nd))(a.ndim))
                for a in args]

    enc = pl.pallas_call(
        _make_lstm_kernel(),
        out_shape=jax.ShapeDtypeStruct((Bp, H), jnp.float32),
        grid_spec=pltpu.PrefetchScalarGridSpec(
            num_scalar_prefetch=0,
            grid=(1,),
            in_specs=in_specs,
            out_specs=pl.BlockSpec((Bp, H), lambda i: (0, 0)),
            scratch_shapes=[pltpu.VMEM((T * Bp, 8 * H), jnp.float32),   # gates_x scratch
                            pltpu.VMEM((T * Bp, 2 * H), jnp.float32)],  # layer-1 outputs [fwd|bwd]
        ),
        compiler_params=pltpu.CompilerParams(
            dimension_semantics=("arbitrary",)),
    )(*args)

    enc = enc[:B]
    enc3 = enc.reshape(bs, R, H)

    # hist = hist[:, None].repeat(1, NH, 1, 1).masked_fill(round_mask == 0, 0)
    # Trivial masked replication done in plain jnp (XLA fuses it).
    MASK = jnp.tril(jnp.ones((NH, R), jnp.float32))        # the hardcoded lower-tri MASK
    masked = enc3[:, None, :, :] * MASK[None, :, :, None]  # [bs, NH, R, H]
    hist_out = masked.reshape(bs * NH, R, H)

    # torch.long -> int32 (TPU has no int64 vector support)
    hist_mask = jnp.tile(MASK.astype(jnp.int32)[None], (bs, 1, 1)).reshape(bs * NH, R)
    return hist_out, hist_mask


# ----------------------------------------------------------------------------
# Deterministic parameter init (shapes implied by __init__; not a checkpoint)
# ----------------------------------------------------------------------------
def init_params(key, E, H, max_len=10):
    keys = jax.random.split(key, 14)

    def w(k, shape):
        return (0.1 * jax.random.normal(k, shape)).astype(jnp.float32)

    p = {
        # 2-layer bidirectional LSTM (gate order i, f, g, o; b = b_ih + b_hh fused)
        'w_ih1f': w(keys[0], (E, 4 * H)),      'w_hh1f': w(keys[1], (H, 4 * H)),  'b1f': w(keys[2], (1, 4 * H)),
        'w_ih1b': w(keys[3], (E, 4 * H)),      'w_hh1b': w(keys[4], (H, 4 * H)),  'b1b': w(keys[5], (1, 4 * H)),
        'w_ih2f': w(keys[6], (2 * H, 4 * H)),  'w_hh2f': w(keys[7], (H, 4 * H)),  'b2f': w(keys[8], (1, 4 * H)),
        'w_ih2b': w(keys[9], (2 * H, 4 * H)),  'w_hh2b': w(keys[10], (H, 4 * H)), 'b2b': w(keys[11], (1, 4 * H)),
        # hist_linear: Linear(2H, H)
        'w_lin': w(keys[12], (2 * H, H)),      'b_lin': w(keys[13], (1, H)),
        # LayerNorm(H) default init
        'gamma': jnp.ones((1, H), jnp.float32), 'beta': jnp.zeros((1, H), jnp.float32),
    }
    # PositionalEmbedding(H, max_len=10): standard sinusoidal table
    pos = jnp.arange(max_len, dtype=jnp.float32)[:, None]
    div = jnp.exp(jnp.arange(0, H, 2, dtype=jnp.float32) * (-math.log(10000.0) / H))
    pe = jnp.zeros((max_len, H), jnp.float32)
    pe = pe.at[:, 0::2].set(jnp.sin(pos * div))
    pe = pe.at[:, 1::2].set(jnp.cos(pos * div))
    p['pe'] = pe
    return p


# ----------------------------------------------------------------------------
# Pure-JAX reference (for correctness check only)
# ----------------------------------------------------------------------------
def _lstm_dir_ref(x, mask, wih, whh, b, reverse):
    B, T, _ = x.shape
    Hd = whh.shape[0]
    idxs = jnp.arange(T - 1, -1, -1) if reverse else jnp.arange(T)

    def step(carry, t):
        h, c = carry
        xt = x[:, t, :]
        m = mask[:, t][:, None]
        gates = xt @ wih + h @ whh + b
        i = jax.nn.sigmoid(gates[:, 0:Hd])
        f = jax.nn.sigmoid(gates[:, Hd:2 * Hd])
        g = jnp.tanh(gates[:, 2 * Hd:3 * Hd])
        o = jax.nn.sigmoid(gates[:, 3 * Hd:4 * Hd])
        cn = f * c + i * g
        hn = o * jnp.tanh(cn)
        h = m * hn + (1.0 - m) * h
        c = m * cn + (1.0 - m) * c
        return (h, c), h

    (h, _), ys = lax.scan(step, (jnp.zeros((B, Hd)), jnp.zeros((B, Hd))), idxs)
    ys = jnp.transpose(ys, (1, 0, 2))
    if reverse:
        ys = ys[:, ::-1, :]
    return h, ys


def reference_forward(hist, hist_len, params, NH=10):
    bs, R, T, E = hist.shape
    H = params['w_hh1f'].shape[0]
    B = bs * R
    x = hist.reshape(B, T, E)
    lens = hist_len.reshape(B)
    mask = (jnp.arange(T)[None, :] < lens[:, None]).astype(jnp.float32)

    _, y1f = _lstm_dir_ref(x, mask, params['w_ih1f'], params['w_hh1f'], params['b1f'], False)
    _, y1b = _lstm_dir_ref(x, mask, params['w_ih1b'], params['w_hh1b'], params['b1b'], True)
    y1 = jnp.concatenate([y1f, y1b], axis=-1)
    h2f, _ = _lstm_dir_ref(y1, mask, params['w_ih2f'], params['w_hh2f'], params['b2f'], False)
    h2b, _ = _lstm_dir_ref(y1, mask, params['w_ih2b'], params['w_hh2b'], params['b2b'], True)

    hcat = jnp.concatenate([h2f, h2b], axis=-1)
    out = hcat @ params['w_lin'] + params['b_lin']
    out = out + jnp.tile(params['pe'][:R], (bs, 1))
    mu = out.mean(-1, keepdims=True)
    var = ((out - mu) ** 2).mean(-1, keepdims=True)
    out = (out - mu) / jnp.sqrt(var + 1e-5) * params['gamma'] + params['beta']

    enc = out.reshape(bs, R, H)
    MASK = jnp.tril(jnp.ones((NH, R), jnp.float32))
    rep = enc[:, None, :, :] * MASK[None, :, :, None]
    return rep.reshape(bs * NH, R, H)


# ----------------------------------------------------------------------------
if __name__ == "__main__":
    bs, R, T = 2, 10, 8   # num_rounds must be 10 to match the hardcoded MASK
    E = 32                # txt_embedding_size
    H = 32                # hidden_size
    NH = 10

    key = jax.random.PRNGKey(0)
    k_hist, k_len, k_par = jax.random.split(key, 3)
    hist = jax.random.normal(k_hist, (bs, R, T, E), jnp.float32)
    hist_len = jax.random.randint(k_len, (bs, R), 1, T + 1).astype(jnp.int32)
    params = init_params(k_par, E, H)

    hist_out, hist_mask = hist_encoder_forward(hist, hist_len, params, NH)
    hist_out = jax.block_until_ready(hist_out)
    hist_mask = jax.block_until_ready(hist_mask)

    assert hist_out.shape == (bs * NH, R, H)
    assert hist_mask.shape == (bs * NH, R)
    ref_out = reference_forward(hist, hist_len, params, NH)
    max_err = float(jnp.max(jnp.abs(hist_out - ref_out)))
    assert jnp.allclose(hist_out, ref_out, atol=1e-4, rtol=1e-4), max_err

    print("KERNEL_OK")
</pallas_src>

<mosaic_0001>
module attributes {stable_mosaic.version = 11 : i64} {
  func.func @kernel(%arg0: i32, %arg1: memref<192x32xf32, #tpu.memory_space<vmem>>, %arg2: memref<8x24x1xf32, #tpu.memory_space<vmem>>, %arg3: memref<32x256xf32, #tpu.memory_space<vmem>>, %arg4: memref<1x256xf32, #tpu.memory_space<vmem>>, %arg5: memref<32x128xf32, #tpu.memory_space<vmem>>, %arg6: memref<32x128xf32, #tpu.memory_space<vmem>>, %arg7: memref<64x256xf32, #tpu.memory_space<vmem>>, %arg8: memref<1x256xf32, #tpu.memory_space<vmem>>, %arg9: memref<32x128xf32, #tpu.memory_space<vmem>>, %arg10: memref<32x128xf32, #tpu.memory_space<vmem>>, %arg11: memref<64x32xf32, #tpu.memory_space<vmem>>, %arg12: memref<1x32xf32, #tpu.memory_space<vmem>>, %arg13: memref<24x32xf32, #tpu.memory_space<vmem>>, %arg14: memref<1x32xf32, #tpu.memory_space<vmem>>, %arg15: memref<1x32xf32, #tpu.memory_space<vmem>>, %arg16: memref<24x32xf32, #tpu.memory_space<vmem>>, %arg17: memref<192x256xf32, #tpu.memory_space<vmem>>, %arg18: memref<192x64xf32, #tpu.memory_space<vmem>>) attributes {dimension_semantics = [#tpu.dimension_semantics<arbitrary>], iteration_bounds = array<i64: 1>, scalar_prefetch = 0 : i64, scratch_operands = 2 : i64, tpu.core_type = #tpu.core_type<tc>, window_params = [{pipeline_mode = #tpu.pipeline_mode<synchronous>, transform_indices = @transform_0, window_bounds = array<i64: 192, 32>}, {pipeline_mode = #tpu.pipeline_mode<synchronous>, transform_indices = @transform_1, window_bounds = array<i64: 8, 24, 1>}, {pipeline_mode = #tpu.pipeline_mode<synchronous>, transform_indices = @transform_2, window_bounds = array<i64: 32, 256>}, {pipeline_mode = #tpu.pipeline_mode<synchronous>, transform_indices = @transform_3, window_bounds = array<i64: 1, 256>}, {pipeline_mode = #tpu.pipeline_mode<synchronous>, transform_indices = @transform_4, window_bounds = array<i64: 32, 128>}, {pipeline_mode = #tpu.pipeline_mode<synchronous>, transform_indices = @transform_5, window_bounds = array<i64: 32, 128>}, {pipeline_mode = #tpu.pipeline_mode<synchronous>, transform_indices = @transform_6, window_bounds = array<i64: 64, 256>}, {pipeline_mode = #tpu.pipeline_mode<synchronous>, transform_indices = @transform_7, window_bounds = array<i64: 1, 256>}, {pipeline_mode = #tpu.pipeline_mode<synchronous>, transform_indices = @transform_8, window_bounds = array<i64: 32, 128>}, {pipeline_mode = #tpu.pipeline_mode<synchronous>, transform_indices = @transform_9, window_bounds = array<i64: 32, 128>}, {pipeline_mode = #tpu.pipeline_mode<synchronous>, transform_indices = @transform_10, window_bounds = array<i64: 64, 32>}, {pipeline_mode = #tpu.pipeline_mode<synchronous>, transform_indices = @transform_11, window_bounds = array<i64: 1, 32>}, {pipeline_mode = #tpu.pipeline_mode<synchronous>, transform_indices = @transform_12, window_bounds = array<i64: 24, 32>}, {pipeline_mode = #tpu.pipeline_mode<synchronous>, transform_indices = @transform_13, window_bounds = array<i64: 1, 32>}, {pipeline_mode = #tpu.pipeline_mode<synchronous>, transform_indices = @transform_14, window_bounds = array<i64: 1, 32>}, {pipeline_mode = #tpu.pipeline_mode<synchronous>, transform_indices = @transform_15, window_bounds = array<i64: 24, 32>}]} {
    %c0 = arith.constant 0 : index
    %c0_0 = arith.constant 0 : index
    %0 = vector.load %arg5[%c0, %c0_0] : memref<32x128xf32, #tpu.memory_space<vmem>>, vector<32x128xf32>
    %c0_1 = arith.constant 0 : index
    %c0_2 = arith.constant 0 : index
    %1 = vector.load %arg6[%c0_1, %c0_2] : memref<32x128xf32, #tpu.memory_space<vmem>>, vector<32x128xf32>
    %c0_3 = arith.constant 0 : index
    %c0_4 = arith.constant 0 : index
    %2 = vector.load %arg9[%c0_3, %c0_4] : memref<32x128xf32, #tpu.memory_space<vmem>>, vector<32x128xf32>
    %c0_5 = arith.constant 0 : index
    %c0_6 = arith.constant 0 : index
    %3 = vector.load %arg10[%c0_5, %c0_6] : memref<32x128xf32, #tpu.memory_space<vmem>>, vector<32x128xf32>
    %c0_7 = arith.constant 0 : index
    %c0_8 = arith.constant 0 : index
    %4 = vector.load %arg1[%c0_7, %c0_8] : memref<192x32xf32, #tpu.memory_space<vmem>>, vector<192x32xf32>
    %c0_9 = arith.constant 0 : index
    %c0_10 = arith.constant 0 : index
    %5 = vector.load %arg3[%c0_9, %c0_10] : memref<32x256xf32, #tpu.memory_space<vmem>>, vector<32x256xf32>
    %cst = arith.constant dense<0.000000e+00> : vector<192x256xf32>
    %6 = tpu.matmul %4, %5, %cst {dimension_numbers = #tpu.dot_dimension_numbers<[1], [0], [0], [1], [0, 0, 1, 1], [], []>} : vector<192x32xf32>, vector<32x256xf32>, vector<192x256xf32> -> vector<192x256xf32>
    %c0_11 = arith.constant 0 : index
    %c0_12 = arith.constant 0 : index
    %7 = vector.load %arg4[%c0_11, %c0_12] : memref<1x256xf32, #tpu.memory_space<vmem>>, vector<1x256xf32>
    %8 = vector.broadcast %7 : vector<1x256xf32> to vector<192x256xf32>
    %9 = arith.addf %6, %8 : vector<192x256xf32>
    %c0_13 = arith.constant 0 : index
    %c0_14 = arith.constant 0 : index
    %10 = vector.load %arg17[%c0_13, %c0_14] : memref<192x256xf32, #tpu.memory_space<vmem>>, vector<192x256xf32>
    tpu.vector_store %arg17[%c0_13, %c0_14], %9 {strides = array<i32>} : memref<192x256xf32, #tpu.memory_space<vmem>>, vector<192x256xf32>,
    %cst_15 = arith.constant 0.000000e+00 : f32
    %11 = vector.broadcast %cst_15 : f32 to vector<24x32xf32>
    %c0_i32 = arith.constant 0 : i32
    %c7_i32 = arith.constant 7 : i32
    %12 = arith.subi %c7_i32, %c0_i32 : i32
    %c24_i32 = arith.constant 24 : i32
    %13 = arith.muli %c0_i32, %c24_i32 : i32
    %14 = tpu.assume_multiple %13, 8 : i32
    %c24_i32_16 = arith.constant 24 : i32
    %15 = arith.muli %12, %c24_i32_16 : i32
    %16 = tpu.assume_multiple %15, 8 : i32
    %17 = arith.index_cast %14 : i32 to index
    %c0_17 = arith.constant 0 : index
    %18 = vector.load %arg17[%17, %c0_17] : memref<192x256xf32, #tpu.memory_space<vmem>>, vector<24x256xf32>
    %19 = arith.index_cast %16 : i32 to index
    %c0_18 = arith.constant 0 : index
    %20 = vector.load %arg17[%19, %c0_18] : memref<192x256xf32, #tpu.memory_space<vmem>>, vector<24x256xf32>
    %21 = vector.extract_strided_slice %18 {offsets = [0, 0], sizes = [24, 128], strides = [1, 1]} : vector<24x256xf32> to vector<24x128xf32>
    %cst_19 = arith.constant dense<0.000000e+00> : vector<24x128xf32>
    %22 = tpu.matmul %11, %0, %cst_19 {dimension_numbers = #tpu.dot_dimension_numbers<[1], [0], [0], [1], [0, 0, 1, 1], [], []>} : vector<24x32xf32>, vector<32x128xf32>, vector<24x128xf32> -> vector<24x128xf32>
    %23 = arith.addf %21, %22 : vector<24x128xf32>
    %24 = vector.extract_strided_slice %20 {offsets = [0, 128], sizes = [24, 128], strides = [1, 1]} : vector<24x256xf32> to vector<24x128xf32>
    %cst_20 = arith.constant dense<0.000000e+00> : vector<24x128xf32>
    %25 = tpu.matmul %11, %1, %cst_20 {dimension_numbers = #tpu.dot_dimension_numbers<[1], [0], [0], [1], [0, 0, 1, 1], [], []>} : vector<24x32xf32>, vector<32x128xf32>, vector<24x128xf32> -> vector<24x128xf32>
    %26 = arith.addf %24, %25 : vector<24x128xf32>
    %27 = vector.extract_strided_slice %23 {offsets = [0, 0], sizes = [24, 32], strides = [1, 1]} : vector<24x128xf32> to vector<24x32xf32>
    %28 = arith.negf %27 : vector<24x32xf32>
    %29 = math.exp %28 : vector<24x32xf32>
    %cst_21 = arith.constant 1.000000e+00 : f32
    %30 = vector.broadcast %cst_21 : f32 to vector<24x32xf32>
    %31 = arith.addf %30, %29 : vector<24x32xf32>
    %32 = arith.divf %30, %31 : vector<24x32xf32>
    %33 = vector.extract_strided_slice %23 {offsets = [0, 32], sizes = [24, 32], strides = [1, 1]} : vector<24x128xf32> to vector<24x32xf32>
    %34 = arith.negf %33 : vector<24x32xf32>
    %35 = math.exp %34 : vector<24x32xf32>
    %cst_22 = arith.constant 1.000000e+00 : f32
    %36 = vector.broadcast %cst_22 : f32 to vector<24x32xf32>
    %37 = arith.addf %36, %35 : vector<24x32xf32>
    %38 = arith.divf %36, %37 : vector<24x32xf32>
    %39 = vector.extract_strided_slice %23 {offsets = [0, 64], sizes = [24, 32], strides = [1, 1]} : vector<24x128xf32> to vector<24x32xf32>
    %40 = math.tanh %39 : vector<24x32xf32>
    %41 = vector.extract_strided_slice %23 {offsets = [0, 96], sizes = [24, 32], strides = [1, 1]} : vector<24x128xf32> to vector<24x32xf32>
    %42 = arith.negf %41 : vector<24x32xf32>
    %43 = math.exp %42 : vector<24x32xf32>
    %cst_23 = arith.constant 1.000000e+00 : f32
    %44 = vector.broadcast %cst_23 : f32 to vector<24x32xf32>
    %45 = arith.addf %44, %43 : vector<24x32xf32>
    %46 = arith.divf %44, %45 : vector<24x32xf32>
    %47 = arith.mulf %38, %11 : vector<24x32xf32>
    %48 = arith.mulf %32, %40 : vector<24x32xf32>
    %49 = arith.addf %47, %48 : vector<24x32xf32>
    %50 = math.tanh %49 : vector<24x32xf32>
    %51 = arith.mulf %46, %50 : vector<24x32xf32>
    %52 = vector.extract_strided_slice %26 {offsets = [0, 0], sizes = [24, 32], strides = [1, 1]} : vector<24x128xf32> to vector<24x32xf32>
    %53 = arith.negf %52 : vector<24x32xf32>
    %54 = math.exp %53 : vector<24x32xf32>
    %cst_24 = arith.constant 1.000000e+00 : f32
    %55 = vector.broadcast %cst_24 : f32 to vector<24x32xf32>
    %56 = arith.addf %55, %54 : vector<24x32xf32>
    %57 = arith.divf %55, %56 : vector<24x32xf32>
    %58 = vector.extract_strided_slice %26 {offsets = [0, 32], sizes = [24, 32], strides = [1, 1]} : vector<24x128xf32> to vector<24x32xf32>
    %59 = arith.negf %58 : vector<24x32xf32>
    %60 = math.exp %59 : vector<24x32xf32>
    %cst_25 = arith.constant 1.000000e+00 : f32
    %61 = vector.broadcast %cst_25 : f32 to vector<24x32xf32>
    %62 = arith.addf %61, %60 : vector<24x32xf32>
    %63 = arith.divf %61, %62 : vector<24x32xf32>
    %64 = vector.extract_strided_slice %26 {offsets = [0, 64], sizes = [24, 32], strides = [1, 1]} : vector<24x128xf32> to vector<24x32xf32>
    %65 = math.tanh %64 : vector<24x32xf32>
    %66 = vector.extract_strided_slice %26 {offsets = [0, 96], sizes = [24, 32], strides = [1, 1]} : vector<24x128xf32> to vector<24x32xf32>
    %67 = arith.negf %66 : vector<24x32xf32>
    %68 = math.exp %67 : vector<24x32xf32>
    %cst_26 = arith.constant 1.000000e+00 : f32
    %69 = vector.broadcast %cst_26 : f32 to vector<24x32xf32>
    %70 = arith.addf %69, %68 : vector<24x32xf32>
    %71 = arith.divf %69, %70 : vector<24x32xf32>
    %72 = arith.mulf %63, %11 : vector<24x32xf32>
    %73 = arith.mulf %57, %65 : vector<24x32xf32>
    %74 = arith.addf %72, %73 : vector<24x32xf32>
    %75 = math.tanh %74 : vector<24x32xf32>
    %76 = arith.mulf %71, %75 : vector<24x32xf32>
    %77 = arith.index_cast %c0_i32 : i32 to index
    %c0_27 = arith.constant 0 : index
    %c0_28 = arith.constant 0 : index
    %78 = vector.load %arg2[%77, %c0_27, %c0_28] : memref<8x24x1xf32, #tpu.memory_space<vmem>>, vector<1x24x1xf32>
    %79 = vector.shape_cast %78 : vector<1x24x1xf32> to vector<24x1xf32>
    %80 = arith.index_cast %12 : i32 to index
    %c0_29 = arith.constant 0 : index
    %c0_30 = arith.constant 0 : index
    %81 = vector.load %arg2[%80, %c0_29, %c0_30] : memref<8x24x1xf32, #tpu.memory_space<vmem>>, vector<1x24x1xf32>
    %82 = vector.shape_cast %81 : vector<1x24x1xf32> to vector<24x1xf32>
    %83 = arith.subf %51, %11 : vector<24x32xf32>
    %84 = vector.broadcast %79 : vector<24x1xf32> to vector<24x32xf32>
    %85 = arith.mulf %84, %83 : vector<24x32xf32>
    %86 = arith.addf %11, %85 : vector<24x32xf32>
    %87 = arith.subf %49, %11 : vector<24x32xf32>
    %88 = vector.broadcast %79 : vector<24x1xf32> to vector<24x32xf32>
    %89 = arith.mulf %88, %87 : vector<24x32xf32>
    %90 = arith.addf %11, %89 : vector<24x32xf32>
    %91 = arith.subf %76, %11 : vector<24x32xf32>
    %92 = vector.broadcast %82 : vector<24x1xf32> to vector<24x32xf32>
    %93 = arith.mulf %92, %91 : vector<24x32xf32>
    %94 = arith.addf %11, %93 : vector<24x32xf32>
    %95 = arith.subf %74, %11 : vector<24x32xf32>
    %96 = vector.broadcast %82 : vector<24x1xf32> to vector<24x32xf32>
    %97 = arith.mulf %96, %95 : vector<24x32xf32>
    %98 = arith.addf %11, %97 : vector<24x32xf32>
    %99 = arith.index_cast %14 : i32 to index
    %c0_31 = arith.constant 0 : index
    %100 = vector.load %arg18[%99, %c0_31] : memref<192x64xf32, #tpu.memory_space<vmem>>, vector<24x32xf32>
    tpu.vector_store %arg18[%99, %c0_31], %86 {strides = array<i32>} : memref<192x64xf32, #tpu.memory_space<vmem>>, vector<24x32xf32>,
    %101 = arith.index_cast %16 : i32 to index
    %c32 = arith.constant 32 : index
    %102 = vector.load %arg18[%101, %c32] : memref<192x64xf32, #tpu.memory_space<vmem>>, vector<24x32xf32>
    tpu.vector_store %arg18[%101, %c32], %94 {strides = array<i32>} : memref<192x64xf32, #tpu.memory_space<vmem>>, vector<24x32xf32>,
    %c1_i32 = arith.constant 1 : i32
    %c7_i32_32 = arith.constant 7 : i32
    %103 = arith.subi %c7_i32_32, %c1_i32 : i32
    %c24_i32_33 = arith.constant 24 : i32
    %104 = arith.muli %c1_i32, %c24_i32_33 : i32
    %105 = tpu.assume_multiple %104, 8 : i32
    %c24_i32_34 = arith.constant 24 : i32
    %106 = arith.muli %103, %c24_i32_34 : i32
    %107 = tpu.assume_multiple %106, 8 : i32
    %108 = arith.index_cast %105 : i32 to index
    %c0_35 = arith.constant 0 : index
    %109 = vector.load %arg17[%108, %c0_35] : memref<192x256xf32, #tpu.memory_space<vmem>>, vector<24x256xf32>
    %110 = arith.index_cast %107 : i32 to index
    %c0_36 = arith.constant 0 : index
    %111 = vector.load %arg17[%110, %c0_36] : memref<192x256xf32, #tpu.memory_space<vmem>>, vector<24x256xf32>
    %112 = vector.extract_strided_slice %109 {offsets = [0, 0], sizes = [24, 128], strides = [1, 1]} : vector<24x256xf32> to vector<24x128xf32>
    %cst_37 = arith.constant dense<0.000000e+00> : vector<24x128xf32>
    %113 = tpu.matmul %86, %0, %cst_37 {dimension_numbers = #tpu.dot_dimension_numbers<[1], [0], [0], [1], [0, 0, 1, 1], [], []>} : vector<24x32xf32>, vector<32x128xf32>, vector<24x128xf32> -> vector<24x128xf32>
    %114 = arith.addf %112, %113 : vector<24x128xf32>
    %115 = vector.extract_strided_slice %111 {offsets = [0, 128], sizes = [24, 128], strides = [1, 1]} : vector<24x256xf32> to vector<24x128xf32>
    %cst_38 = arith.constant dense<0.000000e+00> : vector<24x128xf32>
    %116 = tpu.matmul %94, %1, %cst_38 {dimension_numbers = #tpu.dot_dimension_numbers<[1], [0], [0], [1], [0, 0, 1, 1], [], []>} : vector<24x32xf32>, vector<32x128xf32>, vector<24x128xf32> -> vector<24x128xf32>
    %117 = arith.addf %115, %116 : vector<24x128xf32>
    %118 = vector.extract_strided_slice %114 {offsets = [0, 0], sizes = [24, 32], strides = [1, 1]} : vector<24x128xf32> to vector<24x32xf32>
    %119 = arith.negf %118 : vector<24x32xf32>
    %120 = math.exp %119 : vector<24x32xf32>
    %cst_39 = arith.constant 1.000000e+00 : f32
    %121 = vector.broadcast %cst_39 : f32 to vector<24x32xf32>
    %122 = arith.addf %121, %120 : vector<24x32xf32>
    %123 = arith.divf %121, %122 : vector<24x32xf32>
    %124 = vector.extract_strided_slice %114 {offsets = [0, 32], sizes = [24, 32], strides = [1, 1]} : vector<24x128xf32> to vector<24x32xf32>
    %125 = arith.negf %124 : vector<24x32xf32>
    %126 = math.exp %125 : vector<24x32xf32>
    %cst_40 = arith.constant 1.000000e+00 : f32
    %127 = vector.broadcast %cst_40 : f32 to vector<24x32xf32>
    %128 = arith.addf %127, %126 : vector<24x32xf32>
    %129 = arith.divf %127, %128 : vector<24x32xf32>
    %130 = vector.extract_strided_slice %114 {offsets = [0, 64], sizes = [24, 32], strides = [1, 1]} : vector<24x128xf32> to vector<24x32xf32>
    %131 = math.tanh %130 : vector<24x32xf32>
    %132 = vector.extract_strided_slice %114 {offsets = [0, 96], sizes = [24, 32], strides = [1, 1]} : vector<24x128xf32> to vector<24x32xf32>
    %133 = arith.negf %132 : vector<24x32xf32>
    %134 = math.exp %133 : vector<24x32xf32>
    %cst_41 = arith.constant 1.000000e+00 : f32
    %135 = vector.broadcast %cst_41 : f32 to vector<24x32xf32>
    %136 = arith.addf %135, %134 : vector<24x32xf32>
    %137 = arith.divf %135, %136 : vector<24x32xf32>
    %138 = arith.mulf %129, %90 : vector<24x32xf32>
    %139 = arith.mulf %123, %131 : vector<24x32xf32>
    %140 = arith.addf %138, %139 : vector<24x32xf32>
    %141 = math.tanh %140 : vector<24x32xf32>
    %142 = arith.mulf %137, %141 : vector<24x32xf32>
    %143 = vector.extract_strided_slice %117 {offsets = [0, 0], sizes = [24, 32], strides = [1, 1]} : vector<24x128xf32> to vector<24x32xf32>
    %144 = arith.negf %143 : vector<24x32xf32>
    %145 = math.exp %144 : vector<24x32xf32>
    %cst_42 = arith.constant 1.000000e+00 : f32
    %146 = vector.broadcast %cst_42 : f32 to vector<24x32xf32>
    %147 = arith.addf %146, %145 : vector<24x32xf32>
    %148 = arith.divf %146, %147 : vector<24x32xf32>
    %149 = vector.extract_strided_slice %117 {offsets = [0, 32], sizes = [24, 32], strides = [1, 1]} : vector<24x128xf32> to vector<24x32xf32>
    %150 = arith.negf %149 : vector<24x32xf32>
    %151 = math.exp %150 : vector<24x32xf32>
    %cst_43 = arith.constant 1.000000e+00 : f32
    %152 = vector.broadcast %cst_43 : f32 to vector<24x32xf32>
    %153 = arith.addf %152, %151 : vector<24x32xf32>
    %154 = arith.divf %152, %153 : vector<24x32xf32>
    %155 = vector.extract_strided_slice %117 {offsets = [0, 64], sizes = [24, 32], strides = [1, 1]} : vector<24x128xf32> to vector<24x32xf32>
    %156 = math.tanh %155 : vector<24x32xf32>
    %157 = vector.extract_strided_slice %117 {offsets = [0, 96], sizes = [24, 32], strides = [1, 1]} : vector<24x128xf32> to vector<24x32xf32>
    %158 = arith.negf %157 : vector<24x32xf32>
    %159 = math.exp %158 : vector<24x32xf32>
    %cst_44 = arith.constant 1.000000e+00 : f32
    %160 = vector.broadcast %cst_44 : f32 to vector<24x32xf32>
    %161 = arith.addf %160, %159 : vector<24x32xf32>
    %162 = arith.divf %160, %161 : vector<24x32xf32>
    %163 = arith.mulf %154, %98 : vector<24x32xf32>
    %164 = arith.mulf %148, %156 : vector<24x32xf32>
    %165 = arith.addf %163, %164 : vector<24x32xf32>
    %166 = math.tanh %165 : vector<24x32xf32>
    %167 = arith.mulf %162, %166 : vector<24x32xf32>
    %168 = arith.index_cast %c1_i32 : i32 to index
    %c0_45 = arith.constant 0 : index
    %c0_46 = arith.constant 0 : index
    %169 = vector.load %arg2[%168, %c0_45, %c0_46] : memref<8x24x1xf32, #tpu.memory_space<vmem>>, vector<1x24x1xf32>
    %170 = vector.shape_cast %169 : vector<1x24x1xf32> to vector<24x1xf32>
    %171 = arith.index_cast %103 : i32 to index
    %c0_47 = arith.constant 0 : index
    %c0_48 = arith.constant 0 : index
    %172 = vector.load %arg2[%171, %c0_47, %c0_48] : memref<8x24x1xf32, #tpu.memory_space<vmem>>, vector<1x24x1xf32>
    %173 = vector.shape_cast %172 : vector<1x24x1xf32> to vector<24x1xf32>
    %174 = arith.subf %142, %86 : vector<24x32xf32>
    %175 = vector.broadcast %170 : vector<24x1xf32> to vector<24x32xf32>
    %176 = arith.mulf %175, %174 : vector<24x32xf32>
    %177 = arith.addf %86, %176 : vector<24x32xf32>
    %178 = arith.subf %140, %90 : vector<24x32xf32>
    %179 = vector.broadcast %170 : vector<24x1xf32> to vector<24x32xf32>
    %180 = arith.mulf %179, %178 : vector<24x32xf32>
    %181 = arith.addf %90, %180 : vector<24x32xf32>
    %182 = arith.subf %167, %94 : vector<24x32xf32>
    %183 = vector.broadcast %173 : vector<24x1xf32> to vector<24x32xf32>
    %184 = arith.mulf %183, %182 : vector<24x32xf32>
    %185 = arith.addf %94, %184 : vector<24x32xf32>
    %186 = arith.subf %165, %98 : vector<24x32xf32>
    %187 = vector.broadcast %173 : vector<24x1xf32> to vector<24x32xf32>
    %188 = arith.mulf %187, %186 : vector<24x32xf32>
    %189 = arith.addf %98, %188 : vector<24x32xf32>
    %190 = arith.index_cast %105 : i32 to index
    %c0_49 = arith.constant 0 : index
    %191 = vector.load %arg18[%190, %c0_49] : memref<192x64xf32, #tpu.memory_space<vmem>>, vector<24x32xf32>
    tpu.vector_store %arg18[%190, %c0_49], %177 {strides = array<i32>} : memref<192x64xf32, #tpu.memory_space<vmem>>, vector<24x32xf32>,
    %192 = arith.index_cast %107 : i32 to index
    %c32_50 = arith.constant 32 : index
    %193 = vector.load %arg18[%192, %c32_50] : memref<192x64xf32, #tpu.memory_space<vmem>>, vector<24x32xf32>
    tpu.vector_store %arg18[%192, %c32_50], %185 {strides = array<i32>} : memref<192x64xf32, #tpu.memory_space<vmem>>, vector<24x32xf32>,
    %c2_i32 = arith.constant 2 : i32
    %c7_i32_51 = arith.constant 7 : i32
    %194 = arith.subi %c7_i32_51, %c2_i32 : i32
    %c24_i32_52 = arith.constant 24 : i32
    %195 = arith.muli %c2_i32, %c24_i32_52 : i32
    %196 = tpu.assume_multiple %195, 8 : i32
    %c24_i32_53 = arith.constant 24 : i32
    %197 = arith.muli %194, %c24_i32_53 : i32
    %198 = tpu.assume_multiple %197, 8 : i32
    %199 = arith.index_cast %196 : i32 to index
    %c0_54 = arith.constant 0 : index
    %200 = vector.load %arg17[%199, %c0_54] : memref<192x256xf32, #tpu.memory_space<vmem>>, vector<24x256xf32>
    %201 = arith.index_cast %198 : i32 to index
    %c0_55 = arith.constant 0 : index
    %202 = vector.load %arg17[%201, %c0_55] : memref<192x256xf32, #tpu.memory_space<vmem>>, vector<24x256xf32>
    %203 = vector.extract_strided_slice %200 {offsets = [0, 0], sizes = [24, 128], strides = [1, 1]} : vector<24x256xf32> to vector<24x128xf32>
    %cst_56 = arith.constant dense<0.000000e+00> : vector<24x128xf32>
    %204 = tpu.matmul %177, %0, %cst_56 {dimension_numbers = #tpu.dot_dimension_numbers<[1], [0], [0], [1], [0, 0, 1, 1], [], []>} : vector<24x32xf32>, vector<32x128xf32>, vector<24x128xf32> -> vector<24x128xf32>
    %205 = arith.addf %203, %204 : vector<24x128xf32>
    %206 = vector.extract_strided_slice %202 {offsets = [0, 128], sizes = [24, 128], strides = [1, 1]} : vector<24x256xf32> to vector<24x128xf32>
    %cst_57 = arith.constant dense<0.000000e+00> : vector<24x128xf32>
    %207 = tpu.matmul %185, %1, %cst_57 {dimension_numbers = #tpu.dot_dimension_numbers<[1], [0], [0], [1], [0, 0, 1, 1], [], []>} : vector<24x32xf32>, vector<32x128xf32>, vector<24x128xf32> -> vector<24x128xf32>
    %208 = arith.addf %206, %207 : vector<24x128xf32>
    %209 = vector.extract_strided_slice %205 {offsets = [0, 0], sizes = [24, 32], strides = [1, 1]} : vector<24x128xf32> to vector<24x32xf32>
    %210 = arith.negf %209 : vector<24x32xf32>
    %211 = math.exp %210 : vector<24x32xf32>
    %cst_58 = arith.constant 1.000000e+00 : f32
    %212 = vector.broadcast %cst_58 : f32 to vector<24x32xf32>
    %213 = arith.addf %212, %211 : vector<24x32xf32>
    %214 = arith.divf %212, %213 : vector<24x32xf32>
    %215 = vector.extract_strided_slice %205 {offsets = [0, 32], sizes = [24, 32], strides = [1, 1]} : vector<24x128xf32> to vector<24x32xf32>
    %216 = arith.negf %215 : vector<24x32xf32>
    %217 = math.exp %216 : vector<24x32xf32>
    %cst_59 = arith.constant 1.000000e+00 : f32
    %218 = vector.broadcast %cst_59 : f32 to vector<24x32xf32>
    %219 = arith.addf %218, %217 : vector<24x32xf32>
    %220 = arith.divf %218, %219 : vector<24x32xf32>
    %221 = vector.extract_strided_slice %205 {offsets = [0, 64], sizes = [24, 32], strides = [1, 1]} : vector<24x128xf32> to vector<24x32xf32>
    %222 = math.tanh %221 : vector<24x32xf32>
    %223 = vector.extract_strided_slice %205 {offsets = [0, 96], sizes = [24, 32], strides = [1, 1]} : vector<24x128xf32> to vector<24x32xf32>
    %224 = arith.negf %223 : vector<24x32xf32>
    %225 = math.exp %224 : vector<24x32xf32>
    %cst_60 = arith.constant 1.000000e+00 : f32
    %226 = vector.broadcast %cst_60 : f32 to vector<24x32xf32>
    %227 = arith.addf %226, %225 : vector<24x32xf32>
    %228 = arith.divf %226, %227 : vector<24x32xf32>
    %229 = arith.mulf %220, %181 : vector<24x32xf32>
    %230 = arith.mulf %214, %222 : vector<24x32xf32>
    %231 = arith.addf %229, %230 : vector<24x32xf32>
    %232 = math.tanh %231 : vector<24x32xf32>
    %233 = arith.mulf %228, %232 : vector<24x32xf32>
    %234 = vector.extract_strided_slice %208 {offsets = [0, 0], sizes = [24, 32], strides = [1, 1]} : vector<24x128xf32> to vector<24x32xf32>
    %235 = arith.negf %234 : vector<24x32xf32>
    %236 = math.exp %235 : vector<24x32xf32>
    %cst_61 = arith.constant 1.000000e+00 : f32
    %237 = vector.broadcast %cst_61 : f32 to vector<24x32xf32>
    %238 = arith.addf %237, %236 : vector<24x32xf32>
    %239 = arith.divf %237, %238 : vector<24x32xf32>
    %240 = vector.extract_strided_slice %208 {offsets = [0, 32], sizes = [24, 32], strides = [1, 1]} : vector<24x128xf32> to vector<24x32xf32>
    %241 = arith.negf %240 : vector<24x32xf32>
    %242 = math.exp %241 : vector<24x32xf32>
    %cst_62 = arith.constant 1.000000e+00 : f32
    %243 = vector.broadcast %cst_62 : f32 to vector<24x32xf32>
    %244 = arith.addf %243, %242 : vector<24x32xf32>
    %245 = arith.divf %243, %244 : vector<24x32xf32>
    %246 = vector.extract_strided_slice %208 {offsets = [0, 64], sizes = [24, 32], strides = [1, 1]} : vector<24x128xf32> to vector<24x32xf32>
    %247 = math.tanh %246 : vector<24x32xf32>
    %248 = vector.extract_strided_slice %208 {offsets = [0, 96], sizes = [24, 32], strides = [1, 1]} : vector<24x128xf32> to vector<24x32xf32>
    %249 = arith.negf %248 : vector<24x32xf32>
    %250 = math.exp %249 : vector<24x32xf32>
    %cst_63 = arith.constant 1.000000e+00 : f32
    %251 = vector.broadcast %cst_63 : f32 to vector<24x32xf32>
    %252 = arith.addf %251, %250 : vector<24x32xf32>
    %253 = arith.divf %251, %252 : vector<24x32xf32>
    %254 = arith.mulf %245, %189 : vector<24x32xf32>
    %255 = arith.mulf %239, %247 : vector<24x32xf32>
    %256 = arith.addf %254, %255 : vector<24x32xf32>
    %257 = math.tanh %256 : vector<24x32xf32>
    %258 = arith.mulf %253, %257 : vector<24x32xf32>
    %259 = arith.index_cast %c2_i32 : i32 to index
    %c0_64 = arith.constant 0 : index
    %c0_65 = arith.constant 0 : index
    %260 = vector.load %arg2[%259, %c0_64, %c0_65] : memref<8x24x1xf32, #tpu.memory_space<vmem>>, vector<1x24x1xf32>
    %261 = vector.shape_cast %260 : vector<1x24x1xf32> to vector<24x1xf32>
    %262 = arith.index_cast %194 : i32 to index
    %c0_66 = arith.constant 0 : index
    %c0_67 = arith.constant 0 : index
    %263 = vector.load %arg2[%262, %c0_66, %c0_67] : memref<8x24x1xf32, #tpu.memory_space<vmem>>, vector<1x24x1xf32>
    %264 = vector.shape_cast %263 : vector<1x24x1xf32> to vector<24x1xf32>
    %265 = arith.subf %233, %177 : vector<24x32xf32>
    %266 = vector.broadcast %261 : vector<24x1xf32> to vector<24x32xf32>
    %267 = arith.mulf %266, %265 : vector<24x32xf32>
    %268 = arith.addf %177, %267 : vector<24x32xf32>
    %269 = arith.subf %231, %181 : vector<24x32xf32>
    %270 = vector.broadcast %261 : vector<24x1xf32> to vector<24x32xf32>
    %271 = arith.mulf %270, %269 : vector<24x32xf32>
    %272 = arith.addf %181, %271 : vector<24x32xf32>
    %273 = arith.subf %258, %185 : vector<24x32xf32>
    %274 = vector.broadcast %264 : vector<24x1xf32> to vector<24x32xf32>
    %275 = arith.mulf %274, %273 : vector<24x32xf32>
    %276 = arith.addf %185, %275 : vector<24x32xf32>
    %277 = arith.subf %256, %189 : vector<24x32xf32>
    %278 = vector.broadcast %264 : vector<24x1xf32> to vector<24x32xf32>
    %279 = arith.mulf %278, %277 : vector<24x32xf32>
    %280 = arith.addf %189, %279 : vector<24x32xf32>
    %281 = arith.index_cast %196 : i32 to index
    %c0_68 = arith.constant 0 : index
    %282 = vector.load %arg18[%281, %c0_68] : memref<192x64xf32, #tpu.memory_space<vmem>>, vector<24x32xf32>
    tpu.vector_store %arg18[%281, %c0_68], %268 {strides = array<i32>} : memref<192x64xf32, #tpu.memory_space<vmem>>, vector<24x32xf32>,
    %283 = arith.index_cast %198 : i32 to index
    %c32_69 = arith.constant 32 : index
    %284 = vector.load %arg18[%283, %c32_69] : memref<192x64xf32, #tpu.memory_space<vmem>>, vector<24x32xf32>
    tpu.vector_store %arg18[%283, %c32_69], %276 {strides = array<i32>} : memref<192x64xf32, #tpu.memory_space<vmem>>, vector<24x32xf32>,
    %c3_i32 = arith.constant 3 : i32
    %c7_i32_70 = arith.constant 7 : i32
    %285 = arith.subi %c7_i32_70, %c3_i32 : i32
    %c24_i32_71 = arith.constant 24 : i32
    %286 = arith.muli %c3_i32, %c24_i32_71 : i32
    %287 = tpu.assume_multiple %286, 8 : i32
    %c24_i32_72 = arith.constant 24 : i32
    %288 = arith.muli %285, %c24_i32_72 : i32
    %289 = tpu.assume_multiple %288, 8 : i32
    %290 = arith.index_cast %287 : i32 to index
    %c0_73 = arith.constant 0 : index
    %291 = vector.load %arg17[%290, %c0_73] : memref<192x256xf32, #tpu.memory_space<vmem>>, vector<24x256xf32>
    %292 = arith.index_cast %289 : i32 to index
    %c0_74 = arith.constant 0 : index
    %293 = vector.load %arg17[%292, %c0_74] : memref<192x256xf32, #tpu.memory_space<vmem>>, vector<24x256xf32>
    %294 = vector.extract_strided_slice %291 {offsets = [0, 0], sizes = [24, 128], strides = [1, 1]} : vector<24x256xf32> to vector<24x128xf32>
    %cst_75 = arith.constant dense<0.000000e+00> : vector<24x128xf32>
    %295 = tpu.matmul %268, %0, %cst_75 {dimension_numbers = #tpu.dot_dimension_numbers<[1], [0], [0], [1], [0, 0, 1, 1], [], []>} : vector<24x32xf32>, vector<32x128xf32>, vector<24x128xf32> -> vector<24x128xf32>
    %296 = arith.addf %294, %295 : vector<24x128xf32>
    %297 = vector.extract_strided_slice %293 {offsets = [0, 128], sizes = [24, 128], strides = [1, 1]} : vector<24x256xf32> to vector<24x128xf32>
    %cst_76 = arith.constant dense<0.000000e+00> : vector<24x128xf32>
    %298 = tpu.matmul %276, %1, %cst_76 {dimension_numbers = #tpu.dot_dimension_numbers<[1], [0], [0], [1], [0, 0, 1, 1], [], []>} : vector<24x32xf32>, vector<32x128xf32>, vector<24x128xf32> -> vector<24x128xf32>
    %299 = arith.addf %297, %298 : vector<24x128xf32>
    %300 = vector.extract_strided_slice %296 {offsets = [0, 0], sizes = [24, 32], strides = [1, 1]} : vector<24x128xf32> to vector<24x32xf32>
    %301 = arith.negf %300 : vector<24x32xf32>
    %302 = math.exp %301 : vector<24x32xf32>
    %cst_77 = arith.constant 1.000000e+00 : f32
    %303 = vector.broadcast %cst_77 : f32 to vector<24x32xf32>
    %304 = arith.addf %303, %302 : vector<24x32xf32>
    %305 = arith.divf %303, %304 : vector<24x32xf32>
    %306 = vector.extract_strided_slice %296 {offsets = [0, 32], sizes = [24, 32], strides = [1, 1]} : vector<24x128xf32> to vector<24x32xf32>
    %307 = arith.negf %306 : vector<24x32xf32>
    %308 = math.exp %307 : vector<24x32xf32>
    %cst_78 = arith.constant 1.000000e+00 : f32
    %309 = vector.broadcast %cst_78 : f32 to vector<24x32xf32>
    %310 = arith.addf %309, %308 : vector<24x32xf32>
    %311 = arith.divf %309, %310 : vector<24x32xf32>
    %312 = vector.extract_strided_slice %296 {offsets = [0, 64], sizes = [24, 32], strides = [1, 1]} : vector<24x128xf32> to vector<24x32xf32>
    %313 = math.tanh %312 : vector<24x32xf32>
    %314 = vector.extract_strided_slice %296 {offsets = [0, 96], sizes = [24, 32], strides = [1, 1]} : vector<24x128xf32> to vector<24x32xf32>
    %315 = arith.negf %314 : vector<24x32xf32>
    %316 = math.exp %315 : vector<24x32xf32>
    %cst_79 = arith.constant 1.000000e+00 : f32
    %317 = vector.broadcast %cst_79 : f32 to vector<24x32xf32>
    %318 = arith.addf %317, %316 : vector<24x32xf32>
    %319 = arith.divf %317, %318 : vector<24x32xf32>
    %320 = arith.mulf %311, %272 : vector<24x32xf32>
    %321 = arith.mulf %305, %313 : vector<24x32xf32>
    %322 = arith.addf %320, %321 : vector<24x32xf32>
    %323 = math.tanh %322 : vector<24x32xf32>
    %324 = arith.mulf %319, %323 : vector<24x32xf32>
    %325 = vector.extract_strided_slice %299 {offsets = [0, 0], sizes = [24, 32], strides = [1, 1]} : vector<24x128xf32> to vector<24x32xf32>
    %326 = arith.negf %325 : vector<24x32xf32>
    %327 = math.exp %326 : vector<24x32xf32>
    %cst_80 = arith.constant 1.000000e+00 : f32
    %328 = vector.broadcast %cst_80 : f32 to vector<24x32xf32>
    %329 = arith.addf %328, %327 : vector<24x32xf32>
    %330 = arith.divf %328, %329 : vector<24x32xf32>
    %331 = vector.extract_strided_slice %299 {offsets = [0, 32], sizes = [24, 32], strides = [1, 1]} : vector<24x128xf32> to vector<24x32xf32>
    %332 = arith.negf %331 : vector<24x32xf32>
    %333 = math.exp %332 : vector<24x32xf32>
    %cst_81 = arith.constant 1.000000e+00 : f32
    %334 = vector.broadcast %cst_81 : f32 to vector<24x32xf32>
    %335 = arith.addf %334, %333 : vector<24x32xf32>
    %336 = arith.divf %334, %335 : vector<24x32xf32>
    %337 = vector.extract_strided_slice %299 {offsets = [0, 64], sizes = [24, 32], strides = [1, 1]} : vector<24x128xf32> to vector<24x32xf32>
    %338 = math.tanh %337 : vector<24x32xf32>
    %339 = vector.extract_strided_slice %299 {offsets = [0, 96], sizes = [24, 32], strides = [1, 1]} : vector<24x128xf32> to vector<24x32xf32>
    %340 = arith.negf %339 : vector<24x32xf32>
    %341 = math.exp %340 : vector<24x32xf32>
    %cst_82 = arith.constant 1.000000e+00 : f32
    %342 = vector.broadcast %cst_82 : f32 to vector<24x32xf32>
    %343 = arith.addf %342, %341 : vector<24x32xf32>
    %344 = arith.divf %342, %343 : vector<24x32xf32>
    %345 = arith.mulf %336, %280 : vector<24x32xf32>
    %346 = arith.mulf %330, %338 : vector<24x32xf32>
    %347 = arith.addf %345, %346 : vector<24x32xf32>
    %348 = math.tanh %347 : vector<24x32xf32>
    %349 = arith.mulf %344, %348 : vector<24x32xf32>
    %350 = arith.index_cast %c3_i32 : i32 to index
    %c0_83 = arith.constant 0 : index
    %c0_84 = arith.constant 0 : index
    %351 = vector.load %arg2[%350, %c0_83, %c0_84] : memref<8x24x1xf32, #tpu.memory_space<vmem>>, vector<1x24x1xf32>
    %352 = vector.shape_cast %351 : vector<1x24x1xf32> to vector<24x1xf32>
    %353 = arith.index_cast %285 : i32 to index
    %c0_85 = arith.constant 0 : index
    %c0_86 = arith.constant 0 : index
    %354 = vector.load %arg2[%353, %c0_85, %c0_86] : memref<8x24x1xf32, #tpu.memory_space<vmem>>, vector<1x24x1xf32>
    %355 = vector.shape_cast %354 : vector<1x24x1xf32> to vector<24x1xf32>
    %356 = arith.subf %324, %268 : vector<24x32xf32>
    %357 = vector.broadcast %352 : vector<24x1xf32> to vector<24x32xf32>
    %358 = arith.mulf %357, %356 : vector<24x32xf32>
    %359 = arith.addf %268, %358 : vector<24x32xf32>
    %360 = arith.subf %322, %272 : vector<24x32xf32>
    %361 = vector.broadcast %352 : vector<24x1xf32> to vector<24x32xf32>
    %362 = arith.mulf %361, %360 : vector<24x32xf32>
    %363 = arith.addf %272, %362 : vector<24x32xf32>
    %364 = arith.subf %349, %276 : vector<24x32xf32>
    %365 = vector.broadcast %355 : vector<24x1xf32> to vector<24x32xf32>
    %366 = arith.mulf %365, %364 : vector<24x32xf32>
    %367 = arith.addf %276, %366 : vector<24x32xf32>
    %368 = arith.subf %347, %280 : vector<24x32xf32>
    %369 = vector.broadcast %355 : vector<24x1xf32> to vector<24x32xf32>
    %370 = arith.mulf %369, %368 : vector<24x32xf32>
    %371 = arith.addf %280, %370 : vector<24x32xf32>
    %372 = arith.index_cast %287 : i32 to index
    %c0_87 = arith.constant 0 : index
    %373 = vector.load %arg18[%372, %c0_87] : memref<192x64xf32, #tpu.memory_space<vmem>>, vector<24x32xf32>
    tpu.vector_store %arg18[%372, %c0_87], %359 {strides = array<i32>} : memref<192x64xf32, #tpu.memory_space<vmem>>, vector<24x32xf32>,
    %374 = arith.index_cast %289 : i32 to index
    %c32_88 = arith.constant 32 : index
    %375 = vector.load %arg18[%374, %c32_88] : memref<192x64xf32, #tpu.memory_space<vmem>>, vector<24x32xf32>
    tpu.vector_store %arg18[%374, %c32_88], %367 {strides = array<i32>} : memref<192x64xf32, #tpu.memory_space<vmem>>, vector<24x32xf32>,
    %c4_i32 = arith.constant 4 : i32
    %c7_i32_89 = arith.constant 7 : i32
    %376 = arith.subi %c7_i32_89, %c4_i32 : i32
    %c24_i32_90 = arith.constant 24 : i32
    %377 = arith.muli %c4_i32, %c24_i32_90 : i32
    %378 = tpu.assume_multiple %377, 8 : i32
    %c24_i32_91 = arith.constant 24 : i32
    %379 = arith.muli %376, %c24_i32_91 : i32
    %380 = tpu.assume_multiple %379, 8 : i32
    %381 = arith.index_cast %378 : i32 to index
    %c0_92 = arith.constant 0 : index
    %382 = vector.load %arg17[%381, %c0_92] : memref<192x256xf32, #tpu.memory_space<vmem>>, vector<24x256xf32>
    %383 = arith.index_cast %380 : i32 to index
    %c0_93 = arith.constant 0 : index
    %384 = vector.load %arg17[%383, %c0_93] : memref<192x256xf32, #tpu.memory_space<vmem>>, vector<24x256xf32>
    %385 = vector.extract_strided_slice %382 {offsets = [0, 0], sizes = [24, 128], strides = [1, 1]} : vector<24x256xf32> to vector<24x128xf32>
    %cst_94 = arith.constant dense<0.000000e+00> : vector<24x128xf32>
    %386 = tpu.matmul %359, %0, %cst_94 {dimension_numbers = #tpu.dot_dimension_numbers<[1], [0], [0], [1], [0, 0, 1, 1], [], []>} : vector<24x32xf32>, vector<32x128xf32>, vector<24x128xf32> -> vector<24x128xf32>
    %387 = arith.addf %385, %386 : vector<24x128xf32>
    %388 = vector.extract_strided_slice %384 {offsets = [0, 128], sizes = [24, 128], strides = [1, 1]} : vector<24x256xf32> to vector<24x128xf32>
    %cst_95 = arith.constant dense<0.000000e+00> : vector<24x128xf32>
    %389 = tpu.matmul %367, %1, %cst_95 {dimension_numbers = #tpu.dot_dimension_numbers<[1], [0], [0], [1], [0, 0, 1, 1], [], []>} : vector<24x32xf32>, vector<32x128xf32>, vector<24x128xf32> -> vector<24x128xf32>
    %390 = arith.addf %388, %389 : vector<24x128xf32>
    %391 = vector.extract_strided_slice %387 {offsets = [0, 0], sizes = [24, 32], strides = [1, 1]} : vector<24x128xf32> to vector<24x32xf32>
    %392 = arith.negf %391 : vector<24x32xf32>
    %393 = math.exp %392 : vector<24x32xf32>
    %cst_96 = arith.constant 1.000000e+00 : f32
    %394 = vector.broadcast %cst_96 : f32 to vector<24x32xf32>
    %395 = arith.addf %394, %393 : vector<24x32xf32>
    %396 = arith.divf %394, %395 : vector<24x32xf32>
    %397 = vector.extract_strided_slice %387 {offsets = [0, 32], sizes = [24, 32], strides = [1, 1]} : vector<24x128xf32> to vector<24x32xf32>
    %398 = arith.negf %397 : vector<24x32xf32>
    %399 = math.exp %398 : vector<24x32xf32>
    %cst_97 = arith.constant 1.000000e+00 : f32
    %400 = vector.broadcast %cst_97 : f32 to vector<24x32xf32>
    %401 = arith.addf %400, %399 : vector<24x32xf32>
    %402 = arith.divf %400, %401 : vector<24x32xf32>
    %403 = vector.extract_strided_slice %387 {offsets = [0, 64], sizes = [24, 32], strides = [1, 1]} : vector<24x128xf32> to vector<24x32xf32>
    %404 = math.tanh %403 : vector<24x32xf32>
    %405 = vector.extract_strided_slice %387 {offsets = [0, 96], sizes = [24, 32], strides = [1, 1]} : vector<24x128xf32> to vector<24x32xf32>
    %406 = arith.negf %405 : vector<24x32xf32>
    %407 = math.exp %406 : vector<24x32xf32>
    %cst_98 = arith.constant 1.000000e+00 : f32
    %408 = vector.broadcast %cst_98 : f32 to vector<24x32xf32>
    %409 = arith.addf %408, %407 : vector<24x32xf32>
    %410 = arith.divf %408, %409 : vector<24x32xf32>
    %411 = arith.mulf %402, %363 : vector<24x32xf32>
    %412 = arith.mulf %396, %404 : vector<24x32xf32>
    %413 = arith.addf %411, %412 : vector<24x32xf32>
    %414 = math.tanh %413 : vector<24x32xf32>
    %415 = arith.mulf %410, %414 : vector<24x32xf32>
    %416 = vector.extract_strided_slice %390 {offsets = [0, 0], sizes = [24, 32], strides = [1, 1]} : vector<24x128xf32> to vector<24x32xf32>
    %417 = arith.negf %416 : vector<24x32xf32>
    %418 = math.exp %417 : vector<24x32xf32>
    %cst_99 = arith.constant 1.000000e+00 : f32
    %419 = vector.broadcast %cst_99 : f32 to vector<24x32xf32>
    %420 = arith.addf %419, %418 : vector<24x32xf32>
    %421 = arith.divf %419, %420 : vector<24x32xf32>
    %422 = vector.extract_strided_slice %390 {offsets = [0, 32], sizes = [24, 32], strides = [1, 1]} : vector<24x128xf32> to vector<24x32xf32>
    %423 = arith.negf %422 : vector<24x32xf32>
    %424 = math.exp %423 : vector<24x32xf32>
    %cst_100 = arith.constant 1.000000e+00 : f32
    %425 = vector.broadcast %cst_100 : f32 to vector<24x32xf32>
    %426 = arith.addf %425, %424 : vector<24x32xf32>
    %427 = arith.divf %425, %426 : vector<24x32xf32>
    %428 = vector.extract_strided_slice %390 {offsets = [0, 64], sizes = [24, 32], strides = [1, 1]} : vector<24x128xf32> to vector<24x32xf32>
    %429 = math.tanh %428 : vector<24x32xf32>
    %430 = vector.extract_strided_slice %390 {offsets = [0, 96], sizes = [24, 32], strides = [1, 1]} : vector<24x128xf32> to vector<24x32xf32>
    %431 = arith.negf %430 : vector<24x32xf32>
    %432 = math.exp %431 : vector<24x32xf32>
    %cst_101 = arith.constant 1.000000e+00 : f32
    %433 = vector.broadcast %cst_101 : f32 to vector<24x32xf32>
    %434 = arith.addf %433, %432 : vector<24x32xf32>
    %435 = arith.divf %433, %434 : vector<24x32xf32>
    %436 = arith.mulf %427, %371 : vector<24x32xf32>
    %437 = arith.mulf %421, %429 : vector<24x32xf32>
    %438 = arith.addf %436, %437 : vector<24x32xf32>
    %439 = math.tanh %438 : vector<24x32xf32>
    %440 = arith.mulf %435, %439 : vector<24x32xf32>
    %441 = arith.index_cast %c4_i32 : i32 to index
    %c0_102 = arith.constant 0 : index
    %c0_103 = arith.constant 0 : index
    %442 = vector.load %arg2[%441, %c0_102, %c0_103] : memref<8x24x1xf32, #tpu.memory_space<vmem>>, vector<1x24x1xf32>
    %443 = vector.shape_cast %442 : vector<1x24x1xf32> to vector<24x1xf32>
    %444 = arith.index_cast %376 : i32 to index
    %c0_104 = arith.constant 0 : index
    %c0_105 = arith.constant 0 : index
    %445 = vector.load %arg2[%444, %c0_104, %c0_105] : memref<8x24x1xf32, #tpu.memory_space<vmem>>, vector<1x24x1xf32>
    %446 = vector.shape_cast %445 : vector<1x24x1xf32> to vector<24x1xf32>
    %447 = arith.subf %415, %359 : vector<24x32xf32>
    %448 = vector.broadcast %443 : vector<24x1xf32> to vector<24x32xf32>
    %449 = arith.mulf %448, %447 : vector<24x32xf32>
    %450 = arith.addf %359, %449 : vector<24x32xf32>
    %451 = arith.subf %413, %363 : vector<24x32xf32>
    %452 = vector.broadcast %443 : vector<24x1xf32> to vector<24x32xf32>
    %453 = arith.mulf %452, %451 : vector<24x32xf32>
    %454 = arith.addf %363, %453 : vector<24x32xf32>
    %455 = arith.subf %440, %367 : vector<24x32xf32>
    %456 = vector.broadcast %446 : vector<24x1xf32> to vector<24x32xf32>
    %457 = arith.mulf %456, %455 : vector<24x32xf32>
    %458 = arith.addf %367, %457 : vector<24x32xf32>
    %459 = arith.subf %438, %371 : vector<24x32xf32>
    %460 = vector.broadcast %446 : vector<24x1xf32> to vector<24x32xf32>
    %461 = arith.mulf %460, %459 : vector<24x32xf32>
    %462 = arith.addf %371, %461 : vector<24x32xf32>
    %463 = arith.index_cast %378 : i32 to index
    %c0_106 = arith.constant 0 : index
    %464 = vector.load %arg18[%463, %c0_106] : memref<192x64xf32, #tpu.memory_space<vmem>>, vector<24x32xf32>
    tpu.vector_store %arg18[%463, %c0_106], %450 {strides = array<i32>} : memref<192x64xf32, #tpu.memory_space<vmem>>, vector<24x32xf32>,
    %465 = arith.index_cast %380 : i32 to index
    %c32_107 = arith.constant 32 : index
    %466 = vector.load %arg18[%465, %c32_107] : memref<192x64xf32, #tpu.memory_space<vmem>>, vector<24x32xf32>
    tpu.vector_store %arg18[%465, %c32_107], %458 {strides = array<i32>} : memref<192x64xf32, #tpu.memory_space<vmem>>, vector<24x32xf32>,
    %c5_i32 = arith.constant 5 : i32
    %c7_i32_108 = arith.constant 7 : i32
    %467 = arith.subi %c7_i32_108, %c5_i32 : i32
    %c24_i32_109 = arith.constant 24 : i32
    %468 = arith.muli %c5_i32, %c24_i32_109 : i32
    %469 = tpu.assume_multiple %468, 8 : i32
    %c24_i32_110 = arith.constant 24 : i32
    %470 = arith.muli %467, %c24_i32_110 : i32
    %471 = tpu.assume_multiple %470, 8 : i32
    %472 = arith.index_cast %469 : i32 to index
    %c0_111 = arith.constant 0 : index
    %473 = vector.load %arg17[%472, %c0_111] : memref<192x256xf32, #tpu.memory_space<vmem>>, vector<24x256xf32>
    %474 = arith.index_cast %471 : i32 to index
    %c0_112 = arith.constant 0 : index
    %475 = vector.load %arg17[%474, %c0_112] : memref<192x256xf32, #tpu.memory_space<vmem>>, vector<24x256xf32>
    %476 = vector.extract_strided_slice %473 {offsets = [0, 0], sizes = [24, 128], strides = [1, 1]} : vector<24x256xf32> to vector<24x128xf32>
    %cst_113 = arith.constant dense<0.000000e+00> : vector<24x128xf32>
    %477 = tpu.matmul %450, %0, %cst_113 {dimension_numbers = #tpu.dot_dimension_numbers<[1], [0], [0], [1], [0, 0, 1, 1], [], []>} : vector<24x32xf32>, vector<32x128xf32>, vector<24x128xf32> -> vector<24x128xf32>
    %478 = arith.addf %476, %477 : vector<24x128xf32>
    %479 = vector.extract_strided_slice %475 {offsets = [0, 128], sizes = [24, 128], strides = [1, 1]} : vector<24x256xf32> to vector<24x128xf32>
    %cst_114 = arith.constant dense<0.000000e+00> : vector<24x128xf32>
    %480 = tpu.matmul %458, %1, %cst_114 {dimension_numbers = #tpu.dot_dimension_numbers<[1], [0], [0], [1], [0, 0, 1, 1], [], []>} : vector<24x32xf32>, vector<32x128xf32>, vector<24x128xf32> -> vector<24x128xf32>
    %481 = arith.addf %479, %480 : vector<24x128xf32>
    %482 = vector.extract_strided_slice %478 {offsets = [0, 0], sizes = [24, 32], strides = [1, 1]} : vector<24x128xf32> to vector<24x32xf32>
    %483 = arith.negf %482 : vector<24x32xf32>
    %484 = math.exp %483 : vector<24x32xf32>
    %cst_115 = arith.constant 1.000000e+00 : f32
    %485 = vector.broadcast %cst_115 : f32 to vector<24x32xf32>
    %486 = arith.addf %485, %484 : vector<24x32xf32>
    %487 = arith.divf %485, %486 : vector<24x32xf32>
    %488 = vector.extract_strided_slice %478 {offsets = [0, 32], sizes = [24, 32], strides = [1, 1]} : vector<24x128xf32> to vector<24x32xf32>
    %489 = arith.negf %488 : vector<24x32xf32>
    %490 = math.exp %489 : vector<24x32xf32>
    %cst_116 = arith.constant 1.000000e+00 : f32
    %491 = vector.broadcast %cst_116 : f32 to vector<24x32xf32>
    %492 = arith.addf %491, %490 : vector<24x32xf32>
    %493 = arith.divf %491, %492 : vector<24x32xf32>
    %494 = vector.extract_strided_slice %478 {offsets = [0, 64], sizes = [24, 32], strides = [1, 1]} : vector<24x128xf32> to vector<24x32xf32>
    %495 = math.tanh %494 : vector<24x32xf32>
    %496 = vector.extract_strided_slice %478 {offsets = [0, 96], sizes = [24, 32], strides = [1, 1]} : vector<24x128xf32> to vector<24x32xf32>
    %497 = arith.negf %496 : vector<24x32xf32>
    %498 = math.exp %497 : vector<24x32xf32>
    %cst_117 = arith.constant 1.000000e+00 : f32
    %499 = vector.broadcast %cst_117 : f32 to vector<24x32xf32>
    %500 = arith.addf %499, %498 : vector<24x32xf32>
    %501 = arith.divf %499, %500 : vector<24x32xf32>
    %502 = arith.mulf %493, %454 : vector<24x32xf32>
    %503 = arith.mulf %487, %495 : vector<24x32xf32>
    %504 = arith.addf %502, %503 : vector<24x32xf32>
    %505 = math.tanh %504 : vector<24x32xf32>
    %506 = arith.mulf %501, %505 : vector<24x32xf32>
    %507 = vector.extract_strided_slice %481 {offsets = [0, 0], sizes = [24, 32], strides = [1, 1]} : vector<24x128xf32> to vector<24x32xf32>
    %508 = arith.negf %507 : vector<24x32xf32>
    %509 = math.exp %508 : vector<24x32xf32>
    %cst_118 = arith.constant 1.000000e+00 : f32
    %510 = vector.broadcast %cst_118 : f32 to vector<24x32xf32>
    %511 = arith.addf %510, %509 : vector<24x32xf32>
    %512 = arith.divf %510, %511 : vector<24x32xf32>
    %513 = vector.extract_strided_slice %481 {offsets = [0, 32], sizes = [24, 32], strides = [1, 1]} : vector<24x128xf32> to vector<24x32xf32>
    %514 = arith.negf %513 : vector<24x32xf32>
    %515 = math.exp %514 : vector<24x32xf32>
    %cst_119 = arith.constant 1.000000e+00 : f32
    %516 = vector.broadcast %cst_119 : f32 to vector<24x32xf32>
    %517 = arith.addf %516, %515 : vector<24x32xf32>
    %518 = arith.divf %516, %517 : vector<24x32xf32>
    %519 = vector.extract_strided_slice %481 {offsets = [0, 64], sizes = [24, 32], strides = [1, 1]} : vector<24x128xf32> to vector<24x32xf32>
    %520 = math.tanh %519 : vector<24x32xf32>
    %521 = vector.extract_strided_slice %481 {offsets = [0, 96], sizes = [24, 32], strides = [1, 1]} : vector<24x128xf32> to vector<24x32xf32>
    %522 = arith.negf %521 : vector<24x32xf32>
    %523 = math.exp %522 : vector<24x32xf32>
    %cst_120 = arith.constant 1.000000e+00 : f32
    %524 = vector.broadcast %cst_120 : f32 to vector<24x32xf32>
    %525 = arith.addf %524, %523 : vector<24x32xf32>
    %526 = arith.divf %524, %525 : vector<24x32xf32>
    %527 = arith.mulf %518, %462 : vector<24x32xf32>
    %528 = arith.mulf %512, %520 : vector<24x32xf32>
    %529 = arith.addf %527, %528 : vector<24x32xf32>
    %530 = math.tanh %529 : vector<24x32xf32>
    %531 = arith.mulf %526, %530 : vector<24x32xf32>
    %532 = arith.index_cast %c5_i32 : i32 to index
    %c0_121 = arith.constant 0 : index
    %c0_122 = arith.constant 0 : index
    %533 = vector.load %arg2[%532, %c0_121, %c0_122] : memref<8x24x1xf32, #tpu.memory_space<vmem>>, vector<1x24x1xf32>
    %534 = vector.shape_cast %533 : vector<1x24x1xf32> to vector<24x1xf32>
    %535 = arith.index_cast %467 : i32 to index
    %c0_123 = arith.constant 0 : index
    %c0_124 = arith.constant 0 : index
    %536 = vector.load %arg2[%535, %c0_123, %c0_124] : memref<8x24x1xf32, #tpu.memory_space<vmem>>, vector<1x24x1xf32>
    %537 = vector.shape_cast %536 : vector<1x24x1xf32> to vector<24x1xf32>
    %538 = arith.subf %506, %450 : vector<24x32xf32>
    %539 = vector.broadcast %534 : vector<24x1xf32> to vector<24x32xf32>
    %540 = arith.mulf %539, %538 : vector<24x32xf32>
    %541 = arith.addf %450, %540 : vector<24x32xf32>
    %542 = arith.subf %504, %454 : vector<24x32xf32>
    %543 = vector.broadcast %534 : vector<24x1xf32> to vector<24x32xf32>
    %544 = arith.mulf %543, %542 : vector<24x32xf32>
    %545 = arith.addf %454, %544 : vector<24x32xf32>
    %546 = arith.subf %531, %458 : vector<24x32xf32>
    %547 = vector.broadcast %537 : vector<24x1xf32> to vector<24x32xf32>
    %548 = arith.mulf %547, %546 : vector<24x32xf32>
    %549 = arith.addf %458, %548 : vector<24x32xf32>
    %550 = arith.subf %529, %462 : vector<24x32xf32>
    %551 = vector.broadcast %537 : vector<24x1xf32> to vector<24x32xf32>
    %552 = arith.mulf %551, %550 : vector<24x32xf32>
    %553 = arith.addf %462, %552 : vector<24x32xf32>
    %554 = arith.index_cast %469 : i32 to index
    %c0_125 = arith.constant 0 : index
    %555 = vector.load %arg18[%554, %c0_125] : memref<192x64xf32, #tpu.memory_space<vmem>>, vector<24x32xf32>
    tpu.vector_store %arg18[%554, %c0_125], %541 {strides = array<i32>} : memref<192x64xf32, #tpu.memory_space<vmem>>, vector<24x32xf32>,
    %556 = arith.index_cast %471 : i32 to index
    %c32_126 = arith.constant 32 : index
    %557 = vector.load %arg18[%556, %c32_126] : memref<192x64xf32, #tpu.memory_space<vmem>>, vector<24x32xf32>
    tpu.vector_store %arg18[%556, %c32_126], %549 {strides = array<i32>} : memref<192x64xf32, #tpu.memory_space<vmem>>, vector<24x32xf32>,
    %c6_i32 = arith.constant 6 : i32
    %c7_i32_127 = arith.constant 7 : i32
    %558 = arith.subi %c7_i32_127, %c6_i32 : i32
    %c24_i32_128 = arith.constant 24 : i32
    %559 = arith.muli %c6_i32, %c24_i32_128 : i32
    %560 = tpu.assume_multiple %559, 8 : i32
    %c24_i32_129 = arith.constant 24 : i32
    %561 = arith.muli %558, %c24_i32_129 : i32
    %562 = tpu.assume_multiple %561, 8 : i32
    %563 = arith.index_cast %560 : i32 to index
    %c0_130 = arith.constant 0 : index
    %564 = vector.load %arg17[%563, %c0_130] : memref<192x256xf32, #tpu.memory_space<vmem>>, vector<24x256xf32>
    %565 = arith.index_cast %562 : i32 to index
    %c0_131 = arith.constant 0 : index
    %566 = vector.load %arg17[%565, %c0_131] : memref<192x256xf32, #tpu.memory_space<vmem>>, vector<24x256xf32>
    %567 = vector.extract_strided_slice %564 {offsets = [0, 0], sizes = [24, 128], strides = [1, 1]} : vector<24x256xf32> to vector<24x128xf32>
    %cst_132 = arith.constant dense<0.000000e+00> : vector<24x128xf32>
    %568 = tpu.matmul %541, %0, %cst_132 {dimension_numbers = #tpu.dot_dimension_numbers<[1], [0], [0], [1], [0, 0, 1, 1], [], []>} : vector<24x32xf32>, vector<32x128xf32>, vector<24x128xf32> -> vector<24x128xf32>
    %569 = arith.addf %567, %568 : vector<24x128xf32>
    %570 = vector.extract_strided_slice %566 {offsets = [0, 128], sizes = [24, 128], strides = [1, 1]} : vector<24x256xf32> to vector<24x128xf32>
    %cst_133 = arith.constant dense<0.000000e+00> : vector<24x128xf32>
    %571 = tpu.matmul %549, %1, %cst_133 {dimension_numbers = #tpu.dot_dimension_numbers<[1], [0], [0], [1], [0, 0, 1, 1], [], []>} : vector<24x32xf32>, vector<32x128xf32>, vector<24x128xf32> -> vector<24x128xf32>
    %572 = arith.addf %570, %571 : vector<24x128xf32>
    %573 = vector.extract_strided_slice %569 {offsets = [0, 0], sizes = [24, 32], strides = [1, 1]} : vector<24x128xf32> to vector<24x32xf32>
    %574 = arith.negf %573 : vector<24x32xf32>
    %575 = math.exp %574 : vector<24x32xf32>
    %cst_134 = arith.constant 1.000000e+00 : f32
    %576 = vector.broadcast %cst_134 : f32 to vector<24x32xf32>
    %577 = arith.addf %576, %575 : vector<24x32xf32>
    %578 = arith.divf %576, %577 : vector<24x32xf32>
    %579 = vector.extract_strided_slice %569 {offsets = [0, 32], sizes = [24, 32], strides = [1, 1]} : vector<24x128xf32> to vector<24x32xf32>
    %580 = arith.negf %579 : vector<24x32xf32>
    %581 = math.exp %580 : vector<24x32xf32>
    %cst_135 = arith.constant 1.000000e+00 : f32
    %582 = vector.broadcast %cst_135 : f32 to vector<24x32xf32>
    %583 = arith.addf %582, %581 : vector<24x32xf32>
    %584 = arith.divf %582, %583 : vector<24x32xf32>
    %585 = vector.extract_strided_slice %569 {offsets = [0, 64], sizes = [24, 32], strides = [1, 1]} : vector<24x128xf32> to vector<24x32xf32>
    %586 = math.tanh %585 : vector<24x32xf32>
    %587 = vector.extract_strided_slice %569 {offsets = [0, 96], sizes = [24, 32], strides = [1, 1]} : vector<24x128xf32> to vector<24x32xf32>
    %588 = arith.negf %587 : vector<24x32xf32>
    %589 = math.exp %588 : vector<24x32xf32>
    %cst_136 = arith.constant 1.000000e+00 : f32
    %590 = vector.broadcast %cst_136 : f32 to vector<24x32xf32>
    %591 = arith.addf %590, %589 : vector<24x32xf32>
    %592 = arith.divf %590, %591 : vector<24x32xf32>
    %593 = arith.mulf %584, %545 : vector<24x32xf32>
    %594 = arith.mulf %578, %586 : vector<24x32xf32>
    %595 = arith.addf %593, %594 : vector<24x32xf32>
    %596 = math.tanh %595 : vector<24x32xf32>
    %597 = arith.mulf %592, %596 : vector<24x32xf32>
    %598 = vector.extract_strided_slice %572 {offsets = [0, 0], sizes = [24, 32], strides = [1, 1]} : vector<24x128xf32> to vector<24x32xf32>
    %599 = arith.negf %598 : vector<24x32xf32>
    %600 = math.exp %599 : vector<24x32xf32>
    %cst_137 = arith.constant 1.000000e+00 : f32
    %601 = vector.broadcast %cst_137 : f32 to vector<24x32xf32>
    %602 = arith.addf %601, %600 : vector<24x32xf32>
    %603 = arith.divf %601, %602 : vector<24x32xf32>
    %604 = vector.extract_strided_slice %572 {offsets = [0, 32], sizes = [24, 32], strides = [1, 1]} : vector<24x128xf32> to vector<24x32xf32>
    %605 = arith.negf %604 : vector<24x32xf32>
    %606 = math.exp %605 : vector<24x32xf32>
    %cst_138 = arith.constant 1.000000e+00 : f32
    %607 = vector.broadcast %cst_138 : f32 to vector<24x32xf32>
    %608 = arith.addf %607, %606 : vector<24x32xf32>
    %609 = arith.divf %607, %608 : vector<24x32xf32>
    %610 = vector.extract_strided_slice %572 {offsets = [0, 64], sizes = [24, 32], strides = [1, 1]} : vector<24x128xf32> to vector<24x32xf32>
    %611 = math.tanh %610 : vector<24x32xf32>
    %612 = vector.extract_strided_slice %572 {offsets = [0, 96], sizes = [24, 32], strides = [1, 1]} : vector<24x128xf32> to vector<24x32xf32>
    %613 = arith.negf %612 : vector<24x32xf32>
    %614 = math.exp %613 : vector<24x32xf32>
    %cst_139 = arith.constant 1.000000e+00 : f32
    %615 = vector.broadcast %cst_139 : f32 to vector<24x32xf32>
    %616 = arith.addf %615, %614 : vector<24x32xf32>
    %617 = arith.divf %615, %616 : vector<24x32xf32>
    %618 = arith.mulf %609, %553 : vector<24x32xf32>
    %619 = arith.mulf %603, %611 : vector<24x32xf32>
    %620 = arith.addf %618, %619 : vector<24x32xf32>
    %621 = math.tanh %620 : vector<24x32xf32>
    %622 = arith.mulf %617, %621 : vector<24x32xf32>
    %623 = arith.index_cast %c6_i32 : i32 to index
    %c0_140 = arith.constant 0 : index
    %c0_141 = arith.constant 0 : index
    %624 = vector.load %arg2[%623, %c0_140, %c0_141] : memref<8x24x1xf32, #tpu.memory_space<vmem>>, vector<1x24x1xf32>
    %625 = vector.shape_cast %624 : vector<1x24x1xf32> to vector<24x1xf32>
    %626 = arith.index_cast %558 : i32 to index
    %c0_142 = arith.constant 0 : index
    %c0_143 = arith.constant 0 : index
    %627 = vector.load %arg2[%626, %c0_142, %c0_143] : memref<8x24x1xf32, #tpu.memory_space<vmem>>, vector<1x24x1xf32>
    %628 = vector.shape_cast %627 : vector<1x24x1xf32> to vector<24x1xf32>
    %629 = arith.subf %597, %541 : vector<24x32xf32>
    %630 = vector.broadcast %625 : vector<24x1xf32> to vector<24x32xf32>
    %631 = arith.mulf %630, %629 : vector<24x32xf32>
    %632 = arith.addf %541, %631 : vector<24x32xf32>
    %633 = arith.subf %595, %545 : vector<24x32xf32>
    %634 = vector.broadcast %625 : vector<24x1xf32> to vector<24x32xf32>
    %635 = arith.mulf %634, %633 : vector<24x32xf32>
    %636 = arith.addf %545, %635 : vector<24x32xf32>
    %637 = arith.subf %622, %549 : vector<24x32xf32>
    %638 = vector.broadcast %628 : vector<24x1xf32> to vector<24x32xf32>
    %639 = arith.mulf %638, %637 : vector<24x32xf32>
    %640 = arith.addf %549, %639 : vector<24x32xf32>
    %641 = arith.subf %620, %553 : vector<24x32xf32>
    %642 = vector.broadcast %628 : vector<24x1xf32> to vector<24x32xf32>
    %643 = arith.mulf %642, %641 : vector<24x32xf32>
    %644 = arith.addf %553, %643 : vector<24x32xf32>
    %645 = arith.index_cast %560 : i32 to index
    %c0_144 = arith.constant 0 : index
    %646 = vector.load %arg18[%645, %c0_144] : memref<192x64xf32, #tpu.memory_space<vmem>>, vector<24x32xf32>
    tpu.vector_store %arg18[%645, %c0_144], %632 {strides = array<i32>} : memref<192x64xf32, #tpu.memory_space<vmem>>, vector<24x32xf32>,
    %647 = arith.index_cast %562 : i32 to index
    %c32_145 = arith.constant 32 : index
    %648 = vector.load %arg18[%647, %c32_145] : memref<192x64xf32, #tpu.memory_space<vmem>>, vector<24x32xf32>
    tpu.vector_store %arg18[%647, %c32_145], %640 {strides = array<i32>} : memref<192x64xf32, #tpu.memory_space<vmem>>, vector<24x32xf32>,
    %c7_i32_146 = arith.constant 7 : i32
    %c7_i32_147 = arith.constant 7 : i32
    %649 = arith.subi %c7_i32_147, %c7_i32_146 : i32
    %c24_i32_148 = arith.constant 24 : i32
    %650 = arith.muli %c7_i32_146, %c24_i32_148 : i32
    %651 = tpu.assume_multiple %650, 8 : i32
    %c24_i32_149 = arith.constant 24 : i32
    %652 = arith.muli %649, %c24_i32_149 : i32
    %653 = tpu.assume_multiple %652, 8 : i32
    %654 = arith.index_cast %651 : i32 to index
    %c0_150 = arith.constant 0 : index
    %655 = vector.load %arg17[%654, %c0_150] : memref<192x256xf32, #tpu.memory_space<vmem>>, vector<24x256xf32>
    %656 = arith.index_cast %653 : i32 to index
    %c0_151 = arith.constant 0 : index
    %657 = vector.load %arg17[%656, %c0_151] : memref<192x256xf32, #tpu.memory_space<vmem>>, vector<24x256xf32>
    %658 = vector.extract_strided_slice %655 {offsets = [0, 0], sizes = [24, 128], strides = [1, 1]} : vector<24x256xf32> to vector<24x128xf32>
    %cst_152 = arith.constant dense<0.000000e+00> : vector<24x128xf32>
    %659 = tpu.matmul %632, %0, %cst_152 {dimension_numbers = #tpu.dot_dimension_numbers<[1], [0], [0], [1], [0, 0, 1, 1], [], []>} : vector<24x32xf32>, vector<32x128xf32>, vector<24x128xf32> -> vector<24x128xf32>
    %660 = arith.addf %658, %659 : vector<24x128xf32>
    %661 = vector.extract_strided_slice %657 {offsets = [0, 128], sizes = [24, 128], strides = [1, 1]} : vector<24x256xf32> to vector<24x128xf32>
    %cst_153 = arith.constant dense<0.000000e+00> : vector<24x128xf32>
    %662 = tpu.matmul %640, %1, %cst_153 {dimension_numbers = #tpu.dot_dimension_numbers<[1], [0], [0], [1], [0, 0, 1, 1], [], []>} : vector<24x32xf32>, vector<32x128xf32>, vector<24x128xf32> -> vector<24x128xf32>
    %663 = arith.addf %661, %662 : vector<24x128xf32>
    %664 = vector.extract_strided_slice %660 {offsets = [0, 0], sizes = [24, 32], strides = [1, 1]} : vector<24x128xf32> to vector<24x32xf32>
    %665 = arith.negf %664 : vector<24x32xf32>
    %666 = math.exp %665 : vector<24x32xf32>
    %cst_154 = arith.constant 1.000000e+00 : f32
    %667 = vector.broadcast %cst_154 : f32 to vector<24x32xf32>
    %668 = arith.addf %667, %666 : vector<24x32xf32>
    %669 = arith.divf %667, %668 : vector<24x32xf32>
    %670 = vector.extract_strided_slice %660 {offsets = [0, 32], sizes = [24, 32], strides = [1, 1]} : vector<24x128xf32> to vector<24x32xf32>
    %671 = arith.negf %670 : vector<24x32xf32>
    %672 = math.exp %671 : vector<24x32xf32>
    %cst_155 = arith.constant 1.000000e+00 : f32
    %673 = vector.broadcast %cst_155 : f32 to vector<24x32xf32>
    %674 = arith.addf %673, %672 : vector<24x32xf32>
    %675 = arith.divf %673, %674 : vector<24x32xf32>
    %676 = vector.extract_strided_slice %660 {offsets = [0, 64], sizes = [24, 32], strides = [1, 1]} : vector<24x128xf32> to vector<24x32xf32>
    %677 = math.tanh %676 : vector<24x32xf32>
    %678 = vector.extract_strided_slice %660 {offsets = [0, 96], sizes = [24, 32], strides = [1, 1]} : vector<24x128xf32> to vector<24x32xf32>
    %679 = arith.negf %678 : vector<24x32xf32>
    %680 = math.exp %679 : vector<24x32xf32>
    %cst_156 = arith.constant 1.000000e+00 : f32
    %681 = vector.broadcast %cst_156 : f32 to vector<24x32xf32>
    %682 = arith.addf %681, %680 : vector<24x32xf32>
    %683 = arith.divf %681, %682 : vector<24x32xf32>
    %684 = arith.mulf %675, %636 : vector<24x32xf32>
    %685 = arith.mulf %669, %677 : vector<24x32xf32>
    %686 = arith.addf %684, %685 : vector<24x32xf32>
    %687 = math.tanh %686 : vector<24x32xf32>
    %688 = arith.mulf %683, %687 : vector<24x32xf32>
    %689 = vector.extract_strided_slice %663 {offsets = [0, 0], sizes = [24, 32], strides = [1, 1]} : vector<24x128xf32> to vector<24x32xf32>
    %690 = arith.negf %689 : vector<24x32xf32>
    %691 = math.exp %690 : vector<24x32xf32>
    %cst_157 = arith.constant 1.000000e+00 : f32
    %692 = vector.broadcast %cst_157 : f32 to vector<24x32xf32>
    %693 = arith.addf %692, %691 : vector<24x32xf32>
    %694 = arith.divf %692, %693 : vector<24x32xf32>
    %695 = vector.extract_strided_slice %663 {offsets = [0, 32], sizes = [24, 32], strides = [1, 1]} : vector<24x128xf32> to vector<24x32xf32>
    %696 = arith.negf %695 : vector<24x32xf32>
    %697 = math.exp %696 : vector<24x32xf32>
    %cst_158 = arith.constant 1.000000e+00 : f32
    %698 = vector.broadcast %cst_158 : f32 to vector<24x32xf32>
    %699 = arith.addf %698, %697 : vector<24x32xf32>
    %700 = arith.divf %698, %699 : vector<24x32xf32>
    %701 = vector.extract_strided_slice %663 {offsets = [0, 64], sizes = [24, 32], strides = [1, 1]} : vector<24x128xf32> to vector<24x32xf32>
    %702 = math.tanh %701 : vector<24x32xf32>
    %703 = vector.extract_strided_slice %663 {offsets = [0, 96], sizes = [24, 32], strides = [1, 1]} : vector<24x128xf32> to vector<24x32xf32>
    %704 = arith.negf %703 : vector<24x32xf32>
    %705 = math.exp %704 : vector<24x32xf32>
    %cst_159 = arith.constant 1.000000e+00 : f32
    %706 = vector.broadcast %cst_159 : f32 to vector<24x32xf32>
    %707 = arith.addf %706, %705 : vector<24x32xf32>
    %708 = arith.divf %706, %707 : vector<24x32xf32>
    %709 = arith.mulf %700, %644 : vector<24x32xf32>
    %710 = arith.mulf %694, %702 : vector<24x32xf32>
    %711 = arith.addf %709, %710 : vector<24x32xf32>
    %712 = math.tanh %711 : vector<24x32xf32>
    %713 = arith.mulf %708, %712 : vector<24x32xf32>
    %714 = arith.index_cast %c7_i32_146 : i32 to index
    %c0_160 = arith.constant 0 : index
    %c0_161 = arith.constant 0 : index
    %715 = vector.load %arg2[%714, %c0_160, %c0_161] : memref<8x24x1xf32, #tpu.memory_space<vmem>>, vector<1x24x1xf32>
    %716 = vector.shape_cast %715 : vector<1x24x1xf32> to vector<24x1xf32>
    %717 = arith.index_cast %649 : i32 to index
    %c0_162 = arith.constant 0 : index
    %c0_163 = arith.constant 0 : index
    %718 = vector.load %arg2[%717, %c0_162, %c0_163] : memref<8x24x1xf32, #tpu.memory_space<vmem>>, vector<1x24x1xf32>
    %719 = vector.shape_cast %718 : vector<1x24x1xf32> to vector<24x1xf32>
    %720 = arith.subf %688, %632 : vector<24x32xf32>
    %721 = vector.broadcast %716 : vector<24x1xf32> to vector<24x32xf32>
    %722 = arith.mulf %721, %720 : vector<24x32xf32>
    %723 = arith.addf %632, %722 : vector<24x32xf32>
    %724 = arith.subf %686, %636 : vector<24x32xf32>
    %725 = vector.broadcast %716 : vector<24x1xf32> to vector<24x32xf32>
    %726 = arith.mulf %725, %724 : vector<24x32xf32>
    %727 = arith.addf %636, %726 : vector<24x32xf32>
    %728 = arith.subf %713, %640 : vector<24x32xf32>
    %729 = vector.broadcast %719 : vector<24x1xf32> to vector<24x32xf32>
    %730 = arith.mulf %729, %728 : vector<24x32xf32>
    %731 = arith.addf %640, %730 : vector<24x32xf32>
    %732 = arith.subf %711, %644 : vector<24x32xf32>
    %733 = vector.broadcast %719 : vector<24x1xf32> to vector<24x32xf32>
    %734 = arith.mulf %733, %732 : vector<24x32xf32>
    %735 = arith.addf %644, %734 : vector<24x32xf32>
    %736 = arith.index_cast %651 : i32 to index
    %c0_164 = arith.constant 0 : index
    %737 = vector.load %arg18[%736, %c0_164] : memref<192x64xf32, #tpu.memory_space<vmem>>, vector<24x32xf32>
    tpu.vector_store %arg18[%736, %c0_164], %723 {strides = array<i32>} : memref<192x64xf32, #tpu.memory_space<vmem>>, vector<24x32xf32>,
    %738 = arith.index_cast %653 : i32 to index
    %c32_165 = arith.constant 32 : index
    %739 = vector.load %arg18[%738, %c32_165] : memref<192x64xf32, #tpu.memory_space<vmem>>, vector<24x32xf32>
    tpu.vector_store %arg18[%738, %c32_165], %731 {strides = array<i32>} : memref<192x64xf32, #tpu.memory_space<vmem>>, vector<24x32xf32>,
    %c8_i32 = arith.constant 8 : i32
    %c0_166 = arith.constant 0 : index
    %c0_167 = arith.constant 0 : index
    %740 = vector.load %arg18[%c0_166, %c0_167] : memref<192x64xf32, #tpu.memory_space<vmem>>, vector<192x64xf32>
    %c0_168 = arith.constant 0 : index
    %c0_169 = arith.constant 0 : index
    %741 = vector.load %arg7[%c0_168, %c0_169] : memref<64x256xf32, #tpu.memory_space<vmem>>, vector<64x256xf32>
    %cst_170 = arith.constant dense<0.000000e+00> : vector<192x256xf32>
    %742 = tpu.matmul %740, %741, %cst_170 {dimension_numbers = #tpu.dot_dimension_numbers<[1], [0], [0], [1], [0, 0, 1, 1], [], []>} : vector<192x64xf32>, vector<64x256xf32>, vector<192x256xf32> -> vector<192x256xf32>
    %c0_171 = arith.constant 0 : index
    %c0_172 = arith.constant 0 : index
    %743 = vector.load %arg8[%c0_171, %c0_172] : memref<1x256xf32, #tpu.memory_space<vmem>>, vector<1x256xf32>
    %744 = vector.broadcast %743 : vector<1x256xf32> to vector<192x256xf32>
    %745 = arith.addf %742, %744 : vector<192x256xf32>
    %c0_173 = arith.constant 0 : index
    %c0_174 = arith.constant 0 : index
    %746 = vector.load %arg17[%c0_173, %c0_174] : memref<192x256xf32, #tpu.memory_space<vmem>>, vector<192x256xf32>
    tpu.vector_store %arg17[%c0_173, %c0_174], %745 {strides = array<i32>} : memref<192x256xf32, #tpu.memory_space<vmem>>, vector<192x256xf32>,
    %c0_i32_175 = arith.constant 0 : i32
    %c7_i32_176 = arith.constant 7 : i32
    %747 = arith.subi %c7_i32_176, %c0_i32_175 : i32
    %c24_i32_177 = arith.constant 24 : i32
    %748 = arith.muli %c0_i32_175, %c24_i32_177 : i32
    %749 = tpu.assume_multiple %748, 8 : i32
    %c24_i32_178 = arith.constant 24 : i32
    %750 = arith.muli %747, %c24_i32_178 : i32
    %751 = tpu.assume_multiple %750, 8 : i32
    %752 = arith.index_cast %749 : i32 to index
    %c0_179 = arith.constant 0 : index
    %753 = vector.load %arg17[%752, %c0_179] : memref<192x256xf32, #tpu.memory_space<vmem>>, vector<24x256xf32>
    %754 = arith.index_cast %751 : i32 to index
    %c0_180 = arith.constant 0 : index
    %755 = vector.load %arg17[%754, %c0_180] : memref<192x256xf32, #tpu.memory_space<vmem>>, vector<24x256xf32>
    %756 = vector.extract_strided_slice %753 {offsets = [0, 0], sizes = [24, 128], strides = [1, 1]} : vector<24x256xf32> to vector<24x128xf32>
    %cst_181 = arith.constant dense<0.000000e+00> : vector<24x128xf32>
    %757 = tpu.matmul %11, %2, %cst_181 {dimension_numbers = #tpu.dot_dimension_numbers<[1], [0], [0], [1], [0, 0, 1, 1], [], []>} : vector<24x32xf32>, vector<32x128xf32>, vector<24x128xf32> -> vector<24x128xf32>
    %758 = arith.addf %756, %757 : vector<24x128xf32>
    %759 = vector.extract_strided_slice %755 {offsets = [0, 128], sizes = [24, 128], strides = [1, 1]} : vector<24x256xf32> to vector<24x128xf32>
    %cst_182 = arith.constant dense<0.000000e+00> : vector<24x128xf32>
    %760 = tpu.matmul %11, %3, %cst_182 {dimension_numbers = #tpu.dot_dimension_numbers<[1], [0], [0], [1], [0, 0, 1, 1], [], []>} : vector<24x32xf32>, vector<32x128xf32>, vector<24x128xf32> -> vector<24x128xf32>
    %761 = arith.addf %759, %760 : vector<24x128xf32>
    %762 = vector.extract_strided_slice %758 {offsets = [0, 0], sizes = [24, 32], strides = [1, 1]} : vector<24x128xf32> to vector<24x32xf32>
    %763 = arith.negf %762 : vector<24x32xf32>
    %764 = math.exp %763 : vector<24x32xf32>
    %cst_183 = arith.constant 1.000000e+00 : f32
    %765 = vector.broadcast %cst_183 : f32 to vector<24x32xf32>
    %766 = arith.addf %765, %764 : vector<24x32xf32>
    %767 = arith.divf %765, %766 : vector<24x32xf32>
    %768 = vector.extract_strided_slice %758 {offsets = [0, 32], sizes = [24, 32], strides = [1, 1]} : vector<24x128xf32> to vector<24x32xf32>
    %769 = arith.negf %768 : vector<24x32xf32>
    %770 = math.exp %769 : vector<24x32xf32>
    %cst_184 = arith.constant 1.000000e+00 : f32
    %771 = vector.broadcast %cst_184 : f32 to vector<24x32xf32>
    %772 = arith.addf %771, %770 : vector<24x32xf32>
    %773 = arith.divf %771, %772 : vector<24x32xf32>
    %774 = vector.extract_strided_slice %758 {offsets = [0, 64], sizes = [24, 32], strides = [1, 1]} : vector<24x128xf32> to vector<24x32xf32>
    %775 = math.tanh %774 : vector<24x32xf32>
    %776 = vector.extract_strided_slice %758 {offsets = [0, 96], sizes = [24, 32], strides = [1, 1]} : vector<24x128xf32> to vector<24x32xf32>
    %777 = arith.negf %776 : vector<24x32xf32>
    %778 = math.exp %777 : vector<24x32xf32>
    %cst_185 = arith.constant 1.000000e+00 : f32
    %779 = vector.broadcast %cst_185 : f32 to vector<24x32xf32>
    %780 = arith.addf %779, %778 : vector<24x32xf32>
    %781 = arith.divf %779, %780 : vector<24x32xf32>
    %782 = arith.mulf %773, %11 : vector<24x32xf32>
    %783 = arith.mulf %767, %775 : vector<24x32xf32>
    %784 = arith.addf %782, %783 : vector<24x32xf32>
    %785 = math.tanh %784 : vector<24x32xf32>
    %786 = arith.mulf %781, %785 : vector<24x32xf32>
    %787 = vector.extract_strided_slice %761 {offsets = [0, 0], sizes = [24, 32], strides = [1, 1]} : vector<24x128xf32> to vector<24x32xf32>
    %788 = arith.negf %787 : vector<24x32xf32>
    %789 = math.exp %788 : vector<24x32xf32>
    %cst_186 = arith.constant 1.000000e+00 : f32
    %790 = vector.broadcast %cst_186 : f32 to vector<24x32xf32>
    %791 = arith.addf %790, %789 : vector<24x32xf32>
    %792 = arith.divf %790, %791 : vector<24x32xf32>
    %793 = vector.extract_strided_slice %761 {offsets = [0, 32], sizes = [24, 32], strides = [1, 1]} : vector<24x128xf32> to vector<24x32xf32>
    %794 = arith.negf %793 : vector<24x32xf32>
    %795 = math.exp %794 : vector<24x32xf32>
    %cst_187 = arith.constant 1.000000e+00 : f32
    %796 = vector.broadcast %cst_187 : f32 to vector<24x32xf32>
    %797 = arith.addf %796, %795 : vector<24x32xf32>
    %798 = arith.divf %796, %797 : vector<24x32xf32>
    %799 = vector.extract_strided_slice %761 {offsets = [0, 64], sizes = [24, 32], strides = [1, 1]} : vector<24x128xf32> to vector<24x32xf32>
    %800 = math.tanh %799 : vector<24x32xf32>
    %801 = vector.extract_strided_slice %761 {offsets = [0, 96], sizes = [24, 32], strides = [1, 1]} : vector<24x128xf32> to vector<24x32xf32>
    %802 = arith.negf %801 : vector<24x32xf32>
    %803 = math.exp %802 : vector<24x32xf32>
    %cst_188 = arith.constant 1.000000e+00 : f32
    %804 = vector.broadcast %cst_188 : f32 to vector<24x32xf32>
    %805 = arith.addf %804, %803 : vector<24x32xf32>
    %806 = arith.divf %804, %805 : vector<24x32xf32>
    %807 = arith.mulf %798, %11 : vector<24x32xf32>
    %808 = arith.mulf %792, %800 : vector<24x32xf32>
    %809 = arith.addf %807, %808 : vector<24x32xf32>
    %810 = math.tanh %809 : vector<24x32xf32>
    %811 = arith.mulf %806, %810 : vector<24x32xf32>
    %812 = arith.index_cast %c0_i32_175 : i32 to index
    %c0_189 = arith.constant 0 : index
    %c0_190 = arith.constant 0 : index
    %813 = vector.load %arg2[%812, %c0_189, %c0_190] : memref<8x24x1xf32, #tpu.memory_space<vmem>>, vector<1x24x1xf32>
    %814 = vector.shape_cast %813 : vector<1x24x1xf32> to vector<24x1xf32>
    %815 = arith.index_cast %747 : i32 to index
    %c0_191 = arith.constant 0 : index
    %c0_192 = arith.constant 0 : index
    %816 = vector.load %arg2[%815, %c0_191, %c0_192] : memref<8x24x1xf32, #tpu.memory_space<vmem>>, vector<1x24x1xf32>
    %817 = vector.shape_cast %816 : vector<1x24x1xf32> to vector<24x1xf32>
    %818 = arith.subf %786, %11 : vector<24x32xf32>
    %819 = vector.broadcast %814 : vector<24x1xf32> to vector<24x32xf32>
    %820 = arith.mulf %819, %818 : vector<24x32xf32>
    %821 = arith.addf %11, %820 : vector<24x32xf32>
    %822 = arith.subf %784, %11 : vector<24x32xf32>
    %823 = vector.broadcast %814 : vector<24x1xf32> to vector<24x32xf32>
    %824 = arith.mulf %823, %822 : vector<24x32xf32>
    %825 = arith.addf %11, %824 : vector<24x32xf32>
    %826 = arith.subf %811, %11 : vector<24x32xf32>
    %827 = vector.broadcast %817 : vector<24x1xf32> to vector<24x32xf32>
    %828 = arith.mulf %827, %826 : vector<24x32xf32>
    %829 = arith.addf %11, %828 : vector<24x32xf32>
    %830 = arith.subf %809, %11 : vector<24x32xf32>
    %831 = vector.broadcast %817 : vector<24x1xf32> to vector<24x32xf32>
    %832 = arith.mulf %831, %830 : vector<24x32xf32>
    %833 = arith.addf %11, %832 : vector<24x32xf32>
    %c1_i32_193 = arith.constant 1 : i32
    %c7_i32_194 = arith.constant 7 : i32
    %834 = arith.subi %c7_i32_194, %c1_i32_193 : i32
    %c24_i32_195 = arith.constant 24 : i32
    %835 = arith.muli %c1_i32_193, %c24_i32_195 : i32
    %836 = tpu.assume_multiple %835, 8 : i32
    %c24_i32_196 = arith.constant 24 : i32
    %837 = arith.muli %834, %c24_i32_196 : i32
    %838 = tpu.assume_multiple %837, 8 : i32
    %839 = arith.index_cast %836 : i32 to index
    %c0_197 = arith.constant 0 : index
    %840 = vector.load %arg17[%839, %c0_197] : memref<192x256xf32, #tpu.memory_space<vmem>>, vector<24x256xf32>
    %841 = arith.index_cast %838 : i32 to index
    %c0_198 = arith.constant 0 : index
    %842 = vector.load %arg17[%841, %c0_198] : memref<192x256xf32, #tpu.memory_space<vmem>>, vector<24x256xf32>
    %843 = vector.extract_strided_slice %840 {offsets = [0, 0], sizes = [24, 128], strides = [1, 1]} : vector<24x256xf32> to vector<24x128xf32>
    %cst_199 = arith.constant dense<0.000000e+00> : vector<24x128xf32>
    %844 = tpu.matmul %821, %2, %cst_199 {dimension_numbers = #tpu.dot_dimension_numbers<[1], [0], [0], [1], [0, 0, 1, 1], [], []>} : vector<24x32xf32>, vector<32x128xf32>, vector<24x128xf32> -> vector<24x128xf32>
    %845 = arith.addf %843, %844 : vector<24x128xf32>
    %846 = vector.extract_strided_slice %842 {offsets = [0, 128], sizes = [24, 128], strides = [1, 1]} : vector<24x256xf32> to vector<24x128xf32>
    %cst_200 = arith.constant dense<0.000000e+00> : vector<24x128xf32>
    %847 = tpu.matmul %829, %3, %cst_200 {dimension_numbers = #tpu.dot_dimension_numbers<[1], [0], [0], [1], [0, 0, 1, 1], [], []>} : vector<24x32xf32>, vector<32x128xf32>, vector<24x128xf32> -> vector<24x128xf32>
    %848 = arith.addf %846, %847 : vector<24x128xf32>
    %849 = vector.extract_strided_slice %845 {offsets = [0, 0], sizes = [24, 32], strides = [1, 1]} : vector<24x128xf32> to vector<24x32xf32>
    %850 = arith.negf %849 : vector<24x32xf32>
    %851 = math.exp %850 : vector<24x32xf32>
    %cst_201 = arith.constant 1.000000e+00 : f32
    %852 = vector.broadcast %cst_201 : f32 to vector<24x32xf32>
    %853 = arith.addf %852, %851 : vector<24x32xf32>
    %854 = arith.divf %852, %853 : vector<24x32xf32>
    %855 = vector.extract_strided_slice %845 {offsets = [0, 32], sizes = [24, 32], strides = [1, 1]} : vector<24x128xf32> to vector<24x32xf32>
    %856 = arith.negf %855 : vector<24x32xf32>
    %857 = math.exp %856 : vector<24x32xf32>
    %cst_202 = arith.constant 1.000000e+00 : f32
    %858 = vector.broadcast %cst_202 : f32 to vector<24x32xf32>
    %859 = arith.addf %858, %857 : vector<24x32xf32>
    %860 = arith.divf %858, %859 : vector<24x32xf32>
    %861 = vector.extract_strided_slice %845 {offsets = [0, 64], sizes = [24, 32], strides = [1, 1]} : vector<24x128xf32> to vector<24x32xf32>
    %862 = math.tanh %861 : vector<24x32xf32>
    %863 = vector.extract_strided_slice %845 {offsets = [0, 96], sizes = [24, 32], strides = [1, 1]} : vector<24x128xf32> to vector<24x32xf32>
    %864 = arith.negf %863 : vector<24x32xf32>
    %865 = math.exp %864 : vector<24x32xf32>
    %cst_203 = arith.constant 1.000000e+00 : f32
    %866 = vector.broadcast %cst_203 : f32 to vector<24x32xf32>
    %867 = arith.addf %866, %865 : vector<24x32xf32>
    %868 = arith.divf %866, %867 : vector<24x32xf32>
    %869 = arith.mulf %860, %825 : vector<24x32xf32>
    %870 = arith.mulf %854, %862 : vector<24x32xf32>
    %871 = arith.addf %869, %870 : vector<24x32xf32>
    %872 = math.tanh %871 : vector<24x32xf32>
    %873 = arith.mulf %868, %872 : vector<24x32xf32>
    %874 = vector.extract_strided_slice %848 {offsets = [0, 0], sizes = [24, 32], strides = [1, 1]} : vector<24x128xf32> to vector<24x32xf32>
    %875 = arith.negf %874 : vector<24x32xf32>
    %876 = math.exp %875 : vector<24x32xf32>
    %cst_204 = arith.constant 1.000000e+00 : f32
    %877 = vector.broadcast %cst_204 : f32 to vector<24x32xf32>
    %878 = arith.addf %877, %876 : vector<24x32xf32>
    %879 = arith.divf %877, %878 : vector<24x32xf32>
    %880 = vector.extract_strided_slice %848 {offsets = [0, 32], sizes = [24, 32], strides = [1, 1]} : vector<24x128xf32> to vector<24x32xf32>
    %881 = arith.negf %880 : vector<24x32xf32>
    %882 = math.exp %881 : vector<24x32xf32>
    %cst_205 = arith.constant 1.000000e+00 : f32
    %883 = vector.broadcast %cst_205 : f32 to vector<24x32xf32>
    %884 = arith.addf %883, %882 : vector<24x32xf32>
    %885 = arith.divf %883, %884 : vector<24x32xf32>
    %886 = vector.extract_strided_slice %848 {offsets = [0, 64], sizes = [24, 32], strides = [1, 1]} : vector<24x128xf32> to vector<24x32xf32>
    %887 = math.tanh %886 : vector<24x32xf32>
    %888 = vector.extract_strided_slice %848 {offsets = [0, 96], sizes = [24, 32], strides = [1, 1]} : vector<24x128xf32> to vector<24x32xf32>
    %889 = arith.negf %888 : vector<24x32xf32>
    %890 = math.exp %889 : vector<24x32xf32>
    %cst_206 = arith.constant 1.000000e+00 : f32
    %891 = vector.broadcast %cst_206 : f32 to vector<24x32xf32>
    %892 = arith.addf %891, %890 : vector<24x32xf32>
    %893 = arith.divf %891, %892 : vector<24x32xf32>
    %894 = arith.mulf %885, %833 : vector<24x32xf32>
    %895 = arith.mulf %879, %887 : vector<24x32xf32>
    %896 = arith.addf %894, %895 : vector<24x32xf32>
    %897 = math.tanh %896 : vector<24x32xf32>
    %898 = arith.mulf %893, %897 : vector<24x32xf32>
    %899 = arith.index_cast %c1_i32_193 : i32 to index
    %c0_207 = arith.constant 0 : index
    %c0_208 = arith.constant 0 : index
    %900 = vector.load %arg2[%899, %c0_207, %c0_208] : memref<8x24x1xf32, #tpu.memory_space<vmem>>, vector<1x24x1xf32>
    %901 = vector.shape_cast %900 : vector<1x24x1xf32> to vector<24x1xf32>
    %902 = arith.index_cast %834 : i32 to index
    %c0_209 = arith.constant 0 : index
    %c0_210 = arith.constant 0 : index
    %903 = vector.load %arg2[%902, %c0_209, %c0_210] : memref<8x24x1xf32, #tpu.memory_space<vmem>>, vector<1x24x1xf32>
    %904 = vector.shape_cast %903 : vector<1x24x1xf32> to vector<24x1xf32>
    %905 = arith.subf %873, %821 : vector<24x32xf32>
    %906 = vector.broadcast %901 : vector<24x1xf32> to vector<24x32xf32>
    %907 = arith.mulf %906, %905 : vector<24x32xf32>
    %908 = arith.addf %821, %907 : vector<24x32xf32>
    %909 = arith.subf %871, %825 : vector<24x32xf32>
    %910 = vector.broadcast %901 : vector<24x1xf32> to vector<24x32xf32>
    %911 = arith.mulf %910, %909 : vector<24x32xf32>
    %912 = arith.addf %825, %911 : vector<24x32xf32>
    %913 = arith.subf %898, %829 : vector<24x32xf32>
    %914 = vector.broadcast %904 : vector<24x1xf32> to vector<24x32xf32>
    %915 = arith.mulf %914, %913 : vector<24x32xf32>
    %916 = arith.addf %829, %915 : vector<24x32xf32>
    %917 = arith.subf %896, %833 : vector<24x32xf32>
    %918 = vector.broadcast %904 : vector<24x1xf32> to vector<24x32xf32>
    %919 = arith.mulf %918, %917 : vector<24x32xf32>
    %920 = arith.addf %833, %919 : vector<24x32xf32>
    %c2_i32_211 = arith.constant 2 : i32
    %c7_i32_212 = arith.constant 7 : i32
    %921 = arith.subi %c7_i32_212, %c2_i32_211 : i32
    %c24_i32_213 = arith.constant 24 : i32
    %922 = arith.muli %c2_i32_211, %c24_i32_213 : i32
    %923 = tpu.assume_multiple %922, 8 : i32
    %c24_i32_214 = arith.constant 24 : i32
    %924 = arith.muli %921, %c24_i32_214 : i32
    %925 = tpu.assume_multiple %924, 8 : i32
    %926 = arith.index_cast %923 : i32 to index
    %c0_215 = arith.constant 0 : index
    %927 = vector.load %arg17[%926, %c0_215] : memref<192x256xf32, #tpu.memory_space<vmem>>, vector<24x256xf32>
    %928 = arith.index_cast %925 : i32 to index
    %c0_216 = arith.constant 0 : index
    %929 = vector.load %arg17[%928, %c0_216] : memref<192x256xf32, #tpu.memory_space<vmem>>, vector<24x256xf32>
    %930 = vector.extract_strided_slice %927 {offsets = [0, 0], sizes = [24, 128], strides = [1, 1]} : vector<24x256xf32> to vector<24x128xf32>
    %cst_217 = arith.constant dense<0.000000e+00> : vector<24x128xf32>
    %931 = tpu.matmul %908, %2, %cst_217 {dimension_numbers = #tpu.dot_dimension_numbers<[1], [0], [0], [1], [0, 0, 1, 1], [], []>} : vector<24x32xf32>, vector<32x128xf32>, vector<24x128xf32> -> vector<24x128xf32>
    %932 = arith.addf %930, %931 : vector<24x128xf32>
    %933 = vector.extract_strided_slice %929 {offsets = [0, 128], sizes = [24, 128], strides = [1, 1]} : vector<24x256xf32> to vector<24x128xf32>
    %cst_218 = arith.constant dense<0.000000e+00> : vector<24x128xf32>
    %934 = tpu.matmul %916, %3, %cst_218 {dimension_numbers = #tpu.dot_dimension_numbers<[1], [0], [0], [1], [0, 0, 1, 1], [], []>} : vector<24x32xf32>, vector<32x128xf32>, vector<24x128xf32> -> vector<24x128xf32>
    %935 = arith.addf %933, %934 : vector<24x128xf32>
    %936 = vector.extract_strided_slice %932 {offsets = [0, 0], sizes = [24, 32], strides = [1, 1]} : vector<24x128xf32> to vector<24x32xf32>
    %937 = arith.negf %936 : vector<24x32xf32>
    %938 = math.exp %937 : vector<24x32xf32>
    %cst_219 = arith.constant 1.000000e+00 : f32
    %939 = vector.broadcast %cst_219 : f32 to vector<24x32xf32>
    %940 = arith.addf %939, %938 : vector<24x32xf32>
    %941 = arith.divf %939, %940 : vector<24x32xf32>
    %942 = vector.extract_strided_slice %932 {offsets = [0, 32], sizes = [24, 32], strides = [1, 1]} : vector<24x128xf32> to vector<24x32xf32>
    %943 = arith.negf %942 : vector<24x32xf32>
    %944 = math.exp %943 : vector<24x32xf32>
    %cst_220 = arith.constant 1.000000e+00 : f32
    %945 = vector.broadcast %cst_220 : f32 to vector<24x32xf32>
    %946 = arith.addf %945, %944 : vector<24x32xf32>
    %947 = arith.divf %945, %946 : vector<24x32xf32>
    %948 = vector.extract_strided_slice %932 {offsets = [0, 64], sizes = [24, 32], strides = [1, 1]} : vector<24x128xf32> to vector<24x32xf32>
    %949 = math.tanh %948 : vector<24x32xf32>
    %950 = vector.extract_strided_slice %932 {offsets = [0, 96], sizes = [24, 32], strides = [1, 1]} : vector<24x128xf32> to vector<24x32xf32>
    %951 = arith.negf %950 : vector<24x32xf32>
    %952 = math.exp %951 : vector<24x32xf32>
    %cst_221 = arith.constant 1.000000e+00 : f32
    %953 = vector.broadcast %cst_221 : f32 to vector<24x32xf32>
    %954 = arith.addf %953, %952 : vector<24x32xf32>
    %955 = arith.divf %953, %954 : vector<24x32xf32>
    %956 = arith.mulf %947, %912 : vector<24x32xf32>
    %957 = arith.mulf %941, %949 : vector<24x32xf32>
    %958 = arith.addf %956, %957 : vector<24x32xf32>
    %959 = math.tanh %958 : vector<24x32xf32>
    %960 = arith.mulf %955, %959 : vector<24x32xf32>
    %961 = vector.extract_strided_slice %935 {offsets = [0, 0], sizes = [24, 32], strides = [1, 1]} : vector<24x128xf32> to vector<24x32xf32>
    %962 = arith.negf %961 : vector<24x32xf32>
    %963 = math.exp %962 : vector<24x32xf32>
    %cst_222 = arith.constant 1.000000e+00 : f32
    %964 = vector.broadcast %cst_222 : f32 to vector<24x32xf32>
    %965 = arith.addf %964, %963 : vector<24x32xf32>
    %966 = arith.divf %964, %965 : vector<24x32xf32>
    %967 = vector.extract_strided_slice %935 {offsets = [0, 32], sizes = [24, 32], strides = [1, 1]} : vector<24x128xf32> to vector<24x32xf32>
    %968 = arith.negf %967 : vector<24x32xf32>
    %969 = math.exp %968 : vector<24x32xf32>
    %cst_223 = arith.constant 1.000000e+00 : f32
    %970 = vector.broadcast %cst_223 : f32 to vector<24x32xf32>
    %971 = arith.addf %970, %969 : vector<24x32xf32>
    %972 = arith.divf %970, %971 : vector<24x32xf32>
    %973 = vector.extract_strided_slice %935 {offsets = [0, 64], sizes = [24, 32], strides = [1, 1]} : vector<24x128xf32> to vector<24x32xf32>
    %974 = math.tanh %973 : vector<24x32xf32>
    %975 = vector.extract_strided_slice %935 {offsets = [0, 96], sizes = [24, 32], strides = [1, 1]} : vector<24x128xf32> to vector<24x32xf32>
    %976 = arith.negf %975 : vector<24x32xf32>
    %977 = math.exp %976 : vector<24x32xf32>
    %cst_224 = arith.constant 1.000000e+00 : f32
    %978 = vector.broadcast %cst_224 : f32 to vector<24x32xf32>
    %979 = arith.addf %978, %977 : vector<24x32xf32>
    %980 = arith.divf %978, %979 : vector<24x32xf32>
    %981 = arith.mulf %972, %920 : vector<24x32xf32>
    %982 = arith.mulf %966, %974 : vector<24x32xf32>
    %983 = arith.addf %981, %982 : vector<24x32xf32>
    %984 = math.tanh %983 : vector<24x32xf32>
    %985 = arith.mulf %980, %984 : vector<24x32xf32>
    %986 = arith.index_cast %c2_i32_211 : i32 to index
    %c0_225 = arith.constant 0 : index
    %c0_226 = arith.constant 0 : index
    %987 = vector.load %arg2[%986, %c0_225, %c0_226] : memref<8x24x1xf32, #tpu.memory_space<vmem>>, vector<1x24x1xf32>
    %988 = vector.shape_cast %987 : vector<1x24x1xf32> to vector<24x1xf32>
    %989 = arith.index_cast %921 : i32 to index
    %c0_227 = arith.constant 0 : index
    %c0_228 = arith.constant 0 : index
    %990 = vector.load %arg2[%989, %c0_227, %c0_228] : memref<8x24x1xf32, #tpu.memory_space<vmem>>, vector<1x24x1xf32>
    %991 = vector.shape_cast %990 : vector<1x24x1xf32> to vector<24x1xf32>
    %992 = arith.subf %960, %908 : vector<24x32xf32>
    %993 = vector.broadcast %988 : vector<24x1xf32> to vector<24x32xf32>
    %994 = arith.mulf %993, %992 : vector<24x32xf32>
    %995 = arith.addf %908, %994 : vector<24x32xf32>
    %996 = arith.subf %958, %912 : vector<24x32xf32>
    %997 = vector.broadcast %988 : vector<24x1xf32> to vector<24x32xf32>
    %998 = arith.mulf %997, %996 : vector<24x32xf32>
    %999 = arith.addf %912, %998 : vector<24x32xf32>
    %1000 = arith.subf %985, %916 : vector<24x32xf32>
    %1001 = vector.broadcast %991 : vector<24x1xf32> to vector<24x32xf32>
    %1002 = arith.mulf %1001, %1000 : vector<24x32xf32>
    %1003 = arith.addf %916, %1002 : vector<24x32xf32>
    %1004 = arith.subf %983, %920 : vector<24x32xf32>
    %1005 = vector.broadcast %991 : vector<24x1xf32> to vector<24x32xf32>
    %1006 = arith.mulf %1005, %1004 : vector<24x32xf32>
    %1007 = arith.addf %920, %1006 : vector<24x32xf32>
    %c3_i32_229 = arith.constant 3 : i32
    %c7_i32_230 = arith.constant 7 : i32
    %1008 = arith.subi %c7_i32_230, %c3_i32_229 : i32
    %c24_i32_231 = arith.constant 24 : i32
    %1009 = arith.muli %c3_i32_229, %c24_i32_231 : i32
    %1010 = tpu.assume_multiple %1009, 8 : i32
    %c24_i32_232 = arith.constant 24 : i32
    %1011 = arith.muli %1008, %c24_i32_232 : i32
    %1012 = tpu.assume_multiple %1011, 8 : i32
    %1013 = arith.index_cast %1010 : i32 to index
    %c0_233 = arith.constant 0 : index
    %1014 = vector.load %arg17[%1013, %c0_233] : memref<192x256xf32, #tpu.memory_space<vmem>>, vector<24x256xf32>
    %1015 = arith.index_cast %1012 : i32 to index
    %c0_234 = arith.constant 0 : index
    %1016 = vector.load %arg17[%1015, %c0_234] : memref<192x256xf32, #tpu.memory_space<vmem>>, vector<24x256xf32>
    %1017 = vector.extract_strided_slice %1014 {offsets = [0, 0], sizes = [24, 128], strides = [1, 1]} : vector<24x256xf32> to vector<24x128xf32>
    %cst_235 = arith.constant dense<0.000000e+00> : vector<24x128xf32>
    %1018 = tpu.matmul %995, %2, %cst_235 {dimension_numbers = #tpu.dot_dimension_numbers<[1], [0], [0], [1], [0, 0, 1, 1], [], []>} : vector<24x32xf32>, vector<32x128xf32>, vector<24x128xf32> -> vector<24x128xf32>
    %1019 = arith.addf %1017, %1018 : vector<24x128xf32>
    %1020 = vector.extract_strided_slice %1016 {offsets = [0, 128], sizes = [24, 128], strides = [1, 1]} : vector<24x256xf32> to vector<24x128xf32>
    %cst_236 = arith.constant dense<0.000000e+00> : vector<24x128xf32>
    %1021 = tpu.matmul %1003, %3, %cst_236 {dimension_numbers = #tpu.dot_dimension_numbers<[1], [0], [0], [1], [0, 0, 1, 1], [], []>} : vector<24x32xf32>, vector<32x128xf32>, vector<24x128xf32> -> vector<24x128xf32>
    %1022 = arith.addf %1020, %1021 : vector<24x128xf32>
    %1023 = vector.extract_strided_slice %1019 {offsets = [0, 0], sizes = [24, 32], strides = [1, 1]} : vector<24x128xf32> to vector<24x32xf32>
    %1024 = arith.negf %1023 : vector<24x32xf32>
    %1025 = math.exp %1024 : vector<24x32xf32>
    %cst_237 = arith.constant 1.000000e+00 : f32
    %1026 = vector.broadcast %cst_237 : f32 to vector<24x32xf32>
    %1027 = arith.addf %1026, %1025 : vector<24x32xf32>
    %1028 = arith.divf %1026, %1027 : vector<24x32xf32>
    %1029 = vector.extract_strided_slice %1019 {offsets = [0, 32], sizes = [24, 32], strides = [1, 1]} : vector<24x128xf32> to vector<24x32xf32>
    %1030 = arith.negf %1029 : vector<24x32xf32>
    %1031 = math.exp %1030 : vector<24x32xf32>
    %cst_238 = arith.constant 1.000000e+00 : f32
    %1032 = vector.broadcast %cst_238 : f32 to vector<24x32xf32>
    %1033 = arith.addf %1032, %1031 : vector<24x32xf32>
    %1034 = arith.divf %1032, %1033 : vector<24x32xf32>
    %1035 = vector.extract_strided_slice %1019 {offsets = [0, 64], sizes = [24, 32], strides = [1, 1]} : vector<24x128xf32> to vector<24x32xf32>
    %1036 = math.tanh %1035 : vector<24x32xf32>
    %1037 = vector.extract_strided_slice %1019 {offsets = [0, 96], sizes = [24, 32], strides = [1, 1]} : vector<24x128xf32> to vector<24x32xf32>
    %1038 = arith.negf %1037 : vector<24x32xf32>
    %1039 = math.exp %1038 : vector<24x32xf32>
    %cst_239 = arith.constant 1.000000e+00 : f32
    %1040 = vector.broadcast %cst_239 : f32 to vector<24x32xf32>
    %1041 = arith.addf %1040, %1039 : vector<24x32xf32>
    %1042 = arith.divf %1040, %1041 : vector<24x32xf32>
    %1043 = arith.mulf %1034, %999 : vector<24x32xf32>
    %1044 = arith.mulf %1028, %1036 : vector<24x32xf32>
    %1045 = arith.addf %1043, %1044 : vector<24x32xf32>
    %1046 = math.tanh %1045 : vector<24x32xf32>
    %1047 = arith.mulf %1042, %1046 : vector<24x32xf32>
    %1048 = vector.extract_strided_slice %1022 {offsets = [0, 0], sizes = [24, 32], strides = [1, 1]} : vector<24x128xf32> to vector<24x32xf32>
    %1049 = arith.negf %1048 : vector<24x32xf32>
    %1050 = math.exp %1049 : vector<24x32xf32>
    %cst_240 = arith.constant 1.000000e+00 : f32
    %1051 = vector.broadcast %cst_240 : f32 to vector<24x32xf32>
    %1052 = arith.addf %1051, %1050 : vector<24x32xf32>
    %1053 = arith.divf %1051, %1052 : vector<24x32xf32>
    %1054 = vector.extract_strided_slice %1022 {offsets = [0, 32], sizes = [24, 32], strides = [1, 1]} : vector<24x128xf32> to vector<24x32xf32>
    %1055 = arith.negf %1054 : vector<24x32xf32>
    %1056 = math.exp %1055 : vector<24x32xf32>
    %cst_241 = arith.constant 1.000000e+00 : f32
    %1057 = vector.broadcast %cst_241 : f32 to vector<24x32xf32>
    %1058 = arith.addf %1057, %1056 : vector<24x32xf32>
    %1059 = arith.divf %1057, %1058 : vector<24x32xf32>
    %1060 = vector.extract_strided_slice %1022 {offsets = [0, 64], sizes = [24, 32], strides = [1, 1]} : vector<24x128xf32> to vector<24x32xf32>
    %1061 = math.tanh %1060 : vector<24x32xf32>
    %1062 = vector.extract_strided_slice %1022 {offsets = [0, 96], sizes = [24, 32], strides = [1, 1]} : vector<24x128xf32> to vector<24x32xf32>
    %1063 = arith.negf %1062 : vector<24x32xf32>
    %1064 = math.exp %1063 : vector<24x32xf32>
    %cst_242 = arith.constant 1.000000e+00 : f32
    %1065 = vector.broadcast %cst_242 : f32 to vector<24x32xf32>
    %1066 = arith.addf %1065, %1064 : vector<24x32xf32>
    %1067 = arith.divf %1065, %1066 : vector<24x32xf32>
    %1068 = arith.mulf %1059, %1007 : vector<24x32xf32>
    %1069 = arith.mulf %1053, %1061 : vector<24x32xf32>
    %1070 = arith.addf %1068, %1069 : vector<24x32xf32>
    %1071 = math.tanh %1070 : vector<24x32xf32>
    %1072 = arith.mulf %1067, %1071 : vector<24x32xf32>
    %1073 = arith.index_cast %c3_i32_229 : i32 to index
    %c0_243 = arith.constant 0 : index
    %c0_244 = arith.constant 0 : index
    %1074 = vector.load %arg2[%1073, %c0_243, %c0_244] : memref<8x24x1xf32, #tpu.memory_space<vmem>>, vector<1x24x1xf32>
    %1075 = vector.shape_cast %1074 : vector<1x24x1xf32> to vector<24x1xf32>
    %1076 = arith.index_cast %1008 : i32 to index
    %c0_245 = arith.constant 0 : index
    %c0_246 = arith.constant 0 : index
    %1077 = vector.load %arg2[%1076, %c0_245, %c0_246] : memref<8x24x1xf32, #tpu.memory_space<vmem>>, vector<1x24x1xf32>
    %1078 = vector.shape_cast %1077 : vector<1x24x1xf32> to vector<24x1xf32>
    %1079 = arith.subf %1047, %995 : vector<24x32xf32>
    %1080 = vector.broadcast %1075 : vector<24x1xf32> to vector<24x32xf32>
    %1081 = arith.mulf %1080, %1079 : vector<24x32xf32>
    %1082 = arith.addf %995, %1081 : vector<24x32xf32>
    %1083 = arith.subf %1045, %999 : vector<24x32xf32>
    %1084 = vector.broadcast %1075 : vector<24x1xf32> to vector<24x32xf32>
    %1085 = arith.mulf %1084, %1083 : vector<24x32xf32>
    %1086 = arith.addf %999, %1085 : vector<24x32xf32>
    %1087 = arith.subf %1072, %1003 : vector<24x32xf32>
    %1088 = vector.broadcast %1078 : vector<24x1xf32> to vector<24x32xf32>
    %1089 = arith.mulf %1088, %1087 : vector<24x32xf32>
    %1090 = arith.addf %1003, %1089 : vector<24x32xf32>
    %1091 = arith.subf %1070, %1007 : vector<24x32xf32>
    %1092 = vector.broadcast %1078 : vector<24x1xf32> to vector<24x32xf32>
    %1093 = arith.mulf %1092, %1091 : vector<24x32xf32>
    %1094 = arith.addf %1007, %1093 : vector<24x32xf32>
    %c4_i32_247 = arith.constant 4 : i32
    %c7_i32_248 = arith.constant 7 : i32
    %1095 = arith.subi %c7_i32_248, %c4_i32_247 : i32
    %c24_i32_249 = arith.constant 24 : i32
    %1096 = arith.muli %c4_i32_247, %c24_i32_249 : i32
    %1097 = tpu.assume_multiple %1096, 8 : i32
    %c24_i32_250 = arith.constant 24 : i32
    %1098 = arith.muli %1095, %c24_i32_250 : i32
    %1099 = tpu.assume_multiple %1098, 8 : i32
    %1100 = arith.index_cast %1097 : i32 to index
    %c0_251 = arith.constant 0 : index
    %1101 = vector.load %arg17[%1100, %c0_251] : memref<192x256xf32, #tpu.memory_space<vmem>>, vector<24x256xf32>
    %1102 = arith.index_cast %1099 : i32 to index
    %c0_252 = arith.constant 0 : index
    %1103 = vector.load %arg17[%1102, %c0_252] : memref<192x256xf32, #tpu.memory_space<vmem>>, vector<24x256xf32>
    %1104 = vector.extract_strided_slice %1101 {offsets = [0, 0], sizes = [24, 128], strides = [1, 1]} : vector<24x256xf32> to vector<24x128xf32>
    %cst_253 = arith.constant dense<0.000000e+00> : vector<24x128xf32>
    %1105 = tpu.matmul %1082, %2, %cst_253 {dimension_numbers = #tpu.dot_dimension_numbers<[1], [0], [0], [1], [0, 0, 1, 1], [], []>} : vector<24x32xf32>, vector<32x128xf32>, vector<24x128xf32> -> vector<24x128xf32>
    %1106 = arith.addf %1104, %1105 : vector<24x128xf32>
    %1107 = vector.extract_strided_slice %1103 {offsets = [0, 128], sizes = [24, 128], strides = [1, 1]} : vector<24x256xf32> to vector<24x128xf32>
    %cst_254 = arith.constant dense<0.000000e+00> : vector<24x128xf32>
    %1108 = tpu.matmul %1090, %3, %cst_254 {dimension_numbers = #tpu.dot_dimension_numbers<[1], [0], [0], [1], [0, 0, 1, 1], [], []>} : vector<24x32xf32>, vector<32x128xf32>, vector<24x128xf32> -> vector<24x128xf32>
    %1109 = arith.addf %1107, %1108 : vector<24x128xf32>
    %1110 = vector.extract_strided_slice %1106 {offsets = [0, 0], sizes = [24, 32], strides = [1, 1]} : vector<24x128xf32> to vector<24x32xf32>
    %1111 = arith.negf %1110 : vector<24x32xf32>
    %1112 = math.exp %1111 : vector<24x32xf32>
    %cst_255 = arith.constant 1.000000e+00 : f32
    %1113 = vector.broadcast %cst_255 : f32 to vector<24x32xf32>
    %1114 = arith.addf %1113, %1112 : vector<24x32xf32>
    %1115 = arith.divf %1113, %1114 : vector<24x32xf32>
    %1116 = vector.extract_strided_slice %1106 {offsets = [0, 32], sizes = [24, 32], strides = [1, 1]} : vector<24x128xf32> to vector<24x32xf32>
    %1117 = arith.negf %1116 : vector<24x32xf32>
    %1118 = math.exp %1117 : vector<24x32xf32>
    %cst_256 = arith.constant 1.000000e+00 : f32
    %1119 = vector.broadcast %cst_256 : f32 to vector<24x32xf32>
    %1120 = arith.addf %1119, %1118 : vector<24x32xf32>
    %1121 = arith.divf %1119, %1120 : vector<24x32xf32>
    %1122 = vector.extract_strided_slice %1106 {offsets = [0, 64], sizes = [24, 32], strides = [1, 1]} : vector<24x128xf32> to vector<24x32xf32>
    %1123 = math.tanh %1122 : vector<24x32xf32>
    %1124 = vector.extract_strided_slice %1106 {offsets = [0, 96], sizes = [24, 32], strides = [1, 1]} : vector<24x128xf32> to vector<24x32xf32>
    %1125 = arith.negf %1124 : vector<24x32xf32>
    %1126 = math.exp %1125 : vector<24x32xf32>
    %cst_257 = arith.constant 1.000000e+00 : f32
    %1127 = vector.broadcast %cst_257 : f32 to vector<24x32xf32>
    %1128 = arith.addf %1127, %1126 : vector<24x32xf32>
    %1129 = arith.divf %1127, %1128 : vector<24x32xf32>
    %1130 = arith.mulf %1121, %1086 : vector<24x32xf32>
    %1131 = arith.mulf %1115, %1123 : vector<24x32xf32>
    %1132 = arith.addf %1130, %1131 : vector<24x32xf32>
    %1133 = math.tanh %1132 : vector<24x32xf32>
    %1134 = arith.mulf %1129, %1133 : vector<24x32xf32>
    %1135 = vector.extract_strided_slice %1109 {offsets = [0, 0], sizes = [24, 32], strides = [1, 1]} : vector<24x128xf32> to vector<24x32xf32>
    %1136 = arith.negf %1135 : vector<24x32xf32>
    %1137 = math.exp %1136 : vector<24x32xf32>
    %cst_258 = arith.constant 1.000000e+00 : f32
    %1138 = vector.broadcast %cst_258 : f32 to vector<24x32xf32>
    %1139 = arith.addf %1138, %1137 : vector<24x32xf32>
    %1140 = arith.divf %1138, %1139 : vector<24x32xf32>
    %1141 = vector.extract_strided_slice %1109 {offsets = [0, 32], sizes = [24, 32], strides = [1, 1]} : vector<24x128xf32> to vector<24x32xf32>
    %1142 = arith.negf %1141 : vector<24x32xf32>
    %1143 = math.exp %1142 : vector<24x32xf32>
    %cst_259 = arith.constant 1.000000e+00 : f32
    %1144 = vector.broadcast %cst_259 : f32 to vector<24x32xf32>
    %1145 = arith.addf %1144, %1143 : vector<24x32xf32>
    %1146 = arith.divf %1144, %1145 : vector<24x32xf32>
    %1147 = vector.extract_strided_slice %1109 {offsets = [0, 64], sizes = [24, 32], strides = [1, 1]} : vector<24x128xf32> to vector<24x32xf32>
    %1148 = math.tanh %1147 : vector<24x32xf32>
    %1149 = vector.extract_strided_slice %1109 {offsets = [0, 96], sizes = [24, 32], strides = [1, 1]} : vector<24x128xf32> to vector<24x32xf32>
    %1150 = arith.negf %1149 : vector<24x32xf32>
    %1151 = math.exp %1150 : vector<24x32xf32>
    %cst_260 = arith.constant 1.000000e+00 : f32
    %1152 = vector.broadcast %cst_260 : f32 to vector<24x32xf32>
    %1153 = arith.addf %1152, %1151 : vector<24x32xf32>
    %1154 = arith.divf %1152, %1153 : vector<24x32xf32>
    %1155 = arith.mulf %1146, %1094 : vector<24x32xf32>
    %1156 = arith.mulf %1140, %1148 : vector<24x32xf32>
    %1157 = arith.addf %1155, %1156 : vector<24x32xf32>
    %1158 = math.tanh %1157 : vector<24x32xf32>
    %1159 = arith.mulf %1154, %1158 : vector<24x32xf32>
    %1160 = arith.index_cast %c4_i32_247 : i32 to index
    %c0_261 = arith.constant 0 : index
    %c0_262 = arith.constant 0 : index
    %1161 = vector.load %arg2[%1160, %c0_261, %c0_262] : memref<8x24x1xf32, #tpu.memory_space<vmem>>, vector<1x24x1xf32>
    %1162 = vector.shape_cast %1161 : vector<1x24x1xf32> to vector<24x1xf32>
    %1163 = arith.index_cast %1095 : i32 to index
    %c0_263 = arith.constant 0 : index
    %c0_264 = arith.constant 0 : index
    %1164 = vector.load %arg2[%1163, %c0_263, %c0_264] : memref<8x24x1xf32, #tpu.memory_space<vmem>>, vector<1x24x1xf32>
    %1165 = vector.shape_cast %1164 : vector<1x24x1xf32> to vector<24x1xf32>
    %1166 = arith.subf %1134, %1082 : vector<24x32xf32>
    %1167 = vector.broadcast %1162 : vector<24x1xf32> to vector<24x32xf32>
    %1168 = arith.mulf %1167, %1166 : vector<24x32xf32>
    %1169 = arith.addf %1082, %1168 : vector<24x32xf32>
    %1170 = arith.subf %1132, %1086 : vector<24x32xf32>
    %1171 = vector.broadcast %1162 : vector<24x1xf32> to vector<24x32xf32>
    %1172 = arith.mulf %1171, %1170 : vector<24x32xf32>
    %1173 = arith.addf %1086, %1172 : vector<24x32xf32>
    %1174 = arith.subf %1159, %1090 : vector<24x32xf32>
    %1175 = vector.broadcast %1165 : vector<24x1xf32> to vector<24x32xf32>
    %1176 = arith.mulf %1175, %1174 : vector<24x32xf32>
    %1177 = arith.addf %1090, %1176 : vector<24x32xf32>
    %1178 = arith.subf %1157, %1094 : vector<24x32xf32>
    %1179 = vector.broadcast %1165 : vector<24x1xf32> to vector<24x32xf32>
    %1180 = arith.mulf %1179, %1178 : vector<24x32xf32>
    %1181 = arith.addf %1094, %1180 : vector<24x32xf32>
    %c5_i32_265 = arith.constant 5 : i32
    %c7_i32_266 = arith.constant 7 : i32
    %1182 = arith.subi %c7_i32_266, %c5_i32_265 : i32
    %c24_i32_267 = arith.constant 24 : i32
    %1183 = arith.muli %c5_i32_265, %c24_i32_267 : i32
    %1184 = tpu.assume_multiple %1183, 8 : i32
    %c24_i32_268 = arith.constant 24 : i32
    %1185 = arith.muli %1182, %c24_i32_268 : i32
    %1186 = tpu.assume_multiple %1185, 8 : i32
    %1187 = arith.index_cast %1184 : i32 to index
    %c0_269 = arith.constant 0 : index
    %1188 = vector.load %arg17[%1187, %c0_269] : memref<192x256xf32, #tpu.memory_space<vmem>>, vector<24x256xf32>
    %1189 = arith.index_cast %1186 : i32 to index
    %c0_270 = arith.constant 0 : index
    %1190 = vector.load %arg17[%1189, %c0_270] : memref<192x256xf32, #tpu.memory_space<vmem>>, vector<24x256xf32>
    %1191 = vector.extract_strided_slice %1188 {offsets = [0, 0], sizes = [24, 128], strides = [1, 1]} : vector<24x256xf32> to vector<24x128xf32>
    %cst_271 = arith.constant dense<0.000000e+00> : vector<24x128xf32>
    %1192 = tpu.matmul %1169, %2, %cst_271 {dimension_numbers = #tpu.dot_dimension_numbers<[1], [0], [0], [1], [0, 0, 1, 1], [], []>} : vector<24x32xf32>, vector<32x128xf32>, vector<24x128xf32> -> vector<24x128xf32>
    %1193 = arith.addf %1191, %1192 : vector<24x128xf32>
    %1194 = vector.extract_strided_slice %1190 {offsets = [0, 128], sizes = [24, 128], strides = [1, 1]} : vector<24x256xf32> to vector<24x128xf32>
    %cst_272 = arith.constant dense<0.000000e+00> : vector<24x128xf32>
    %1195 = tpu.matmul %1177, %3, %cst_272 {dimension_numbers = #tpu.dot_dimension_numbers<[1], [0], [0], [1], [0, 0, 1, 1], [], []>} : vector<24x32xf32>, vector<32x128xf32>, vector<24x128xf32> -> vector<24x128xf32>
    %1196 = arith.addf %1194, %1195 : vector<24x128xf32>
    %1197 = vector.extract_strided_slice %1193 {offsets = [0, 0], sizes = [24, 32], strides = [1, 1]} : vector<24x128xf32> to vector<24x32xf32>
    %1198 = arith.negf %1197 : vector<24x32xf32>
    %1199 = math.exp %1198 : vector<24x32xf32>
    %cst_273 = arith.constant 1.000000e+00 : f32
    %1200 = vector.broadcast %cst_273 : f32 to vector<24x32xf32>
    %1201 = arith.addf %1200, %1199 : vector<24x32xf32>
    %1202 = arith.divf %1200, %1201 : vector<24x32xf32>
    %1203 = vector.extract_strided_slice %1193 {offsets = [0, 32], sizes = [24, 32], strides = [1, 1]} : vector<24x128xf32> to vector<24x32xf32>
    %1204 = arith.negf %1203 : vector<24x32xf32>
    %1205 = math.exp %1204 : vector<24x32xf32>
    %cst_274 = arith.constant 1.000000e+00 : f32
    %1206 = vector.broadcast %cst_274 : f32 to vector<24x32xf32>
    %1207 = arith.addf %1206, %1205 : vector<24x32xf32>
    %1208 = arith.divf %1206, %1207 : vector<24x32xf32>
    %1209 = vector.extract_strided_slice %1193 {offsets = [0, 64], sizes = [24, 32], strides = [1, 1]} : vector<24x128xf32> to vector<24x32xf32>
    %1210 = math.tanh %1209 : vector<24x32xf32>
    %1211 = vector.extract_strided_slice %1193 {offsets = [0, 96], sizes = [24, 32], strides = [1, 1]} : vector<24x128xf32> to vector<24x32xf32>
    %1212 = arith.negf %1211 : vector<24x32xf32>
    %1213 = math.exp %1212 : vector<24x32xf32>
    %cst_275 = arith.constant 1.000000e+00 : f32
    %1214 = vector.broadcast %cst_275 : f32 to vector<24x32xf32>
    %1215 = arith.addf %1214, %1213 : vector<24x32xf32>
    %1216 = arith.divf %1214, %1215 : vector<24x32xf32>
    %1217 = arith.mulf %1208, %1173 : vector<24x32xf32>
    %1218 = arith.mulf %1202, %1210 : vector<24x32xf32>
    %1219 = arith.addf %1217, %1218 : vector<24x32xf32>
    %1220 = math.tanh %1219 : vector<24x32xf32>
    %1221 = arith.mulf %1216, %1220 : vector<24x32xf32>
    %1222 = vector.extract_strided_slice %1196 {offsets = [0, 0], sizes = [24, 32], strides = [1, 1]} : vector<24x128xf32> to vector<24x32xf32>
    %1223 = arith.negf %1222 : vector<24x32xf32>
    %1224 = math.exp %1223 : vector<24x32xf32>
    %cst_276 = arith.constant 1.000000e+00 : f32
    %1225 = vector.broadcast %cst_276 : f32 to vector<24x32xf32>
    %1226 = arith.addf %1225, %1224 : vector<24x32xf32>
    %1227 = arith.divf %1225, %1226 : vector<24x32xf32>
    %1228 = vector.extract_strided_slice %1196 {offsets = [0, 32], sizes = [24, 32], strides = [1, 1]} : vector<24x128xf32> to vector<24x32xf32>
    %1229 = arith.negf %1228 : vector<24x32xf32>
    %1230 = math.exp %1229 : vector<24x32xf32>
    %cst_277 = arith.constant 1.000000e+00 : f32
    %1231 = vector.broadcast %cst_277 : f32 to vector<24x32xf32>
    %1232 = arith.addf %1231, %1230 : vector<24x32xf32>
    %1233 = arith.divf %1231, %1232 : vector<24x32xf32>
    %1234 = vector.extract_strided_slice %1196 {offsets = [0, 64], sizes = [24, 32], strides = [1, 1]} : vector<24x128xf32> to vector<24x32xf32>
    %1235 = math.tanh %1234 : vector<24x32xf32>
    %1236 = vector.extract_strided_slice %1196 {offsets = [0, 96], sizes = [24, 32], strides = [1, 1]} : vector<24x128xf32> to vector<24x32xf32>
    %1237 = arith.negf %1236 : vector<24x32xf32>
    %1238 = math.exp %1237 : vector<24x32xf32>
    %cst_278 = arith.constant 1.000000e+00 : f32
    %1239 = vector.broadcast %cst_278 : f32 to vector<24x32xf32>
    %1240 = arith.addf %1239, %1238 : vector<24x32xf32>
    %1241 = arith.divf %1239, %1240 : vector<24x32xf32>
    %1242 = arith.mulf %1233, %1181 : vector<24x32xf32>
    %1243 = arith.mulf %1227, %1235 : vector<24x32xf32>
    %1244 = arith.addf %1242, %1243 : vector<24x32xf32>
    %1245 = math.tanh %1244 : vector<24x32xf32>
    %1246 = arith.mulf %1241, %1245 : vector<24x32xf32>
    %1247 = arith.index_cast %c5_i32_265 : i32 to index
    %c0_279 = arith.constant 0 : index
    %c0_280 = arith.constant 0 : index
    %1248 = vector.load %arg2[%1247, %c0_279, %c0_280] : memref<8x24x1xf32, #tpu.memory_space<vmem>>, vector<1x24x1xf32>
    %1249 = vector.shape_cast %1248 : vector<1x24x1xf32> to vector<24x1xf32>
    %1250 = arith.index_cast %1182 : i32 to index
    %c0_281 = arith.constant 0 : index
    %c0_282 = arith.constant 0 : index
    %1251 = vector.load %arg2[%1250, %c0_281, %c0_282] : memref<8x24x1xf32, #tpu.memory_space<vmem>>, vector<1x24x1xf32>
    %1252 = vector.shape_cast %1251 : vector<1x24x1xf32> to vector<24x1xf32>
    %1253 = arith.subf %1221, %1169 : vector<24x32xf32>
    %1254 = vector.broadcast %1249 : vector<24x1xf32> to vector<24x32xf32>
    %1255 = arith.mulf %1254, %1253 : vector<24x32xf32>
    %1256 = arith.addf %1169, %1255 : vector<24x32xf32>
    %1257 = arith.subf %1219, %1173 : vector<24x32xf32>
    %1258 = vector.broadcast %1249 : vector<24x1xf32> to vector<24x32xf32>
    %1259 = arith.mulf %1258, %1257 : vector<24x32xf32>
    %1260 = arith.addf %1173, %1259 : vector<24x32xf32>
    %1261 = arith.subf %1246, %1177 : vector<24x32xf32>
    %1262 = vector.broadcast %1252 : vector<24x1xf32> to vector<24x32xf32>
    %1263 = arith.mulf %1262, %1261 : vector<24x32xf32>
    %1264 = arith.addf %1177, %1263 : vector<24x32xf32>
    %1265 = arith.subf %1244, %1181 : vector<24x32xf32>
    %1266 = vector.broadcast %1252 : vector<24x1xf32> to vector<24x32xf32>
    %1267 = arith.mulf %1266, %1265 : vector<24x32xf32>
    %1268 = arith.addf %1181, %1267 : vector<24x32xf32>
    %c6_i32_283 = arith.constant 6 : i32
    %c7_i32_284 = arith.constant 7 : i32
    %1269 = arith.subi %c7_i32_284, %c6_i32_283 : i32
    %c24_i32_285 = arith.constant 24 : i32
    %1270 = arith.muli %c6_i32_283, %c24_i32_285 : i32
    %1271 = tpu.assume_multiple %1270, 8 : i32
    %c24_i32_286 = arith.constant 24 : i32
    %1272 = arith.muli %1269, %c24_i32_286 : i32
    %1273 = tpu.assume_multiple %1272, 8 : i32
    %1274 = arith.index_cast %1271 : i32 to index
    %c0_287 = arith.constant 0 : index
    %1275 = vector.load %arg17[%1274, %c0_287] : memref<192x256xf32, #tpu.memory_space<vmem>>, vector<24x256xf32>
    %1276 = arith.index_cast %1273 : i32 to index
    %c0_288 = arith.constant 0 : index
    %1277 = vector.load %arg17[%1276, %c0_288] : memref<192x256xf32, #tpu.memory_space<vmem>>, vector<24x256xf32>
    %1278 = vector.extract_strided_slice %1275 {offsets = [0, 0], sizes = [24, 128], strides = [1, 1]} : vector<24x256xf32> to vector<24x128xf32>
    %cst_289 = arith.constant dense<0.000000e+00> : vector<24x128xf32>
    %1279 = tpu.matmul %1256, %2, %cst_289 {dimension_numbers = #tpu.dot_dimension_numbers<[1], [0], [0], [1], [0, 0, 1, 1], [], []>} : vector<24x32xf32>, vector<32x128xf32>, vector<24x128xf32> -> vector<24x128xf32>
    %1280 = arith.addf %1278, %1279 : vector<24x128xf32>
    %1281 = vector.extract_strided_slice %1277 {offsets = [0, 128], sizes = [24, 128], strides = [1, 1]} : vector<24x256xf32> to vector<24x128xf32>
    %cst_290 = arith.constant dense<0.000000e+00> : vector<24x128xf32>
    %1282 = tpu.matmul %1264, %3, %cst_290 {dimension_numbers = #tpu.dot_dimension_numbers<[1], [0], [0], [1], [0, 0, 1, 1], [], []>} : vector<24x32xf32>, vector<32x128xf32>, vector<24x128xf32> -> vector<24x128xf32>
    %1283 = arith.addf %1281, %1282 : vector<24x128xf32>
    %1284 = vector.extract_strided_slice %1280 {offsets = [0, 0], sizes = [24, 32], strides = [1, 1]} : vector<24x128xf32> to vector<24x32xf32>
    %1285 = arith.negf %1284 : vector<24x32xf32>
    %1286 = math.exp %1285 : vector<24x32xf32>
    %cst_291 = arith.constant 1.000000e+00 : f32
    %1287 = vector.broadcast %cst_291 : f32 to vector<24x32xf32>
    %1288 = arith.addf %1287, %1286 : vector<24x32xf32>
    %1289 = arith.divf %1287, %1288 : vector<24x32xf32>
    %1290 = vector.extract_strided_slice %1280 {offsets = [0, 32], sizes = [24, 32], strides = [1, 1]} : vector<24x128xf32> to vector<24x32xf32>
    %1291 = arith.negf %1290 : vector<24x32xf32>
    %1292 = math.exp %1291 : vector<24x32xf32>
    %cst_292 = arith.constant 1.000000e+00 : f32
    %1293 = vector.broadcast %cst_292 : f32 to vector<24x32xf32>
    %1294 = arith.addf %1293, %1292 : vector<24x32xf32>
    %1295 = arith.divf %1293, %1294 : vector<24x32xf32>
    %1296 = vector.extract_strided_slice %1280 {offsets = [0, 64], sizes = [24, 32], strides = [1, 1]} : vector<24x128xf32> to vector<24x32xf32>
    %1297 = math.tanh %1296 : vector<24x32xf32>
    %1298 = vector.extract_strided_slice %1280 {offsets = [0, 96], sizes = [24, 32], strides = [1, 1]} : vector<24x128xf32> to vector<24x32xf32>
    %1299 = arith.negf %1298 : vector<24x32xf32>
    %1300 = math.exp %1299 : vector<24x32xf32>
    %cst_293 = arith.constant 1.000000e+00 : f32
    %1301 = vector.broadcast %cst_293 : f32 to vector<24x32xf32>
    %1302 = arith.addf %1301, %1300 : vector<24x32xf32>
    %1303 = arith.divf %1301, %1302 : vector<24x32xf32>
    %1304 = arith.mulf %1295, %1260 : vector<24x32xf32>
    %1305 = arith.mulf %1289, %1297 : vector<24x32xf32>
    %1306 = arith.addf %1304, %1305 : vector<24x32xf32>
    %1307 = math.tanh %1306 : vector<24x32xf32>
    %1308 = arith.mulf %1303, %1307 : vector<24x32xf32>
    %1309 = vector.extract_strided_slice %1283 {offsets = [0, 0], sizes = [24, 32], strides = [1, 1]} : vector<24x128xf32> to vector<24x32xf32>
    %1310 = arith.negf %1309 : vector<24x32xf32>
    %1311 = math.exp %1310 : vector<24x32xf32>
    %cst_294 = arith.constant 1.000000e+00 : f32
    %1312 = vector.broadcast %cst_294 : f32 to vector<24x32xf32>
    %1313 = arith.addf %1312, %1311 : vector<24x32xf32>
    %1314 = arith.divf %1312, %1313 : vector<24x32xf32>
    %1315 = vector.extract_strided_slice %1283 {offsets = [0, 32], sizes = [24, 32], strides = [1, 1]} : vector<24x128xf32> to vector<24x32xf32>
    %1316 = arith.negf %1315 : vector<24x32xf32>
    %1317 = math.exp %1316 : vector<24x32xf32>
    %cst_295 = arith.constant 1.000000e+00 : f32
    %1318 = vector.broadcast %cst_295 : f32 to vector<24x32xf32>
    %1319 = arith.addf %1318, %1317 : vector<24x32xf32>
    %1320 = arith.divf %1318, %1319 : vector<24x32xf32>
    %1321 = vector.extract_strided_slice %1283 {offsets = [0, 64], sizes = [24, 32], strides = [1, 1]} : vector<24x128xf32> to vector<24x32xf32>
    %1322 = math.tanh %1321 : vector<24x32xf32>
    %1323 = vector.extract_strided_slice %1283 {offsets = [0, 96], sizes = [24, 32], strides = [1, 1]} : vector<24x128xf32> to vector<24x32xf32>
    %1324 = arith.negf %1323 : vector<24x32xf32>
    %1325 = math.exp %1324 : vector<24x32xf32>
    %cst_296 = arith.constant 1.000000e+00 : f32
    %1326 = vector.broadcast %cst_296 : f32 to vector<24x32xf32>
    %1327 = arith.addf %1326, %1325 : vector<24x32xf32>
    %1328 = arith.divf %1326, %1327 : vector<24x32xf32>
    %1329 = arith.mulf %1320, %1268 : vector<24x32xf32>
    %1330 = arith.mulf %1314, %1322 : vector<24x32xf32>
    %1331 = arith.addf %1329, %1330 : vector<24x32xf32>
    %1332 = math.tanh %1331 : vector<24x32xf32>
    %1333 = arith.mulf %1328, %1332 : vector<24x32xf32>
    %1334 = arith.index_cast %c6_i32_283 : i32 to index
    %c0_297 = arith.constant 0 : index
    %c0_298 = arith.constant 0 : index
    %1335 = vector.load %arg2[%1334, %c0_297, %c0_298] : memref<8x24x1xf32, #tpu.memory_space<vmem>>, vector<1x24x1xf32>
    %1336 = vector.shape_cast %1335 : vector<1x24x1xf32> to vector<24x1xf32>
    %1337 = arith.index_cast %1269 : i32 to index
    %c0_299 = arith.constant 0 : index
    %c0_300 = arith.constant 0 : index
    %1338 = vector.load %arg2[%1337, %c0_299, %c0_300] : memref<8x24x1xf32, #tpu.memory_space<vmem>>, vector<1x24x1xf32>
    %1339 = vector.shape_cast %1338 : vector<1x24x1xf32> to vector<24x1xf32>
    %1340 = arith.subf %1308, %1256 : vector<24x32xf32>
    %1341 = vector.broadcast %1336 : vector<24x1xf32> to vector<24x32xf32>
    %1342 = arith.mulf %1341, %1340 : vector<24x32xf32>
    %1343 = arith.addf %1256, %1342 : vector<24x32xf32>
    %1344 = arith.subf %1306, %1260 : vector<24x32xf32>
    %1345 = vector.broadcast %1336 : vector<24x1xf32> to vector<24x32xf32>
    %1346 = arith.mulf %1345, %1344 : vector<24x32xf32>
    %1347 = arith.addf %1260, %1346 : vector<24x32xf32>
    %1348 = arith.subf %1333, %1264 : vector<24x32xf32>
    %1349 = vector.broadcast %1339 : vector<24x1xf32> to vector<24x32xf32>
    %1350 = arith.mulf %1349, %1348 : vector<24x32xf32>
    %1351 = arith.addf %1264, %1350 : vector<24x32xf32>
    %1352 = arith.subf %1331, %1268 : vector<24x32xf32>
    %1353 = vector.broadcast %1339 : vector<24x1xf32> to vector<24x32xf32>
    %1354 = arith.mulf %1353, %1352 : vector<24x32xf32>
    %1355 = arith.addf %1268, %1354 : vector<24x32xf32>
    %c7_i32_301 = arith.constant 7 : i32
    %c7_i32_302 = arith.constant 7 : i32
    %1356 = arith.subi %c7_i32_302, %c7_i32_301 : i32
    %c24_i32_303 = arith.constant 24 : i32
    %1357 = arith.muli %c7_i32_301, %c24_i32_303 : i32
    %1358 = tpu.assume_multiple %1357, 8 : i32
    %c24_i32_304 = arith.constant 24 : i32
    %1359 = arith.muli %1356, %c24_i32_304 : i32
    %1360 = tpu.assume_multiple %1359, 8 : i32
    %1361 = arith.index_cast %1358 : i32 to index
    %c0_305 = arith.constant 0 : index
    %1362 = vector.load %arg17[%1361, %c0_305] : memref<192x256xf32, #tpu.memory_space<vmem>>, vector<24x256xf32>
    %1363 = arith.index_cast %1360 : i32 to index
    %c0_306 = arith.constant 0 : index
    %1364 = vector.load %arg17[%1363, %c0_306] : memref<192x256xf32, #tpu.memory_space<vmem>>, vector<24x256xf32>
    %1365 = vector.extract_strided_slice %1362 {offsets = [0, 0], sizes = [24, 128], strides = [1, 1]} : vector<24x256xf32> to vector<24x128xf32>
    %cst_307 = arith.constant dense<0.000000e+00> : vector<24x128xf32>
    %1366 = tpu.matmul %1343, %2, %cst_307 {dimension_numbers = #tpu.dot_dimension_numbers<[1], [0], [0], [1], [0, 0, 1, 1], [], []>} : vector<24x32xf32>, vector<32x128xf32>, vector<24x128xf32> -> vector<24x128xf32>
    %1367 = arith.addf %1365, %1366 : vector<24x128xf32>
    %1368 = vector.extract_strided_slice %1364 {offsets = [0, 128], sizes = [24, 128], strides = [1, 1]} : vector<24x256xf32> to vector<24x128xf32>
    %cst_308 = arith.constant dense<0.000000e+00> : vector<24x128xf32>
    %1369 = tpu.matmul %1351, %3, %cst_308 {dimension_numbers = #tpu.dot_dimension_numbers<[1], [0], [0], [1], [0, 0, 1, 1], [], []>} : vector<24x32xf32>, vector<32x128xf32>, vector<24x128xf32> -> vector<24x128xf32>
    %1370 = arith.addf %1368, %1369 : vector<24x128xf32>
    %1371 = vector.extract_strided_slice %1367 {offsets = [0, 0], sizes = [24, 32], strides = [1, 1]} : vector<24x128xf32> to vector<24x32xf32>
    %1372 = arith.negf %1371 : vector<24x32xf32>
    %1373 = math.exp %1372 : vector<24x32xf32>
    %cst_309 = arith.constant 1.000000e+00 : f32
    %1374 = vector.broadcast %cst_309 : f32 to vector<24x32xf32>
    %1375 = arith.addf %1374, %1373 : vector<24x32xf32>
    %1376 = arith.divf %1374, %1375 : vector<24x32xf32>
    %1377 = vector.extract_strided_slice %1367 {offsets = [0, 32], sizes = [24, 32], strides = [1, 1]} : vector<24x128xf32> to vector<24x32xf32>
    %1378 = arith.negf %1377 : vector<24x32xf32>
    %1379 = math.exp %1378 : vector<24x32xf32>
    %cst_310 = arith.constant 1.000000e+00 : f32
    %1380 = vector.broadcast %cst_310 : f32 to vector<24x32xf32>
    %1381 = arith.addf %1380, %1379 : vector<24x32xf32>
    %1382 = arith.divf %1380, %1381 : vector<24x32xf32>
    %1383 = vector.extract_strided_slice %1367 {offsets = [0, 64], sizes = [24, 32], strides = [1, 1]} : vector<24x128xf32> to vector<24x32xf32>
    %1384 = math.tanh %1383 : vector<24x32xf32>
    %1385 = vector.extract_strided_slice %1367 {offsets = [0, 96], sizes = [24, 32], strides = [1, 1]} : vector<24x128xf32> to vector<24x32xf32>
    %1386 = arith.negf %1385 : vector<24x32xf32>
    %1387 = math.exp %1386 : vector<24x32xf32>
    %cst_311 = arith.constant 1.000000e+00 : f32
    %1388 = vector.broadcast %cst_311 : f32 to vector<24x32xf32>
    %1389 = arith.addf %1388, %1387 : vector<24x32xf32>
    %1390 = arith.divf %1388, %1389 : vector<24x32xf32>
    %1391 = arith.mulf %1382, %1347 : vector<24x32xf32>
    %1392 = arith.mulf %1376, %1384 : vector<24x32xf32>
    %1393 = arith.addf %1391, %1392 : vector<24x32xf32>
    %1394 = math.tanh %1393 : vector<24x32xf32>
    %1395 = arith.mulf %1390, %1394 : vector<24x32xf32>
    %1396 = vector.extract_strided_slice %1370 {offsets = [0, 0], sizes = [24, 32], strides = [1, 1]} : vector<24x128xf32> to vector<24x32xf32>
    %1397 = arith.negf %1396 : vector<24x32xf32>
    %1398 = math.exp %1397 : vector<24x32xf32>
    %cst_312 = arith.constant 1.000000e+00 : f32
    %1399 = vector.broadcast %cst_312 : f32 to vector<24x32xf32>
    %1400 = arith.addf %1399, %1398 : vector<24x32xf32>
    %1401 = arith.divf %1399, %1400 : vector<24x32xf32>
    %1402 = vector.extract_strided_slice %1370 {offsets = [0, 32], sizes = [24, 32], strides = [1, 1]} : vector<24x128xf32> to vector<24x32xf32>
    %1403 = arith.negf %1402 : vector<24x32xf32>
    %1404 = math.exp %1403 : vector<24x32xf32>
    %cst_313 = arith.constant 1.000000e+00 : f32
    %1405 = vector.broadcast %cst_313 : f32 to vector<24x32xf32>
    %1406 = arith.addf %1405, %1404 : vector<24x32xf32>
    %1407 = arith.divf %1405, %1406 : vector<24x32xf32>
    %1408 = vector.extract_strided_slice %1370 {offsets = [0, 64], sizes = [24, 32], strides = [1, 1]} : vector<24x128xf32> to vector<24x32xf32>
    %1409 = math.tanh %1408 : vector<24x32xf32>
    %1410 = vector.extract_strided_slice %1370 {offsets = [0, 96], sizes = [24, 32], strides = [1, 1]} : vector<24x128xf32> to vector<24x32xf32>
    %1411 = arith.negf %1410 : vector<24x32xf32>
    %1412 = math.exp %1411 : vector<24x32xf32>
    %cst_314 = arith.constant 1.000000e+00 : f32
    %1413 = vector.broadcast %cst_314 : f32 to vector<24x32xf32>
    %1414 = arith.addf %1413, %1412 : vector<24x32xf32>
    %1415 = arith.divf %1413, %1414 : vector<24x32xf32>
    %1416 = arith.mulf %1407, %1355 : vector<24x32xf32>
    %1417 = arith.mulf %1401, %1409 : vector<24x32xf32>
    %1418 = arith.addf %1416, %1417 : vector<24x32xf32>
    %1419 = math.tanh %1418 : vector<24x32xf32>
    %1420 = arith.mulf %1415, %1419 : vector<24x32xf32>
    %1421 = arith.index_cast %c7_i32_301 : i32 to index
    %c0_315 = arith.constant 0 : index
    %c0_316 = arith.constant 0 : index
    %1422 = vector.load %arg2[%1421, %c0_315, %c0_316] : memref<8x24x1xf32, #tpu.memory_space<vmem>>, vector<1x24x1xf32>
    %1423 = vector.shape_cast %1422 : vector<1x24x1xf32> to vector<24x1xf32>
    %1424 = arith.index_cast %1356 : i32 to index
    %c0_317 = arith.constant 0 : index
    %c0_318 = arith.constant 0 : index
    %1425 = vector.load %arg2[%1424, %c0_317, %c0_318] : memref<8x24x1xf32, #tpu.memory_space<vmem>>, vector<1x24x1xf32>
    %1426 = vector.shape_cast %1425 : vector<1x24x1xf32> to vector<24x1xf32>
    %1427 = arith.subf %1395, %1343 : vector<24x32xf32>
    %1428 = vector.broadcast %1423 : vector<24x1xf32> to vector<24x32xf32>
    %1429 = arith.mulf %1428, %1427 : vector<24x32xf32>
    %1430 = arith.addf %1343, %1429 : vector<24x32xf32>
    %1431 = arith.subf %1393, %1347 : vector<24x32xf32>
    %1432 = vector.broadcast %1423 : vector<24x1xf32> to vector<24x32xf32>
    %1433 = arith.mulf %1432, %1431 : vector<24x32xf32>
    %1434 = arith.addf %1347, %1433 : vector<24x32xf32>
    %1435 = arith.subf %1420, %1351 : vector<24x32xf32>
    %1436 = vector.broadcast %1426 : vector<24x1xf32> to vector<24x32xf32>
    %1437 = arith.mulf %1436, %1435 : vector<24x32xf32>
    %1438 = arith.addf %1351, %1437 : vector<24x32xf32>
    %1439 = arith.subf %1418, %1355 : vector<24x32xf32>
    %1440 = vector.broadcast %1426 : vector<24x1xf32> to vector<24x32xf32>
    %1441 = arith.mulf %1440, %1439 : vector<24x32xf32>
    %1442 = arith.addf %1355, %1441 : vector<24x32xf32>
    %c8_i32_319 = arith.constant 8 : i32
    %c0_320 = arith.constant 0 : index
    %c0_321 = arith.constant 0 : index
    %1443 = vector.load %arg11[%c0_320, %c0_321] : memref<64x32xf32, #tpu.memory_space<vmem>>, vector<64x32xf32>
    %1444 = vector.extract_strided_slice %1443 {offsets = [0, 0], sizes = [32, 32], strides = [1, 1]} : vector<64x32xf32> to vector<32x32xf32>
    %cst_322 = arith.constant dense<0.000000e+00> : vector<24x32xf32>
    %1445 = tpu.matmul %1430, %1444, %cst_322 {dimension_numbers = #tpu.dot_dimension_numbers<[1], [0], [0], [1], [0, 0, 1, 1], [], []>} : vector<24x32xf32>, vector<32x32xf32>, vector<24x32xf32> -> vector<24x32xf32>
    %1446 = vector.extract_strided_slice %1443 {offsets = [32, 0], sizes = [32, 32], strides = [1, 1]} : vector<64x32xf32> to vector<32x32xf32>
    %cst_323 = arith.constant dense<0.000000e+00> : vector<24x32xf32>
    %1447 = tpu.matmul %1438, %1446, %cst_323 {dimension_numbers = #tpu.dot_dimension_numbers<[1], [0], [0], [1], [0, 0, 1, 1], [], []>} : vector<24x32xf32>, vector<32x32xf32>, vector<24x32xf32> -> vector<24x32xf32>
    %1448 = arith.addf %1445, %1447 : vector<24x32xf32>
    %c0_324 = arith.constant 0 : index
    %c0_325 = arith.constant 0 : index
    %1449 = vector.load %arg12[%c0_324, %c0_325] : memref<1x32xf32, #tpu.memory_space<vmem>>, vector<1x32xf32>
    %1450 = vector.broadcast %1449 : vector<1x32xf32> to vector<24x32xf32>
    %1451 = arith.addf %1448, %1450 : vector<24x32xf32>
    %c0_326 = arith.constant 0 : index
    %c0_327 = arith.constant 0 : index
    %1452 = vector.load %arg13[%c0_326, %c0_327] : memref<24x32xf32, #tpu.memory_space<vmem>>, vector<24x32xf32>
    %1453 = arith.addf %1451, %1452 : vector<24x32xf32>
    %cst_328 = arith.constant dense<0.000000e+00> : vector<24xf32>
    %1454 = vector.multi_reduction <add>, %1453, %cst_328 [1] : vector<24x32xf32> to vector<24xf32>
    %1455 = vector.shape_cast %1454 : vector<24xf32> to vector<24x1xf32>
    %cst_329 = arith.constant 3.200000e+01 : f32
    %1456 = vector.broadcast %cst_329 : f32 to vector<24x1xf32>
    %1457 = arith.divf %1455, %1456 : vector<24x1xf32>
    %1458 = vector.broadcast %1457 : vector<24x1xf32> to vector<24x32xf32>
    %1459 = arith.subf %1453, %1458 : vector<24x32xf32>
    %1460 = arith.mulf %1459, %1459 : vector<24x32xf32>
    %cst_330 = arith.constant dense<0.000000e+00> : vector<24xf32>
    %1461 = vector.multi_reduction <add>, %1460, %cst_330 [1] : vector<24x32xf32> to vector<24xf32>
    %1462 = vector.shape_cast %1461 : vector<24xf32> to vector<24x1xf32>
    %cst_331 = arith.constant 3.200000e+01 : f32
    %1463 = vector.broadcast %cst_331 : f32 to vector<24x1xf32>
    %1464 = arith.divf %1462, %1463 : vector<24x1xf32>
    %1465 = vector.broadcast %1457 : vector<24x1xf32> to vector<24x32xf32>
    %1466 = arith.subf %1453, %1465 : vector<24x32xf32>
    %cst_332 = arith.constant 9.99999974E-6 : f32
    %1467 = vector.broadcast %cst_332 : f32 to vector<24x1xf32>
    %1468 = arith.addf %1464, %1467 : vector<24x1xf32>
    %1469 = math.rsqrt %1468 : vector<24x1xf32>
    %1470 = vector.broadcast %1469 : vector<24x1xf32> to vector<24x32xf32>
    %1471 = arith.mulf %1466, %1470 : vector<24x32xf32>
    %c0_333 = arith.constant 0 : index
    %c0_334 = arith.constant 0 : index
    %1472 = vector.load %arg14[%c0_333, %c0_334] : memref<1x32xf32, #tpu.memory_space<vmem>>, vector<1x32xf32>
    %1473 = vector.broadcast %1472 : vector<1x32xf32> to vector<24x32xf32>
    %1474 = arith.mulf %1471, %1473 : vector<24x32xf32>
    %c0_335 = arith.constant 0 : index
    %c0_336 = arith.constant 0 : index
    %1475 = vector.load %arg15[%c0_335, %c0_336] : memref<1x32xf32, #tpu.memory_space<vmem>>, vector<1x32xf32>
    %1476 = vector.broadcast %1475 : vector<1x32xf32> to vector<24x32xf32>
    %1477 = arith.addf %1474, %1476 : vector<24x32xf32>
    %c0_337 = arith.constant 0 : index
    %c0_338 = arith.constant 0 : index
    %1478 = vector.load %arg16[%c0_337, %c0_338] : memref<24x32xf32, #tpu.memory_space<vmem>>, vector<24x32xf32>
    tpu.vector_store %arg16[%c0_337, %c0_338], %1477 {strides = array<i32>} : memref<24x32xf32, #tpu.memory_space<vmem>>, vector<24x32xf32>,
    return
  }
  func.func @transform_0(%arg0: i32) -> (i32, i32) {
    %c0_i32 = arith.constant 0 : i32
    %c0_i32_0 = arith.constant 0 : i32
    %c0_i32_1 = arith.constant 0 : i32
    return %c0_i32, %c0_i32_0 : i32, i32
  }
  func.func @transform_1(%arg0: i32) -> (i32, i32, i32) {
    %c0_i32 = arith.constant 0 : i32
    %c0_i32_0 = arith.constant 0 : i32
    %c0_i32_1 = arith.constant 0 : i32
    %c0_i32_2 = arith.constant 0 : i32
    return %c0_i32, %c0_i32_0, %c0_i32_1 : i32, i32, i32
  }
  func.func @transform_2(%arg0: i32) -> (i32, i32) {
    %c0_i32 = arith.constant 0 : i32
    %c0_i32_0 = arith.constant 0 : i32
    %c0_i32_1 = arith.constant 0 : i32
    return %c0_i32, %c0_i32_0 : i32, i32
  }
  func.func @transform_3(%arg0: i32) -> (i32, i32) {
    %c0_i32 = arith.constant 0 : i32
    %c0_i32_0 = arith.constant 0 : i32
    %c0_i32_1 = arith.constant 0 : i32
    return %c0_i32, %c0_i32_0 : i32, i32
  }
  func.func @transform_4(%arg0: i32) -> (i32, i32) {
    %c0_i32 = arith.constant 0 : i32
    %c0_i32_0 = arith.constant 0 : i32
    %c0_i32_1 = arith.constant 0 : i32
    return %c0_i32, %c0_i32_0 : i32, i32
  }
  func.func @transform_5(%arg0: i32) -> (i32, i32) {
    %c0_i32 = arith.constant 0 : i32
    %c0_i32_0 = arith.constant 0 : i32
    %c0_i32_1 = arith.constant 0 : i32
    return %c0_i32, %c0_i32_0 : i32, i32
  }
  func.func @transform_6(%arg0: i32) -> (i32, i32) {
    %c0_i32 = arith.constant 0 : i32
    %c0_i32_0 = arith.constant 0 : i32
    %c0_i32_1 = arith.constant 0 : i32
    return %c0_i32, %c0_i32_0 : i32, i32
  }
  func.func @transform_7(%arg0: i32) -> (i32, i32) {
    %c0_i32 = arith.constant 0 : i32
    %c0_i32_0 = arith.constant 0 : i32
    %c0_i32_1 = arith.constant 0 : i32
    return %c0_i32, %c0_i32_0 : i32, i32
  }
  func.func @transform_8(%arg0: i32) -> (i32, i32) {
    %c0_i32 = arith.constant 0 : i32
    %c0_i32_0 = arith.constant 0 : i32
    %c0_i32_1 = arith.constant 0 : i32
    return %c0_i32, %c0_i32_0 : i32, i32
  }
  func.func @transform_9(%arg0: i32) -> (i32, i32) {
    %c0_i32 = arith.constant 0 : i32
    %c0_i32_0 = arith.constant 0 : i32
    %c0_i32_1 = arith.constant 0 : i32
    return %c0_i32, %c0_i32_0 : i32, i32
  }
  func.func @transform_10(%arg0: i32) -> (i32, i32) {
    %c0_i32 = arith.constant 0 : i32
    %c0_i32_0 = arith.constant 0 : i32
    %c0_i32_1 = arith.constant 0 : i32
    return %c0_i32, %c0_i32_0 : i32, i32
  }
  func.func @transform_11(%arg0: i32) -> (i32, i32) {
    %c0_i32 = arith.constant 0 : i32
    %c0_i32_0 = arith.constant 0 : i32
    %c0_i32_1 = arith.constant 0 : i32
    return %c0_i32, %c0_i32_0 : i32, i32
  }
  func.func @transform_12(%arg0: i32) -> (i32, i32) {
    %c0_i32 = arith.constant 0 : i32
    %c0_i32_0 = arith.constant 0 : i32
    %c0_i32_1 = arith.constant 0 : i32
    return %c0_i32, %c0_i32_0 : i32, i32
  }
  func.func @transform_13(%arg0: i32) -> (i32, i32) {
    %c0_i32 = arith.constant 0 : i32
    %c0_i32_0 = arith.constant 0 : i32
    %c0_i32_1 = arith.constant 0 : i32
    return %c0_i32, %c0_i32_0 : i32, i32
  }
  func.func @transform_14(%arg0: i32) -> (i32, i32) {
    %c0_i32 = arith.constant 0 : i32
    %c0_i32_0 = arith.constant 0 : i32
    %c0_i32_1 = arith.constant 0 : i32
    return %c0_i32, %c0_i32_0 : i32, i32
  }
  func.func @transform_15(%arg0: i32) -> (i32, i32) {
    %c0_i32 = arith.constant 0 : i32
    %c0_i32_0 = arith.constant 0 : i32
    %c0_i32_1 = arith.constant 0 : i32
    return %c0_i32, %c0_i32_0 : i32, i32
  }
}

</mosaic_0001>

<bundles_post_ra>
// kernel: tpu_custom_call.1
= control target key start
LH: loop header
LB: loop body
LE: loop exit
PB: predicated region body
PF: predicated region fallthrough
CT: control target
= control target key end

     0   :  { %v13855_v5 = vmov 0.0|0.0   ;;  %v13857_v8 = vmov 0.0   ;;  %vm9903_vm0 = vmmov 0   ;;  %vm111_vm1 = vcmask 261120   ;;  %s13838_s0 = inlined_call_operand.vmem [shape: f32[192,32], index: 0, kind: input, shape index: {}]   ;;  %s13839_s1 = inlined_call_operand.vmem [shape: f32[8,24,1], index: 1, kind: input, shape index: {}]   ;;  %s13840_s2 = inlined_call_operand.vmem [shape: f32[32,256], index: 2, kind: input, shape index: {}]   ;;  %s13841_s3 = inlined_call_operand.vmem [shape: f32[1,256], index: 3, kind: input, shape index: {}]   ;;  %s13842_s4 = inlined_call_operand.vmem [shape: f32[32,128], index: 4, kind: input, shape index: {}]   ;;  %s13843_s5 = inlined_call_operand.vmem [shape: f32[32,128], index: 5, kind: input, shape index: {}]   ;;  %s13844_s6 = inlined_call_operand.vmem [shape: f32[64,256], index: 6, kind: input, shape index: {}]   ;;  %s13845_s7 = inlined_call_operand.vmem [shape: f32[1,256], index: 7, kind: input, shape index: {}]   ;;  %s13846_s8 = inlined_call_operand.vmem [shape: f32[32,128], index: 8, kind: input, shape index: {}]   ;;  %s13847_s9 = inlined_call_operand.vmem [shape: f32[32,128], index: 9, kind: input, shape index: {}]   ;;  %s13848_s10 = inlined_call_operand.vmem [shape: f32[64,32], index: 10, kind: input, shape index: {}]   ;;  %s13849_s11 = inlined_call_operand.vmem [shape: f32[1,32], index: 11, kind: input, shape index: {}]   ;;  %s13850_s12 = inlined_call_operand.vmem [shape: f32[24,32], index: 12, kind: input, shape index: {}]   ;;  %s13851_s13 = inlined_call_operand.vmem [shape: f32[1,32], index: 13, kind: input, shape index: {}]   ;;  %s13852_s14 = inlined_call_operand.vmem [shape: f32[1,32], index: 14, kind: input, shape index: {}]   ;;  %s13853_s15 = inlined_call_operand.hbm [shape: f32[24,32], index: 15, kind: output, shape index: {}]  }
   0x1   :  { %v92_v0 = vld [vmem:[%s13840_s2 + $0x8] sm:$0xff]  ;;  %v94_v1 = vld [vmem:[%s13840_s2 + $0x18] sm:$0xff]  ;;  %v91_v2 = vld [vmem:[%s13840_s2] sm:$0xff]  ;;  %8869 = vmatprep.subr.bf16.mxu1 %v13855_v5  ;;  %248 = vmatprep.mubr.f32.mxu0 %v13857_v8 }
   0x2   :  { %v8861_v3 = vpack.c.bf16 %v94_v1, %v92_v0  ;;  %v93_v4 = vld [vmem:[%s13840_s2 + $0x10] sm:$0xff]  ;;  %v51_v6 = vld [vmem:[%s13842_s4] sm:$0xff]  ;;  %v52_v7 = vld [vmem:[%s13842_s4 + $0x8] sm:$0xff]  ;;  %8291 = vmatprep.mubr.msk.f32.mxu1 %vm9903_vm0, %v13857_v8 }
   0x3   :  { %v8863_v9 = vpack.c.bf16 %v93_v4, %v91_v2  ;;  %v10010_v10 = vpack.c.bf16 %v52_v7, %v51_v6  ;;  %v96_v11 = vld [vmem:[%s13840_s2 + $0x28] sm:$0xff]  ;;  %v98_v12 = vld [vmem:[%s13840_s2 + $0x38] sm:$0xff]  ;;  %v95_v13 = vld [vmem:[%s13840_s2 + $0x20] sm:$0xff] }
   0x4   :  { %8862 = vmatprep.subr.bf16.mxu0 %v8861_v3  ;;  %v8865_v14 = vpack.c.bf16 %v98_v12, %v96_v11  ;;  %v97_v15 = vld [vmem:[%s13840_s2 + $0x30] sm:$0xff]  ;;  %v54_v17 = vld [vmem:[%s13842_s4 + $0x18] sm:$0xff]  ;;  %v67_v20 = vld [vmem:[%s13838_s0] sm:$0xff] }
   0x5   :  { %v53_v16 = vld [vmem:[%s13842_s4 + $0x10] sm:$0xff]  ;;  %8864 = vmatpush1.bf16.msra.mxu0 %v8863_v9  ;;  %8871 = vmatpush3.bf16.msra.mxu1 %v10010_v10  ;;  %v8867_v18 = vpack.c.bf16 %v97_v15, %v95_v13  ;;  %v55_v21 = vld [vmem:[%s13843_s5] sm:$0xff]  ;;  %v56_v22 = vld [vmem:[%s13843_s5 + $0x8] sm:$0xff] }
   0x6   :  { %v10033_v19 = vpack.c.bf16 %v54_v17, %v53_v16  ;;  %8866 = vmatprep.subr.bf16.mxu0 %v8865_v14  ;;  %8872 = vmatprep.subr.bf16.mxu1 %v13855_v5  ;;  %v10050_v23 = vpack.c.bf16 %v56_v22, %v55_v21  ;;  %v57_v24 = vld [vmem:[%s13843_s5 + $0x10] sm:$0xff]  ;;  %v68_v25 = vld [vmem:[%s13838_s0 + $0x8] sm:$0xff]  ;;  %v58_v26 = vld [vmem:[%s13843_s5 + $0x18] sm:$0xff] }
   0x7   :  { %v10065_v27 = vpack.c.bf16 %v58_v26, %v57_v24 }
   0x9   :  { %8868 = vmatpush1.bf16.msra.mxu0 %v8867_v18  ;;  %8874 = vmatpush3.bf16.msra.mxu1 %v10033_v19 }
   0xa   :  { %8875 = vmatprep.subr.bf16.mxu1 %v13855_v5  ;;  %8917 = vmatprep.subr.bf16.mxu0 %v13855_v5 }
   0xc   :  { %7745 = vmatmul.mubr.msk.f32.vlgmr.msra.gmra.mrb[0].mxu0 %vm111_vm1, %v67_v20  ;;  %8292 = vmatmul.mubr.f32.vlgmr.msra.gmra.mrb[0].mxu1 %v13857_v8 }
   0xd   :  { %254 = vmatprep.mubr.f32.mxu0 %v13857_v8  ;;  %8294 = vmatprep.mubr.msk.f32.mxu1 %vm9903_vm0, %v13857_v8 }
   0xe   :  { %8877 = vmatpush3.bf16.msra.mxu1 %v10050_v23  ;;  %8919 = vmatpush3.bf16.msra.mxu0 %v10010_v10 }
   0xf   :  { %20 = vsyncpa [#allocation5], 0  ;;  %8878 = vmatprep.subr.bf16.mxu1 %v13855_v5  ;;  %8920 = vmatprep.subr.bf16.mxu0 %v13855_v5  ;;  %v69_v28 = vld [vmem:[%s13838_s0 + $0x10] sm:$0xff]  ;;  %v70_v29 = vld [vmem:[%s13838_s0 + $0x18] sm:$0xff]  ;;  %v101_v50 = vlaneseq  ;;  %vm855_vm2 = vcmask 523520   ;;  %vm3975_vm3 = vcmask 523264  }
  0x10   :  { %7746 = vmatmul.mubr.msk.f32.gmra.mrb[2].mxu0 %vm111_vm1, %v68_v25  ;;  %8295 = vmatmul.mubr.f32.gmra.mrb[2].mxu1 %v13857_v8  ;;  %v71_v30 = vld [vmem:[%s13838_s0 + $0x20] sm:$0xff]  ;;  %v72_v31 = vld [vmem:[%s13838_s0 + $0x28] sm:$0xff]  ;;  %v73_v32 = vld [vmem:[%s13838_s0 + $0x30] sm:$0xff] }
  0x11   :  { %260 = vmatprep.mubr.f32.mxu0 %v13857_v8  ;;  %8297 = vmatprep.mubr.msk.f32.mxu1 %vm9903_vm0, %v13857_v8  ;;  %v74_v33 = vld [vmem:[%s13838_s0 + $0x38] sm:$0xff]  ;;  %v75_v34 = vld [vmem:[%s13838_s0 + $0x40] sm:$0xff]  ;;  %v76_v35 = vld [vmem:[%s13838_s0 + $0x48] sm:$0xff]  ;;  %v10206_v51 = vshrl.u32 %v101_v50, 7 }
  0x12   :  { %8880 = vmatpush3.bf16.msra.mxu1 %v10065_v27  ;;  %8922 = vmatpush3.bf16.msra.mxu0 %v10033_v19  ;;  %v77_v36 = vld [vmem:[%s13838_s0 + $0x50] sm:$0xff]  ;;  %v78_v37 = vld [vmem:[%s13838_s0 + $0x58] sm:$0xff]  ;;  %v79_v38 = vld [vmem:[%s13838_s0 + $0x60] sm:$0xff] }
  0x13   :  { %8881 = vmatprep.subr.bf16.mxu1 %v13855_v5  ;;  %8929 = vmatprep.subr.bf16.mxu0 %v13855_v5  ;;  %v80_v39 = vld [vmem:[%s13838_s0 + $0x68] sm:$0xff]  ;;  %v81_v40 = vld [vmem:[%s13838_s0 + $0x70] sm:$0xff]  ;;  %v82_v41 = vld [vmem:[%s13838_s0 + $0x78] sm:$0xff]  ;;  %13881 = vst [vmem:[#allocation7_spill] sm:$0xff] %v10206_v51  ;;  %v13854_v52 = vsub.s32 0, %v10206_v51 }
  0x14   :  { %7747 = vmatmul.mubr.msk.f32.gmra.mrb[4].mxu0 %vm111_vm1, %v69_v28  ;;  %8298 = vmatmul.mubr.f32.gmra.mrb[4].mxu1 %v13857_v8  ;;  %v83_v42 = vld [vmem:[%s13838_s0 + $0x80] sm:$0xff]  ;;  %v84_v43 = vld [vmem:[%s13838_s0 + $0x88] sm:$0xff]  ;;  %v85_v44 = vld [vmem:[%s13838_s0 + $0x90] sm:$0xff] }
  0x15   :  { %266 = vmatprep.mubr.f32.mxu0 %v13857_v8  ;;  %8308 = vmatprep.mubr.msk.f32.mxu1 %vm9903_vm0, %v13857_v8  ;;  %v86_v45 = vld [vmem:[%s13838_s0 + $0x98] sm:$0xff]  ;;  %v87_v46 = vld [vmem:[%s13838_s0 + $0xa0] sm:$0xff]  ;;  %v88_v47 = vld [vmem:[%s13838_s0 + $0xa8] sm:$0xff] }
  0x16   :  { %v89_v48 = vld [vmem:[%s13838_s0 + $0xb0] sm:$0xff]  ;;  %v90_v49 = vld [vmem:[%s13838_s0 + $0xb8] sm:$0xff]  ;;  %v10212_v53 = vld [vmem:[%s13841_s3] sm:$0x3]  ;;  %s9904_s0 = smov 64   ;;  %s9906_s3 = smov 32  }
  0x17   :  { %v10217_v54 = vrot.slane %v10212_v53, %v13854_v52 }
  0x18   :  { %7748 = vmatmul.mubr.msk.f32.gmra.mrb[6].mxu0 %vm111_vm1, %v70_v29  ;;  %8309 = vmatmul.mubr.f32.vlgmr.msra.gmra.mrb[6].mxu1 %v13857_v8 }
  0x19   :  { %272 = vmatprep.mubr.f32.mxu0 %v13857_v8  ;;  %8311 = vmatprep.mubr.msk.f32.mxu1 %vm9903_vm0, %v13857_v8 }
  0x1a   :  { %8883 = vmatpush3.bf16.msra.mxu1 %v10010_v10 }
  0x1b   :  { %8884 = vmatprep.subr.bf16.mxu1 %v13855_v5 }
  0x1c   :  { %7749 = vmatmul.mubr.msk.f32.gmra.mrb[8].mxu0 %vm111_vm1, %v71_v30  ;;  %8312 = vmatmul.mubr.f32.gmra.mrb[8].mxu1 %v13857_v8 }
  0x1d   :  { %278 = vmatprep.mubr.f32.mxu0 %v13857_v8  ;;  %8314 = vmatprep.mubr.msk.f32.mxu1 %vm9903_vm0, %v13857_v8 }
  0x1e   :  { %8886 = vmatpush3.bf16.msra.mxu1 %v10033_v19 }
  0x1f   :  { %8887 = vmatprep.subr.bf16.mxu1 %v13855_v5 }
  0x20   :  { %7750 = vmatmul.mubr.msk.f32.gmra.mrb[10].mxu0 %vm111_vm1, %v72_v31  ;;  %8315 = vmatmul.mubr.f32.gmra.mrb[10].mxu1 %v13857_v8 }
  0x21   :  { %284 = vmatprep.mubr.f32.mxu0 %v13857_v8  ;;  %8325 = vmatprep.mubr.msk.f32.mxu1 %vm9903_vm0, %v13857_v8 }
  0x24   :  { %7751 = vmatmul.mubr.msk.f32.gmra.mrb[12].mxu0 %vm111_vm1, %v73_v32 }
  0x25   :  { %290 = vmatprep.mubr.f32.mxu0 %v13857_v8 }
  0x28   :  { %7752 = vmatmul.mubr.msk.f32.gmra.mrb[14].mxu0 %vm111_vm1, %v74_v33 }
  0x29   :  { %296 = vmatprep.mubr.f32.mxu0 %v13857_v8 }
  0x2c   :  { %7753 = vmatmul.mubr.msk.f32.gmra.mrb[16].mxu0 %vm111_vm1, %v75_v34 }
  0x2d   :  { %302 = vmatprep.mubr.f32.mxu0 %v13857_v8 }
  0x30   :  { %7754 = vmatmul.mubr.msk.f32.gmra.mrb[18].mxu0 %vm111_vm1, %v76_v35 }
  0x31   :  { %308 = vmatprep.mubr.f32.mxu0 %v13857_v8 }
  0x34   :  { %7755 = vmatmul.mubr.msk.f32.gmra.mrb[20].mxu0 %vm111_vm1, %v77_v36 }
  0x35   :  { %314 = vmatprep.mubr.f32.mxu0 %v13857_v8 }
  0x38   :  { %7756 = vmatmul.mubr.msk.f32.gmra.mrb[22].mxu0 %vm111_vm1, %v78_v37 }
  0x39   :  { %320 = vmatprep.mubr.f32.mxu0 %v13857_v8 }
  0x3c   :  { %7757 = vmatmul.mubr.msk.f32.gmra.mrb[24].mxu0 %vm111_vm1, %v79_v38 }
  0x3d   :  { %326 = vmatprep.mubr.f32.mxu0 %v13857_v8 }
  0x40   :  { %7758 = vmatmul.mubr.msk.f32.gmra.mrb[26].mxu0 %vm111_vm1, %v80_v39 }
  0x41   :  { %332 = vmatprep.mubr.f32.mxu0 %v13857_v8 }
  0x44   :  { %7759 = vmatmul.mubr.msk.f32.gmra.mrb[28].mxu0 %vm111_vm1, %v81_v40 }
  0x45   :  { %338 = vmatprep.mubr.f32.mxu0 %v13857_v8 }
  0x48   :  { %7760 = vmatmul.mubr.msk.f32.gmra.mrb[30].mxu0 %vm111_vm1, %v82_v41 }
  0x49   :  { %344 = vmatprep.mubr.f32.mxu0 %v13857_v8 }
  0x4c   :  { %7761 = vmatmul.mubr.msk.f32.gmra.mrb[32].mxu0 %vm111_vm1, %v83_v42 }
  0x4d   :  { %350 = vmatprep.mubr.f32.mxu0 %v13857_v8 }
  0x50   :  { %7762 = vmatmul.mubr.msk.f32.gmra.mrb[34].mxu0 %vm111_vm1, %v84_v43 }
  0x51   :  { %356 = vmatprep.mubr.f32.mxu0 %v13857_v8 }
  0x54   :  { %7763 = vmatmul.mubr.msk.f32.gmra.mrb[36].mxu0 %vm111_vm1, %v85_v44 }
  0x55   :  { %362 = vmatprep.mubr.f32.mxu0 %v13857_v8 }
  0x58   :  { %7764 = vmatmul.mubr.msk.f32.gmra.mrb[38].mxu0 %vm111_vm1, %v86_v45 }
  0x59   :  { %368 = vmatprep.mubr.f32.mxu0 %v13857_v8 }
  0x5c   :  { %7765 = vmatmul.mubr.msk.f32.gmra.mrb[40].mxu0 %vm111_vm1, %v87_v46 }
  0x5d   :  { %374 = vmatprep.mubr.f32.mxu0 %v13857_v8 }
  0x60   :  { %7766 = vmatmul.mubr.msk.f32.gmra.mrb[42].mxu0 %vm111_vm1, %v88_v47 }
  0x61   :  { %380 = vmatprep.mubr.f32.mxu0 %v13857_v8 }
  0x64   :  { %7767 = vmatmul.mubr.msk.f32.gmra.mrb[44].mxu0 %vm111_vm1, %v89_v48 }
  0x65   :  { %386 = vmatprep.mubr.f32.mxu0 %v13857_v8 }
  0x68   :  { %7768 = vmatmul.mubr.msk.f32.gmra.mrb[46].mxu0 %vm111_vm1, %v90_v49 }
  0x69   :  { %8427 = vmatprep.mubr.msk.f32.mxu0 %vm9903_vm0, %v13857_v8 }
  0xdf   :  { %v250_v55 = vpop.f32.mrb[0].mxu0  ;;  %v522_v56 = vpop.f32.mrb[0].mxu1 }
  0xe0   :  { %v251_v57 = vadd.f32 %v250_v55, %v10217_v54  ;;  %v10220_v58 = vpop.f32.mrb[1].mxu0  ;;  %v8293_v59 = vpop.f32.mrb[1].mxu1 }
  0xe1   :  { %13882 = vst [vmem:[#allocation8_spill] sm:$0xff] %v10220_v58 }
  0xe2   :  { %v10222_v60 = vadd.f32 %v522_v56, %v251_v57 }
  0xe3   :  { %v256_v61 = vpop.f32.mrb[2].mxu0  ;;  %v527_v62 = vpop.f32.mrb[2].mxu1 }
  0xe4   :  { %9100 = vtanh.f32 %v10222_v60  ;;  %v257_v63 = vadd.f32 %v256_v61, %v10217_v54  ;;  %v10226_v0 = vpop.f32.mrb[3].mxu0  ;;  %v8296_v1 = vpop.f32.mrb[3].mxu1 }
  0xe5   :  { %13883 = vst [vmem:[#allocation9_spill] sm:$0xff] %v10226_v0  ;;  %v13859_v1 = vsub.s32 1, %v10206_v51  ;;  %v9905_v51 = vmov 0  }
  0xe6   :  { %v10228_v2 = vadd.f32 %v527_v62, %v257_v63  ;;  %9098 = vset.pattern.permute.xlu0 %v9905_v51  ;;  %9099 = vset.pattern.permute.xlu1 %v9905_v51 }
  0xe7   :  { %v262_v3 = vpop.f32.mrb[4].mxu0  ;;  %v532_v4 = vpop.f32.mrb[4].mxu1 }
  0xe8   :  { %9102 = vtanh.f32 %v10228_v2  ;;  %v263_v6 = vadd.f32 %v262_v3, %v10217_v54  ;;  %v10232_v7 = vpop.f32.mrb[5].mxu0  ;;  %v8299_v9 = vpop.f32.mrb[5].mxu1 }
  0xe9   :  { %13884 = vst [vmem:[#allocation10_spill] sm:$0xff] %v10232_v7 }
  0xea   :  { %v10234_v11 = vadd.f32 %v532_v4, %v263_v6  ;;  %v10316_v6 = vrot.slane %v10212_v53, %v13859_v1 }
  0xeb   :  { %v10236_v12 = vpop.f32.mrb[6].mxu0  ;;  %v605_v13 = vpop.f32.mrb[6].mxu1 }
  0xec   :  { %9104 = vtanh.f32 %v10234_v11  ;;  %v10239_v14 = vpop.f32.mrb[7].mxu0  ;;  %v8310_v15 = vpop.f32.mrb[7].mxu1 }
  0xed   :  { %13885 = vst [vmem:[#allocation11_spill] sm:$0xff] %v10239_v14 }
  0xee   :  { %v9101_v16 = vpop.eup %9100 }
  0xef   :  { %v10241_v17 = vpop.f32.mrb[8].mxu0  ;;  %649 = vrot.lane.b32.xlu0 %v9101_v16, %s9904_s0  ;;  %v610_v18 = vpop.f32.mrb[8].mxu1 }
  0xf0   :  { %v10244_v20 = vpop.f32.mrb[9].mxu0  ;;  %v8313_v21 = vpop.f32.mrb[9].mxu1 }
  0xf1   :  { %13886 = vst [vmem:[#allocation12_spill] sm:$0xff] %v10244_v20 }
  0xf2   :  { %v9103_v22 = vpop.eup %9102 }
  0xf3   :  { %v10246_v24 = vpop.f32.mrb[10].mxu0  ;;  %651 = vrot.lane.b32.xlu0 %v9103_v22, %s9904_s0  ;;  %v615_v25 = vpop.f32.mrb[10].mxu1 }
  0xf4   :  { %v10249_v26 = vpop.f32.mrb[11].mxu0  ;;  %v8316_v28 = vpop.f32.mrb[11].mxu1 }
  0xf5   :  { %13887 = vst [vmem:[#allocation13_spill] sm:$0xff] %v10249_v26 }
  0xf6   :  { %v9105_v29 = vpop.eup %9104 }
  0xf7   :  { %v10251_v30 = vpop.f32.mrb[12].mxu0  ;;  %653 = vrot.lane.b32.xlu1 %v9105_v29, %s9904_s0 }
  0xf8   :  { %v10254_v31 = vpop.f32.mrb[13].mxu0 }
  0xfb   :  { %v10256_v32 = vpop.f32.mrb[14].mxu0 }
  0xfc   :  { %v10258_v33 = vpop.f32.mrb[15].mxu0 }
  0xfd   :  { %13888 = vst [vmem:[#allocation14_spill] sm:$0xff] %v10258_v33 }
  0xff   :  { %v10260_v34 = vpop.f32.mrb[16].mxu0 }
 0x100   :  { %v10262_v35 = vpop.f32.mrb[17].mxu0 }
 0x101   :  { %13889 = vst [vmem:[#allocation15_spill] sm:$0xff] %v10262_v35 }
 0x103   :  { %v10264_v36 = vpop.f32.mrb[18].mxu0 }
 0x104   :  { %v10266_v37 = vpop.f32.mrb[19].mxu0 }
 0x107   :  { %v10268_v38 = vpop.f32.mrb[20].mxu0 }
 0x108   :  { %v10270_v39 = vpop.f32.mrb[21].mxu0 }
 0x10b   :  { %v10272_v40 = vpop.f32.mrb[22].mxu0 }
 0x10c   :  { %v10274_v41 = vpop.f32.mrb[23].mxu0 }
 0x10f   :  { %v10276_v42 = vpop.f32.mrb[24].mxu0 }
 0x110   :  { %v10278_v43 = vpop.f32.mrb[25].mxu0 }
 0x113   :  { %v10280_v44 = vpop.f32.mrb[26].mxu0 }
 0x114   :  { %v10282_v45 = vpop.f32.mrb[27].mxu0 }
 0x117   :  { %v10284_v46 = vpop.f32.mrb[28].mxu0 }
 0x118   :  { %v10286_v47 = vpop.f32.mrb[29].mxu0 }
 0x11b   :  { %v10288_v48 = vpop.f32.mrb[30].mxu0 }
 0x11c   :  { %13890 = vst [vmem:[#allocation16_spill] sm:$0xff] %v10288_v48  ;;  %v10290_v49 = vpop.f32.mrb[31].mxu0 }
 0x11f   :  { %v10292_v50 = vpop.f32.mrb[32].mxu0 }
 0x120   :  { %13891 = vst [vmem:[#allocation17_spill] sm:$0xff] %v10292_v50  ;;  %v10294_v55 = vpop.f32.mrb[33].mxu0  ;;  %v281_v50 = vadd.f32 %v10246_v24, %v10217_v54 }
 0x123   :  { %v10296_v56 = vpop.f32.mrb[34].mxu0 }
 0x124   :  { %13892 = vst [vmem:[#allocation18_spill] sm:$0xff] %v10296_v56  ;;  %v10298_v57 = vpop.f32.mrb[35].mxu0 }
 0x127   :  { %v10300_v59 = vpop.f32.mrb[36].mxu0 }
 0x128   :  { %13893 = vst [vmem:[#allocation19_spill] sm:$0xff] %v10300_v59  ;;  %v10302_v61 = vpop.f32.mrb[37].mxu0 }
 0x12b   :  { %v10304_v62 = vpop.f32.mrb[38].mxu0 }
 0x12c   :  { %13894 = vst [vmem:[#allocation20_spill] sm:$0xff] %v10304_v62  ;;  %v10306_v63 = vpop.f32.mrb[39].mxu0 }
 0x12f   :  { %v10309_v3 = vpop.f32.mrb[40].mxu0 }
 0x130   :  { %13895 = vst [vmem:[#allocation21_spill] sm:$0xff] %v10309_v3  ;;  %v10311_v4 = vpop.f32.mrb[41].mxu0 }
 0x133   :  { %v10318_v9 = vpop.f32.mrb[42].mxu0 }
 0x134   :  { %13896 = vst [vmem:[#allocation22_spill] sm:$0xff] %v10318_v9  ;;  %v378_v15 = vpop.f32.mrb[43].mxu0 }
 0x135   :  { %v379_v16 = vadd.f32 %v378_v15, %v10316_v6 }
 0x137   :  { %v619_v21 = vadd.f32 %v605_v13, %v379_v16  ;;  %v10321_v22 = vpop.f32.mrb[44].mxu0  ;;  %v7769_v13 = vmul.f32 -1.442695, %v10222_v60  ;;  %v7770_v16 = vmul.f32 -1.442695, %v10228_v2 }
 0x138   :  { %13897 = vst [vmem:[#allocation23_spill] sm:$0xff] %v10321_v22  ;;  %v384_v28 = vpop.f32.mrb[45].mxu0 }
 0x139   :  { %9106 = vtanh.f32 %v619_v21  ;;  %v385_v29 = vadd.f32 %v384_v28, %v10316_v6  ;;  %v7771_v28 = vmul.f32 -1.442695, %v10234_v11 }
 0x13b   :  { %v620_v52 = vadd.f32 %v610_v18, %v385_v29  ;;  %v10324_v5 = vpop.f32.mrb[46].mxu0 }
 0x13c   :  { %13898 = vst [vmem:[#allocation24_spill] sm:$0xff] %v10324_v5  ;;  %v390_v8 = vpop.f32.mrb[47].mxu0 }
 0x13d   :  { %9108 = vtanh.f32 %v620_v52  ;;  %v391_v53 = vadd.f32 %v390_v8, %v10316_v6 }
 0x13f   :  { %v621_v1 = vadd.f32 %v615_v25, %v391_v53 }
 0x141   :  { %9110 = vtanh.f32 %v621_v1 }
 0x142   :  { %9112 = vpow2.f32 %v7769_v13 }
 0x143   :  { %v9107_v15 = vpop.eup %9106  ;;  %9114 = vpow2.f32 %v7770_v16 }
 0x144   :  { %721 = vrot.lane.b32.xlu1 %v9107_v15, %s9904_s0  ;;  %9116 = vpow2.f32 %v7771_v28 }
 0x147   :  { %v9109_v18 = vpop.eup %9108 }
 0x148   :  { %723 = vrot.lane.b32.xlu0 %v9109_v18, %s9904_s0 }
 0x14b   :  { %v9111_v8 = vpop.eup %9110 }
 0x14c   :  { %725 = vrot.lane.b32.xlu1 %v9111_v8, %s9904_s0  ;;  %v9113_v51 = vpop.eup %9112 }
 0x14d   :  { %v631_v25 = vadd.f32 1.0, %v9113_v51  ;;  %v9115_v29 = vpop.eup %9114 }
 0x14e   :  { %v632_v60 = vadd.f32 1.0, %v9115_v29  ;;  %v9117_v53 = vpop.eup %9116  ;;  %v7772_v29 = vmul.f32 -1.442695, %v619_v21 }
 0x14f   :  { %9118 = vrcp.f32 %v631_v25  ;;  %v633_v13 = vadd.f32 1.0, %v9117_v53  ;;  %v7774_v53 = vmul.f32 -1.442695, %v621_v1 }
 0x150   :  { %9120 = vrcp.f32 %v632_v60  ;;  %v7773_v60 = vmul.f32 -1.442695, %v620_v52 }
 0x151   :  { %9122 = vrcp.f32 %v633_v13 }
 0x152   :  { %9124 = vpow2.f32 %v7772_v29 }
 0x153   :  { %9126 = vpow2.f32 %v7773_v60 }
 0x154   :  { %9128 = vpow2.f32 %v7774_v53 }
 0x159   :  { %v10333_v2 = vpop.eup %9118 }
 0x15a   :  { %v10337_v11 = vpop.eup %9120 }
 0x15b   :  { %v10341_v8 = vpop.eup %9122 }
 0x15c   :  { %v9125_v13 = vpop.eup %9124 }
 0x161   :  { %v650_v15 = vpop.permute.xlu0 %649 }
 0x162   :  { %v658_v16 = vmul.f32 %v10333_v2, %v650_v15  ;;  %v703_v15 = vadd.f32 1.0, %v9125_v13  ;;  %v768_v13 = vld [vmem:[%s13839_s1 + $0x10] sm:$0xff] }
 0x164   :  { %664 = vrot.lane.b32.xlu0 %v658_v16, %s9906_s3  ;;  %v9127_v16 = vpop.eup %9126  ;;  %9130 = vrcp.f32 %v703_v15  ;;  %v767_v15 = vld [vmem:[%s13839_s1 + $0x8] sm:$0xff] }
 0x165   :  { %v652_v18 = vpop.permute.xlu0 %651  ;;  %v9129_v5 = vpop.eup %9128 }
 0x166   :  { %v659_v28 = vmul.f32 %v10337_v11, %v652_v18  ;;  %v704_v18 = vadd.f32 1.0, %v9127_v16  ;;  %v7775_v16 = vld [vmem:[%s13839_s1 + $0xa8] sm:$0xff] }
 0x168   :  { %666 = vrot.lane.b32.xlu1 %v659_v28, %s9906_s3  ;;  %9132 = vrcp.f32 %v704_v18  ;;  %v705_v28 = vadd.f32 1.0, %v9129_v5  ;;  %v766_v5 = vld [vmem:[%s13839_s1] sm:$0xff]  ;;  %v7776_v18 = vld [vmem:[%s13839_s1 + $0xb0] sm:$0xff] }
 0x169   :  { %v654_v51 = vpop.permute.xlu1 %653 }
 0x16a   :  { %v660_v25 = vmul.f32 %v10341_v8, %v654_v51  ;;  %9134 = vrcp.f32 %v705_v28  ;;  %v7777_v28 = vld [vmem:[%s13839_s1 + $0xb8] sm:$0xff] }
 0x16c   :  { %668 = vrot.lane.b32.xlu0 %v660_v25, %s9906_s3 }
 0x16e   :  { %v10345_v22 = vpop.eup %9130 }
 0x172   :  { %v10349_v52 = vpop.eup %9132 }
 0x174   :  { %v10353_v29 = vpop.eup %9134 }
 0x1b6   :  { %v722_v51 = vpop.permute.xlu1 %721 }
 0x1b7   :  { %v730_v25 = vmul.f32 %v10345_v22, %v722_v51  ;;  %v643_v51 = vmul.f32 0.0, %v10333_v2 }
 0x1b9   :  { %736 = vrot.lane.b32.xlu1 %v730_v25, %s9906_s3 }
 0x1ba   :  { %v724_v1 = vpop.permute.xlu0 %723 }
 0x1bb   :  { %v731_v21 = vmul.f32 %v10349_v52, %v724_v1 }
 0x1bd   :  { %738 = vrot.lane.b32.xlu0 %v731_v21, %s9906_s3  ;;  %v644_v21 = vmul.f32 0.0, %v10337_v11 }
 0x1be   :  { %v726_v60 = vpop.permute.xlu1 %725 }
 0x1bf   :  { %v732_v53 = vmul.f32 %v10353_v29, %v726_v60 }
 0x1c1   :  { %775 = vperm.xlu0 %9098, %v766_v5   ;;  %740 = vrot.lane.b32.xlu1 %v732_v53, %s9906_s3  ;;  %v645_v53 = vmul.f32 0.0, %v10341_v8 }
 0x1c5   :  { %785 = vperm.xlu0 %9098, %v768_v13   ;;  %780 = vperm.xlu1 %9099, %v767_v15  }
 0x1c9   :  { %802 = vperm.xlu0 %9098, %v7775_v16  }
 0x1cd   :  { %807 = vperm.xlu0 %9098, %v7776_v18  }
 0x1d1   :  { %812 = vperm.xlu0 %9098, %v7777_v28  }
 0x1d6   :  { %v665_v25 = vpop.permute.xlu0 %664 }
 0x1d7   :  { %v10376_v1 = vadd.f32 %v665_v25, %v643_v51  ;;  %v715_v51 = vmul.f32 0.0, %v10345_v22 }
 0x1d9   :  { %9136 = vtanh.f32 %v10376_v1 }
 0x1da   :  { %v667_v60 = vpop.permute.xlu1 %666 }
 0x1db   :  { %v10380_v5 = vadd.f32 %v667_v60, %v644_v21  ;;  %v716_v60 = vmul.f32 0.0, %v10349_v52 }
 0x1dd   :  { %9138 = vtanh.f32 %v10380_v5 }
 0x1de   :  { %v669_v13 = vpop.permute.xlu0 %668 }
 0x1df   :  { %v10384_v15 = vadd.f32 %v669_v13, %v645_v53 }
 0x1e1   :  { %9140 = vtanh.f32 %v10384_v15 }
 0x1e3   :  { %v9137_v16 = vpop.eup %9136 }
 0x1e4   :  { %682 = vrot.lane.b32.xlu1 %v9137_v16, %s9904_s0  ;;  %v717_v16 = vmul.f32 0.0, %v10353_v29 }
 0x1e7   :  { %v9139_v18 = vpop.eup %9138 }
 0x1e8   :  { %684 = vrot.lane.b32.xlu1 %v9139_v18, %s9904_s0 }
 0x1eb   :  { %v9141_v28 = vpop.eup %9140 }
 0x1ec   :  { %686 = vrot.lane.b32.xlu1 %v9141_v28, %s9904_s0 }
 0x22b   :  { %v737_v25 = vpop.permute.xlu1 %736 }
 0x22c   :  { %v10391_v21 = vadd.f32 %v737_v25, %v715_v51 }
 0x22e   :  { %9142 = vtanh.f32 %v10391_v21 }
 0x22f   :  { %v739_v53 = vpop.permute.xlu0 %738 }
 0x230   :  { %v10395_v13 = vadd.f32 %v739_v53, %v716_v60 }
 0x232   :  { %9144 = vtanh.f32 %v10395_v13 }
 0x233   :  { %v741_v18 = vpop.permute.xlu1 %740 }
 0x234   :  { %v10399_v9 = vadd.f32 %v741_v18, %v717_v16 }
 0x236   :  { %9146 = vtanh.f32 %v10399_v9 }
 0x238   :  { %v9143_v28 = vpop.eup %9142 }
 0x239   :  { %754 = vrot.lane.b32.xlu1 %v9143_v28, %s9904_s0 }
 0x23c   :  { %v9145_v51 = vpop.eup %9144 }
 0x23d   :  { %756 = vrot.lane.b32.xlu1 %v9145_v51, %s9904_s0 }
 0x240   :  { %v9147_v25 = vpop.eup %9146  ;;  %v10408_v0 = vpop.permute.xlu0 %775 }
 0x241   :  { %758 = vrot.lane.b32.xlu0 %v9147_v25, %s9904_s0 }
 0x244   :  { %v10405_v60 = vpop.permute.xlu1 %780 }
 0x256   :  { %v683_v53 = vpop.permute.xlu1 %682 }
 0x257   :  { %v691_v7 = vmul.f32 %v10333_v2, %v683_v53  ;;  %v10422_v2 = vpop.permute.xlu0 %785 }
 0x259   :  { %v10411_v16 = vmul.f32 %v10408_v0, %v691_v7 }
 0x25a   :  { %v685_v18 = vpop.permute.xlu1 %684 }
 0x25b   :  { %v692_v58 = vmul.f32 %v10337_v11, %v685_v18  ;;  %830 = vrot.lane.b32.xlu1 %v10411_v16, %s9906_s3  ;;  %v10429_v11 = vpop.permute.xlu0 %802 }
 0x25d   :  { %v10417_v28 = vmul.f32 %v10405_v60, %v692_v58 }
 0x25e   :  { %v687_v51 = vpop.permute.xlu1 %686 }
 0x25f   :  { %v693_v25 = vmul.f32 %v10341_v8, %v687_v51  ;;  %832 = vrot.lane.b32.xlu0 %v10417_v28, %s9906_s3  ;;  %v10431_v53 = vpop.permute.xlu0 %807 }
 0x261   :  { %v10425_v7 = vmul.f32 %v10422_v2, %v693_v25 }
 0x263   :  { %834 = vrot.lane.b32.xlu1 %v10425_v7, %s9906_s3  ;;  %v10437_v51 = vpop.permute.xlu0 %812 }
 0x2ab   :  { %v755_v58 = vpop.permute.xlu1 %754 }
 0x2ac   :  { %v763_v18 = vmul.f32 %v10345_v22, %v755_v58 }
 0x2ae   :  { %v10435_v8 = vmul.f32 %v10429_v11, %v763_v18 }
 0x2af   :  { %v757_v3 = vpop.permute.xlu1 %756 }
 0x2b0   :  { %13899 = vst [vmem:[#allocation25_spill] sm:$0xff] %v10435_v8  ;;  %v764_v62 = vmul.f32 %v10349_v52, %v757_v3  ;;  %960 = vrot.lane.b32.xlu0 %v10435_v8, %s9906_s3  ;;  %v13902_v3 = vmov 0.0  }
 0x2b2   :  { %v10443_v25 = vmul.f32 %v10431_v53, %v764_v62 }
 0x2b3   :  { %v759_v59 = vpop.permute.xlu0 %758 }
 0x2b4   :  { %13900 = vst [vmem:[#allocation26_spill] sm:$0xff] %v10443_v25  ;;  %v765_v26 = vmul.f32 %v10353_v29, %v759_v59  ;;  %962 = vrot.lane.b32.xlu1 %v10443_v25, %s9906_s3  ;;  %v13903_v59 = vmov 0.0|0.0  }
 0x2b6   :  { %v10449_v22 = vmul.f32 %v10437_v51, %v765_v26 }
 0x2b8   :  { %13901 = vst [vmem:[#allocation27_spill] sm:$0xff] %v10449_v22  ;;  %964 = vrot.lane.b32.xlu0 %v10449_v22, %s9906_s3 }
 0x2cd   :  { %v831_v58 = vpop.permute.xlu1 %830 }
 0x2ce   :  { %839 = vst.msk [vmem:[#allocation3] sm:$0xff] %vm111_vm1, %v831_v58  ;;  %8326 = vmatmul.mubr.msk.f32.vlgmr.msra.gmra.mrb[12].mxu1 %vm111_vm1, %v831_v58  ;;  %v269_v58 = vadd.f32 %v10236_v12, %v10217_v54 }
 0x2cf   :  { %8328 = vmatprep.mubr.msk.f32.mxu1 %vm9903_vm0, %v13902_v3  ;;  %8889 = vmatpush3.bf16.msra.mxu1 %v10050_v23 }
 0x2d0   :  { %8890 = vmatprep.subr.bf16.mxu1 %v13903_v59 }
 0x2d1   :  { %v833_v62 = vpop.permute.xlu0 %832 }
 0x2d2   :  { %840 = vst.msk [vmem:[#allocation3 + $0x8] sm:$0xff] %vm111_vm1, %v833_v62  ;;  %8329 = vmatmul.mubr.msk.f32.gmra.mrb[14].mxu1 %vm111_vm1, %v833_v62 }
 0x2d3   :  { %8331 = vmatprep.mubr.msk.f32.mxu1 %vm9903_vm0, %v13902_v3  ;;  %8892 = vmatpush3.bf16.msra.mxu1 %v10065_v27 }
 0x2d4   :  { %8893 = vmatprep.subr.bf16.mxu1 %v13903_v59 }
 0x2d5   :  { %v835_v26 = vpop.permute.xlu1 %834 }
 0x2d6   :  { %841 = vst.msk [vmem:[#allocation3 + $0x10] sm:$0xff] %vm111_vm1, %v835_v26  ;;  %8332 = vmatmul.mubr.msk.f32.gmra.mrb[16].mxu1 %vm111_vm1, %v835_v26 }
 0x2d7   :  { %8342 = vmatprep.mubr.msk.f32.mxu1 %vm9903_vm0, %v13902_v3 }
 0x322   :  { %v961_v52 = vpop.permute.xlu0 %960 }
 0x323   :  { %8343 = vmatmul.mubr.msk.f32.vlgmr.msra.gmra.mrb[18].mxu1 %vm111_vm1, %v961_v52 }
 0x324   :  { %8345 = vmatprep.mubr.msk.f32.mxu1 %vm9903_vm0, %v13902_v3  ;;  %8895 = vmatpush3.bf16.msra.mxu1 %v10010_v10 }
 0x325   :  { %8896 = vmatprep.subr.bf16.mxu1 %v13903_v59 }
 0x326   :  { %v963_v29 = vpop.permute.xlu1 %962 }
 0x327   :  { %8346 = vmatmul.mubr.msk.f32.gmra.mrb[20].mxu1 %vm111_vm1, %v963_v29  ;;  %v275_v29 = vadd.f32 %v10241_v17, %v10217_v54  ;;  %v361_v17 = vadd.f32 %v10302_v61, %v10316_v6 }
 0x328   :  { %8348 = vmatprep.mubr.msk.f32.mxu1 %vm9903_vm0, %v13902_v3  ;;  %8898 = vmatpush3.bf16.msra.mxu1 %v10033_v19 }
 0x329   :  { %8899 = vmatprep.subr.bf16.mxu1 %v13903_v59 }
 0x32a   :  { %v965_v18 = vpop.permute.xlu0 %964 }
 0x32b   :  { %8349 = vmatmul.mubr.msk.f32.gmra.mrb[22].mxu1 %vm111_vm1, %v965_v18 }
 0x32c   :  { %8359 = vmatprep.mubr.msk.f32.mxu1 %vm9903_vm0, %v13902_v3 }
 0x3a1   :  { %v943_v62 = vpop.f32.mrb[12].mxu1 }
 0x3a2   :  { %v957_v26 = vadd.f32 %v943_v62, %v269_v58  ;;  %v8327_v52 = vpop.f32.mrb[13].mxu1 }
 0x3a4   :  { %9148 = vtanh.f32 %v957_v26 }
 0x3a5   :  { %v948_v20 = vpop.f32.mrb[14].mxu1 }
 0x3a6   :  { %v958_v14 = vadd.f32 %v948_v20, %v275_v29  ;;  %v8330_v56 = vpop.f32.mrb[15].mxu1 }
 0x3a8   :  { %9150 = vtanh.f32 %v958_v14 }
 0x3a9   :  { %v953_v18 = vpop.f32.mrb[16].mxu1 }
 0x3aa   :  { %v959_v48 = vadd.f32 %v953_v18, %v281_v50  ;;  %v8333_v35 = vpop.f32.mrb[17].mxu1  ;;  %v367_v50 = vadd.f32 %v10306_v63, %v10316_v6 }
 0x3ac   :  { %9152 = vtanh.f32 %v959_v48  ;;  %v7786_v63 = vmul.f32 -1.442695, %v959_v48 }
 0x3ae   :  { %v9149_v33 = vpop.eup %9148 }
 0x3af   :  { %1082 = vrot.lane.b32.xlu1 %v9149_v33, %s9904_s0  ;;  %v373_v33 = vadd.f32 %v10311_v4, %v10316_v6 }
 0x3b2   :  { %v9151_v12 = vpop.eup %9150 }
 0x3b3   :  { %1084 = vrot.lane.b32.xlu0 %v9151_v12, %s9904_s0 }
 0x3b6   :  { %v9153_v58 = vpop.eup %9152 }
 0x3b7   :  { %1086 = vrot.lane.b32.xlu1 %v9153_v58, %s9904_s0  ;;  %v7784_v58 = vmul.f32 -1.442695, %v957_v26 }
 0x3f6   :  { %v1038_v20 = vpop.f32.mrb[18].mxu1 }
 0x3f7   :  { %v1052_v56 = vadd.f32 %v1038_v20, %v361_v17  ;;  %v8344_v24 = vpop.f32.mrb[19].mxu1  ;;  %v7785_v17 = vmul.f32 -1.442695, %v958_v14 }
 0x3f9   :  { %9154 = vtanh.f32 %v1052_v56 }
 0x3fa   :  { %v1043_v35 = vpop.f32.mrb[20].mxu1 }
 0x3fb   :  { %v1053_v62 = vadd.f32 %v1043_v35, %v367_v50  ;;  %v8347_v52 = vpop.f32.mrb[21].mxu1 }
 0x3fd   :  { %9156 = vtanh.f32 %v1053_v62 }
 0x3fe   :  { %v1048_v29 = vpop.f32.mrb[22].mxu1 }
 0x3ff   :  { %v1054_v18 = vadd.f32 %v1048_v29, %v373_v33  ;;  %v8350_v12 = vpop.f32.mrb[23].mxu1 }
 0x401   :  { %9158 = vtanh.f32 %v1054_v18 }
 0x402   :  { %9160 = vpow2.f32 %v7784_v58 }
 0x403   :  { %v9155_v61 = vpop.eup %9154  ;;  %9162 = vpow2.f32 %v7785_v17 }
 0x404   :  { %1154 = vrot.lane.b32.xlu0 %v9155_v61, %s9904_s0  ;;  %9164 = vpow2.f32 %v7786_v63 }
 0x407   :  { %v9157_v20 = vpop.eup %9156 }
 0x408   :  { %1156 = vrot.lane.b32.xlu1 %v9157_v20, %s9904_s0 }
 0x40b   :  { %v9159_v24 = vpop.eup %9158 }
 0x40c   :  { %1158 = vrot.lane.b32.xlu0 %v9159_v24, %s9904_s0  ;;  %v9161_v4 = vpop.eup %9160  ;;  %v7787_v24 = vmul.f32 -1.442695, %v1052_v56 }
 0x40d   :  { %v1064_v50 = vadd.f32 1.0, %v9161_v4  ;;  %v9163_v35 = vpop.eup %9162  ;;  %v7788_v4 = vmul.f32 -1.442695, %v1053_v62 }
 0x40e   :  { %v1065_v52 = vadd.f32 1.0, %v9163_v35  ;;  %v9165_v26 = vpop.eup %9164 }
 0x40f   :  { %9166 = vrcp.f32 %v1064_v50  ;;  %v1066_v33 = vadd.f32 1.0, %v9165_v26  ;;  %v7789_v50 = vmul.f32 -1.442695, %v1054_v18 }
 0x410   :  { %9168 = vrcp.f32 %v1065_v52 }
 0x411   :  { %9170 = vrcp.f32 %v1066_v33 }
 0x412   :  { %9172 = vpow2.f32 %v7787_v24 }
 0x413   :  { %9174 = vpow2.f32 %v7788_v4  ;;  %v7790_v4 = vld [vmem:[%s13839_s1 + $0x18] sm:$0xff] }
 0x414   :  { %9176 = vpow2.f32 %v7789_v50 }
 0x419   :  { %v10500_v29 = vpop.eup %9166 }
 0x41a   :  { %v10504_v48 = vpop.eup %9168 }
 0x41b   :  { %v10508_v17 = vpop.eup %9170 }
 0x41c   :  { %v9173_v35 = vpop.eup %9172 }
 0x41d   :  { %v1136_v52 = vadd.f32 1.0, %v9173_v35  ;;  %v9175_v26 = vpop.eup %9174  ;;  %v7791_v35 = vld [vmem:[%s13839_s1 + $0x20] sm:$0xff] }
 0x41e   :  { %v1137_v33 = vadd.f32 1.0, %v9175_v26  ;;  %v7793_v26 = vld [vmem:[%s13839_s1 + $0x90] sm:$0xff] }
 0x41f   :  { %9178 = vrcp.f32 %v1136_v52  ;;  %v7792_v52 = vld [vmem:[%s13839_s1 + $0x28] sm:$0xff] }
 0x420   :  { %9180 = vrcp.f32 %v1137_v33  ;;  %v7794_v33 = vld [vmem:[%s13839_s1 + $0x98] sm:$0xff] }
 0x421   :  { %v1083_v14 = vpop.permute.xlu1 %1082 }
 0x422   :  { %v1091_v12 = vmul.f32 %v10500_v29, %v1083_v14  ;;  %v9177_v14 = vpop.eup %9176 }
 0x424   :  { %1097 = vrot.lane.b32.xlu1 %v1091_v12, %s9906_s3  ;;  %v1138_v12 = vadd.f32 1.0, %v9177_v14  ;;  %v7795_v14 = vld [vmem:[%s13839_s1 + $0xa0] sm:$0xff] }
 0x425   :  { %v1085_v58 = vpop.permute.xlu0 %1084 }
 0x426   :  { %v1092_v61 = vmul.f32 %v10504_v48, %v1085_v58  ;;  %9182 = vrcp.f32 %v1138_v12  ;;  %v10544_v12 = vmul.f32 %v10408_v0, %v10376_v1  ;;  %v10559_v0 = vmul.f32 %v10422_v2, %v10384_v15 }
 0x427   :  { %v10574_v2 = vmul.f32 %v10429_v11, %v10391_v21  ;;  %v10589_v21 = vmul.f32 %v10437_v51, %v10399_v9 }
 0x428   :  { %1099 = vrot.lane.b32.xlu0 %v1092_v61, %s9906_s3 }
 0x429   :  { %v1087_v20 = vpop.permute.xlu1 %1086  ;;  %v10512_v58 = vpop.eup %9178 }
 0x42a   :  { %v1093_v63 = vmul.f32 %v10508_v17, %v1087_v20  ;;  %v10516_v56 = vpop.eup %9180 }
 0x42c   :  { %1101 = vrot.lane.b32.xlu1 %v1093_v63, %s9906_s3 }
 0x430   :  { %v10520_v63 = vpop.eup %9182 }
 0x476   :  { %v1155_v61 = vpop.permute.xlu0 %1154 }
 0x477   :  { %v1163_v20 = vmul.f32 %v10512_v58, %v1155_v61  ;;  %v1076_v61 = vmul.f32 %v10500_v29, %v10544_v12 }
 0x479   :  { %1169 = vrot.lane.b32.xlu0 %v1163_v20, %s9906_s3 }
 0x47a   :  { %v1157_v62 = vpop.permute.xlu1 %1156 }
 0x47b   :  { %v1164_v18 = vmul.f32 %v10516_v56, %v1157_v62  ;;  %v10550_v62 = vmul.f32 %v10405_v60, %v10380_v5  ;;  %v1078_v5 = vmul.f32 %v10508_v17, %v10559_v0 }
 0x47d   :  { %1171 = vrot.lane.b32.xlu1 %v1164_v18, %s9906_s3 }
 0x47e   :  { %v1159_v24 = vpop.permute.xlu0 %1158 }
 0x47f   :  { %v1165_v50 = vmul.f32 %v10520_v63, %v1159_v24  ;;  %v1077_v24 = vmul.f32 %v10504_v48, %v10550_v62 }
 0x481   :  { %1212 = vperm.xlu1 %9099, %v7790_v4   ;;  %1173 = vrot.lane.b32.xlu0 %v1165_v50, %s9906_s3 }
 0x485   :  { %1217 = vperm.xlu1 %9099, %v7791_v35  }
 0x489   :  { %1222 = vperm.xlu1 %9099, %v7792_v52  }
 0x48d   :  { %1245 = vperm.xlu1 %9099, %v7793_v26   ;;  %v1148_v26 = vmul.f32 %v10512_v58, %v10574_v2 }
 0x491   :  { %1250 = vperm.xlu1 %9099, %v7794_v33  }
 0x495   :  { %1255 = vperm.xlu1 %9099, %v7795_v14   ;;  %v10580_v14 = vmul.f32 %v10431_v53, %v10395_v13  ;;  %v1150_v13 = vmul.f32 %v10520_v63, %v10589_v21 }
 0x496   :  { %v1098_v20 = vpop.permute.xlu1 %1097 }
 0x497   :  { %v10552_v18 = vadd.f32 %v1098_v20, %v1076_v61  ;;  %v1149_v20 = vmul.f32 %v10516_v56, %v10580_v14 }
 0x499   :  { %9184 = vtanh.f32 %v10552_v18 }
 0x49a   :  { %v1100_v4 = vpop.permute.xlu0 %1099 }
 0x49b   :  { %v10561_v1 = vadd.f32 %v1100_v4, %v1077_v24 }
 0x49d   :  { %9186 = vtanh.f32 %v10561_v1 }
 0x49e   :  { %v1102_v60 = vpop.permute.xlu1 %1101 }
 0x49f   :  { %v10566_v50 = vadd.f32 %v1102_v60, %v1078_v5 }
 0x4a1   :  { %9188 = vtanh.f32 %v10566_v50 }
 0x4a3   :  { %v9185_v35 = vpop.eup %9184 }
 0x4a4   :  { %1115 = vrot.lane.b32.xlu0 %v9185_v35, %s9904_s0 }
 0x4a7   :  { %v9187_v52 = vpop.eup %9186 }
 0x4a8   :  { %1117 = vrot.lane.b32.xlu0 %v9187_v52, %s9904_s0 }
 0x4ab   :  { %v9189_v15 = vpop.eup %9188 }
 0x4ac   :  { %1119 = vrot.lane.b32.xlu0 %v9189_v15, %s9904_s0 }
 0x4eb   :  { %v1170_v33 = vpop.permute.xlu0 %1169 }
 0x4ec   :  { %v10582_v61 = vadd.f32 %v1170_v33, %v1148_v26 }
 0x4ee   :  { %9190 = vtanh.f32 %v10582_v61 }
 0x4ef   :  { %v1172_v24 = vpop.permute.xlu1 %1171 }
 0x4f0   :  { %v10591_v11 = vadd.f32 %v1172_v24, %v1149_v20 }
 0x4f2   :  { %9192 = vtanh.f32 %v10591_v11 }
 0x4f3   :  { %v1174_v53 = vpop.permute.xlu0 %1173 }
 0x4f4   :  { %v10596_v4 = vadd.f32 %v1174_v53, %v1150_v13 }
 0x4f6   :  { %9194 = vtanh.f32 %v10596_v4 }
 0x4f8   :  { %v9191_v5 = vpop.eup %9190 }
 0x4f9   :  { %1187 = vrot.lane.b32.xlu0 %v9191_v5, %s9904_s0 }
 0x4fc   :  { %v9193_v60 = vpop.eup %9192 }
 0x4fd   :  { %1189 = vrot.lane.b32.xlu0 %v9193_v60, %s9904_s0 }
 0x500   :  { %v9195_v9 = vpop.eup %9194  ;;  %v10602_v51 = vpop.permute.xlu1 %1212 }
 0x501   :  { %1191 = vrot.lane.b32.xlu0 %v9195_v9, %s9904_s0 }
 0x504   :  { %v10608_v24 = vpop.permute.xlu1 %1217 }
 0x516   :  { %v1116_v35 = vpop.permute.xlu0 %1115 }
 0x517   :  { %v1124_v52 = vmul.f32 %v10500_v29, %v1116_v35 }
 0x519   :  { %v1207_v15 = vsub.f32 %v1124_v52, %v10411_v16 }
 0x51a   :  { %v1118_v26 = vpop.permute.xlu0 %1117 }
 0x51b   :  { %v1225_v33 = vmul.f32 %v10602_v51, %v1207_v15  ;;  %v1125_v20 = vmul.f32 %v10504_v48, %v1118_v26  ;;  %v10622_v48 = vpop.permute.xlu1 %1222 }
 0x51d   :  { %v1208_v13 = vsub.f32 %v1125_v20, %v10417_v28  ;;  %v10612_v53 = vadd.f32 %v1225_v33, %v10411_v16 }
 0x51e   :  { %v1120_v5 = vpop.permute.xlu0 %1119 }
 0x51f   :  { %v1226_v60 = vmul.f32 %v10608_v24, %v1208_v13  ;;  %v1126_v9 = vmul.f32 %v10508_v17, %v1120_v5  ;;  %1276 = vrot.lane.b32.xlu1 %v10612_v53, %s9906_s3  ;;  %v10632_v17 = vpop.permute.xlu1 %1245 }
 0x521   :  { %v1209_v29 = vsub.f32 %v1126_v9, %v10425_v7  ;;  %v10620_v35 = vadd.f32 %v1226_v60, %v10417_v28 }
 0x523   :  { %v1227_v52 = vmul.f32 %v10622_v48, %v1209_v29  ;;  %1278 = vrot.lane.b32.xlu0 %v10620_v35, %s9906_s3  ;;  %v10638_v5 = vpop.permute.xlu1 %1250 }
 0x525   :  { %v10628_v16 = vadd.f32 %v1227_v52, %v10425_v7 }
 0x527   :  { %1280 = vrot.lane.b32.xlu1 %v10628_v16, %s9906_s3 }
 0x56b   :  { %v1188_v15 = vpop.permute.xlu0 %1187 }
 0x56c   :  { %v1196_v26 = vmul.f32 %v10512_v58, %v1188_v15 }
 0x56e   :  { %v1240_v28 = vsub.f32 %v1196_v26, %v10435_v8 }
 0x56f   :  { %v1190_v33 = vpop.permute.xlu0 %1189 }
 0x570   :  { %v1258_v20 = vmul.f32 %v10632_v17, %v1240_v28  ;;  %v1197_v13 = vmul.f32 %v10516_v56, %v1190_v33  ;;  %v10652_v56 = vpop.permute.xlu1 %1255 }
 0x572   :  { %v1241_v7 = vsub.f32 %v1197_v13, %v10443_v25  ;;  %v10642_v60 = vadd.f32 %v1258_v20, %v10435_v8 }
 0x573   :  { %v1192_v9 = vpop.permute.xlu0 %1191 }
 0x574   :  { %v1259_v29 = vmul.f32 %v10638_v5, %v1241_v7  ;;  %v1198_v52 = vmul.f32 %v10520_v63, %v1192_v9  ;;  %1406 = vrot.lane.b32.xlu0 %v10642_v60, %s9906_s3 }
 0x576   :  { %v1242_v58 = vsub.f32 %v1198_v52, %v10449_v22  ;;  %v10650_v15 = vadd.f32 %v1259_v29, %v10443_v25  ;;  %v287_v29 = vadd.f32 %v10251_v30, %v10217_v54 }
 0x578   :  { %v1260_v26 = vmul.f32 %v10652_v56, %v1242_v58  ;;  %1408 = vrot.lane.b32.xlu1 %v10650_v15, %s9906_s3 }
 0x57a   :  { %v10658_v28 = vadd.f32 %v1260_v26, %v10449_v22 }
 0x57c   :  { %1410 = vrot.lane.b32.xlu0 %v10658_v28, %s9906_s3 }
 0x591   :  { %v1277_v63 = vpop.permute.xlu1 %1276 }
 0x592   :  { %1286 = vst.msk [vmem:[#allocation3 + $0x18] sm:$0xff] %vm111_vm1, %v1277_v63  ;;  %8360 = vmatmul.mubr.msk.f32.vlgmr.msra.gmra.mrb[24].mxu1 %vm111_vm1, %v1277_v63  ;;  %v293_v63 = vadd.f32 %v10256_v32, %v10217_v54  ;;  %v343_v32 = vadd.f32 %v10290_v49, %v10316_v6 }
 0x593   :  { %8362 = vmatprep.mubr.msk.f32.mxu1 %vm9903_vm0, %v13902_v3  ;;  %8901 = vmatpush3.bf16.msra.mxu1 %v10050_v23 }
 0x594   :  { %8902 = vmatprep.subr.bf16.mxu1 %v13903_v59 }
 0x595   :  { %v1279_v33 = vpop.permute.xlu0 %1278 }
 0x596   :  { %1287 = vst.msk [vmem:[#allocation3 + $0x20] sm:$0xff] %vm111_vm1, %v1279_v33  ;;  %8363 = vmatmul.mubr.msk.f32.gmra.mrb[26].mxu1 %vm111_vm1, %v1279_v33 }
 0x597   :  { %8365 = vmatprep.mubr.msk.f32.mxu1 %vm9903_vm0, %v13902_v3  ;;  %8904 = vmatpush3.bf16.msra.mxu1 %v10065_v27 }
 0x598   :  { %8905 = vmatprep.subr.bf16.mxu1 %v13903_v59 }
 0x599   :  { %v1281_v20 = vpop.permute.xlu1 %1280 }
 0x59a   :  { %1288 = vst.msk [vmem:[#allocation3 + $0x28] sm:$0xff] %vm111_vm1, %v1281_v20  ;;  %8366 = vmatmul.mubr.msk.f32.gmra.mrb[28].mxu1 %vm111_vm1, %v1281_v20 }
 0x59b   :  { %8376 = vmatprep.mubr.msk.f32.mxu1 %vm9903_vm0, %v13902_v3 }
 0x5e6   :  { %v1407_v13 = vpop.permute.xlu0 %1406 }
 0x5e7   :  { %8377 = vmatmul.mubr.msk.f32.vlgmr.msra.gmra.mrb[30].mxu1 %vm111_vm1, %v1407_v13 }
 0x5e8   :  { %8379 = vmatprep.mubr.msk.f32.mxu1 %vm9903_vm0, %v13902_v3  ;;  %8907 = vmatpush3.bf16.msra.mxu1 %v10010_v10 }
 0x5e9   :  { %8908 = vmatprep.subr.bf16.mxu1 %v13903_v59 }
 0x5ea   :  { %v1409_v7 = vpop.permute.xlu1 %1408 }
 0x5eb   :  { %8380 = vmatmul.mubr.msk.f32.gmra.mrb[32].mxu1 %vm111_vm1, %v1409_v7  ;;  %v299_v7 = vadd.f32 %v10260_v34, %v10217_v54 }
 0x5ec   :  { %8382 = vmatprep.mubr.msk.f32.mxu1 %vm9903_vm0, %v13902_v3  ;;  %8910 = vmatpush3.bf16.msra.mxu1 %v10033_v19 }
 0x5ed   :  { %8911 = vmatprep.subr.bf16.mxu1 %v13903_v59 }
 0x5ee   :  { %v1411_v9 = vpop.permute.xlu0 %1410 }
 0x5ef   :  { %8383 = vmatmul.mubr.msk.f32.gmra.mrb[34].mxu1 %vm111_vm1, %v1411_v9 }
 0x5f0   :  { %8393 = vmatprep.mubr.msk.f32.mxu1 %vm9903_vm0, %v13902_v3 }
 0x665   :  { %v1389_v52 = vpop.f32.mrb[24].mxu1 }
 0x666   :  { %v1403_v58 = vadd.f32 %v1389_v52, %v287_v29  ;;  %v8361_v26 = vpop.f32.mrb[25].mxu1 }
 0x668   :  { %9196 = vtanh.f32 %v1403_v58 }
 0x669   :  { %v1394_v33 = vpop.f32.mrb[26].mxu1 }
 0x66a   :  { %v1404_v20 = vadd.f32 %v1394_v33, %v293_v63  ;;  %v8364_v13 = vpop.f32.mrb[27].mxu1  ;;  %v349_v63 = vadd.f32 %v10294_v55, %v10316_v6 }
 0x66c   :  { %9198 = vtanh.f32 %v1404_v20 }
 0x66d   :  { %v1399_v9 = vpop.f32.mrb[28].mxu1 }
 0x66e   :  { %v1405_v22 = vadd.f32 %v1399_v9, %v299_v7  ;;  %v8367_v25 = vpop.f32.mrb[29].mxu1 }
 0x670   :  { %9200 = vtanh.f32 %v1405_v22  ;;  %v7804_v55 = vmul.f32 -1.442695, %v1405_v22 }
 0x672   :  { %v9197_v8 = vpop.eup %9196 }
 0x673   :  { %1528 = vrot.lane.b32.xlu1 %v9197_v8, %s9904_s0  ;;  %v355_v8 = vadd.f32 %v10298_v57, %v10316_v6 }
 0x676   :  { %v9199_v30 = vpop.eup %9198 }
 0x677   :  { %1530 = vrot.lane.b32.xlu0 %v9199_v30, %s9904_s0 }
 0x67a   :  { %v9201_v29 = vpop.eup %9200 }
 0x67b   :  { %1532 = vrot.lane.b32.xlu1 %v9201_v29, %s9904_s0  ;;  %v7802_v29 = vmul.f32 -1.442695, %v1403_v58 }
 0x6ba   :  { %v1484_v52 = vpop.f32.mrb[30].mxu1 }
 0x6bb   :  { %v1498_v26 = vadd.f32 %v1484_v52, %v343_v32  ;;  %v8378_v34 = vpop.f32.mrb[31].mxu1  ;;  %v7803_v32 = vmul.f32 -1.442695, %v1404_v20 }
 0x6bd   :  { %9202 = vtanh.f32 %v1498_v26 }
 0x6be   :  { %v1489_v25 = vpop.f32.mrb[32].mxu1 }
 0x6bf   :  { %v1499_v33 = vadd.f32 %v1489_v25, %v349_v63  ;;  %v8381_v13 = vpop.f32.mrb[33].mxu1 }
 0x6c1   :  { %9204 = vtanh.f32 %v1499_v33 }
 0x6c2   :  { %v1494_v7 = vpop.f32.mrb[34].mxu1 }
 0x6c3   :  { %v1500_v9 = vadd.f32 %v1494_v7, %v355_v8  ;;  %v8384_v30 = vpop.f32.mrb[35].mxu1 }
 0x6c5   :  { %9206 = vtanh.f32 %v1500_v9 }
 0x6c6   :  { %9208 = vpow2.f32 %v7802_v29 }
 0x6c7   :  { %v9203_v49 = vpop.eup %9202  ;;  %9210 = vpow2.f32 %v7803_v32 }
 0x6c8   :  { %1600 = vrot.lane.b32.xlu0 %v9203_v49, %s9904_s0  ;;  %9212 = vpow2.f32 %v7804_v55 }
 0x6cb   :  { %v9205_v52 = vpop.eup %9204 }
 0x6cc   :  { %1602 = vrot.lane.b32.xlu1 %v9205_v52, %s9904_s0 }
 0x6cf   :  { %v9207_v34 = vpop.eup %9206 }
 0x6d0   :  { %1604 = vrot.lane.b32.xlu0 %v9207_v34, %s9904_s0  ;;  %v9209_v57 = vpop.eup %9208  ;;  %v7805_v34 = vmul.f32 -1.442695, %v1498_v26 }
 0x6d1   :  { %v1510_v63 = vadd.f32 1.0, %v9209_v57  ;;  %v9211_v25 = vpop.eup %9210  ;;  %v7806_v57 = vmul.f32 -1.442695, %v1499_v33 }
 0x6d2   :  { %v1511_v13 = vadd.f32 1.0, %v9211_v25  ;;  %v9213_v58 = vpop.eup %9212 }
 0x6d3   :  { %9214 = vrcp.f32 %v1510_v63  ;;  %v1512_v8 = vadd.f32 1.0, %v9213_v58  ;;  %v7807_v63 = vmul.f32 -1.442695, %v1500_v9 }
 0x6d4   :  { %9216 = vrcp.f32 %v1511_v13 }
 0x6d5   :  { %9218 = vrcp.f32 %v1512_v8 }
 0x6d6   :  { %9220 = vpow2.f32 %v7805_v34 }
 0x6d7   :  { %9222 = vpow2.f32 %v7806_v57  ;;  %v7808_v57 = vld [vmem:[%s13839_s1 + $0x30] sm:$0xff] }
 0x6d8   :  { %9224 = vpow2.f32 %v7807_v63 }
 0x6dd   :  { %v10709_v7 = vpop.eup %9214 }
 0x6de   :  { %v10713_v22 = vpop.eup %9216 }
 0x6df   :  { %v10717_v32 = vpop.eup %9218 }
 0x6e0   :  { %v9221_v25 = vpop.eup %9220 }
 0x6e1   :  { %v1582_v13 = vadd.f32 1.0, %v9221_v25  ;;  %v9223_v58 = vpop.eup %9222  ;;  %v7809_v25 = vld [vmem:[%s13839_s1 + $0x38] sm:$0xff] }
 0x6e2   :  { %v1583_v8 = vadd.f32 1.0, %v9223_v58  ;;  %v7811_v58 = vld [vmem:[%s13839_s1 + $0x78] sm:$0xff] }
 0x6e3   :  { %9226 = vrcp.f32 %v1582_v13  ;;  %v7810_v13 = vld [vmem:[%s13839_s1 + $0x40] sm:$0xff] }
 0x6e4   :  { %9228 = vrcp.f32 %v1583_v8  ;;  %v1231_v8 = vsub.f32 %v10552_v18, %v10544_v12 }
 0x6e5   :  { %v1529_v20 = vpop.permute.xlu1 %1528 }
 0x6e6   :  { %v1537_v30 = vmul.f32 %v10709_v7, %v1529_v20  ;;  %v9225_v20 = vpop.eup %9224 }
 0x6e8   :  { %1543 = vrot.lane.b32.xlu1 %v1537_v30, %s9906_s3  ;;  %v1584_v30 = vadd.f32 1.0, %v9225_v20  ;;  %v7812_v20 = vld [vmem:[%s13839_s1 + $0x80] sm:$0xff] }
 0x6e9   :  { %v1531_v29 = vpop.permute.xlu0 %1530 }
 0x6ea   :  { %v1538_v49 = vmul.f32 %v10713_v22, %v1531_v29  ;;  %9230 = vrcp.f32 %v1584_v30  ;;  %v1234_v30 = vmul.f32 %v1231_v8, %v10602_v51 }
 0x6ec   :  { %1545 = vrot.lane.b32.xlu0 %v1538_v49, %s9906_s3 }
 0x6ed   :  { %v1533_v52 = vpop.permute.xlu1 %1532  ;;  %v10721_v29 = vpop.eup %9226 }
 0x6ee   :  { %v1539_v55 = vmul.f32 %v10717_v32, %v1533_v52  ;;  %v10725_v26 = vpop.eup %9228 }
 0x6f0   :  { %1547 = vrot.lane.b32.xlu1 %v1539_v55, %s9906_s3 }
 0x6f4   :  { %v10729_v55 = vpop.eup %9230 }
 0x73a   :  { %v1601_v49 = vpop.permute.xlu0 %1600 }
 0x73b   :  { %v1609_v52 = vmul.f32 %v10721_v29, %v1601_v49  ;;  %v1232_v49 = vsub.f32 %v10561_v1, %v10550_v62 }
 0x73d   :  { %1615 = vrot.lane.b32.xlu0 %v1609_v52, %s9906_s3  ;;  %v7813_v52 = vld [vmem:[%s13839_s1 + $0x88] sm:$0xff]  ;;  %v1235_v18 = vmul.f32 %v1232_v49, %v10608_v24  ;;  %v1265_v49 = vsub.f32 %v10591_v11, %v10580_v14 }
 0x73e   :  { %v1603_v33 = vpop.permute.xlu1 %1602 }
 0x73f   :  { %v1610_v9 = vmul.f32 %v10725_v26, %v1603_v33  ;;  %v10757_v33 = vadd.f32 %v1234_v30, %v10544_v12  ;;  %v10765_v1 = vadd.f32 %v1235_v18, %v10550_v62  ;;  %v1268_v18 = vmul.f32 %v1265_v49, %v10638_v5 }
 0x741   :  { %1617 = vrot.lane.b32.xlu1 %v1610_v9, %s9906_s3  ;;  %v1233_v9 = vsub.f32 %v10566_v50, %v10559_v0  ;;  %v1522_v51 = vmul.f32 %v10709_v7, %v10757_v33  ;;  %v1523_v12 = vmul.f32 %v10713_v22, %v10765_v1 }
 0x742   :  { %v1605_v34 = vpop.permute.xlu0 %1604 }
 0x743   :  { %v1611_v63 = vmul.f32 %v10729_v55, %v1605_v34 }
 0x745   :  { %1658 = vperm.xlu1 %9099, %v7808_v57   ;;  %1619 = vrot.lane.b32.xlu0 %v1611_v63, %s9906_s3  ;;  %v1236_v57 = vmul.f32 %v1233_v9, %v10622_v48  ;;  %v1266_v9 = vsub.f32 %v10596_v4, %v10589_v21 }
 0x747   :  { %v10774_v50 = vadd.f32 %v1236_v57, %v10559_v0  ;;  %v10801_v57 = vadd.f32 %v1268_v18, %v10580_v14 }
 0x749   :  { %1663 = vperm.xlu1 %9099, %v7809_v25   ;;  %v1524_v62 = vmul.f32 %v10717_v32, %v10774_v50 }
 0x74d   :  { %1668 = vperm.xlu1 %9099, %v7810_v13  }
 0x751   :  { %1691 = vperm.xlu1 %9099, %v7811_v58  }
 0x755   :  { %1696 = vperm.xlu1 %9099, %v7812_v20   ;;  %v1264_v20 = vsub.f32 %v10582_v61, %v10574_v2  ;;  %v1269_v61 = vmul.f32 %v1266_v9, %v10652_v56 }
 0x757   :  { %v1267_v30 = vmul.f32 %v1264_v20, %v10632_v17  ;;  %v10810_v5 = vadd.f32 %v1269_v61, %v10589_v21 }
 0x759   :  { %1701 = vperm.xlu1 %9099, %v7813_v52   ;;  %v10793_v52 = vadd.f32 %v1267_v30, %v10574_v2  ;;  %v1595_v2 = vmul.f32 %v10725_v26, %v10801_v57  ;;  %v1596_v14 = vmul.f32 %v10729_v55, %v10810_v5 }
 0x75a   :  { %v1544_v34 = vpop.permute.xlu1 %1543 }
 0x75b   :  { %v10768_v63 = vadd.f32 %v1544_v34, %v1522_v51  ;;  %v1594_v51 = vmul.f32 %v10721_v29, %v10793_v52 }
 0x75d   :  { %9232 = vtanh.f32 %v10768_v63 }
 0x75e   :  { %v1546_v24 = vpop.permute.xlu0 %1545 }
 0x75f   :  { %v10776_v25 = vadd.f32 %v1546_v24, %v1523_v12 }
 0x761   :  { %9234 = vtanh.f32 %v10776_v25 }
 0x762   :  { %v1548_v13 = vpop.permute.xlu1 %1547 }
 0x763   :  { %v10781_v48 = vadd.f32 %v1548_v13, %v1524_v62 }
 0x765   :  { %9236 = vtanh.f32 %v10781_v48 }
 0x767   :  { %v9233_v58 = vpop.eup %9232 }
 0x768   :  { %1561 = vrot.lane.b32.xlu0 %v9233_v58, %s9904_s0 }
 0x76b   :  { %v9235_v8 = vpop.eup %9234 }
 0x76c   :  { %1563 = vrot.lane.b32.xlu0 %v9235_v8, %s9904_s0 }
 0x76f   :  { %v9237_v0 = vpop.eup %9236 }
 0x770   :  { %1565 = vrot.lane.b32.xlu0 %v9237_v0, %s9904_s0 }
 0x7af   :  { %v1616_v34 = vpop.permute.xlu0 %1615 }
 0x7b0   :  { %v10804_v17 = vadd.f32 %v1616_v34, %v1594_v51 }
 0x7b2   :  { %9238 = vtanh.f32 %v10804_v17 }
 0x7b3   :  { %v1618_v11 = vpop.permute.xlu1 %1617 }
 0x7b4   :  { %v10812_v4 = vadd.f32 %v1618_v11, %v1595_v2 }
 0x7b6   :  { %9240 = vtanh.f32 %v10812_v4 }
 0x7b7   :  { %v1620_v12 = vpop.permute.xlu0 %1619 }
 0x7b8   :  { %v10817_v56 = vadd.f32 %v1620_v12, %v1596_v14 }
 0x7ba   :  { %9242 = vtanh.f32 %v10817_v56 }
 0x7bc   :  { %v9239_v24 = vpop.eup %9238 }
 0x7bd   :  { %1633 = vrot.lane.b32.xlu0 %v9239_v24, %s9904_s0 }
 0x7c0   :  { %v9241_v62 = vpop.eup %9240 }
 0x7c1   :  { %1635 = vrot.lane.b32.xlu0 %v9241_v62, %s9904_s0 }
 0x7c4   :  { %v9243_v21 = vpop.eup %9242  ;;  %v10823_v13 = vpop.permute.xlu1 %1658 }
 0x7c5   :  { %1637 = vrot.lane.b32.xlu0 %v9243_v21, %s9904_s0 }
 0x7c8   :  { %v10829_v18 = vpop.permute.xlu1 %1663 }
 0x7da   :  { %v1562_v58 = vpop.permute.xlu0 %1561 }
 0x7db   :  { %v1570_v8 = vmul.f32 %v10709_v7, %v1562_v58 }
 0x7dd   :  { %v1653_v0 = vsub.f32 %v1570_v8, %v10612_v53 }
 0x7de   :  { %v1564_v20 = vpop.permute.xlu0 %1563 }
 0x7df   :  { %v1671_v30 = vmul.f32 %v10823_v13, %v1653_v0  ;;  %v1571_v49 = vmul.f32 %v10713_v22, %v1564_v20  ;;  %v10843_v22 = vpop.permute.xlu1 %1668 }
 0x7e1   :  { %v1654_v9 = vsub.f32 %v1571_v49, %v10620_v35  ;;  %v10833_v51 = vadd.f32 %v1671_v30, %v10612_v53 }
 0x7e2   :  { %v1566_v34 = vpop.permute.xlu0 %1565 }
 0x7e3   :  { %v1672_v61 = vmul.f32 %v10829_v18, %v1654_v9  ;;  %v1572_v2 = vmul.f32 %v10717_v32, %v1566_v34  ;;  %1722 = vrot.lane.b32.xlu1 %v10833_v51, %s9906_s3  ;;  %v10853_v32 = vpop.permute.xlu1 %1691 }
 0x7e5   :  { %v1655_v7 = vsub.f32 %v1572_v2, %v10628_v16  ;;  %v10841_v11 = vadd.f32 %v1672_v61, %v10620_v35 }
 0x7e7   :  { %v1673_v14 = vmul.f32 %v10843_v22, %v1655_v7  ;;  %1724 = vrot.lane.b32.xlu0 %v10841_v11, %s9906_s3  ;;  %v10859_v8 = vpop.permute.xlu1 %1696 }
 0x7e9   :  { %v10849_v53 = vadd.f32 %v1673_v14, %v10628_v16 }
 0x7eb   :  { %1726 = vrot.lane.b32.xlu1 %v10849_v53, %s9906_s3 }
 0x82f   :  { %v1634_v12 = vpop.permute.xlu0 %1633 }
 0x830   :  { %v1642_v24 = vmul.f32 %v10721_v29, %v1634_v12 }
 0x832   :  { %v1686_v35 = vsub.f32 %v1642_v24, %v10642_v60 }
 0x833   :  { %v1636_v62 = vpop.permute.xlu0 %1635 }
 0x834   :  { %v1704_v21 = vmul.f32 %v10853_v32, %v1686_v35  ;;  %v1643_v58 = vmul.f32 %v10725_v26, %v1636_v62  ;;  %v10873_v26 = vpop.permute.xlu1 %1701  ;;  %v305_v35 = vadd.f32 %v10264_v36, %v10217_v54  ;;  %v325_v36 = vadd.f32 %v10278_v43, %v10316_v6 }
 0x836   :  { %v1687_v16 = vsub.f32 %v1643_v58, %v10650_v15  ;;  %v10863_v0 = vadd.f32 %v1704_v21, %v10642_v60 }
 0x837   :  { %v1638_v20 = vpop.permute.xlu0 %1637 }
 0x838   :  { %v1705_v30 = vmul.f32 %v10859_v8, %v1687_v16  ;;  %v1644_v49 = vmul.f32 %v10729_v55, %v1638_v20  ;;  %1852 = vrot.lane.b32.xlu0 %v10863_v0, %s9906_s3  ;;  %v311_v16 = vadd.f32 %v10268_v38, %v10217_v54  ;;  %v331_v38 = vadd.f32 %v10282_v45, %v10316_v6 }
 0x83a   :  { %v1688_v29 = vsub.f32 %v1644_v49, %v10658_v28  ;;  %v10871_v9 = vadd.f32 %v1705_v30, %v10650_v15 }
 0x83c   :  { %v1706_v34 = vmul.f32 %v10873_v26, %v1688_v29  ;;  %1854 = vrot.lane.b32.xlu1 %v10871_v9, %s9906_s3  ;;  %v317_v29 = vadd.f32 %v10272_v40, %v10217_v54  ;;  %v337_v40 = vadd.f32 %v10286_v47, %v10316_v6 }
 0x83e   :  { %v10879_v61 = vadd.f32 %v1706_v34, %v10658_v28 }
 0x840   :  { %1856 = vrot.lane.b32.xlu0 %v10879_v61, %s9906_s3 }
 0x855   :  { %v1723_v55 = vpop.permute.xlu1 %1722 }
 0x856   :  { %1732 = vst.msk [vmem:[#allocation3 + $0x30] sm:$0xff] %vm111_vm1, %v1723_v55  ;;  %8394 = vmatmul.mubr.msk.f32.vlgmr.msra.gmra.mrb[36].mxu1 %vm111_vm1, %v1723_v55 }
 0x857   :  { %8396 = vmatprep.mubr.msk.f32.mxu1 %vm9903_vm0, %v13902_v3  ;;  %8913 = vmatpush3.bf16.msra.mxu1 %v10050_v23 }
 0x858   :  { %8914 = vmatprep.subr.bf16.mxu1 %v13903_v59 }
 0x859   :  { %v1725_v2 = vpop.permute.xlu0 %1724 }
 0x85a   :  { %1733 = vst.msk [vmem:[#allocation3 + $0x38] sm:$0xff] %vm111_vm1, %v1725_v2  ;;  %8397 = vmatmul.mubr.msk.f32.gmra.mrb[38].mxu1 %vm111_vm1, %v1725_v2 }
 0x85b   :  { %8399 = vmatprep.mubr.msk.f32.mxu1 %vm9903_vm0, %v13902_v3  ;;  %8916 = vmatpush3.bf16.msra.mxu1 %v10065_v27 }
 0x85c   :  { %8923 = vmatprep.subr.bf16.mxu1 %v13903_v59 }
 0x85d   :  { %v1727_v7 = vpop.permute.xlu1 %1726 }
 0x85e   :  { %1734 = vst.msk [vmem:[#allocation3 + $0x40] sm:$0xff] %vm111_vm1, %v1727_v7  ;;  %8400 = vmatmul.mubr.msk.f32.gmra.mrb[40].mxu1 %vm111_vm1, %v1727_v7 }
 0x85f   :  { %8410 = vmatprep.mubr.msk.f32.mxu1 %vm9903_vm0, %v13902_v3 }
 0x8aa   :  { %v1853_v14 = vpop.permute.xlu0 %1852 }
 0x8ab   :  { %8411 = vmatmul.mubr.msk.f32.vlgmr.msra.gmra.mrb[42].mxu1 %vm111_vm1, %v1853_v14 }
 0x8ac   :  { %8413 = vmatprep.mubr.msk.f32.mxu1 %vm9903_vm0, %v13902_v3  ;;  %8925 = vmatpush3.bf16.msra.mxu1 %v10050_v23 }
 0x8ad   :  { %8926 = vmatprep.subr.bf16.mxu1 %v13903_v59 }
 0x8ae   :  { %v1855_v12 = vpop.permute.xlu1 %1854 }
 0x8af   :  { %8414 = vmatmul.mubr.msk.f32.gmra.mrb[44].mxu1 %vm111_vm1, %v1855_v12 }
 0x8b0   :  { %8416 = vmatprep.mubr.msk.f32.mxu1 %vm9903_vm0, %v13902_v3  ;;  %8928 = vmatpush3.bf16.msra.mxu1 %v10065_v27 }
 0x8b1   :  { %8935 = vmatprep.subr.bf16.mxu1 %v13903_v59 }
 0x8b2   :  { %v1857_v24 = vpop.permute.xlu0 %1856 }
 0x8b3   :  { %8417 = vmatmul.mubr.msk.f32.gmra.mrb[46].mxu1 %vm111_vm1, %v1857_v24 }
 0x8b4   :  { %8444 = vmatprep.mubr.msk.f32.mxu1 %vm9903_vm0, %v13902_v3 }
 0x929   :  { %v1835_v62 = vpop.f32.mrb[36].mxu1 }
 0x92a   :  { %v10914_v21 = vadd.f32 %v1835_v62, %v305_v35  ;;  %v8395_v58 = vpop.f32.mrb[37].mxu1 }
 0x92d   :  { %v1840_v20 = vpop.f32.mrb[38].mxu1 }
 0x92e   :  { %v10918_v30 = vadd.f32 %v1840_v20, %v311_v16  ;;  %v8398_v49 = vpop.f32.mrb[39].mxu1 }
 0x931   :  { %v1845_v34 = vpop.f32.mrb[40].mxu1 }
 0x932   :  { %v10922_v55 = vadd.f32 %v1845_v34, %v317_v29  ;;  %v8401_v2 = vpop.f32.mrb[41].mxu1 }
 0x97e   :  { %v1930_v7 = vpop.f32.mrb[42].mxu1 }
 0x97f   :  { %v1944_v14 = vadd.f32 %v1930_v7, %v325_v36  ;;  %v8412_v12 = vpop.f32.mrb[43].mxu1 }
 0x981   :  { %9244 = vtanh.f32 %v1944_v14  ;;  %v7823_v45 = vmul.f32 -1.442695, %v1944_v14 }
 0x982   :  { %v1935_v24 = vpop.f32.mrb[44].mxu1 }
 0x983   :  { %v1945_v35 = vadd.f32 %v1935_v24, %v331_v38  ;;  %v8415_v62 = vpop.f32.mrb[45].mxu1 }
 0x985   :  { %9246 = vtanh.f32 %v1945_v35  ;;  %v7824_v34 = vmul.f32 -1.442695, %v1945_v35 }
 0x986   :  { %v1940_v58 = vpop.f32.mrb[46].mxu1 }
 0x987   :  { %v1946_v16 = vadd.f32 %v1940_v58, %v337_v40  ;;  %v8418_v20 = vpop.f32.mrb[47].mxu1 }
 0x989   :  { %9248 = vtanh.f32 %v1946_v16  ;;  %v7825_v2 = vmul.f32 -1.442695, %v1946_v16 }
 0x98a   :  { %9250 = vpow2.f32 %v7823_v45 }
 0x98b   :  { %v9245_v49 = vpop.eup %9244  ;;  %9252 = vpow2.f32 %v7824_v34 }
 0x98c   :  { %2046 = vrot.lane.b32.xlu1 %v9245_v49, %s9904_s0  ;;  %9254 = vpow2.f32 %v7825_v2  ;;  %v10954_v2 = vld [vmem:[%s13839_s1 + $0x60] sm:$0xff] }
 0x98f   :  { %v9247_v43 = vpop.eup %9246 }
 0x990   :  { %2048 = vrot.lane.b32.xlu0 %v9247_v43, %s9904_s0 }
 0x993   :  { %v9249_v29 = vpop.eup %9248 }
 0x994   :  { %2050 = vrot.lane.b32.xlu1 %v9249_v29, %s9904_s0  ;;  %v9251_v47 = vpop.eup %9250 }
 0x995   :  { %v2028_v36 = vadd.f32 1.0, %v9251_v47  ;;  %v9253_v7 = vpop.eup %9252  ;;  %v10960_v47 = vld [vmem:[%s13839_s1 + $0x68] sm:$0xff] }
 0x996   :  { %v2029_v12 = vadd.f32 1.0, %v9253_v7  ;;  %v9255_v38 = vpop.eup %9254  ;;  %v7820_v7 = vmul.f32 -1.442695, %v10914_v21 }
 0x997   :  { %9256 = vrcp.f32 %v2028_v36  ;;  %v2030_v24 = vadd.f32 1.0, %v9255_v38  ;;  %v10966_v36 = vld [vmem:[%s13839_s1 + $0x70] sm:$0xff] }
 0x998   :  { %9258 = vrcp.f32 %v2029_v12  ;;  %v7822_v12 = vmul.f32 -1.442695, %v10922_v55 }
 0x999   :  { %9260 = vrcp.f32 %v2030_v24  ;;  %v1710_v24 = vsub.f32 %v10804_v17, %v10793_v52  ;;  %v1712_v17 = vsub.f32 %v10817_v56, %v10810_v5 }
 0x99a   :  { %9262 = vtanh.f32 %v10914_v21 }
 0x99b   :  { %9264 = vtanh.f32 %v10918_v30 }
 0x99c   :  { %9266 = vtanh.f32 %v10922_v55 }
 0x99d   :  { %9268 = vpow2.f32 %v7820_v7 }
 0x99e   :  { %9270 = vpow2.f32 %v7822_v12 }
 0x9a1   :  { %v10933_v62 = vpop.eup %9256 }
 0x9a2   :  { %v10939_v35 = vpop.eup %9258 }
 0x9a3   :  { %v10944_v20 = vpop.eup %9260 }
 0x9a4   :  { %v9263_v29 = vpop.eup %9262 }
 0x9a5   :  { %v9265_v45 = vpop.eup %9264 }
 0x9a6   :  { %v9267_v34 = vpop.eup %9266 }
 0x9a7   :  { %v9269_v38 = vpop.eup %9268 }
 0x9fe   :  { %v2047_v40 = vpop.permute.xlu1 %2046 }
 0x9ff   :  { %v2055_v14 = vmul.f32 %v10933_v62, %v2047_v40  ;;  %v7821_v40 = vmul.f32 -1.442695, %v10918_v30 }
 0xa01   :  { %2061 = vrot.lane.b32.xlu0 %v2055_v14, %s9906_s3  ;;  %v1713_v14 = vmul.f32 %v1710_v24, %v10853_v32  ;;  %9272 = vpow2.f32 %v7821_v40 }
 0xa02   :  { %v2049_v58 = vpop.permute.xlu0 %2048 }
 0xa03   :  { %v2056_v16 = vmul.f32 %v10939_v35, %v2049_v58  ;;  %v1956_v58 = vadd.f32 1.0, %v9269_v38  ;;  %v10978_v21 = vadd.f32 %v1713_v14, %v10793_v52 }
 0xa05   :  { %2063 = vrot.lane.b32.xlu1 %v2056_v16, %s9906_s3  ;;  %v9271_v16 = vpop.eup %9270  ;;  %9274 = vrcp.f32 %v1956_v58  ;;  %v2040_v30 = vmul.f32 %v10933_v62, %v10978_v21 }
 0xa06   :  { %v2051_v49 = vpop.permute.xlu1 %2050 }
 0xa07   :  { %v2057_v43 = vmul.f32 %v10944_v20, %v2051_v49  ;;  %v1711_v49 = vsub.f32 %v10812_v4, %v10801_v57  ;;  %v1715_v4 = vmul.f32 %v1712_v17, %v10873_v26 }
 0xa09   :  { %1974 = vrot.lane.b32.xlu1 %v9263_v29, %s9904_s0  ;;  %2065 = vrot.lane.b32.xlu0 %v2057_v43, %s9906_s3  ;;  %v1714_v55 = vmul.f32 %v1711_v49, %v10859_v8  ;;  %v1958_v43 = vadd.f32 1.0, %v9271_v16  ;;  %v10995_v56 = vadd.f32 %v1715_v4, %v10810_v5 }
 0xa0b   :  { %v10986_v29 = vadd.f32 %v1714_v55, %v10801_v57  ;;  %9276 = vrcp.f32 %v1958_v43  ;;  %v9273_v7 = vpop.eup %9272  ;;  %v2042_v57 = vmul.f32 %v10944_v20, %v10995_v56 }
 0xa0c   :  { %v1957_v24 = vadd.f32 1.0, %v9273_v7 }
 0xa0d   :  { %1978 = vrot.lane.b32.xlu1 %v9267_v34, %s9904_s0  ;;  %1976 = vrot.lane.b32.xlu0 %v9265_v45, %s9904_s0  ;;  %v2041_v52 = vmul.f32 %v10939_v35, %v10986_v29 }
 0xa0f   :  { %v11002_v26 = vpop.eup %9274 }
 0xa11   :  { %2137 = vperm.xlu0 %9098, %v10954_v2  }
 0xa15   :  { %2142 = vperm.xlu0 %9098, %v10960_v47   ;;  %v11009_v5 = vpop.eup %9276 }
 0xa19   :  { %2147 = vperm.xlu0 %9098, %v10966_v36  }
 0xa73   :  { %v2062_v32 = vpop.permute.xlu0 %2061 }
 0xa74   :  { %v10989_v45 = vadd.f32 %v2062_v32, %v2040_v30 }
 0xa76   :  { %9278 = vtanh.f32 %v10989_v45 }
 0xa77   :  { %v2064_v8 = vpop.permute.xlu1 %2063 }
 0xa78   :  { %v10997_v34 = vadd.f32 %v2064_v8, %v2041_v52  ;;  %v1677_v8 = vsub.f32 %v10768_v63, %v10757_v33 }
 0xa7a   :  { %9280 = vtanh.f32 %v10997_v34  ;;  %v1680_v7 = vmul.f32 %v1677_v8, %v10823_v13  ;;  %v1679_v13 = vsub.f32 %v10781_v48, %v10774_v50 }
 0xa7b   :  { %v1975_v12 = vpop.permute.xlu1 %1974  ;;  %v2066_v38 = vpop.permute.xlu0 %2065 }
 0xa7c   :  { %v1983_v40 = vmul.f32 %v11002_v26, %v1975_v12  ;;  %v11005_v14 = vadd.f32 %v2066_v38, %v2042_v57 }
 0xa7e   :  { %9282 = vtanh.f32 %v11005_v14  ;;  %1989 = vrot.lane.b32.xlu0 %v1983_v40, %s9906_s3  ;;  %v1678_v40 = vsub.f32 %v10776_v25, %v10765_v1  ;;  %v1682_v25 = vmul.f32 %v1679_v13, %v10843_v22  ;;  %v11091_v13 = vld [vmem:[%s13839_s1 + $0x50] sm:$0xff] }
 0xa7f   :  { %v1979_v58 = vpop.permute.xlu1 %1978  ;;  %9284 = vrcp.f32 %v1957_v24  ;;  %v1977_v17 = vpop.permute.xlu0 %1976  ;;  %v11031_v24 = vadd.f32 %v1680_v7, %v10757_v33 }
 0xa80   :  { %v9279_v16 = vpop.eup %9278  ;;  %v1985_v49 = vmul.f32 %v11009_v5, %v1979_v58  ;;  %v11059_v22 = vadd.f32 %v1682_v25, %v10774_v50  ;;  %v11077_v50 = vld [vmem:[%s13839_s1 + $0x48] sm:$0xff] }
 0xa81   :  { %2079 = vrot.lane.b32.xlu1 %v9279_v16, %s9904_s0 }
 0xa82   :  { %1993 = vrot.lane.b32.xlu0 %v1985_v49, %s9906_s3  ;;  %v1968_v49 = vmul.f32 %v11002_v26, %v11031_v24 }
 0xa84   :  { %v9281_v55 = vpop.eup %9280 }
 0xa85   :  { %2081 = vrot.lane.b32.xlu1 %v9281_v55, %s9904_s0  ;;  %v1681_v55 = vmul.f32 %v1678_v40, %v10829_v18 }
 0xa87   :  { %v11051_v7 = vadd.f32 %v1681_v55, %v10765_v1 }
 0xa88   :  { %v9283_v43 = vpop.eup %9282 }
 0xa89   :  { %2083 = vrot.lane.b32.xlu1 %v9283_v43, %s9904_s0  ;;  %v11016_v30 = vpop.eup %9284 }
 0xa8a   :  { %v1984_v32 = vmul.f32 %v11016_v30, %v1977_v17 }
 0xa8d   :  { %1991 = vrot.lane.b32.xlu1 %v1984_v32, %s9906_s3 }
 0xa90   :  { %v11020_v4 = vpop.permute.xlu0 %2137 }
 0xa94   :  { %v11022_v52 = vpop.permute.xlu0 %2142 }
 0xa98   :  { %v11027_v57 = vpop.permute.xlu0 %2147 }
 0xaf0   :  { %v1990_v58 = vpop.permute.xlu0 %1989 }
 0xaf1   :  { %v11043_v43 = vadd.f32 %v1990_v58, %v1968_v49 }
 0xaf3   :  { %v2080_v12 = vpop.permute.xlu1 %2079  ;;  %9286 = vtanh.f32 %v11043_v43 }
 0xaf4   :  { %v2088_v38 = vmul.f32 %v10933_v62, %v2080_v12  ;;  %v1969_v12 = vmul.f32 %v11016_v30, %v11051_v7 }
 0xaf6   :  { %v2132_v16 = vsub.f32 %v2088_v38, %v10863_v0  ;;  %v1994_v38 = vpop.permute.xlu0 %1993 }
 0xaf7   :  { %v2082_v63 = vpop.permute.xlu1 %2081 }
 0xaf8   :  { %v2150_v62 = vmul.f32 %v11020_v4, %v2132_v16  ;;  %v2089_v33 = vmul.f32 %v10939_v35, %v2082_v63 }
 0xafa   :  { %v2133_v17 = vsub.f32 %v2089_v33, %v10871_v9  ;;  %v11048_v32 = vadd.f32 %v2150_v62, %v10863_v0  ;;  %v11099_v62 = vld [vmem:[%s13839_s1 + $0x58] sm:$0xff] }
 0xafb   :  { %v2084_v8 = vpop.permute.xlu1 %2083 }
 0xafc   :  { %v2151_v48 = vmul.f32 %v11022_v52, %v2133_v17  ;;  %v2090_v18 = vmul.f32 %v10944_v20, %v2084_v8  ;;  %2292 = vrot.lane.b32.xlu1 %v11048_v32, %s9906_s3  ;;  %v1970_v20 = vmul.f32 %v11009_v5, %v11059_v22 }
 0xafd   :  { %v9287_v55 = vpop.eup %9286 }
 0xafe   :  { %v2134_v35 = vsub.f32 %v2090_v18, %v10879_v61  ;;  %v11065_v1 = vadd.f32 %v2151_v48, %v10871_v9  ;;  %v11079_v49 = vadd.f32 %v1994_v38, %v1970_v20 }
 0xaff   :  { %v1992_v40 = vpop.permute.xlu1 %1991 }
 0xb00   :  { %v2152_v58 = vmul.f32 %v11027_v57, %v2134_v35  ;;  %v11070_v16 = vadd.f32 %v1992_v40, %v1969_v12  ;;  %2294 = vrot.lane.b32.xlu0 %v11065_v1, %s9906_s3 }
 0xb02   :  { %9288 = vtanh.f32 %v11070_v16  ;;  %v11083_v63 = vadd.f32 %v2152_v58, %v10879_v61 }
 0xb03   :  { %9290 = vtanh.f32 %v11079_v49 }
 0xb04   :  { %2104 = vperm.xlu0 %9098, %v11077_v50   ;;  %2296 = vrot.lane.b32.xlu1 %v11083_v63, %s9906_s3 }
 0xb08   :  { %2109 = vperm.xlu0 %9098, %v11091_v13   ;;  %2007 = vrot.lane.b32.xlu1 %v9287_v55, %s9904_s0 }
 0xb0c   :  { %v9289_v33 = vpop.eup %9288  ;;  %2114 = vperm.xlu0 %9098, %v11099_v62  }
 0xb0d   :  { %2009 = vrot.lane.b32.xlu1 %v9289_v33, %s9904_s0  ;;  %v9291_v25 = vpop.eup %9290 }
 0xb11   :  { %2011 = vrot.lane.b32.xlu1 %v9291_v25, %s9904_s0 }
 0xb6e   :  { %v2293_v17 = vpop.permute.xlu1 %2292 }
 0xb6f   :  { %8445 = vmatmul.mubr.msk.f32.vlgmr.msra.gmra.mrb[48].mxu1 %vm111_vm1, %v2293_v17 }
 0xb70   :  { %8447 = vmatprep.mubr.msk.f32.mxu1 %vm9903_vm0, %v13902_v3  ;;  %8937 = vmatpush3.bf16.msra.mxu1 %v10050_v23 }
 0xb71   :  { %8938 = vmatprep.subr.bf16.mxu1 %v13903_v59 }
 0xb72   :  { %v2295_v8 = vpop.permute.xlu0 %2294 }
 0xb73   :  { %8448 = vmatmul.mubr.msk.f32.gmra.mrb[50].mxu1 %vm111_vm1, %v2295_v8 }
 0xb74   :  { %8450 = vmatprep.mubr.msk.f32.mxu1 %vm9903_vm0, %v13902_v3  ;;  %8940 = vmatpush3.bf16.msra.mxu1 %v10065_v27 }
 0xb75   :  { %8947 = vmatprep.subr.bf16.mxu1 %v13903_v59 }
 0xb76   :  { %v2297_v48 = vpop.permute.xlu1 %2296 }
 0xb77   :  { %8451 = vmatmul.mubr.msk.f32.gmra.mrb[52].mxu1 %vm111_vm1, %v2297_v48 }
 0xb78   :  { %8478 = vmatprep.mubr.msk.f32.mxu1 %vm9903_vm0, %v13902_v3 }
 0xb7a   :  { %v2008_v18 = vpop.permute.xlu1 %2007 }
 0xb7b   :  { %v2016_v35 = vmul.f32 %v11002_v26, %v2008_v18 }
 0xb7d   :  { %v2099_v38 = vsub.f32 %v2016_v35, %v10833_v51 }
 0xb7f   :  { %v2010_v12 = vpop.permute.xlu1 %2009 }
 0xb80   :  { %v2017_v40 = vmul.f32 %v11016_v30, %v2010_v12  ;;  %v307_v12 = vadd.f32 %v10266_v37, %v10316_v6 }
 0xb82   :  { %v2100_v33 = vsub.f32 %v2017_v40, %v10841_v11 }
 0xb83   :  { %v11120_v20 = vpop.permute.xlu0 %2104  ;;  %v2012_v58 = vpop.permute.xlu1 %2011 }
 0xb84   :  { %v2117_v55 = vmul.f32 %v11120_v20, %v2099_v38  ;;  %v2018_v17 = vmul.f32 %v11009_v5, %v2012_v58 }
 0xb86   :  { %v11125_v25 = vadd.f32 %v2117_v55, %v10833_v51  ;;  %v2101_v30 = vsub.f32 %v2018_v17, %v10849_v53  ;;  %v313_v55 = vadd.f32 %v10270_v39, %v10316_v6 }
 0xb87   :  { %v11128_v8 = vpop.permute.xlu0 %2109 }
 0xb88   :  { %v2118_v26 = vmul.f32 %v11128_v8, %v2100_v33  ;;  %2168 = vrot.lane.b32.xlu0 %v11125_v25, %s9906_s3 }
 0xb8a   :  { %v11135_v48 = vadd.f32 %v2118_v26, %v10841_v11 }
 0xb8b   :  { %v11137_v18 = vpop.permute.xlu0 %2114 }
 0xb8c   :  { %v2119_v35 = vmul.f32 %v11137_v18, %v2101_v30  ;;  %2170 = vrot.lane.b32.xlu1 %v11135_v48, %s9906_s3  ;;  %v319_v30 = vadd.f32 %v10274_v41, %v10316_v6 }
 0xb8e   :  { %v11143_v51 = vadd.f32 %v2119_v35, %v10849_v53 }
 0xb90   :  { %2172 = vrot.lane.b32.xlu0 %v11143_v51, %s9906_s3 }
 0xbfa   :  { %v2169_v5 = vpop.permute.xlu0 %2168 }
 0xbfb   :  { %2178 = vst.msk [vmem:[#allocation3 + $0x48] sm:$0xff] %vm111_vm1, %v2169_v5  ;;  %8428 = vmatmul.mubr.msk.f32.vlgmr.msra.gmra.mrb[48].mxu0 %vm111_vm1, %v2169_v5 }
 0xbfc   :  { %8430 = vmatprep.mubr.msk.f32.mxu0 %vm9903_vm0, %v13902_v3  ;;  %8931 = vmatpush3.bf16.msra.mxu0 %v10010_v10 }
 0xbfd   :  { %8932 = vmatprep.subr.bf16.mxu0 %v13903_v59 }
 0xbfe   :  { %v2171_v11 = vpop.permute.xlu1 %2170 }
 0xbff   :  { %2179 = vst.msk [vmem:[#allocation3 + $0x50] sm:$0xff] %vm111_vm1, %v2171_v11  ;;  %8431 = vmatmul.mubr.msk.f32.gmra.mrb[50].mxu0 %vm111_vm1, %v2171_v11 }
 0xc00   :  { %8433 = vmatprep.mubr.msk.f32.mxu0 %vm9903_vm0, %v13902_v3  ;;  %8934 = vmatpush3.bf16.msra.mxu0 %v10033_v19 }
 0xc01   :  { %8941 = vmatprep.subr.bf16.mxu0 %v13903_v59 }
 0xc02   :  { %v2173_v53 = vpop.permute.xlu0 %2172 }
 0xc03   :  { %2180 = vst.msk [vmem:[#allocation3 + $0x58] sm:$0xff] %vm111_vm1, %v2173_v53  ;;  %8434 = vmatmul.mubr.msk.f32.gmra.mrb[52].mxu0 %vm111_vm1, %v2173_v53 }
 0xc04   :  { %8461 = vmatprep.mubr.msk.f32.mxu0 %vm9903_vm0, %v13902_v3 }
 0xc42   :  { %v2370_v38 = vpop.f32.mrb[48].mxu1 }
 0xc43   :  { %v2384_v40 = vadd.f32 %v2370_v38, %v307_v12  ;;  %v8446_v58 = vpop.f32.mrb[49].mxu1 }
 0xc45   :  { %9292 = vtanh.f32 %v2384_v40  ;;  %v7841_v39 = vmul.f32 -1.442695, %v2384_v40 }
 0xc46   :  { %v2375_v33 = vpop.f32.mrb[50].mxu1 }
 0xc47   :  { %v2385_v17 = vadd.f32 %v2375_v33, %v313_v55  ;;  %v8449_v26 = vpop.f32.mrb[51].mxu1 }
 0xc49   :  { %9294 = vtanh.f32 %v2385_v17  ;;  %v7842_v38 = vmul.f32 -1.442695, %v2385_v17 }
 0xc4a   :  { %v2380_v35 = vpop.f32.mrb[52].mxu1 }
 0xc4b   :  { %v2386_v5 = vadd.f32 %v2380_v35, %v319_v30  ;;  %v8452_v11 = vpop.f32.mrb[53].mxu1 }
 0xc4d   :  { %9296 = vtanh.f32 %v2386_v5  ;;  %v7843_v58 = vmul.f32 -1.442695, %v2386_v5 }
 0xc4e   :  { %9298 = vpow2.f32 %v7841_v39 }
 0xc4f   :  { %v9293_v53 = vpop.eup %9292  ;;  %9300 = vpow2.f32 %v7842_v38 }
 0xc50   :  { %2486 = vrot.lane.b32.xlu1 %v9293_v53, %s9904_s0  ;;  %9302 = vpow2.f32 %v7843_v58  ;;  %v323_v58 = vadd.f32 %v10276_v42, %v10217_v54 }
 0xc53   :  { %v9295_v37 = vpop.eup %9294 }
 0xc54   :  { %2488 = vrot.lane.b32.xlu0 %v9295_v37, %s9904_s0 }
 0xc57   :  { %v9297_v12 = vpop.eup %9296 }
 0xc58   :  { %2490 = vrot.lane.b32.xlu1 %v9297_v12, %s9904_s0  ;;  %v9299_v41 = vpop.eup %9298 }
 0xc59   :  { %v2468_v55 = vadd.f32 1.0, %v9299_v41  ;;  %v9301_v33 = vpop.eup %9300 }
 0xc5a   :  { %v2469_v26 = vadd.f32 1.0, %v9301_v33  ;;  %v9303_v30 = vpop.eup %9302 }
 0xc5b   :  { %9304 = vrcp.f32 %v2468_v55  ;;  %v2470_v35 = vadd.f32 1.0, %v9303_v30 }
 0xc5c   :  { %9306 = vrcp.f32 %v2469_v26  ;;  %v329_v26 = vadd.f32 %v10280_v44, %v10217_v54  ;;  %v2156_v44 = vsub.f32 %v10989_v45, %v10978_v21 }
 0xc5d   :  { %9308 = vrcp.f32 %v2470_v35 }
 0xc65   :  { %v11172_v11 = vpop.eup %9304 }
 0xc66   :  { %v11176_v40 = vpop.eup %9306 }
 0xc67   :  { %v11180_v12 = vpop.eup %9308 }
 0xcc2   :  { %v2487_v53 = vpop.permute.xlu1 %2486 }
 0xcc3   :  { %v2495_v37 = vmul.f32 %v11172_v11, %v2487_v53 }
 0xcc5   :  { %2501 = vrot.lane.b32.xlu0 %v2495_v37, %s9906_s3  ;;  %v335_v37 = vadd.f32 %v10284_v46, %v10217_v54 }
 0xcc6   :  { %v2489_v17 = vpop.permute.xlu0 %2488 }
 0xcc7   :  { %v2496_v5 = vmul.f32 %v11176_v40, %v2489_v17 }
 0xcc9   :  { %2503 = vrot.lane.b32.xlu1 %v2496_v5, %s9906_s3 }
 0xcca   :  { %v2491_v39 = vpop.permute.xlu1 %2490 }
 0xccb   :  { %v2497_v38 = vmul.f32 %v11180_v12, %v2491_v39 }
 0xccd   :  { %2505 = vrot.lane.b32.xlu0 %v2497_v38, %s9906_s3 }
 0xcce   :  { %v2275_v41 = vpop.f32.mrb[48].mxu0 }
 0xccf   :  { %v2289_v55 = vadd.f32 %v2275_v41, %v323_v58  ;;  %v8429_v33 = vpop.f32.mrb[49].mxu0  ;;  %v2159_v41 = vmul.f32 %v2156_v44, %v11020_v4 }
 0xcd0   :  { %v2157_v33 = vsub.f32 %v10997_v34, %v10986_v29 }
 0xcd1   :  { %9310 = vtanh.f32 %v2289_v55  ;;  %v7838_v46 = vmul.f32 -1.442695, %v2289_v55 }
 0xcd2   :  { %v2280_v30 = vpop.f32.mrb[50].mxu0 }
 0xcd3   :  { %v2290_v35 = vadd.f32 %v2280_v30, %v329_v26  ;;  %v8432_v53 = vpop.f32.mrb[51].mxu0  ;;  %v11202_v30 = vadd.f32 %v2159_v41, %v10978_v21 }
 0xcd5   :  { %9312 = vtanh.f32 %v2290_v35  ;;  %v7839_v26 = vmul.f32 -1.442695, %v2290_v35 }
 0xcd6   :  { %v2285_v17 = vpop.f32.mrb[52].mxu0 }
 0xcd7   :  { %v2291_v5 = vadd.f32 %v2285_v17, %v335_v37  ;;  %v8435_v39 = vpop.f32.mrb[53].mxu0 }
 0xcd9   :  { %9314 = vtanh.f32 %v2291_v5  ;;  %v7840_v45 = vmul.f32 -1.442695, %v2291_v5 }
 0xcda   :  { %9316 = vpow2.f32 %v7838_v46 }
 0xcdb   :  { %v9311_v42 = vpop.eup %9310  ;;  %9318 = vpow2.f32 %v7839_v26 }
 0xcdc   :  { %2414 = vrot.lane.b32.xlu1 %v9311_v42, %s9904_s0 }
 0xcdf   :  { %v9313_v38 = vpop.eup %9312 }
 0xce0   :  { %2416 = vrot.lane.b32.xlu0 %v9313_v38, %s9904_s0 }
 0xce3   :  { %v9315_v58 = vpop.eup %9314 }
 0xce4   :  { %2418 = vrot.lane.b32.xlu1 %v9315_v58, %s9904_s0  ;;  %2575 = vperm.xlu0 %9098, %v11077_v50   ;;  %v2160_v50 = vmul.f32 %v2157_v33, %v11022_v52  ;;  %v9317_v37 = vpop.eup %9316 }
 0xce5   :  { %v2396_v17 = vadd.f32 1.0, %v9317_v37  ;;  %v9319_v39 = vpop.eup %9318 }
 0xce6   :  { %v11210_v4 = vadd.f32 %v2160_v50, %v10986_v29  ;;  %v2397_v38 = vadd.f32 1.0, %v9319_v39 }
 0xce8   :  { %2580 = vperm.xlu0 %9098, %v11091_v13   ;;  %v2158_v13 = vsub.f32 %v11005_v14, %v10995_v56  ;;  %v2481_v21 = vmul.f32 %v11176_v40, %v11210_v4 }
 0xcea   :  { %v2161_v34 = vmul.f32 %v2158_v13, %v11027_v57 }
 0xcec   :  { %2585 = vperm.xlu0 %9098, %v11099_v62   ;;  %v2480_v62 = vmul.f32 %v11172_v11, %v11202_v30  ;;  %v11219_v52 = vadd.f32 %v2161_v34, %v10995_v56 }
 0xcee   :  { %v2482_v29 = vmul.f32 %v11180_v12, %v11219_v52 }
 0xd37   :  { %v2502_v55 = vpop.permute.xlu0 %2501 }
 0xd38   :  { %v11213_v35 = vadd.f32 %v2502_v55, %v2480_v62 }
 0xd3a   :  { %9320 = vtanh.f32 %v11213_v35 }
 0xd3b   :  { %9322 = vpow2.f32 %v7840_v45  ;;  %v2504_v14 = vpop.permute.xlu1 %2503 }
 0xd3c   :  { %v11221_v53 = vadd.f32 %v2504_v14, %v2481_v21 }
 0xd3e   :  { %9324 = vtanh.f32 %v11221_v53 }
 0xd3f   :  { %v2506_v57 = vpop.permute.xlu0 %2505 }
 0xd40   :  { %v11226_v5 = vadd.f32 %v2506_v57, %v2482_v29  ;;  %v2123_v57 = vsub.f32 %v11043_v43, %v11031_v24 }
 0xd42   :  { %9326 = vtanh.f32 %v11226_v5 }
 0xd43   :  { %9328 = vrcp.f32 %v2396_v17 }
 0xd44   :  { %v9321_v42 = vpop.eup %9320  ;;  %9330 = vrcp.f32 %v2397_v38 }
 0xd45   :  { %v9323_v56 = vpop.eup %9322  ;;  %2519 = vrot.lane.b32.xlu1 %v9321_v42, %s9904_s0  ;;  %v2126_v42 = vmul.f32 %v2123_v57, %v11120_v20 }
 0xd46   :  { %v2398_v44 = vadd.f32 1.0, %v9323_v56 }
 0xd48   :  { %v9325_v58 = vpop.eup %9324  ;;  %9332 = vrcp.f32 %v2398_v44 }
 0xd49   :  { %2521 = vrot.lane.b32.xlu1 %v9325_v58, %s9904_s0  ;;  %v2124_v58 = vsub.f32 %v11070_v16, %v11051_v7  ;;  %v2125_v16 = vsub.f32 %v11079_v49, %v11059_v22 }
 0xd4b   :  { %v2127_v20 = vmul.f32 %v2124_v58, %v11128_v8 }
 0xd4c   :  { %v9327_v46 = vpop.eup %9326 }
 0xd4d   :  { %2523 = vrot.lane.b32.xlu1 %v9327_v46, %s9904_s0  ;;  %v11232_v41 = vpop.eup %9328  ;;  %v11280_v8 = vadd.f32 %v2127_v20, %v11051_v7 }
 0xd4e   :  { %v2415_v33 = vpop.permute.xlu1 %2414  ;;  %v11236_v50 = vpop.eup %9330 }
 0xd4f   :  { %v2423_v26 = vmul.f32 %v11232_v41, %v2415_v33  ;;  %v11264_v33 = vadd.f32 %v2126_v42, %v11031_v24  ;;  %v2409_v49 = vmul.f32 %v11236_v50, %v11280_v8 }
 0xd51   :  { %2429 = vrot.lane.b32.xlu0 %v2423_v26, %s9906_s3 }
 0xd52   :  { %v2417_v13 = vpop.permute.xlu0 %2416  ;;  %v11240_v45 = vpop.eup %9332 }
 0xd53   :  { %v2424_v62 = vmul.f32 %v11236_v50, %v2417_v13 }
 0xd55   :  { %2431 = vrot.lane.b32.xlu1 %v2424_v62, %s9906_s3  ;;  %v2408_v62 = vmul.f32 %v11232_v41, %v11264_v33 }
 0xd56   :  { %v2419_v55 = vpop.permute.xlu1 %2418 }
 0xd57   :  { %v2425_v34 = vmul.f32 %v11240_v45, %v2419_v55 }
 0xd59   :  { %2433 = vrot.lane.b32.xlu0 %v2425_v34, %s9906_s3 }
 0xd63   :  { %v11244_v21 = vpop.permute.xlu0 %2575 }
 0xd67   :  { %v11247_v29 = vpop.permute.xlu0 %2580 }
 0xd6b   :  { %v11261_v46 = vpop.permute.xlu0 %2585 }
 0xdb7   :  { %v2520_v14 = vpop.permute.xlu1 %2519 }
 0xdb8   :  { %v2528_v37 = vmul.f32 %v11172_v11, %v2520_v14 }
 0xdba   :  { %v2570_v17 = vsub.f32 %v2528_v37, %v11048_v32 }
 0xdbb   :  { %v2522_v39 = vpop.permute.xlu1 %2521 }
 0xdbc   :  { %v2588_v38 = vmul.f32 %v11244_v21, %v2570_v17  ;;  %v2529_v56 = vmul.f32 %v11176_v40, %v2522_v39 }
 0xdbe   :  { %v2571_v44 = vsub.f32 %v2529_v56, %v11065_v1  ;;  %v11259_v11 = vadd.f32 %v2588_v38, %v11048_v32 }
 0xdbf   :  { %v2524_v43 = vpop.permute.xlu1 %2523 }
 0xdc0   :  { %v2589_v26 = vmul.f32 %v11247_v29, %v2571_v44  ;;  %v2530_v40 = vmul.f32 %v11180_v12, %v2524_v43  ;;  %2728 = vrot.lane.b32.xlu1 %v11259_v11, %s9906_s3  ;;  %v2128_v12 = vmul.f32 %v2125_v16, %v11137_v18 }
 0xdc2   :  { %v2572_v13 = vsub.f32 %v2530_v40, %v11083_v63  ;;  %v11277_v24 = vadd.f32 %v2589_v26, %v11065_v1  ;;  %v11295_v7 = vadd.f32 %v2128_v12, %v11059_v22 }
 0xdc3   :  { %v2430_v55 = vpop.permute.xlu0 %2429 }
 0xdc4   :  { %v2590_v34 = vmul.f32 %v11261_v46, %v2572_v13  ;;  %v11284_v14 = vadd.f32 %v2430_v55, %v2408_v62  ;;  %2730 = vrot.lane.b32.xlu0 %v11277_v24, %s9906_s3  ;;  %v2410_v17 = vmul.f32 %v11240_v45, %v11295_v7 }
 0xdc6   :  { %9334 = vtanh.f32 %v11284_v14  ;;  %v11292_v37 = vadd.f32 %v2590_v34, %v11083_v63 }
 0xdc7   :  { %v2432_v57 = vpop.permute.xlu1 %2431 }
 0xdc8   :  { %v11297_v18 = vadd.f32 %v2432_v57, %v2409_v49  ;;  %2542 = vperm.xlu0 %9098, %v10954_v2   ;;  %2732 = vrot.lane.b32.xlu1 %v11292_v37, %s9906_s3 }
 0xdca   :  { %9336 = vtanh.f32 %v11297_v18 }
 0xdcb   :  { %v2434_v39 = vpop.permute.xlu0 %2433 }
 0xdcc   :  { %v11305_v42 = vadd.f32 %v2434_v39, %v2410_v17  ;;  %2547 = vperm.xlu0 %9098, %v10960_v47   ;;  %v289_v39 = vadd.f32 %v10254_v31, %v10316_v6 }
 0xdce   :  { %9338 = vtanh.f32 %v11305_v42 }
 0xdd0   :  { %v9335_v22 = vpop.eup %9334  ;;  %2552 = vperm.xlu0 %9098, %v10966_v36  }
 0xdd1   :  { %2447 = vrot.lane.b32.xlu1 %v9335_v22, %s9904_s0 }
 0xdd4   :  { %v9337_v2 = vpop.eup %9336 }
 0xdd5   :  { %2449 = vrot.lane.b32.xlu1 %v9337_v2, %s9904_s0 }
 0xdd8   :  { %v9339_v38 = vpop.eup %9338 }
 0xdd9   :  { %2451 = vrot.lane.b32.xlu1 %v9339_v38, %s9904_s0 }
 0xe32   :  { %v2729_v56 = vpop.permute.xlu1 %2728 }
 0xe33   :  { %8479 = vmatmul.mubr.msk.f32.vlgmr.msra.gmra.mrb[54].mxu1 %vm111_vm1, %v2729_v56  ;;  %v13905_v56 = vld [vmem:[#allocation14_spill] sm:$0xff] }
 0xe34   :  { %8481 = vmatprep.mubr.msk.f32.mxu1 %vm9903_vm0, %v13902_v3  ;;  %8949 = vmatpush3.bf16.msra.mxu1 %v10050_v23 }
 0xe35   :  { %8950 = vmatprep.subr.bf16.mxu1 %v13903_v59 }
 0xe36   :  { %v2731_v47 = vpop.permute.xlu0 %2730 }
 0xe37   :  { %8482 = vmatmul.mubr.msk.f32.gmra.mrb[56].mxu1 %vm111_vm1, %v2731_v47  ;;  %v295_v47 = vadd.f32 %v13905_v56, %v10316_v6 }
 0xe38   :  { %8484 = vmatprep.mubr.msk.f32.mxu1 %vm9903_vm0, %v13902_v3  ;;  %8952 = vmatpush3.bf16.msra.mxu1 %v10065_v27 }
 0xe39   :  { %8959 = vmatprep.subr.bf16.mxu1 %v13903_v59 }
 0xe3a   :  { %v2733_v36 = vpop.permute.xlu1 %2732 }
 0xe3b   :  { %8485 = vmatmul.mubr.msk.f32.gmra.mrb[58].mxu1 %vm111_vm1, %v2733_v36 }
 0xe3c   :  { %8512 = vmatprep.mubr.msk.f32.mxu1 %vm9903_vm0, %v13902_v3 }
 0xe43   :  { %v2448_v58 = vpop.permute.xlu1 %2447 }
 0xe44   :  { %v2456_v44 = vmul.f32 %v11232_v41, %v2448_v58 }
 0xe46   :  { %v2537_v43 = vsub.f32 %v2456_v44, %v11125_v25 }
 0xe47   :  { %v11328_v20 = vpop.permute.xlu0 %2542  ;;  %v2450_v26 = vpop.permute.xlu1 %2449 }
 0xe48   :  { %v2555_v40 = vmul.f32 %v11328_v20, %v2537_v43  ;;  %v2457_v16 = vmul.f32 %v11236_v50, %v2450_v26  ;;  %v13906_v43 = vld [vmem:[#allocation15_spill] sm:$0xff] }
 0xe49   :  { %v301_v26 = vadd.f32 %v13906_v43, %v10316_v6 }
 0xe4a   :  { %v11333_v13 = vadd.f32 %v2555_v40, %v11125_v25  ;;  %v2538_v62 = vsub.f32 %v2457_v16, %v11135_v48 }
 0xe4b   :  { %v11336_v55 = vpop.permute.xlu0 %2547  ;;  %v2452_v12 = vpop.permute.xlu1 %2451 }
 0xe4c   :  { %v2556_v34 = vmul.f32 %v11336_v55, %v2538_v62  ;;  %v2458_v41 = vmul.f32 %v11240_v45, %v2452_v12  ;;  %2606 = vrot.lane.b32.xlu0 %v11333_v13, %s9906_s3 }
 0xe4e   :  { %v11343_v49 = vadd.f32 %v2556_v34, %v11135_v48  ;;  %v2539_v50 = vsub.f32 %v2458_v41, %v11143_v51 }
 0xe4f   :  { %v11346_v57 = vpop.permute.xlu0 %2552 }
 0xe50   :  { %v2557_v25 = vmul.f32 %v11346_v57, %v2539_v50  ;;  %2608 = vrot.lane.b32.xlu1 %v11343_v49, %s9906_s3 }
 0xe52   :  { %v11352_v17 = vadd.f32 %v2557_v25, %v11143_v51 }
 0xe54   :  { %2610 = vrot.lane.b32.xlu0 %v11352_v17, %s9906_s3 }
 0xebe   :  { %v11356_v45 = vpop.permute.xlu0 %2606 }
 0xebf   :  { %8462 = vmatmul.mubr.msk.f32.vlgmr.msra.gmra.mrb[54].mxu0 %vm111_vm1, %v11356_v45 }
 0xec0   :  { %8464 = vmatprep.mubr.msk.f32.mxu0 %vm9903_vm0, %v13902_v3  ;;  %8943 = vmatpush3.bf16.msra.mxu0 %v10010_v10 }
 0xec1   :  { %8944 = vmatprep.subr.bf16.mxu0 %v13903_v59 }
 0xec2   :  { %v11364_v48 = vpop.permute.xlu1 %2608 }
 0xec3   :  { %8465 = vmatmul.mubr.msk.f32.gmra.mrb[56].mxu0 %vm111_vm1, %v11364_v48 }
 0xec4   :  { %8467 = vmatprep.mubr.msk.f32.mxu0 %vm9903_vm0, %v13902_v3  ;;  %8946 = vmatpush3.bf16.msra.mxu0 %v10033_v19 }
 0xec5   :  { %8953 = vmatprep.subr.bf16.mxu0 %v13903_v59 }
 0xec6   :  { %v11372_v51 = vpop.permute.xlu0 %2610 }
 0xec7   :  { %13904 = vst [vmem:[#allocation28_spill] sm:$0xff] %v11372_v51  ;;  %8468 = vmatmul.mubr.msk.f32.gmra.mrb[58].mxu0 %vm111_vm1, %v11372_v51 }
 0xec8   :  { %8495 = vmatprep.mubr.msk.f32.mxu0 %vm9903_vm0, %v13902_v3 }
 0xf06   :  { %v2806_v22 = vpop.f32.mrb[54].mxu1 }
 0xf07   :  { %v2820_v2 = vadd.f32 %v2806_v22, %v289_v39  ;;  %v8480_v38 = vpop.f32.mrb[55].mxu1 }
 0xf09   :  { %9340 = vtanh.f32 %v2820_v2  ;;  %v7859_v41 = vmul.f32 -1.442695, %v2820_v2 }
 0xf0a   :  { %v2811_v36 = vpop.f32.mrb[56].mxu1 }
 0xf0b   :  { %v2821_v58 = vadd.f32 %v2811_v36, %v295_v47  ;;  %v8483_v44 = vpop.f32.mrb[57].mxu1 }
 0xf0d   :  { %9342 = vtanh.f32 %v2821_v58  ;;  %v7860_v50 = vmul.f32 -1.442695, %v2821_v58 }
 0xf0e   :  { %v2816_v40 = vpop.f32.mrb[58].mxu1 }
 0xf0f   :  { %v2822_v16 = vadd.f32 %v2816_v40, %v301_v26  ;;  %v8486_v62 = vpop.f32.mrb[59].mxu1 }
 0xf11   :  { %9344 = vtanh.f32 %v2822_v16  ;;  %v7861_v25 = vmul.f32 -1.442695, %v2822_v16 }
 0xf12   :  { %9346 = vpow2.f32 %v7859_v41 }
 0xf13   :  { %v9341_v12 = vpop.eup %9340  ;;  %9348 = vpow2.f32 %v7860_v50 }
 0xf14   :  { %2922 = vrot.lane.b32.xlu1 %v9341_v12, %s9904_s0  ;;  %9350 = vpow2.f32 %v7861_v25 }
 0xf17   :  { %v9343_v31 = vpop.eup %9342 }
 0xf18   :  { %2924 = vrot.lane.b32.xlu0 %v9343_v31, %s9904_s0  ;;  %v13907_v31 = vld [vmem:[#allocation16_spill] sm:$0xff] }
 0xf1b   :  { %v9345_v34 = vpop.eup %9344 }
 0xf1c   :  { %2926 = vrot.lane.b32.xlu1 %v9345_v34, %s9904_s0  ;;  %v9347_v39 = vpop.eup %9346  ;;  %v341_v34 = vadd.f32 %v13907_v31, %v10217_v54  ;;  %v7865_v31 = vld [vmem:[%s13839_s1 + $0x30] sm:$0xff] }
 0xf1d   :  { %v2904_v22 = vadd.f32 1.0, %v9347_v39  ;;  %v9349_v38 = vpop.eup %9348  ;;  %v13908_v39 = vld [vmem:[#allocation17_spill] sm:$0xff] }
 0xf1e   :  { %v2905_v56 = vadd.f32 1.0, %v9349_v38  ;;  %v9351_v47 = vpop.eup %9350 }
 0xf1f   :  { %9352 = vrcp.f32 %v2904_v22  ;;  %v2906_v36 = vadd.f32 1.0, %v9351_v47  ;;  %v347_v22 = vadd.f32 %v13908_v39, %v10217_v54  ;;  %v2594_v39 = vsub.f32 %v11213_v35, %v11202_v30 }
 0xf20   :  { %9354 = vrcp.f32 %v2905_v56 }
 0xf21   :  { %9356 = vrcp.f32 %v2906_v36  ;;  %v13909_v36 = vld [vmem:[#allocation18_spill] sm:$0xff] }
 0xf29   :  { %v11387_v44 = vpop.eup %9352 }
 0xf2a   :  { %v11391_v2 = vpop.eup %9354 }
 0xf2b   :  { %v11395_v16 = vpop.eup %9356 }
 0xf86   :  { %v2923_v43 = vpop.permute.xlu1 %2922 }
 0xf87   :  { %v2931_v26 = vmul.f32 %v11387_v44, %v2923_v43  ;;  %v353_v43 = vadd.f32 %v13909_v36, %v10217_v54 }
 0xf89   :  { %2937 = vrot.lane.b32.xlu0 %v2931_v26, %s9906_s3 }
 0xf8a   :  { %v2925_v58 = vpop.permute.xlu0 %2924 }
 0xf8b   :  { %v2932_v40 = vmul.f32 %v11391_v2, %v2925_v58 }
 0xf8d   :  { %2939 = vrot.lane.b32.xlu1 %v2932_v40, %s9906_s3 }
 0xf8e   :  { %v2927_v62 = vpop.permute.xlu1 %2926 }
 0xf8f   :  { %v2933_v12 = vmul.f32 %v11395_v16, %v2927_v62 }
 0xf91   :  { %2941 = vrot.lane.b32.xlu0 %v2933_v12, %s9906_s3 }
 0xf92   :  { %v2711_v41 = vpop.f32.mrb[54].mxu0 }
 0xf93   :  { %v2725_v50 = vadd.f32 %v2711_v41, %v341_v34  ;;  %v8463_v25 = vpop.f32.mrb[55].mxu0  ;;  %v7866_v41 = vld [vmem:[%s13839_s1 + $0x38] sm:$0xff] }
 0xf94   :  { %v7867_v25 = vld [vmem:[%s13839_s1 + $0x40] sm:$0xff] }
 0xf95   :  { %9358 = vtanh.f32 %v2725_v50 }
 0xf96   :  { %v2716_v38 = vpop.f32.mrb[56].mxu0 }
 0xf97   :  { %v2726_v56 = vadd.f32 %v2716_v38, %v347_v22  ;;  %v8466_v47 = vpop.f32.mrb[57].mxu0  ;;  %v7856_v22 = vmul.f32 -1.442695, %v2725_v50  ;;  %v2597_v38 = vmul.f32 %v2594_v39, %v11244_v21 }
 0xf98   :  { %v2595_v47 = vsub.f32 %v11221_v53, %v11210_v4 }
 0xf99   :  { %9360 = vtanh.f32 %v2726_v56  ;;  %v7857_v36 = vmul.f32 -1.442695, %v2726_v56 }
 0xf9a   :  { %v2721_v26 = vpop.f32.mrb[58].mxu0 }
 0xf9b   :  { %v2727_v58 = vadd.f32 %v2721_v26, %v353_v43  ;;  %v8469_v40 = vpop.f32.mrb[59].mxu0  ;;  %v11423_v43 = vadd.f32 %v2597_v38, %v11202_v30  ;;  %v2598_v26 = vmul.f32 %v2595_v47, %v11247_v29 }
 0xf9c   :  { %v2596_v40 = vsub.f32 %v11226_v5, %v11219_v52 }
 0xf9d   :  { %9362 = vtanh.f32 %v2727_v58  ;;  %v7858_v35 = vmul.f32 -1.442695, %v2727_v58  ;;  %v11431_v21 = vadd.f32 %v2598_v26, %v11210_v4 }
 0xf9e   :  { %9364 = vpow2.f32 %v7856_v22  ;;  %v2599_v53 = vmul.f32 %v2596_v40, %v11261_v46 }
 0xf9f   :  { %v9359_v62 = vpop.eup %9358  ;;  %9366 = vpow2.f32 %v7857_v36  ;;  %v2917_v30 = vmul.f32 %v11391_v2, %v11431_v21 }
 0xfa0   :  { %2850 = vrot.lane.b32.xlu1 %v9359_v62, %s9904_s0  ;;  %v2916_v62 = vmul.f32 %v11387_v44, %v11423_v43  ;;  %v11440_v29 = vadd.f32 %v2599_v53, %v11219_v52 }
 0xfa2   :  { %v2918_v4 = vmul.f32 %v11395_v16, %v11440_v29 }
 0xfa3   :  { %v9361_v12 = vpop.eup %9360 }
 0xfa4   :  { %2852 = vrot.lane.b32.xlu0 %v9361_v12, %s9904_s0 }
 0xfa7   :  { %v9363_v34 = vpop.eup %9362 }
 0xfa8   :  { %2854 = vrot.lane.b32.xlu1 %v9363_v34, %s9904_s0  ;;  %3011 = vperm.xlu0 %9098, %v7865_v31   ;;  %v9365_v58 = vpop.eup %9364 }
 0xfa9   :  { %v2832_v31 = vadd.f32 1.0, %v9365_v58 }
 0xfac   :  { %3016 = vperm.xlu0 %9098, %v7866_v41   ;;  %v9367_v41 = vpop.eup %9366 }
 0xfad   :  { %v2833_v39 = vadd.f32 1.0, %v9367_v41  ;;  %v2561_v41 = vsub.f32 %v11284_v14, %v11264_v33 }
 0xfb0   :  { %3021 = vperm.xlu0 %9098, %v7867_v25  }
 0xffb   :  { %v2938_v50 = vpop.permute.xlu0 %2937 }
 0xffc   :  { %v11434_v56 = vadd.f32 %v2938_v50, %v2916_v62 }
 0xffe   :  { %9368 = vtanh.f32 %v11434_v56 }
 0xfff   :  { %9370 = vpow2.f32 %v7858_v35  ;;  %v2940_v5 = vpop.permute.xlu1 %2939 }
0x1000   :  { %v11442_v12 = vadd.f32 %v2940_v5, %v2917_v30 }
0x1002   :  { %9372 = vtanh.f32 %v11442_v12 }
0x1003   :  { %v2942_v46 = vpop.permute.xlu0 %2941 }
0x1004   :  { %v11447_v34 = vadd.f32 %v2942_v46, %v2918_v4 }
0x1006   :  { %9374 = vtanh.f32 %v11447_v34 }
0x1007   :  { %9376 = vrcp.f32 %v2832_v31 }
0x1008   :  { %v9369_v25 = vpop.eup %9368  ;;  %9378 = vrcp.f32 %v2833_v39 }
0x1009   :  { %v9371_v52 = vpop.eup %9370  ;;  %2955 = vrot.lane.b32.xlu1 %v9369_v25, %s9904_s0 }
0x100a   :  { %v2834_v38 = vadd.f32 1.0, %v9371_v52  ;;  %v2564_v52 = vmul.f32 %v2561_v41, %v11328_v20 }
0x100c   :  { %v9373_v22 = vpop.eup %9372  ;;  %9380 = vrcp.f32 %v2834_v38 }
0x100d   :  { %2957 = vrot.lane.b32.xlu1 %v9373_v22, %s9904_s0 }
0x1010   :  { %v9375_v47 = vpop.eup %9374 }
0x1011   :  { %2959 = vrot.lane.b32.xlu1 %v9375_v47, %s9904_s0  ;;  %v11453_v36 = vpop.eup %9376  ;;  %v2562_v47 = vsub.f32 %v11297_v18, %v11280_v8  ;;  %v2563_v18 = vsub.f32 %v11305_v42, %v11295_v7  ;;  %v7862_v42 = vld [vmem:[%s13839_s1 + $0x78] sm:$0xff] }
0x1012   :  { %v2851_v26 = vpop.permute.xlu1 %2850  ;;  %v11457_v62 = vpop.eup %9378 }
0x1013   :  { %v2859_v40 = vmul.f32 %v11453_v36, %v2851_v26  ;;  %v2565_v20 = vmul.f32 %v2562_v47, %v11336_v55 }
0x1015   :  { %2865 = vrot.lane.b32.xlu0 %v2859_v40, %s9906_s3  ;;  %v11501_v55 = vadd.f32 %v2565_v20, %v11280_v8 }
0x1016   :  { %v2853_v35 = vpop.permute.xlu0 %2852  ;;  %v11461_v53 = vpop.eup %9380 }
0x1017   :  { %v2860_v50 = vmul.f32 %v11457_v62, %v2853_v35  ;;  %v11485_v35 = vadd.f32 %v2564_v52, %v11264_v33 }
0x1019   :  { %2867 = vrot.lane.b32.xlu1 %v2860_v50, %s9906_s3 }
0x101a   :  { %v2855_v30 = vpop.permute.xlu1 %2854 }
0x101b   :  { %v2861_v5 = vmul.f32 %v11461_v53, %v2855_v30 }
0x101d   :  { %2869 = vrot.lane.b32.xlu0 %v2861_v5, %s9906_s3  ;;  %v2844_v5 = vmul.f32 %v11453_v36, %v11485_v35 }
0x1027   :  { %v11465_v58 = vpop.permute.xlu0 %3011 }
0x102b   :  { %v11468_v31 = vpop.permute.xlu0 %3016 }
0x102f   :  { %v11482_v40 = vpop.permute.xlu0 %3021 }
0x107b   :  { %v2956_v4 = vpop.permute.xlu1 %2955 }
0x107c   :  { %v2964_v46 = vmul.f32 %v11387_v44, %v2956_v4 }
0x107e   :  { %v3006_v25 = vsub.f32 %v2964_v46, %v11259_v11 }
0x107f   :  { %v2958_v39 = vpop.permute.xlu1 %2957 }
0x1080   :  { %v3024_v22 = vmul.f32 %v11465_v58, %v3006_v25  ;;  %v2965_v38 = vmul.f32 %v11391_v2, %v2958_v39  ;;  %v2845_v25 = vmul.f32 %v11457_v62, %v11501_v55 }
0x1082   :  { %v3007_v26 = vsub.f32 %v2965_v38, %v11277_v24  ;;  %v11480_v44 = vadd.f32 %v3024_v22, %v11259_v11  ;;  %v7863_v22 = vld [vmem:[%s13839_s1 + $0x80] sm:$0xff] }
0x1083   :  { %v2960_v14 = vpop.permute.xlu1 %2959 }
0x1084   :  { %v3025_v50 = vmul.f32 %v11468_v31, %v3007_v26  ;;  %v2966_v2 = vmul.f32 %v11395_v16, %v2960_v14  ;;  %3164 = vrot.lane.b32.xlu1 %v11480_v44, %s9906_s3  ;;  %v2566_v16 = vmul.f32 %v2563_v18, %v11346_v57 }
0x1086   :  { %v3008_v30 = vsub.f32 %v2966_v2, %v11292_v37  ;;  %v11498_v33 = vadd.f32 %v3025_v50, %v11277_v24  ;;  %v11519_v39 = vadd.f32 %v2566_v16, %v11295_v7  ;;  %v7864_v7 = vld [vmem:[%s13839_s1 + $0x88] sm:$0xff] }
0x1087   :  { %v2866_v4 = vpop.permute.xlu0 %2865 }
0x1088   :  { %v3026_v46 = vmul.f32 %v11482_v40, %v3008_v30  ;;  %v11505_v41 = vadd.f32 %v2866_v4, %v2844_v5  ;;  %3166 = vrot.lane.b32.xlu0 %v11498_v33, %s9906_s3  ;;  %v2846_v38 = vmul.f32 %v11461_v53, %v11519_v39 }
0x108a   :  { %9382 = vtanh.f32 %v11505_v41  ;;  %v11516_v8 = vadd.f32 %v3026_v46, %v11292_v37 }
0x108b   :  { %v2868_v57 = vpop.permute.xlu1 %2867 }
0x108c   :  { %v11521_v52 = vadd.f32 %v2868_v57, %v2845_v25  ;;  %2978 = vperm.xlu0 %9098, %v7862_v42   ;;  %3168 = vrot.lane.b32.xlu1 %v11516_v8, %s9906_s3 }
0x108e   :  { %9384 = vtanh.f32 %v11521_v52 }
0x108f   :  { %v2870_v47 = vpop.permute.xlu0 %2869 }
0x1090   :  { %v11531_v26 = vadd.f32 %v2870_v47, %v2846_v38  ;;  %2983 = vperm.xlu0 %9098, %v7863_v22  }
0x1092   :  { %9386 = vtanh.f32 %v11531_v26 }
0x1094   :  { %v9383_v14 = vpop.eup %9382  ;;  %2988 = vperm.xlu0 %9098, %v7864_v7  }
0x1095   :  { %2883 = vrot.lane.b32.xlu1 %v9383_v14, %s9904_s0 }
0x1098   :  { %v9385_v20 = vpop.eup %9384 }
0x1099   :  { %2885 = vrot.lane.b32.xlu1 %v9385_v20, %s9904_s0 }
0x109c   :  { %v9387_v50 = vpop.eup %9386 }
0x109d   :  { %2887 = vrot.lane.b32.xlu1 %v9387_v50, %s9904_s0 }
0x10f6   :  { %v3165_v2 = vpop.permute.xlu1 %3164 }
0x10f7   :  { %8513 = vmatmul.mubr.msk.f32.vlgmr.msra.gmra.mrb[60].mxu1 %vm111_vm1, %v3165_v2 }
0x10f8   :  { %8515 = vmatprep.mubr.msk.f32.mxu1 %vm9903_vm0, %v13902_v3  ;;  %8961 = vmatpush3.bf16.msra.mxu1 %v10050_v23 }
0x10f9   :  { %8962 = vmatprep.subr.bf16.mxu1 %v13903_v59 }
0x10fa   :  { %v3167_v18 = vpop.permute.xlu0 %3166 }
0x10fb   :  { %8516 = vmatmul.mubr.msk.f32.gmra.mrb[62].mxu1 %vm111_vm1, %v3167_v18 }
0x10fc   :  { %8518 = vmatprep.mubr.msk.f32.mxu1 %vm9903_vm0, %v13902_v3  ;;  %8964 = vmatpush3.bf16.msra.mxu1 %v10065_v27 }
0x10fd   :  { %8981 = vmatprep.subr.bf16.mxu1 %v13903_v59 }
0x10fe   :  { %v3169_v30 = vpop.permute.xlu1 %3168 }
0x10ff   :  { %8519 = vmatmul.mubr.msk.f32.gmra.mrb[64].mxu1 %vm111_vm1, %v3169_v30 }
0x1100   :  { %8546 = vmatprep.mubr.msk.f32.mxu1 %vm9903_vm0, %v13902_v3 }
0x1107   :  { %v2884_v5 = vpop.permute.xlu1 %2883 }
0x1108   :  { %v2892_v23 = vmul.f32 %v11453_v36, %v2884_v5  ;;  %v13913_v5 = vld [vmem:[#allocation12_spill] sm:$0xff] }
0x110a   :  { %v2973_v4 = vsub.f32 %v2892_v23, %v11333_v13  ;;  %v277_v23 = vadd.f32 %v13913_v5, %v10316_v6 }
0x110b   :  { %v11555_v16 = vpop.permute.xlu0 %2978  ;;  %v2886_v46 = vpop.permute.xlu1 %2885 }
0x110c   :  { %v2991_v42 = vmul.f32 %v11555_v16, %v2973_v4  ;;  %v2893_v27 = vmul.f32 %v11457_v62, %v2886_v46 }
0x110e   :  { %v11560_v25 = vadd.f32 %v2991_v42, %v11333_v13  ;;  %v2974_v57 = vsub.f32 %v2893_v27, %v11343_v49  ;;  %v13914_v42 = vld [vmem:[#allocation13_spill] sm:$0xff] }
0x110f   :  { %v11563_v22 = vpop.permute.xlu0 %2983  ;;  %v2888_v38 = vpop.permute.xlu1 %2887  ;;  %v283_v27 = vadd.f32 %v13914_v42, %v10316_v6 }
0x1110   :  { %v2992_v47 = vmul.f32 %v11563_v22, %v2974_v57  ;;  %v2894_v36 = vmul.f32 %v11461_v53, %v2888_v38  ;;  %3042 = vrot.lane.b32.xlu0 %v11560_v25, %s9906_s3 }
0x1112   :  { %v11570_v7 = vadd.f32 %v2992_v47, %v11343_v49  ;;  %v2975_v62 = vsub.f32 %v2894_v36, %v11352_v17 }
0x1113   :  { %v11573_v14 = vpop.permute.xlu0 %2988 }
0x1114   :  { %v2993_v13 = vmul.f32 %v11573_v14, %v2975_v62  ;;  %3044 = vrot.lane.b32.xlu1 %v11570_v7, %s9906_s3 }
0x1116   :  { %v11579_v20 = vadd.f32 %v2993_v13, %v11352_v17 }
0x1118   :  { %3046 = vrot.lane.b32.xlu0 %v11579_v20, %s9906_s3 }
0x1182   :  { %v11583_v53 = vpop.permute.xlu0 %3042 }
0x1183   :  { %8496 = vmatmul.mubr.msk.f32.vlgmr.msra.gmra.mrb[60].mxu0 %vm111_vm1, %v11583_v53 }
0x1184   :  { %8498 = vmatprep.mubr.msk.f32.mxu0 %vm9903_vm0, %v13902_v3  ;;  %8955 = vmatpush3.bf16.msra.mxu0 %v10010_v10  ;;  %v13912_v10 = vld [vmem:[#allocation11_spill] sm:$0xff] }
0x1185   :  { %8956 = vmatprep.subr.bf16.mxu0 %v13903_v59  ;;  %v271_v50 = vadd.f32 %v13912_v10, %v10316_v6 }
0x1186   :  { %v11591_v49 = vpop.permute.xlu1 %3044 }
0x1187   :  { %13910 = vst [vmem:[#allocation14_spill] sm:$0xff] %v11591_v49  ;;  %8499 = vmatmul.mubr.msk.f32.gmra.mrb[62].mxu0 %vm111_vm1, %v11591_v49 }
0x1188   :  { %8501 = vmatprep.mubr.msk.f32.mxu0 %vm9903_vm0, %v13902_v3  ;;  %8958 = vmatpush3.bf16.msra.mxu0 %v10033_v19 }
0x118a   :  { %v11598_v17 = vpop.permute.xlu0 %3046 }
0x118b   :  { %13911 = vst [vmem:[#allocation15_spill] sm:$0xff] %v11598_v17  ;;  %8502 = vmatmul.mubr.msk.f32.gmra.mrb[64].mxu0 %vm111_vm1, %v11598_v17 }
0x118c   :  { %8529 = vmatprep.mubr.msk.f32.mxu0 %vm9903_vm0, %v13902_v3 }
0x11ca   :  { %v3242_v2 = vpop.f32.mrb[60].mxu1 }
0x11cb   :  { %v3256_v18 = vadd.f32 %v3242_v2, %v271_v50  ;;  %v8514_v30 = vpop.f32.mrb[61].mxu1 }
0x11cd   :  { %9388 = vtanh.f32 %v3256_v18  ;;  %v7877_v10 = vmul.f32 -1.442695, %v3256_v18 }
0x11ce   :  { %v3247_v4 = vpop.f32.mrb[62].mxu1 }
0x11cf   :  { %v3257_v19 = vadd.f32 %v3247_v4, %v277_v23  ;;  %v8517_v46 = vpop.f32.mrb[63].mxu1 }
0x11d1   :  { %9390 = vtanh.f32 %v3257_v19  ;;  %v7878_v50 = vmul.f32 -1.442695, %v3257_v19 }
0x11d2   :  { %v3252_v57 = vpop.f32.mrb[64].mxu1 }
0x11d3   :  { %v3258_v38 = vadd.f32 %v3252_v57, %v283_v27  ;;  %v8520_v47 = vpop.f32.mrb[65].mxu1 }
0x11d5   :  { %9392 = vtanh.f32 %v3258_v38  ;;  %v7879_v2 = vmul.f32 -1.442695, %v3258_v38 }
0x11d6   :  { %9394 = vpow2.f32 %v7877_v10  ;;  %v13915_v10 = vld [vmem:[#allocation19_spill] sm:$0xff] }
0x11d7   :  { %v9389_v36 = vpop.eup %9388  ;;  %9396 = vpow2.f32 %v7878_v50  ;;  %v359_v50 = vadd.f32 %v13915_v10, %v10217_v54 }
0x11d8   :  { %3358 = vrot.lane.b32.xlu1 %v9389_v36, %s9904_s0  ;;  %9398 = vpow2.f32 %v7879_v2 }
0x11db   :  { %v9391_v62 = vpop.eup %9390 }
0x11dc   :  { %3360 = vrot.lane.b32.xlu0 %v9391_v62, %s9904_s0 }
0x11df   :  { %v9393_v13 = vpop.eup %9392 }
0x11e0   :  { %3362 = vrot.lane.b32.xlu1 %v9393_v13, %s9904_s0  ;;  %v9395_v30 = vpop.eup %9394 }
0x11e1   :  { %v3340_v5 = vadd.f32 1.0, %v9395_v30  ;;  %v9397_v23 = vpop.eup %9396 }
0x11e2   :  { %v3341_v4 = vadd.f32 1.0, %v9397_v23  ;;  %v9399_v46 = vpop.eup %9398  ;;  %v13916_v23 = vld [vmem:[#allocation20_spill] sm:$0xff] }
0x11e3   :  { %9400 = vrcp.f32 %v3340_v5  ;;  %v3342_v42 = vadd.f32 1.0, %v9399_v46 }
0x11e4   :  { %9402 = vrcp.f32 %v3341_v4  ;;  %v365_v4 = vadd.f32 %v13916_v23, %v10217_v54  ;;  %v3030_v23 = vsub.f32 %v11434_v56, %v11423_v43 }
0x11e5   :  { %9404 = vrcp.f32 %v3342_v42 }
0x11ed   :  { %v11613_v27 = vpop.eup %9400 }
0x11ee   :  { %v11617_v18 = vpop.eup %9402 }
0x11ef   :  { %v11621_v36 = vpop.eup %9404 }
0x124a   :  { %v3359_v57 = vpop.permute.xlu1 %3358 }
0x124b   :  { %v3367_v47 = vmul.f32 %v11613_v27, %v3359_v57 }
0x124d   :  { %3373 = vrot.lane.b32.xlu0 %v3367_v47, %s9906_s3  ;;  %v13917_v47 = vld [vmem:[#allocation21_spill] sm:$0xff] }
0x124e   :  { %v3361_v19 = vpop.permute.xlu0 %3360 }
0x124f   :  { %v3368_v38 = vmul.f32 %v11617_v18, %v3361_v19  ;;  %v371_v19 = vadd.f32 %v13917_v47, %v10217_v54 }
0x1251   :  { %3375 = vrot.lane.b32.xlu1 %v3368_v38, %s9906_s3 }
0x1252   :  { %v3363_v62 = vpop.permute.xlu1 %3362 }
0x1253   :  { %v3369_v13 = vmul.f32 %v11621_v36, %v3363_v62 }
0x1255   :  { %3377 = vrot.lane.b32.xlu0 %v3369_v13, %s9906_s3 }
0x1256   :  { %v3147_v2 = vpop.f32.mrb[60].mxu0 }
0x1257   :  { %v3161_v30 = vadd.f32 %v3147_v2, %v359_v50  ;;  %v8497_v5 = vpop.f32.mrb[61].mxu0  ;;  %v7883_v50 = vld [vmem:[%s13839_s1 + $0x18] sm:$0xff] }
0x1258   :  { %v7884_v5 = vld [vmem:[%s13839_s1 + $0x20] sm:$0xff] }
0x1259   :  { %9406 = vtanh.f32 %v3161_v30 }
0x125a   :  { %v3152_v46 = vpop.f32.mrb[62].mxu0 }
0x125b   :  { %v3162_v42 = vadd.f32 %v3152_v46, %v365_v4  ;;  %v8500_v57 = vpop.f32.mrb[63].mxu0  ;;  %v7874_v4 = vmul.f32 -1.442695, %v3161_v30  ;;  %v3033_v46 = vmul.f32 %v3030_v23, %v11465_v58 }
0x125c   :  { %v3031_v57 = vsub.f32 %v11442_v12, %v11431_v21 }
0x125d   :  { %9408 = vtanh.f32 %v3162_v42  ;;  %v7875_v47 = vmul.f32 -1.442695, %v3162_v42 }
0x125e   :  { %v3157_v38 = vpop.f32.mrb[64].mxu0 }
0x125f   :  { %v3163_v62 = vadd.f32 %v3157_v38, %v371_v19  ;;  %v8503_v49 = vpop.f32.mrb[65].mxu0  ;;  %v11649_v19 = vadd.f32 %v3033_v46, %v11423_v43  ;;  %v3034_v38 = vmul.f32 %v3031_v57, %v11468_v31 }
0x1260   :  { %v7885_v49 = vld [vmem:[%s13839_s1 + $0x28] sm:$0xff] }
0x1261   :  { %9410 = vtanh.f32 %v3163_v62  ;;  %v7876_v56 = vmul.f32 -1.442695, %v3163_v62  ;;  %v11657_v58 = vadd.f32 %v3034_v38, %v11431_v21 }
0x1262   :  { %9412 = vpow2.f32 %v7874_v4 }
0x1263   :  { %v9407_v10 = vpop.eup %9406  ;;  %9414 = vpow2.f32 %v7875_v47  ;;  %v3353_v43 = vmul.f32 %v11617_v18, %v11657_v58 }
0x1264   :  { %3286 = vrot.lane.b32.xlu1 %v9407_v10, %s9904_s0  ;;  %v3032_v10 = vsub.f32 %v11447_v34, %v11440_v29 }
0x1266   :  { %v3035_v12 = vmul.f32 %v3032_v10, %v11482_v40 }
0x1267   :  { %v9409_v13 = vpop.eup %9408 }
0x1268   :  { %3288 = vrot.lane.b32.xlu0 %v9409_v13, %s9904_s0  ;;  %v3352_v13 = vmul.f32 %v11613_v27, %v11649_v19  ;;  %v11666_v31 = vadd.f32 %v3035_v12, %v11440_v29 }
0x126a   :  { %v3354_v21 = vmul.f32 %v11621_v36, %v11666_v31 }
0x126b   :  { %v9411_v2 = vpop.eup %9410 }
0x126c   :  { %3290 = vrot.lane.b32.xlu1 %v9411_v2, %s9904_s0  ;;  %3447 = vperm.xlu0 %9098, %v7883_v50   ;;  %v9413_v62 = vpop.eup %9412 }
0x126d   :  { %v3268_v2 = vadd.f32 1.0, %v9413_v62 }
0x1270   :  { %3452 = vperm.xlu0 %9098, %v7884_v5  }
0x1274   :  { %3457 = vperm.xlu0 %9098, %v7885_v49   ;;  %v9415_v49 = vpop.eup %9414 }
0x1275   :  { %v3269_v4 = vadd.f32 1.0, %v9415_v49 }
0x12bf   :  { %v3374_v30 = vpop.permute.xlu0 %3373 }
0x12c0   :  { %v11660_v42 = vadd.f32 %v3374_v30, %v3352_v13 }
0x12c2   :  { %9416 = vtanh.f32 %v11660_v42 }
0x12c3   :  { %9418 = vpow2.f32 %v7876_v56  ;;  %v3376_v34 = vpop.permute.xlu1 %3375 }
0x12c4   :  { %v11668_v50 = vadd.f32 %v3376_v34, %v3353_v43 }
0x12c6   :  { %9420 = vtanh.f32 %v11668_v50 }
0x12c7   :  { %v3378_v40 = vpop.permute.xlu0 %3377 }
0x12c8   :  { %v11673_v5 = vadd.f32 %v3378_v40, %v3354_v21 }
0x12ca   :  { %9422 = vtanh.f32 %v11673_v5 }
0x12cb   :  { %9424 = vrcp.f32 %v3268_v2 }
0x12cc   :  { %v9417_v23 = vpop.eup %9416  ;;  %9426 = vrcp.f32 %v3269_v4 }
0x12cd   :  { %v9419_v29 = vpop.eup %9418  ;;  %3391 = vrot.lane.b32.xlu1 %v9417_v23, %s9904_s0  ;;  %v2997_v23 = vsub.f32 %v11505_v41, %v11485_v35 }
0x12ce   :  { %v3270_v57 = vadd.f32 1.0, %v9419_v29 }
0x12d0   :  { %v9421_v46 = vpop.eup %9420  ;;  %9428 = vrcp.f32 %v3270_v57 }
0x12d1   :  { %3393 = vrot.lane.b32.xlu1 %v9421_v46, %s9904_s0  ;;  %v3000_v46 = vmul.f32 %v2997_v23, %v11555_v16 }
0x12d4   :  { %v9423_v47 = vpop.eup %9422 }
0x12d5   :  { %3395 = vrot.lane.b32.xlu1 %v9423_v47, %s9904_s0  ;;  %v11679_v38 = vpop.eup %9424 }
0x12d6   :  { %v3287_v10 = vpop.permute.xlu1 %3286  ;;  %v11683_v56 = vpop.eup %9426 }
0x12d7   :  { %v3295_v13 = vmul.f32 %v11679_v38, %v3287_v10  ;;  %v2998_v10 = vsub.f32 %v11521_v52, %v11501_v55  ;;  %v2999_v52 = vsub.f32 %v11531_v26, %v11519_v39  ;;  %v7880_v26 = vld [vmem:[%s13839_s1 + $0x90] sm:$0xff] }
0x12d9   :  { %3301 = vrot.lane.b32.xlu0 %v3295_v13, %s9906_s3  ;;  %v3001_v16 = vmul.f32 %v2998_v10, %v11563_v22 }
0x12da   :  { %v3289_v30 = vpop.permute.xlu0 %3288  ;;  %v11687_v43 = vpop.eup %9428 }
0x12db   :  { %v3296_v12 = vmul.f32 %v11683_v56, %v3289_v30  ;;  %v11727_v22 = vadd.f32 %v3001_v16, %v11501_v55 }
0x12dd   :  { %3303 = vrot.lane.b32.xlu1 %v3296_v12, %s9906_s3  ;;  %v11711_v12 = vadd.f32 %v3000_v46, %v11485_v35 }
0x12de   :  { %v3291_v34 = vpop.permute.xlu1 %3290 }
0x12df   :  { %v3297_v62 = vmul.f32 %v11687_v43, %v3291_v34 }
0x12e1   :  { %3305 = vrot.lane.b32.xlu0 %v3297_v62, %s9906_s3 }
0x12eb   :  { %v11691_v21 = vpop.permute.xlu0 %3447 }
0x12ef   :  { %v11694_v49 = vpop.permute.xlu0 %3452 }
0x12f3   :  { %v11708_v30 = vpop.permute.xlu0 %3457 }
0x133f   :  { %v3392_v40 = vpop.permute.xlu1 %3391 }
0x1340   :  { %v3400_v2 = vmul.f32 %v11613_v27, %v3392_v40  ;;  %v3280_v40 = vmul.f32 %v11679_v38, %v11711_v12 }
0x1342   :  { %v3442_v4 = vsub.f32 %v3400_v2, %v11480_v44 }
0x1343   :  { %v3394_v29 = vpop.permute.xlu1 %3393 }
0x1344   :  { %v3460_v57 = vmul.f32 %v11691_v21, %v3442_v4  ;;  %v3401_v47 = vmul.f32 %v11617_v18, %v3394_v29  ;;  %v3281_v29 = vmul.f32 %v11683_v56, %v11727_v22 }
0x1346   :  { %v3443_v13 = vsub.f32 %v3401_v47, %v11498_v33  ;;  %v11706_v27 = vadd.f32 %v3460_v57, %v11480_v44  ;;  %v7881_v47 = vld [vmem:[%s13839_s1 + $0x98] sm:$0xff] }
0x1347   :  { %v3396_v41 = vpop.permute.xlu1 %3395 }
0x1348   :  { %v3461_v34 = vmul.f32 %v11694_v49, %v3443_v13  ;;  %v3402_v18 = vmul.f32 %v11621_v36, %v3396_v41  ;;  %3600 = vrot.lane.b32.xlu1 %v11706_v27, %s9906_s3  ;;  %v3002_v36 = vmul.f32 %v2999_v52, %v11573_v14 }
0x134a   :  { %v3444_v62 = vsub.f32 %v3402_v18, %v11516_v8  ;;  %v11724_v35 = vadd.f32 %v3461_v34, %v11498_v33  ;;  %v11745_v46 = vadd.f32 %v3002_v36, %v11519_v39  ;;  %v7882_v39 = vld [vmem:[%s13839_s1 + $0xa0] sm:$0xff] }
0x134b   :  { %v3302_v2 = vpop.permute.xlu0 %3301 }
0x134c   :  { %v3462_v23 = vmul.f32 %v11708_v30, %v3444_v62  ;;  %v11731_v4 = vadd.f32 %v3302_v2, %v3280_v40  ;;  %3602 = vrot.lane.b32.xlu0 %v11724_v35, %s9906_s3  ;;  %v3282_v10 = vmul.f32 %v11687_v43, %v11745_v46 }
0x134e   :  { %9430 = vtanh.f32 %v11731_v4  ;;  %v11742_v55 = vadd.f32 %v3462_v23, %v11516_v8 }
0x134f   :  { %v3304_v14 = vpop.permute.xlu1 %3303 }
0x1350   :  { %v11747_v57 = vadd.f32 %v3304_v14, %v3281_v29  ;;  %3414 = vperm.xlu0 %9098, %v7880_v26   ;;  %3604 = vrot.lane.b32.xlu1 %v11742_v55, %s9906_s3 }
0x1352   :  { %9432 = vtanh.f32 %v11747_v57 }
0x1353   :  { %v3306_v13 = vpop.permute.xlu0 %3305 }
0x1354   :  { %v11757_v41 = vadd.f32 %v3306_v13, %v3282_v10  ;;  %3419 = vperm.xlu0 %9098, %v7881_v47  }
0x1356   :  { %9434 = vtanh.f32 %v11757_v41 }
0x1358   :  { %v9431_v16 = vpop.eup %9430  ;;  %3424 = vperm.xlu0 %9098, %v7882_v39  }
0x1359   :  { %3319 = vrot.lane.b32.xlu1 %v9431_v16, %s9904_s0 }
0x135c   :  { %v9433_v34 = vpop.eup %9432 }
0x135d   :  { %3321 = vrot.lane.b32.xlu1 %v9433_v34, %s9904_s0 }
0x1360   :  { %v9435_v18 = vpop.eup %9434 }
0x1361   :  { %3323 = vrot.lane.b32.xlu1 %v9435_v18, %s9904_s0 }
0x13ba   :  { %v3601_v52 = vpop.permute.xlu1 %3600 }
0x13bb   :  { %8547 = vmatmul.mubr.msk.f32.vlgmr.msra.gmra.mrb[66].mxu1 %vm111_vm1, %v3601_v52 }
0x13bc   :  { %8549 = vmatprep.mubr.msk.f32.mxu1 %vm9903_vm0, %v13902_v3 }
0x13be   :  { %v3603_v62 = vpop.permute.xlu0 %3602 }
0x13bf   :  { %8550 = vmatmul.mubr.msk.f32.gmra.mrb[68].mxu1 %vm111_vm1, %v3603_v62 }
0x13c0   :  { %8552 = vmatprep.mubr.msk.f32.mxu1 %vm9903_vm0, %v13902_v3 }
0x13c2   :  { %v3605_v40 = vpop.permute.xlu1 %3604 }
0x13c3   :  { %8553 = vmatmul.mubr.msk.f32.gmra.mrb[70].mxu1 %vm111_vm1, %v3605_v40  ;;  %v13921_v40 = vld [vmem:[#allocation8_spill] sm:$0xff] }
0x13c4   :  { %8563 = vmatprep.mubr.msk.f32.mxu1 %vm9903_vm0, %v13902_v3 }
0x13cb   :  { %v3320_v2 = vpop.permute.xlu1 %3319 }
0x13cc   :  { %v3328_v36 = vmul.f32 %v11679_v38, %v3320_v2  ;;  %v253_v2 = vadd.f32 %v13921_v40, %v10316_v6 }
0x13ce   :  { %v3409_v23 = vsub.f32 %v3328_v36, %v11560_v25 }
0x13cf   :  { %v11777_v26 = vpop.permute.xlu0 %3414  ;;  %v3322_v29 = vpop.permute.xlu1 %3321 }
0x13d0   :  { %v3427_v14 = vmul.f32 %v11777_v26, %v3409_v23  ;;  %v3329_v47 = vmul.f32 %v11683_v56, %v3322_v29 }
0x13d2   :  { %v11782_v10 = vadd.f32 %v3427_v14, %v11560_v25  ;;  %v3410_v13 = vsub.f32 %v3329_v47, %v11570_v7  ;;  %v13922_v14 = vld [vmem:[#allocation9_spill] sm:$0xff] }
0x13d3   :  { %v11785_v39 = vpop.permute.xlu0 %3419  ;;  %v3324_v16 = vpop.permute.xlu1 %3323  ;;  %v259_v47 = vadd.f32 %v13922_v14, %v10316_v6 }
0x13d4   :  { %v3428_v34 = vmul.f32 %v11785_v39, %v3410_v13  ;;  %v3330_v38 = vmul.f32 %v11687_v43, %v3324_v16  ;;  %3478 = vrot.lane.b32.xlu0 %v11782_v10, %s9906_s3 }
0x13d6   :  { %v11792_v18 = vadd.f32 %v3428_v34, %v11570_v7  ;;  %v3411_v56 = vsub.f32 %v3330_v38, %v11579_v20  ;;  %v13923_v38 = vld [vmem:[#allocation10_spill] sm:$0xff] }
0x13d7   :  { %v11795_v52 = vpop.permute.xlu0 %3424 }
0x13d8   :  { %v3429_v25 = vmul.f32 %v11795_v52, %v3411_v56  ;;  %3480 = vrot.lane.b32.xlu1 %v11792_v18, %s9906_s3  ;;  %v265_v56 = vadd.f32 %v13923_v38, %v10316_v6 }
0x13da   :  { %v11801_v62 = vadd.f32 %v3429_v25, %v11579_v20 }
0x13dc   :  { %3482 = vrot.lane.b32.xlu0 %v11801_v62, %s9906_s3 }
0x1446   :  { %v11805_v43 = vpop.permute.xlu0 %3478 }
0x1447   :  { %13918 = vst [vmem:[#allocation16_spill] sm:$0xff] %v11805_v43  ;;  %8530 = vmatmul.mubr.msk.f32.vlgmr.msra.gmra.mrb[66].mxu0 %vm111_vm1, %v11805_v43 }
0x1448   :  { %8532 = vmatprep.mubr.msk.f32.mxu0 %vm9903_vm0, %v13902_v3 }
0x144a   :  { %v11811_v7 = vpop.permute.xlu1 %3480 }
0x144b   :  { %13919 = vst [vmem:[#allocation17_spill] sm:$0xff] %v11811_v7  ;;  %8533 = vmatmul.mubr.msk.f32.gmra.mrb[68].mxu0 %vm111_vm1, %v11811_v7 }
0x144c   :  { %8535 = vmatprep.mubr.msk.f32.mxu0 %vm9903_vm0, %v13902_v3 }
0x144e   :  { %v11817_v20 = vpop.permute.xlu0 %3482 }
0x144f   :  { %13920 = vst [vmem:[#allocation18_spill] sm:$0xff] %v11817_v20  ;;  %8536 = vmatmul.mubr.msk.f32.gmra.mrb[70].mxu0 %vm111_vm1, %v11817_v20 }
0x1450   :  { %4112 = vmatprep.mubr.f32.mxu0 %v13902_v3 }
0x148e   :  { %v3678_v36 = vpop.f32.mrb[66].mxu1 }
0x148f   :  { %v3692_v23 = vadd.f32 %v3678_v36, %v253_v2  ;;  %v8548_v29 = vpop.f32.mrb[67].mxu1 }
0x1491   :  { %9436 = vtanh.f32 %v3692_v23  ;;  %v7895_v36 = vmul.f32 -1.442695, %v3692_v23 }
0x1492   :  { %v3683_v13 = vpop.f32.mrb[68].mxu1 }
0x1493   :  { %v3693_v16 = vadd.f32 %v3683_v13, %v259_v47  ;;  %v8551_v34 = vpop.f32.mrb[69].mxu1 }
0x1495   :  { %9438 = vtanh.f32 %v3693_v16  ;;  %v7896_v29 = vmul.f32 -1.442695, %v3693_v16 }
0x1496   :  { %v3688_v25 = vpop.f32.mrb[70].mxu1 }
0x1497   :  { %v3694_v20 = vadd.f32 %v3688_v25, %v265_v56  ;;  %v8554_v43 = vpop.f32.mrb[71].mxu1 }
0x1499   :  { %9440 = vtanh.f32 %v3694_v20  ;;  %v7897_v14 = vmul.f32 -1.442695, %v3694_v20 }
0x149a   :  { %9442 = vpow2.f32 %v7895_v36 }
0x149b   :  { %v9437_v7 = vpop.eup %9436  ;;  %9444 = vpow2.f32 %v7896_v29  ;;  %v13924_v29 = vld [vmem:[#allocation22_spill] sm:$0xff] }
0x149c   :  { %3794 = vrot.lane.b32.xlu1 %v9437_v7, %s9904_s0  ;;  %9446 = vpow2.f32 %v7897_v14  ;;  %v377_v14 = vadd.f32 %v13924_v29, %v10217_v54 }
0x149f   :  { %v9439_v40 = vpop.eup %9438 }
0x14a0   :  { %3796 = vrot.lane.b32.xlu0 %v9439_v40, %s9904_s0 }
0x14a3   :  { %v9441_v2 = vpop.eup %9440 }
0x14a4   :  { %3798 = vrot.lane.b32.xlu1 %v9441_v2, %s9904_s0  ;;  %v9443_v6 = vpop.eup %9442 }
0x14a5   :  { %v3776_v47 = vadd.f32 1.0, %v9443_v6  ;;  %v9445_v13 = vpop.eup %9444 }
0x14a6   :  { %v3777_v43 = vadd.f32 1.0, %v9445_v13  ;;  %v9447_v34 = vpop.eup %9446 }
0x14a7   :  { %9448 = vrcp.f32 %v3776_v47  ;;  %v3778_v7 = vadd.f32 1.0, %v9447_v34 }
0x14a8   :  { %9450 = vrcp.f32 %v3777_v43  ;;  %v13925_v43 = vld [vmem:[#allocation23_spill] sm:$0xff] }
0x14a9   :  { %9452 = vrcp.f32 %v3778_v7  ;;  %v383_v34 = vadd.f32 %v13925_v43, %v10217_v54 }
0x14b1   :  { %v11831_v38 = vpop.eup %9448 }
0x14b2   :  { %v11835_v23 = vpop.eup %9450 }
0x14b3   :  { %v11839_v40 = vpop.eup %9452 }
0x150e   :  { %v3795_v56 = vpop.permute.xlu1 %3794 }
0x150f   :  { %v3803_v25 = vmul.f32 %v11831_v38, %v3795_v56 }
0x1511   :  { %3809 = vrot.lane.b32.xlu0 %v3803_v25, %s9906_s3 }
0x1512   :  { %v3797_v20 = vpop.permute.xlu0 %3796 }
0x1513   :  { %v3804_v16 = vmul.f32 %v11835_v23, %v3797_v20  ;;  %v13926_v20 = vld [vmem:[#allocation24_spill] sm:$0xff] }
0x1515   :  { %3811 = vrot.lane.b32.xlu1 %v3804_v16, %s9906_s3  ;;  %v389_v16 = vadd.f32 %v13926_v20, %v10217_v54  ;;  %v3843_v54 = vld [vmem:[%s13839_s1 + $0x8] sm:$0xff] }
0x1516   :  { %v3799_v2 = vpop.permute.xlu1 %3798 }
0x1517   :  { %v3805_v36 = vmul.f32 %v11839_v40, %v3799_v2 }
0x1519   :  { %3813 = vrot.lane.b32.xlu0 %v3805_v36, %s9906_s3 }
0x151a   :  { %v3583_v6 = vpop.f32.mrb[66].mxu0 }
0x151b   :  { %v3597_v47 = vadd.f32 %v3583_v6, %v377_v14  ;;  %v8531_v13 = vpop.f32.mrb[67].mxu0  ;;  %v3842_v14 = vld [vmem:[%s13839_s1] sm:$0xff] }
0x151c   :  { %v3466_v13 = vsub.f32 %v11660_v42, %v11649_v19 }
0x151d   :  { %9454 = vtanh.f32 %v3597_v47  ;;  %v7892_v43 = vmul.f32 -1.442695, %v3597_v47 }
0x151e   :  { %v3588_v7 = vpop.f32.mrb[68].mxu0 }
0x151f   :  { %v3598_v56 = vadd.f32 %v3588_v7, %v383_v34  ;;  %v8534_v25 = vpop.f32.mrb[69].mxu0  ;;  %v3469_v34 = vmul.f32 %v3466_v13, %v11691_v21  ;;  %v3467_v7 = vsub.f32 %v11668_v50, %v11657_v58 }
0x1521   :  { %9456 = vtanh.f32 %v3598_v56  ;;  %v7893_v25 = vmul.f32 -1.442695, %v3598_v56  ;;  %v3472_v20 = vadd.f32 %v3469_v34, %v11649_v19 }
0x1522   :  { %v3593_v2 = vpop.f32.mrb[70].mxu0 }
0x1523   :  { %v3599_v17 = vadd.f32 %v3593_v2, %v389_v16  ;;  %v8537_v51 = vpop.f32.mrb[71].mxu0  ;;  %v3470_v16 = vmul.f32 %v3467_v7, %v11694_v49  ;;  %v3468_v2 = vsub.f32 %v11673_v5, %v11666_v31 }
0x1524   :  { %v3844_v51 = vld [vmem:[%s13839_s1 + $0x10] sm:$0xff] }
0x1525   :  { %9458 = vtanh.f32 %v3599_v17  ;;  %v3473_v47 = vadd.f32 %v3470_v16, %v11657_v58  ;;  %v3471_v21 = vmul.f32 %v3468_v2, %v11708_v30 }
0x1526   :  { %9460 = vpow2.f32 %v7892_v43 }
0x1527   :  { %v9455_v29 = vpop.eup %9454  ;;  %9462 = vpow2.f32 %v7893_v25  ;;  %v3789_v50 = vmul.f32 %v11835_v23, %v3473_v47  ;;  %v3474_v49 = vadd.f32 %v3471_v21, %v11666_v31 }
0x1528   :  { %3722 = vrot.lane.b32.xlu1 %v9455_v29, %s9904_s0  ;;  %v3788_v29 = vmul.f32 %v11831_v38, %v3472_v20 }
0x1529   :  { %v3790_v5 = vmul.f32 %v11839_v40, %v3474_v49 }
0x152b   :  { %v9457_v36 = vpop.eup %9456 }
0x152c   :  { %3724 = vrot.lane.b32.xlu0 %v9457_v36, %s9904_s0  ;;  %v7894_v36 = vmul.f32 -1.442695, %v3599_v17 }
0x152f   :  { %v9459_v6 = vpop.eup %9458 }
0x1530   :  { %3726 = vrot.lane.b32.xlu1 %v9459_v6, %s9904_s0  ;;  %3874 = vperm.xlu0 %9098, %v3842_v14   ;;  %v9461_v6 = vpop.eup %9460 }
0x1531   :  { %v3704_v17 = vadd.f32 1.0, %v9461_v6  ;;  %v9463_v13 = vpop.eup %9462  ;;  %v3952_v6 = vld [vmem:[%s13844_s6 + $0x28] sm:$0xff] }
0x1532   :  { %v3705_v30 = vadd.f32 1.0, %v9463_v13  ;;  %v3953_v13 = vld [vmem:[%s13844_s6 + $0x30] sm:$0xff] }
0x1534   :  { %3879 = vperm.xlu0 %9098, %v3843_v54  }
0x1538   :  { %3884 = vperm.xlu0 %9098, %v3844_v51  }
0x1583   :  { %v3810_v42 = vpop.permute.xlu0 %3809 }
0x1584   :  { %v3818_v14 = vadd.f32 %v3810_v42, %v3788_v29 }
0x1586   :  { %9464 = vtanh.f32 %v3818_v14  ;;  %v3948_v14 = vld [vmem:[%s13844_s6 + $0x8] sm:$0xff] }
0x1587   :  { %9466 = vpow2.f32 %v7894_v36  ;;  %v3812_v19 = vpop.permute.xlu1 %3811 }
0x1588   :  { %v3819_v56 = vadd.f32 %v3812_v19, %v3789_v50  ;;  %v3950_v50 = vld [vmem:[%s13844_s6 + $0x18] sm:$0xff]  ;;  %v3947_v19 = vld [vmem:[%s13844_s6] sm:$0xff] }
0x1589   :  { %v8965_v49 = vpack.c.bf16 %v3950_v50, %v3948_v14  ;;  %v3962_v14 = vld [vmem:[%s13844_s6 + $0x78] sm:$0xff] }
0x158a   :  { %9468 = vtanh.f32 %v3819_v56  ;;  %v3949_v56 = vld [vmem:[%s13844_s6 + $0x10] sm:$0xff] }
0x158b   :  { %v3814_v54 = vpop.permute.xlu0 %3813  ;;  %8966 = vmatprep.subr.bf16.mxu0 %v8965_v49  ;;  %v3961_v49 = vld [vmem:[%s13844_s6 + $0x70] sm:$0xff] }
0x158c   :  { %v3820_v51 = vadd.f32 %v3814_v54, %v3790_v5  ;;  %v3954_v5 = vld [vmem:[%s13844_s6 + $0x38] sm:$0xff]  ;;  %v8967_v54 = vpack.c.bf16 %v3949_v56, %v3947_v19  ;;  %v3959_v19 = vld [vmem:[%s13844_s6 + $0x60] sm:$0xff] }
0x158d   :  { %v8979_v56 = vpack.c.bf16 %v3961_v49, %v3959_v19 }
0x158e   :  { %9470 = vtanh.f32 %v3820_v51  ;;  %v3951_v51 = vld [vmem:[%s13844_s6 + $0x20] sm:$0xff]  ;;  %8968 = vmatpush1.bf16.msra.mxu0 %v8967_v54  ;;  %v62_v54 = vld [vmem:[%s13846_s8 + $0x18] sm:$0xff] }
0x158f   :  { %9472 = vrcp.f32 %v3704_v17  ;;  %v8969_v17 = vpack.c.bf16 %v3954_v5, %v3952_v6  ;;  %v61_v5 = vld [vmem:[%s13846_s8 + $0x10] sm:$0xff] }
0x1590   :  { %v9465_v58 = vpop.eup %9464  ;;  %9474 = vrcp.f32 %v3705_v30  ;;  %v3956_v30 = vld [vmem:[%s13844_s6 + $0x48] sm:$0xff] }
0x1591   :  { %v9467_v43 = vpop.eup %9466  ;;  %3827 = vrot.lane.b32.xlu1 %v9465_v58, %s9904_s0  ;;  %v8971_v58 = vpack.c.bf16 %v3953_v13, %v3951_v51  ;;  %8970 = vmatprep.subr.bf16.mxu0 %v8969_v17  ;;  %v11956_v51 = vpack.c.bf16 %v62_v54, %v61_v5 }
0x1592   :  { %v3706_v7 = vadd.f32 1.0, %v9467_v43  ;;  %v3958_v43 = vld [vmem:[%s13844_s6 + $0x58] sm:$0xff] }
0x1593   :  { %8972 = vmatpush1.bf16.msra.mxu0 %v8971_v58  ;;  %v3433_v58 = vsub.f32 %v11731_v4, %v11711_v12 }
0x1594   :  { %v9469_v34 = vpop.eup %9468  ;;  %9476 = vrcp.f32 %v3706_v7  ;;  %v3955_v7 = vld [vmem:[%s13844_s6 + $0x40] sm:$0xff] }
0x1595   :  { %3829 = vrot.lane.b32.xlu1 %v9469_v34, %s9904_s0  ;;  %v8973_v34 = vpack.c.bf16 %v3958_v43, %v3956_v30 }
0x1597   :  { %8974 = vmatprep.subr.bf16.mxu0 %v8973_v34  ;;  %v3436_v34 = vmul.f32 %v3433_v58, %v11777_v26 }
0x1598   :  { %v9471_v31 = vpop.eup %9470 }
0x1599   :  { %3831 = vrot.lane.b32.xlu1 %v9471_v31, %s9904_s0  ;;  %v11879_v25 = vpop.eup %9472  ;;  %v3957_v31 = vld [vmem:[%s13844_s6 + $0x50] sm:$0xff] }
0x159a   :  { %v3723_v20 = vpop.permute.xlu1 %3722  ;;  %v11883_v2 = vpop.eup %9474 }
0x159b   :  { %v3731_v16 = vmul.f32 %v11879_v25, %v3723_v20  ;;  %v8975_v20 = vpack.c.bf16 %v3957_v31, %v3955_v7  ;;  %v3434_v31 = vsub.f32 %v11747_v57, %v11727_v22 }
0x159d   :  { %3737 = vrot.lane.b32.xlu0 %v3731_v16, %s9906_s3  ;;  %8976 = vmatpush1.bf16.msra.mxu0 %v8975_v20  ;;  %v3437_v26 = vmul.f32 %v3434_v31, %v11785_v39 }
0x159e   :  { %v3725_v29 = vpop.permute.xlu0 %3724  ;;  %v11887_v42 = vpop.eup %9476 }
0x159f   :  { %v3732_v36 = vmul.f32 %v11883_v2, %v3725_v29  ;;  %v59_v29 = vld [vmem:[%s13846_s8] sm:$0xff]  ;;  %v3440_v39 = vadd.f32 %v3437_v26, %v11727_v22  ;;  %v11999_v22 = vld [vmem:[%s13839_s1 + $0xa8] sm:$0xff] }
0x15a1   :  { %3739 = vrot.lane.b32.xlu1 %v3732_v36, %s9906_s3  ;;  %v60_v36 = vld [vmem:[%s13846_s8 + $0x8] sm:$0xff] }
0x15a2   :  { %v3727_v47 = vpop.permute.xlu1 %3726 }
0x15a3   :  { %v3733_v21 = vmul.f32 %v11887_v42, %v3727_v47  ;;  %v11933_v47 = vpack.c.bf16 %v60_v36, %v59_v29 }
0x15a5   :  { %3741 = vrot.lane.b32.xlu0 %v3733_v21, %s9906_s3  ;;  %v3960_v21 = vld [vmem:[%s13844_s6 + $0x68] sm:$0xff]  ;;  %8983 = vmatpush3.bf16.msra.mxu1 %v11933_v47 }
0x15a6   :  { %v8977_v50 = vpack.c.bf16 %v3962_v14, %v3960_v21  ;;  %8984 = vmatprep.subr.bf16.mxu1 %v13903_v59  ;;  %v3439_v21 = vadd.f32 %v3436_v34, %v11711_v12  ;;  %v3435_v12 = vsub.f32 %v11757_v41, %v11745_v46 }
0x15a8   :  { %8978 = vmatprep.subr.bf16.mxu0 %v8977_v50  ;;  %v3716_v14 = vmul.f32 %v11879_v25, %v3439_v21 }
0x15a9   :  { %8980 = vmatpush1.bf16.msra.mxu0 %v8979_v56  ;;  %8986 = vmatpush3.bf16.msra.mxu1 %v11956_v51  ;;  %v3438_v56 = vmul.f32 %v3435_v12, %v11795_v52 }
0x15aa   :  { %9035 = vmatprep.subr.bf16.mxu0 %v13903_v59  ;;  %8987 = vmatprep.subr.bf16.mxu1 %v13903_v59 }
0x15ab   :  { %v3441_v52 = vadd.f32 %v3438_v56, %v11745_v46 }
0x15ac   :  { %8564 = vmatmul.mubr.f32.vlgmr.msra.gmra.mrb[72].mxu1 %v13902_v3 }
0x15ad   :  { %8566 = vmatprep.mubr.msk.f32.mxu1 %vm9903_vm0, %v13902_v3 }
0x15af   :  { %v3875_v16 = vpop.permute.xlu0 %3874 }
0x15b0   :  { %8567 = vmatmul.mubr.f32.gmra.mrb[74].mxu1 %v13902_v3 }
0x15b1   :  { %8569 = vmatprep.mubr.msk.f32.mxu1 %vm9903_vm0, %v13902_v3 }
0x15b3   :  { %v3880_v13 = vpop.permute.xlu0 %3879 }
0x15b4   :  { %8570 = vmatmul.mubr.f32.gmra.mrb[76].mxu1 %v13902_v3 }
0x15b5   :  { %8580 = vmatprep.mubr.msk.f32.mxu1 %vm9903_vm0, %v13902_v3 }
0x15b7   :  { %v3885_v29 = vpop.permute.xlu0 %3884 }
0x1603   :  { %v3828_v6 = vpop.permute.xlu1 %3827 }
0x1604   :  { %v3836_v17 = vmul.f32 %v11831_v38, %v3828_v6  ;;  %v3717_v6 = vmul.f32 %v11883_v2, %v3440_v39 }
0x1606   :  { %v3869_v30 = vsub.f32 %v3836_v17, %v11706_v27 }
0x1607   :  { %v3830_v43 = vpop.permute.xlu1 %3829 }
0x1608   :  { %v3887_v7 = vmul.f32 %v3875_v16, %v3869_v30  ;;  %v3837_v38 = vmul.f32 %v11835_v23, %v3830_v43 }
0x160a   :  { %v3870_v20 = vsub.f32 %v3837_v38, %v11724_v35  ;;  %v3890_v4 = vadd.f32 %v3887_v7, %v11706_v27 }
0x160b   :  { %v3832_v36 = vpop.permute.xlu1 %3831 }
0x160c   :  { %v3888_v16 = vmul.f32 %v3880_v13, %v3870_v20  ;;  %v3838_v23 = vmul.f32 %v11839_v40, %v3832_v36  ;;  %3911 = vrot.lane.b32.xlu1 %v3890_v4, %s9904_s0  ;;  %v3718_v13 = vmul.f32 %v11887_v42, %v3441_v52  ;;  %v65_v20 = vld [vmem:[%s13847_s9 + $0x10] sm:$0xff]  ;;  %v66_v4 = vld [vmem:[%s13847_s9 + $0x18] sm:$0xff] }
0x160e   :  { %v3871_v57 = vsub.f32 %v3838_v23, %v11742_v55  ;;  %v3891_v50 = vadd.f32 %v3888_v16, %v11724_v35 }
0x160f   :  { %v3738_v19 = vpop.permute.xlu0 %3737 }
0x1610   :  { %v3889_v40 = vmul.f32 %v3885_v29, %v3871_v57  ;;  %v3746_v49 = vadd.f32 %v3738_v19, %v3716_v14  ;;  %3913 = vrot.lane.b32.xlu0 %v3891_v50, %s9904_s0  ;;  %v12093_v29 = vpack.c.bf16 %v66_v4, %v65_v20 }
0x1612   :  { %9478 = vtanh.f32 %v3746_v49  ;;  %v3892_v5 = vadd.f32 %v3889_v40, %v11742_v55 }
0x1613   :  { %v3740_v54 = vpop.permute.xlu1 %3739 }
0x1614   :  { %v3747_v41 = vadd.f32 %v3740_v54, %v3717_v6  ;;  %3493 = vrot.lane.b32.xlu0 %v11706_v27, %s9904_s0  ;;  %3915 = vrot.lane.b32.xlu1 %v3892_v5, %s9904_s0  ;;  %v12009_v27 = vld [vmem:[%s13839_s1 + $0xb0] sm:$0xff] }
0x1616   :  { %9480 = vtanh.f32 %v3747_v41 }
0x1617   :  { %v3742_v17 = vpop.permute.xlu0 %3741 }
0x1618   :  { %3495 = vrot.lane.b32.xlu0 %v11724_v35, %s9904_s0  ;;  %3850 = vperm.xlu1 %9099, %v11999_v22   ;;  %v3748_v58 = vadd.f32 %v3742_v17, %v3718_v13  ;;  %v12019_v35 = vld [vmem:[%s13839_s1 + $0xb8] sm:$0xff] }
0x161a   :  { %9482 = vtanh.f32 %v3748_v58 }
0x161c   :  { %v9479_v30 = vpop.eup %9478  ;;  %3855 = vperm.xlu0 %9098, %v12009_v27  }
0x161d   :  { %3755 = vrot.lane.b32.xlu1 %v9479_v30, %s9904_s0 }
0x1620   :  { %v9481_v46 = vpop.eup %9480 }
0x1621   :  { %3497 = vrot.lane.b32.xlu1 %v11742_v55, %s9904_s0  ;;  %3757 = vrot.lane.b32.xlu0 %v9481_v46, %s9904_s0  ;;  %v64_v55 = vld [vmem:[%s13847_s9 + $0x8] sm:$0xff] }
0x1624   :  { %v9483_v43 = vpop.eup %9482 }
0x1625   :  { %3860 = vperm.xlu1 %9099, %v12019_v35   ;;  %3057 = vrot.lane.b32.xlu0 %v11480_v44, %s9904_s0 }
0x1629   :  { %3759 = vrot.lane.b32.xlu1 %v9483_v43, %s9904_s0  ;;  %3059 = vrot.lane.b32.xlu0 %v11498_v33, %s9904_s0 }
0x162d   :  { %3061 = vrot.lane.b32.xlu1 %v11516_v8, %s9904_s0  ;;  %2621 = vrot.lane.b32.xlu0 %v11259_v11, %s9904_s0  ;;  %v63_v8 = vld [vmem:[%s13847_s9] sm:$0xff] }
0x162e   :  { %v12080_v34 = vpack.c.bf16 %v64_v55, %v63_v8 }
0x1630   :  { %8989 = vmatpush3.bf16.msra.mxu1 %v12080_v34 }
0x1631   :  { %2623 = vrot.lane.b32.xlu1 %v11277_v24, %s9904_s0  ;;  %2625 = vrot.lane.b32.xlu0 %v11292_v37, %s9904_s0 }
0x1632   :  { %8990 = vmatprep.subr.bf16.mxu1 %v13903_v59 }
0x1634   :  { %8992 = vmatpush3.bf16.msra.mxu1 %v12093_v29 }
0x1635   :  { %2184 = vrot.lane.b32.xlu1 %v11048_v32, %s9904_s0  ;;  %2186 = vrot.lane.b32.xlu0 %v11065_v1, %s9904_s0  ;;  %v13927_v32 = vld [vmem:[#allocation25_spill] sm:$0xff] }
0x1636   :  { %8993 = vmatprep.subr.bf16.mxu1 %v13903_v59 }
0x1637   :  { %8581 = vmatmul.mubr.f32.vlgmr.msra.gmra.mrb[78].mxu1 %v13902_v3 }
0x1638   :  { %8583 = vmatprep.mubr.msk.f32.mxu1 %vm9903_vm0, %v13902_v3  ;;  %8995 = vmatpush3.bf16.msra.mxu1 %v11933_v47 }
0x1639   :  { %2188 = vrot.lane.b32.xlu1 %v11083_v63, %s9904_s0  ;;  %1738 = vrot.lane.b32.xlu0 %v10863_v0, %s9904_s0  ;;  %v13928_v0 = vld [vmem:[#allocation26_spill] sm:$0xff] }
0x163a   :  { %8996 = vmatprep.subr.bf16.mxu1 %v13903_v59 }
0x163b   :  { %8584 = vmatmul.mubr.f32.gmra.mrb[80].mxu1 %v13902_v3 }
0x163c   :  { %8586 = vmatprep.mubr.msk.f32.mxu1 %vm9903_vm0, %v13902_v3  ;;  %8998 = vmatpush3.bf16.msra.mxu1 %v11956_v51 }
0x163d   :  { %1740 = vrot.lane.b32.xlu1 %v10871_v9, %s9904_s0  ;;  %1742 = vrot.lane.b32.xlu0 %v10879_v61, %s9904_s0  ;;  %v13929_v9 = vld [vmem:[#allocation27_spill] sm:$0xff] }
0x163e   :  { %8999 = vmatprep.subr.bf16.mxu1 %v13903_v59 }
0x163f   :  { %8587 = vmatmul.mubr.f32.gmra.mrb[82].mxu1 %v13902_v3 }
0x1640   :  { %8597 = vmatprep.mubr.msk.f32.mxu1 %vm9903_vm0, %v13902_v3 }
0x1641   :  { %1292 = vrot.lane.b32.xlu1 %v10642_v60, %s9904_s0  ;;  %1294 = vrot.lane.b32.xlu0 %v10650_v15, %s9904_s0 }
0x1645   :  { %1296 = vrot.lane.b32.xlu1 %v10658_v28, %s9904_s0  ;;  %845 = vrot.lane.b32.xlu0 %v13927_v32, %s9904_s0 }
0x1649   :  { %847 = vrot.lane.b32.xlu0 %v13928_v0, %s9904_s0  ;;  %v13931_v0 = vld [vmem:[#allocation15_spill] sm:$0xff] }
0x164d   :  { %849 = vrot.lane.b32.xlu0 %v13929_v9, %s9904_s0 }
0x167e   :  { %v3912_v61 = vpop.permute.xlu1 %3911 }
0x167f   :  { %3920 = vst.msk [vmem:[#allocation3] sm:$0xff] %vm855_vm2, %v3912_v61  ;;  %v4383_v20 = vpop.f32.mrb[72].mxu1 }
0x1680   :  { %v8565_v4 = vpop.f32.mrb[73].mxu1 }
0x1682   :  { %v3914_v60 = vpop.permute.xlu0 %3913 }
0x1683   :  { %3921 = vst.msk [vmem:[#allocation3 + $0x8] sm:$0xff] %vm855_vm2, %v3914_v60 }
0x1686   :  { %v3494_v15 = vpop.permute.xlu0 %3493  ;;  %v3916_v1 = vpop.permute.xlu1 %3915  ;;  %v3923_v28 = vld [vmem:[#allocation3] sm:$0xff] }
0x1687   :  { %3502 = vst.msk [vmem:[#allocation3 + $0x18] sm:$0xff] %vm855_vm2, %v3494_v15  ;;  %3922 = vst.msk [vmem:[#allocation3 + $0x10] sm:$0xff] %vm855_vm2, %v3916_v1  ;;  %7901 = vmatmul.mubr.msk.f32.vlgmr.msra.gmra.mrb[72].mxu0 %vm3975_vm3, %v3923_v28  ;;  %v13933_v15 = vld [vmem:[#allocation17_spill] sm:$0xff]  ;;  %v13934_v1 = vld [vmem:[#allocation16_spill] sm:$0xff] }
0x1688   :  { %4118 = vmatprep.mubr.f32.mxu0 %v13902_v3  ;;  %9037 = vmatpush3.bf16.msra.mxu0 %v12080_v34 }
0x1689   :  { %9038 = vmatprep.subr.bf16.mxu0 %v13903_v59 }
0x168a   :  { %v3496_v63 = vpop.permute.xlu0 %3495  ;;  %v3924_v11 = vld [vmem:[#allocation3 + $0x8] sm:$0xff] }
0x168b   :  { %3503 = vst.msk [vmem:[#allocation3 + $0x20] sm:$0xff] %vm855_vm2, %v3496_v63  ;;  %7902 = vmatmul.mubr.msk.f32.gmra.mrb[74].mxu0 %vm3975_vm3, %v3924_v11 }
0x168c   :  { %4124 = vmatprep.mubr.f32.mxu0 %v13902_v3  ;;  %9040 = vmatpush3.bf16.msra.mxu0 %v12093_v29 }
0x168d   :  { %9047 = vmatprep.subr.bf16.mxu0 %v13903_v59 }
0x168e   :  { %v3925_v24 = vld [vmem:[#allocation3 + $0x10] sm:$0xff]  ;;  %v3926_v37 = vld [vmem:[#allocation3 + $0x18] sm:$0xff] }
0x168f   :  { %7903 = vmatmul.mubr.msk.f32.gmra.mrb[76].mxu0 %vm3975_vm3, %v3925_v24  ;;  %v13935_v24 = vld [vmem:[#allocation18_spill] sm:$0xff] }
0x1690   :  { %4130 = vmatprep.mubr.f32.mxu0 %v13902_v3 }
0x1692   :  { %v3927_v44 = vld [vmem:[#allocation3 + $0x20] sm:$0xff] }
0x1693   :  { %7904 = vmatmul.mubr.msk.f32.gmra.mrb[78].mxu0 %vm3975_vm3, %v3926_v37 }
0x1694   :  { %4136 = vmatprep.mubr.f32.mxu0 %v13902_v3 }
0x1697   :  { %7905 = vmatmul.mubr.msk.f32.gmra.mrb[80].mxu0 %vm3975_vm3, %v3927_v44  ;;  %v3851_v33 = vpop.permute.xlu1 %3850 }
0x1698   :  { %4142 = vmatprep.mubr.f32.mxu0 %v13902_v3 }
0x169b   :  { %v3856_v7 = vpop.permute.xlu0 %3855  ;;  %v3756_v38 = vpop.permute.xlu1 %3755 }
0x169c   :  { %v3764_v31 = vmul.f32 %v11879_v25, %v3756_v38 }
0x169e   :  { %v3845_v36 = vsub.f32 %v3764_v31, %v11782_v10 }
0x169f   :  { %v3758_v21 = vpop.permute.xlu0 %3757  ;;  %v3498_v26 = vpop.permute.xlu1 %3497 }
0x16a0   :  { %v3863_v25 = vmul.f32 %v3851_v33, %v3845_v36  ;;  %v3765_v16 = vmul.f32 %v11883_v2, %v3758_v21  ;;  %3504 = vst.msk [vmem:[#allocation3 + $0x28] sm:$0xff] %vm855_vm2, %v3498_v26  ;;  %v4388_v21 = vpop.f32.mrb[74].mxu1 }
0x16a1   :  { %v8568_v26 = vpop.f32.mrb[75].mxu1 }
0x16a2   :  { %v3846_v23 = vsub.f32 %v3765_v16, %v11792_v18  ;;  %v3866_v57 = vadd.f32 %v3863_v25, %v11782_v10  ;;  %v4393_v16 = vpop.f32.mrb[76].mxu1 }
0x16a3   :  { %v3058_v14 = vpop.permute.xlu0 %3057 }
0x16a4   :  { %v3864_v50 = vmul.f32 %v3856_v7, %v3846_v23  ;;  %3066 = vst.msk [vmem:[#allocation3 + $0x30] sm:$0xff] %vm855_vm2, %v3058_v14  ;;  %3896 = vrot.lane.b32.xlu1 %v3866_v57, %s9906_s3  ;;  %v3861_v2 = vpop.permute.xlu1 %3860  ;;  %v8571_v23 = vpop.f32.mrb[77].mxu1 }
0x16a6   :  { %v3867_v19 = vadd.f32 %v3864_v50, %v11792_v18 }
0x16a7   :  { %v3060_v10 = vpop.permute.xlu0 %3059  ;;  %v3928_v12 = vld [vmem:[#allocation3 + $0x28] sm:$0xff] }
0x16a8   :  { %3067 = vst.msk [vmem:[#allocation3 + $0x38] sm:$0xff] %vm855_vm2, %v3060_v10  ;;  %3898 = vrot.lane.b32.xlu1 %v3867_v19, %s9906_s3  ;;  %7906 = vmatmul.mubr.msk.f32.gmra.mrb[82].mxu0 %vm3975_vm3, %v3928_v12  ;;  %v3760_v39 = vpop.permute.xlu1 %3759  ;;  %v12205_v12 = vld [vmem:[%s13845_s7] sm:$0x3] }
0x16a9   :  { %v3766_v40 = vmul.f32 %v11887_v42, %v3760_v39  ;;  %4148 = vmatprep.mubr.f32.mxu0 %v13902_v3  ;;  %v13936_v39 = vld [vmem:[#allocation7_spill] sm:$0xff] }
0x16ab   :  { %v3847_v18 = vsub.f32 %v3766_v40, %v11801_v62  ;;  %v2622_v49 = vpop.permute.xlu0 %2621  ;;  %v3929_v56 = vld [vmem:[#allocation3 + $0x30] sm:$0xff]  ;;  %v13937_v40 = vsub.s32 0, %v13936_v39 }
0x16ac   :  { %2630 = vst.msk [vmem:[#allocation3 + $0x48] sm:$0xff] %vm855_vm2, %v2622_v49  ;;  %7907 = vmatmul.mubr.msk.f32.gmra.mrb[84].mxu0 %vm3975_vm3, %v3929_v56  ;;  %v3062_v6 = vpop.permute.xlu1 %3061 }
0x16ad   :  { %v3865_v5 = vmul.f32 %v3861_v2, %v3847_v18  ;;  %3068 = vst.msk [vmem:[#allocation3 + $0x40] sm:$0xff] %vm855_vm2, %v3062_v6  ;;  %4154 = vmatprep.mubr.f32.mxu0 %v13902_v3  ;;  %v12210_v18 = vrot.slane %v12205_v12, %v13937_v40 }
0x16af   :  { %v2626_v42 = vpop.permute.xlu0 %2625  ;;  %v3930_v54 = vld [vmem:[#allocation3 + $0x38] sm:$0xff]  ;;  %v3868_v41 = vadd.f32 %v3865_v5, %v11801_v62 }
0x16b0   :  { %2632 = vst.msk [vmem:[#allocation3 + $0x58] sm:$0xff] %vm855_vm2, %v2626_v42  ;;  %7908 = vmatmul.mubr.msk.f32.gmra.mrb[86].mxu0 %vm3975_vm3, %v3930_v54  ;;  %v2624_v52 = vpop.permute.xlu1 %2623 }
0x16b1   :  { %2631 = vst.msk [vmem:[#allocation3 + $0x50] sm:$0xff] %vm855_vm2, %v2624_v52  ;;  %3900 = vrot.lane.b32.xlu1 %v3868_v41, %s9906_s3  ;;  %4160 = vmatprep.mubr.f32.mxu0 %v13902_v3 }
0x16b3   :  { %v2187_v17 = vpop.permute.xlu0 %2186  ;;  %v3932_v46 = vld [vmem:[#allocation3 + $0x48] sm:$0xff] }
0x16b4   :  { %2195 = vst.msk [vmem:[#allocation3 + $0x68] sm:$0xff] %vm855_vm2, %v2187_v17  ;;  %v2185_v13 = vpop.permute.xlu1 %2184  ;;  %v3931_v58 = vld [vmem:[#allocation3 + $0x40] sm:$0xff] }
0x16b5   :  { %2616 = vst.msk [vmem:[#allocation3 + $0x68] sm:$0xff] %vm111_vm1, %v11364_v48  ;;  %7909 = vmatmul.mubr.msk.f32.gmra.mrb[88].mxu0 %vm3975_vm3, %v3931_v58  ;;  %v13930_v48 = vld [vmem:[#allocation28_spill] sm:$0xff] }
0x16b6   :  { %2194 = vst.msk [vmem:[#allocation3 + $0x60] sm:$0xff] %vm855_vm2, %v2185_v13  ;;  %4166 = vmatprep.mubr.f32.mxu0 %v13902_v3 }
0x16b7   :  { %2615 = vst.msk [vmem:[#allocation3 + $0x60] sm:$0xff] %vm111_vm1, %v11356_v45  ;;  %v1739_v62 = vpop.permute.xlu0 %1738  ;;  %v3934_v60 = vld [vmem:[#allocation3 + $0x58] sm:$0xff] }
0x16b8   :  { %1748 = vst.msk [vmem:[#allocation3 + $0x78] sm:$0xff] %vm855_vm2, %v1739_v62  ;;  %v2189_v30 = vpop.permute.xlu1 %2188  ;;  %v3933_v32 = vld [vmem:[#allocation3 + $0x50] sm:$0xff] }
0x16b9   :  { %3051 = vst.msk [vmem:[#allocation3 + $0x78] sm:$0xff] %vm111_vm1, %v11583_v53  ;;  %7910 = vmatmul.mubr.msk.f32.gmra.mrb[90].mxu0 %vm3975_vm3, %v3932_v46  ;;  %v13932_v53 = vld [vmem:[#allocation14_spill] sm:$0xff] }
0x16ba   :  { %2196 = vst.msk [vmem:[#allocation3 + $0x70] sm:$0xff] %vm855_vm2, %v2189_v30  ;;  %4172 = vmatprep.mubr.f32.mxu0 %v13902_v3 }
0x16bb   :  { %2617 = vst.msk [vmem:[#allocation3 + $0x70] sm:$0xff] %vm111_vm1, %v13930_v48  ;;  %v1743_v45 = vpop.permute.xlu0 %1742 }
0x16bc   :  { %1750 = vst.msk [vmem:[#allocation3 + $0x88] sm:$0xff] %vm855_vm2, %v1743_v45  ;;  %v1741_v43 = vpop.permute.xlu1 %1740  ;;  %v3936_v44 = vld [vmem:[#allocation3 + $0x68] sm:$0xff] }
0x16bd   :  { %3053 = vst.msk [vmem:[#allocation3 + $0x88] sm:$0xff] %vm111_vm1, %v13931_v0  ;;  %7911 = vmatmul.mubr.msk.f32.gmra.mrb[92].mxu0 %vm3975_vm3, %v3933_v32 }
0x16be   :  { %1749 = vst.msk [vmem:[#allocation3 + $0x80] sm:$0xff] %vm855_vm2, %v1741_v43  ;;  %4178 = vmatprep.mubr.f32.mxu0 %v13902_v3  ;;  %v3935_v11 = vld [vmem:[#allocation3 + $0x60] sm:$0xff] }
0x16bf   :  { %3052 = vst.msk [vmem:[#allocation3 + $0x80] sm:$0xff] %vm111_vm1, %v13932_v53  ;;  %v1295_v9 = vpop.permute.xlu0 %1294 }
0x16c0   :  { %1303 = vst.msk [vmem:[#allocation3 + $0x98] sm:$0xff] %vm855_vm2, %v1295_v9  ;;  %v1293_v61 = vpop.permute.xlu1 %1292  ;;  %v3938_v55 = vld [vmem:[#allocation3 + $0x78] sm:$0xff] }
0x16c1   :  { %3488 = vst.msk [vmem:[#allocation3 + $0x98] sm:$0xff] %vm111_vm1, %v13933_v15  ;;  %7912 = vmatmul.mubr.msk.f32.gmra.mrb[94].mxu0 %vm3975_vm3, %v3934_v60 }
0x16c2   :  { %1302 = vst.msk [vmem:[#allocation3 + $0x90] sm:$0xff] %vm855_vm2, %v1293_v61  ;;  %4184 = vmatprep.mubr.f32.mxu0 %v13902_v3  ;;  %v3937_v8 = vld [vmem:[#allocation3 + $0x70] sm:$0xff] }
0x16c3   :  { %3487 = vst.msk [vmem:[#allocation3 + $0x90] sm:$0xff] %vm111_vm1, %v13934_v1  ;;  %v846_v28 = vpop.permute.xlu0 %845 }
0x16c4   :  { %856 = vst.msk [vmem:[#allocation3 + $0xa8] sm:$0xff] %vm855_vm2, %v846_v28  ;;  %v1297_v63 = vpop.permute.xlu1 %1296  ;;  %v3940_v38 = vld [vmem:[#allocation3 + $0x88] sm:$0xff] }
0x16c5   :  { %1304 = vst.msk [vmem:[#allocation3 + $0xa0] sm:$0xff] %vm855_vm2, %v1297_v63  ;;  %7913 = vmatmul.mubr.msk.f32.gmra.mrb[96].mxu0 %vm3975_vm3, %v3935_v11 }
0x16c6   :  { %3489 = vst.msk [vmem:[#allocation3 + $0xa0] sm:$0xff] %vm111_vm1, %v13935_v24  ;;  %4190 = vmatprep.mubr.f32.mxu0 %v13902_v3  ;;  %v3939_v7 = vld [vmem:[#allocation3 + $0x80] sm:$0xff] }
0x16c7   :  { %v848_v37 = vpop.permute.xlu0 %847 }
0x16c8   :  { %857 = vst.msk [vmem:[#allocation3 + $0xb0] sm:$0xff] %vm855_vm2, %v848_v37  ;;  %v3942_v36 = vld [vmem:[#allocation3 + $0x98] sm:$0xff] }
0x16c9   :  { %7914 = vmatmul.mubr.msk.f32.gmra.mrb[98].mxu0 %vm3975_vm3, %v3936_v44 }
0x16ca   :  { %4196 = vmatprep.mubr.f32.mxu0 %v13902_v3  ;;  %v3941_v31 = vld [vmem:[#allocation3 + $0x90] sm:$0xff] }
0x16cb   :  { %v850_v33 = vpop.permute.xlu0 %849 }
0x16cc   :  { %858 = vst.msk [vmem:[#allocation3 + $0xb8] sm:$0xff] %vm855_vm2, %v850_v33 }
0x16cd   :  { %7915 = vmatmul.mubr.msk.f32.gmra.mrb[100].mxu0 %vm3975_vm3, %v3937_v8  ;;  %v3943_v25 = vld [vmem:[#allocation3 + $0xa0] sm:$0xff] }
0x16ce   :  { %4202 = vmatprep.mubr.f32.mxu0 %v13902_v3 }
0x16d1   :  { %7916 = vmatmul.mubr.msk.f32.gmra.mrb[102].mxu0 %vm3975_vm3, %v3938_v55 }
0x16d2   :  { %4208 = vmatprep.mubr.f32.mxu0 %v13902_v3 }
0x16d5   :  { %7917 = vmatmul.mubr.msk.f32.gmra.mrb[104].mxu0 %vm3975_vm3, %v3939_v7 }
0x16d6   :  { %4214 = vmatprep.mubr.f32.mxu0 %v13902_v3 }
0x16d9   :  { %7918 = vmatmul.mubr.msk.f32.gmra.mrb[106].mxu0 %vm3975_vm3, %v3940_v38 }
0x16da   :  { %4220 = vmatprep.mubr.f32.mxu0 %v13902_v3 }
0x16dd   :  { %7919 = vmatmul.mubr.msk.f32.gmra.mrb[108].mxu0 %vm3975_vm3, %v3941_v31 }
0x16de   :  { %4226 = vmatprep.mubr.f32.mxu0 %v13902_v3 }
0x16e1   :  { %7920 = vmatmul.mubr.msk.f32.gmra.mrb[110].mxu0 %vm3975_vm3, %v3942_v36 }
0x16e2   :  { %4232 = vmatprep.mubr.f32.mxu0 %v13902_v3 }
0x16e5   :  { %7921 = vmatmul.mubr.msk.f32.gmra.mrb[112].mxu0 %vm3975_vm3, %v3943_v25 }
0x16e6   :  { %4238 = vmatprep.mubr.f32.mxu0 %v13902_v3 }
0x170a   :  { %v4466_v53 = vpop.f32.mrb[78].mxu1 }
0x170b   :  { %v8582_v9 = vpop.f32.mrb[79].mxu1 }
0x170e   :  { %v4471_v61 = vpop.f32.mrb[80].mxu1 }
0x170f   :  { %v8585_v60 = vpop.f32.mrb[81].mxu1 }
0x1712   :  { %v4476_v11 = vpop.f32.mrb[82].mxu1 }
0x1713   :  { %v8588_v24 = vpop.f32.mrb[83].mxu1 }
0x1716   :  { %v3897_v57 = vpop.permute.xlu1 %3896 }
0x1717   :  { %3905 = vst.msk [vmem:[#allocation3 + $0xa8] sm:$0xff] %vm111_vm1, %v3897_v57 }
0x171a   :  { %v3899_v14 = vpop.permute.xlu1 %3898 }
0x171b   :  { %3906 = vst.msk [vmem:[#allocation3 + $0xb0] sm:$0xff] %vm111_vm1, %v3899_v14 }
0x171e   :  { %v3944_v50 = vld [vmem:[#allocation3 + $0xa8] sm:$0xff] }
0x171f   :  { %7922 = vmatmul.mubr.msk.f32.gmra.mrb[114].mxu0 %vm3975_vm3, %v3944_v50 }
0x1720   :  { %4244 = vmatprep.mubr.f32.mxu0 %v13902_v3 }
0x1722   :  { %v3945_v2 = vld [vmem:[#allocation3 + $0xb0] sm:$0xff] }
0x1723   :  { %7923 = vmatmul.mubr.msk.f32.gmra.mrb[116].mxu0 %vm3975_vm3, %v3945_v2  ;;  %v3901_v19 = vpop.permute.xlu1 %3900 }
0x1724   :  { %3907 = vst.msk [vmem:[#allocation3 + $0xb8] sm:$0xff] %vm111_vm1, %v3901_v19  ;;  %4250 = vmatprep.mubr.f32.mxu0 %v13902_v3 }
0x172b   :  { %v3946_v10 = vld [vmem:[#allocation3 + $0xb8] sm:$0xff] }
0x172c   :  { %7924 = vmatmul.mubr.msk.f32.gmra.mrb[118].mxu0 %vm3975_vm3, %v3946_v10 }
0x172d   :  { %8716 = vmatprep.mubr.msk.f32.mxu0 %vm9903_vm0, %v13902_v3 }
0x175a   :  { %v4114_v49 = vpop.f32.mrb[72].mxu0 }
0x175b   :  { %v4115_v56 = vadd.f32 %v4114_v49, %v12210_v18  ;;  %v12213_v6 = vpop.f32.mrb[73].mxu0 }
0x175c   :  { %13938 = vst [vmem:[#allocation11_spill] sm:$0xff] %v12213_v6 }
0x175d   :  { %v4397_v5 = vadd.f32 %v4383_v20, %v4115_v56 }
0x175e   :  { %v4120_v42 = vpop.f32.mrb[74].mxu0 }
0x175f   :  { %9484 = vtanh.f32 %v4397_v5  ;;  %v4121_v54 = vadd.f32 %v4120_v42, %v12210_v18  ;;  %v12216_v41 = vpop.f32.mrb[75].mxu0 }
0x1760   :  { %13939 = vst [vmem:[#allocation12_spill] sm:$0xff] %v12216_v41 }
0x1761   :  { %v4398_v52 = vadd.f32 %v4388_v21, %v4121_v54 }
0x1762   :  { %v4126_v17 = vpop.f32.mrb[76].mxu0 }
0x1763   :  { %9486 = vtanh.f32 %v4398_v52  ;;  %v4127_v13 = vadd.f32 %v4126_v17, %v12210_v18  ;;  %v12219_v58 = vpop.f32.mrb[77].mxu0  ;;  %v7926_v9 = vmul.f32 -1.442695, %v4398_v52 }
0x1764   :  { %13940 = vst [vmem:[#allocation13_spill] sm:$0xff] %v12219_v58 }
0x1765   :  { %v4399_v62 = vadd.f32 %v4393_v16, %v4127_v13  ;;  %v7925_v13 = vmul.f32 -1.442695, %v4397_v5 }
0x1766   :  { %v12221_v30 = vpop.f32.mrb[78].mxu0 }
0x1767   :  { %9488 = vtanh.f32 %v4399_v62  ;;  %v12223_v46 = vpop.f32.mrb[79].mxu0 }
0x1768   :  { %13941 = vst [vmem:[#allocation19_spill] sm:$0xff] %v12223_v46  ;;  %9490 = vpow2.f32 %v7925_v13 }
0x1769   :  { %v9485_v48 = vpop.eup %9484 }
0x176a   :  { %v12225_v45 = vpop.f32.mrb[80].mxu0  ;;  %4510 = vrot.lane.b32.xlu0 %v9485_v48, %s9904_s0  ;;  %v7927_v48 = vmul.f32 -1.442695, %v4399_v62 }
0x176b   :  { %v12228_v43 = vpop.f32.mrb[81].mxu0 }
0x176c   :  { %13942 = vst [vmem:[#allocation20_spill] sm:$0xff] %v12228_v43  ;;  %9492 = vpow2.f32 %v7927_v48 }
0x176d   :  { %v9487_v32 = vpop.eup %9486  ;;  %9494 = vpow2.f32 %v7926_v9 }
0x176e   :  { %4512 = vrot.lane.b32.xlu1 %v9487_v32, %s9904_s0  ;;  %v13952_v32 = vsub.s32 1, %v13936_v39 }
0x1771   :  { %v9489_v0 = vpop.eup %9488 }
0x1772   :  { %4514 = vrot.lane.b32.xlu0 %v9489_v0, %s9904_s0  ;;  %v12299_v0 = vrot.slane %v12205_v12, %v13952_v32 }
0x177b   :  { %v12232_v15 = vpop.f32.mrb[82].mxu0 }
0x177c   :  { %v12234_v1 = vpop.f32.mrb[83].mxu0 }
0x177d   :  { %13943 = vst [vmem:[#allocation21_spill] sm:$0xff] %v12234_v1  ;;  %v9491_v1 = vpop.eup %9490 }
0x177e   :  { %v4492_v13 = vadd.f32 1.0, %v9491_v1  ;;  %v9493_v48 = vpop.eup %9492 }
0x177f   :  { %v12236_v28 = vpop.f32.mrb[84].mxu0  ;;  %v4494_v12 = vadd.f32 1.0, %v9493_v48  ;;  %v9495_v32 = vpop.eup %9494 }
0x1780   :  { %v12238_v63 = vpop.f32.mrb[85].mxu0 }
0x1781   :  { %13944 = vst [vmem:[#allocation8_spill] sm:$0xff] %v12238_v63 }
0x1783   :  { %v12240_v37 = vpop.f32.mrb[86].mxu0 }
0x1784   :  { %v12242_v44 = vpop.f32.mrb[87].mxu0 }
0x1785   :  { %13945 = vst [vmem:[#allocation9_spill] sm:$0xff] %v12242_v44  ;;  %v4145_v44 = vadd.f32 %v12232_v15, %v12210_v18 }
0x1788   :  { %v12244_v33 = vpop.f32.mrb[88].mxu0 }
0x1789   :  { %v12246_v8 = vpop.f32.mrb[89].mxu0 }
0x178a   :  { %13946 = vst [vmem:[#allocation10_spill] sm:$0xff] %v12246_v8 }
0x178c   :  { %v12248_v55 = vpop.f32.mrb[90].mxu0 }
0x178d   :  { %v12250_v7 = vpop.f32.mrb[91].mxu0 }
0x1790   :  { %v12252_v38 = vpop.f32.mrb[92].mxu0 }
0x1791   :  { %v12254_v31 = vpop.f32.mrb[93].mxu0 }
0x1794   :  { %v12256_v20 = vpop.f32.mrb[94].mxu0 }
0x1795   :  { %v12258_v4 = vpop.f32.mrb[95].mxu0 }
0x1798   :  { %v12260_v36 = vpop.f32.mrb[96].mxu0 }
0x1799   :  { %v12262_v21 = vpop.f32.mrb[97].mxu0 }
0x179c   :  { %v12264_v26 = vpop.f32.mrb[98].mxu0 }
0x179d   :  { %v12266_v25 = vpop.f32.mrb[99].mxu0 }
0x17a0   :  { %v12268_v16 = vpop.f32.mrb[100].mxu0 }
0x17a1   :  { %v12270_v23 = vpop.f32.mrb[101].mxu0 }
0x17a4   :  { %v12272_v57 = vpop.f32.mrb[102].mxu0 }
0x17a5   :  { %v12274_v14 = vpop.f32.mrb[103].mxu0 }
0x17a8   :  { %v12276_v50 = vpop.f32.mrb[104].mxu0 }
0x17a9   :  { %13947 = vst [vmem:[#allocation22_spill] sm:$0xff] %v12276_v50  ;;  %v12278_v2 = vpop.f32.mrb[105].mxu0 }
0x17ac   :  { %v12280_v19 = vpop.f32.mrb[106].mxu0 }
0x17ad   :  { %13948 = vst [vmem:[#allocation23_spill] sm:$0xff] %v12280_v19  ;;  %v12282_v10 = vpop.f32.mrb[107].mxu0 }
0x17b0   :  { %v12284_v40 = vpop.f32.mrb[108].mxu0 }
0x17b1   :  { %13949 = vst [vmem:[#allocation24_spill] sm:$0xff] %v12284_v40  ;;  %v12286_v49 = vpop.f32.mrb[109].mxu0 }
0x17b2   :  { %v4225_v15 = vadd.f32 %v12286_v49, %v12299_v0 }
0x17b4   :  { %v12288_v56 = vpop.f32.mrb[110].mxu0 }
0x17b5   :  { %13950 = vst [vmem:[#allocation25_spill] sm:$0xff] %v12288_v56  ;;  %v12290_v42 = vpop.f32.mrb[111].mxu0 }
0x17b8   :  { %v12292_v54 = vpop.f32.mrb[112].mxu0 }
0x17b9   :  { %13951 = vst [vmem:[#allocation26_spill] sm:$0xff] %v12292_v54  ;;  %v12294_v17 = vpop.f32.mrb[113].mxu0 }
0x17ba   :  { %v4237_v49 = vadd.f32 %v12294_v17, %v12299_v0 }
0x17dc   :  { %v4511_v1 = vpop.permute.xlu0 %4510 }
0x17f2   :  { %v12301_v60 = vpop.f32.mrb[114].mxu0 }
0x17f3   :  { %13953 = vst [vmem:[#allocation27_spill] sm:$0xff] %v12301_v60  ;;  %v4242_v24 = vpop.f32.mrb[115].mxu0 }
0x17f4   :  { %v4243_v58 = vadd.f32 %v4242_v24, %v12299_v0 }
0x17f6   :  { %v4480_v41 = vadd.f32 %v4466_v53, %v4243_v58  ;;  %v12304_v6 = vpop.f32.mrb[116].mxu0  ;;  %v4493_v53 = vadd.f32 1.0, %v9495_v32 }
0x17f7   :  { %13954 = vst [vmem:[#allocation28_spill] sm:$0xff] %v12304_v6  ;;  %v4248_v5 = vpop.f32.mrb[117].mxu0 }
0x17f8   :  { %9496 = vtanh.f32 %v4480_v41  ;;  %v4249_v62 = vadd.f32 %v4248_v5, %v12299_v0 }
0x17fa   :  { %v4481_v39 = vadd.f32 %v4471_v61, %v4249_v62 }
0x17fc   :  { %9498 = vtanh.f32 %v4481_v39 }
0x17fd   :  { %9500 = vrcp.f32 %v4492_v13  ;;  %v4515_v13 = vpop.permute.xlu0 %4514 }
0x17fe   :  { %9502 = vrcp.f32 %v4494_v12  ;;  %v4513_v12 = vpop.permute.xlu1 %4512 }
0x17ff   :  { %v12307_v52 = vpop.f32.mrb[118].mxu0 }
0x1800   :  { %13955 = vst [vmem:[#allocation15_spill] sm:$0xff] %v12307_v52  ;;  %v4254_v60 = vpop.f32.mrb[119].mxu0 }
0x1801   :  { %v4255_v9 = vadd.f32 %v4254_v60, %v12299_v0 }
0x1802   :  { %v9497_v58 = vpop.eup %9496 }
0x1803   :  { %v4482_v24 = vadd.f32 %v4476_v11, %v4255_v9  ;;  %4582 = vrot.lane.b32.xlu1 %v9497_v58, %s9904_s0  ;;  %v7928_v58 = vmul.f32 -1.442695, %v4480_v41 }
0x1805   :  { %9504 = vtanh.f32 %v4482_v24 }
0x1806   :  { %v9499_v5 = vpop.eup %9498  ;;  %9506 = vrcp.f32 %v4493_v53  ;;  %v7929_v53 = vmul.f32 -1.442695, %v4481_v39 }
0x1807   :  { %4584 = vrot.lane.b32.xlu0 %v9499_v5, %s9904_s0  ;;  %v12312_v61 = vpop.eup %9500  ;;  %9508 = vpow2.f32 %v7928_v58  ;;  %v7930_v5 = vmul.f32 -1.442695, %v4482_v24 }
0x1808   :  { %v4519_v62 = vmul.f32 %v12312_v61, %v4511_v1  ;;  %v12316_v60 = vpop.eup %9502  ;;  %9510 = vpow2.f32 %v7929_v53 }
0x1809   :  { %v4521_v48 = vmul.f32 %v12316_v60, %v4515_v13  ;;  %9512 = vpow2.f32 %v7930_v5 }
0x180b   :  { %4525 = vrot.lane.b32.xlu0 %v4519_v62, %s9906_s3 }
0x180f   :  { %v9505_v11 = vpop.eup %9504  ;;  %4529 = vrot.lane.b32.xlu0 %v4521_v48, %s9906_s3 }
0x1810   :  { %4586 = vrot.lane.b32.xlu1 %v9505_v11, %s9904_s0  ;;  %v12321_v32 = vpop.eup %9506 }
0x1811   :  { %v4520_v9 = vmul.f32 %v12321_v32, %v4513_v12  ;;  %v9509_v1 = vpop.eup %9508 }
0x1812   :  { %v4564_v62 = vadd.f32 1.0, %v9509_v1  ;;  %v9511_v13 = vpop.eup %9510 }
0x1813   :  { %v4565_v52 = vadd.f32 1.0, %v9511_v13  ;;  %v9513_v48 = vpop.eup %9512 }
0x1814   :  { %4527 = vrot.lane.b32.xlu1 %v4520_v9, %s9906_s3  ;;  %9514 = vrcp.f32 %v4564_v62  ;;  %v4566_v11 = vadd.f32 1.0, %v9513_v48  ;;  %v4504_v9 = vmul.f32 0.0, %v12312_v61  ;;  %v4505_v62 = vmul.f32 0.0, %v12321_v32 }
0x1815   :  { %9516 = vrcp.f32 %v4565_v52 }
0x1816   :  { %9518 = vrcp.f32 %v4566_v11  ;;  %v4506_v11 = vmul.f32 0.0, %v12316_v60 }
0x181e   :  { %v12325_v6 = vpop.eup %9514 }
0x181f   :  { %v12329_v41 = vpop.eup %9516 }
0x1820   :  { %v12340_v53 = vpop.eup %9518 }
0x1875   :  { %v4583_v43 = vpop.permute.xlu1 %4582 }
0x1876   :  { %v4591_v12 = vmul.f32 %v12325_v6, %v4583_v43  ;;  %v9874_v43 = vld [vmem:[%s13839_s1] sm:$0xff] }
0x1878   :  { %4597 = vrot.lane.b32.xlu1 %v4591_v12, %s9906_s3 }
0x1879   :  { %v4585_v39 = vpop.permute.xlu0 %4584 }
0x187a   :  { %v4592_v24 = vmul.f32 %v12329_v41, %v4585_v39 }
0x187c   :  { %4599 = vrot.lane.b32.xlu0 %v4592_v24, %s9906_s3  ;;  %v9875_v24 = vld [vmem:[%s13839_s1 + $0x8] sm:$0xff] }
0x187d   :  { %v4526_v52 = vpop.permute.xlu0 %4525 }
0x187e   :  { %v12334_v58 = vadd.f32 %v4526_v52, %v4504_v9  ;;  %v9876_v52 = vld [vmem:[%s13839_s1 + $0x10] sm:$0xff] }
0x1880   :  { %9520 = vtanh.f32 %v12334_v58  ;;  %4635 = vperm.xlu0 %9098, %v9874_v43  }
0x1881   :  { %v4530_v13 = vpop.permute.xlu0 %4529 }
0x1882   :  { %v4587_v5 = vpop.permute.xlu1 %4586  ;;  %v12348_v39 = vadd.f32 %v4530_v13, %v4506_v11 }
0x1883   :  { %v4593_v1 = vmul.f32 %v12340_v53, %v4587_v5 }
0x1885   :  { %4601 = vrot.lane.b32.xlu1 %v4593_v1, %s9906_s3  ;;  %v4576_v1 = vmul.f32 0.0, %v12325_v6 }
0x1886   :  { %v4528_v48 = vpop.permute.xlu1 %4527 }
0x1887   :  { %v12346_v12 = vadd.f32 %v4528_v48, %v4505_v62  ;;  %v4577_v48 = vmul.f32 0.0, %v12329_v41 }
0x1889   :  { %9522 = vtanh.f32 %v12346_v12  ;;  %4640 = vperm.xlu1 %9099, %v9875_v24  }
0x188a   :  { %v9521_v9 = vpop.eup %9520  ;;  %9524 = vtanh.f32 %v12348_v39 }
0x188b   :  { %4543 = vrot.lane.b32.xlu0 %v9521_v9, %s9904_s0 }
0x188d   :  { %4645 = vperm.xlu1 %9099, %v9876_v52  }
0x1891   :  { %4662 = vperm.xlu1 %9099, %v11999_v22  }
0x1893   :  { %v9523_v43 = vpop.eup %9522 }
0x1894   :  { %4545 = vrot.lane.b32.xlu0 %v9523_v43, %s9904_s0  ;;  %v9525_v5 = vpop.eup %9524 }
0x1895   :  { %4667 = vperm.xlu1 %9099, %v12009_v27   ;;  %v4578_v27 = vmul.f32 0.0, %v12340_v53 }
0x1898   :  { %4547 = vrot.lane.b32.xlu0 %v9525_v5, %s9904_s0 }
0x1899   :  { %4672 = vperm.xlu1 %9099, %v12019_v35  }
0x18ea   :  { %v4598_v62 = vpop.permute.xlu1 %4597 }
0x18eb   :  { %v12365_v13 = vadd.f32 %v4598_v62, %v4576_v1 }
0x18ed   :  { %9526 = vtanh.f32 %v12365_v13 }
0x18ee   :  { %v4600_v22 = vpop.permute.xlu0 %4599 }
0x18ef   :  { %v12369_v11 = vadd.f32 %v4600_v22, %v4577_v48 }
0x18f1   :  { %9528 = vtanh.f32 %v12369_v11 }
0x18f7   :  { %v9527_v24 = vpop.eup %9526  ;;  %v4602_v9 = vpop.permute.xlu1 %4601 }
0x18f8   :  { %v12373_v52 = vadd.f32 %v4602_v9, %v4578_v27  ;;  %4615 = vrot.lane.b32.xlu0 %v9527_v24, %s9904_s0 }
0x18fa   :  { %9530 = vtanh.f32 %v12373_v52 }
0x18fb   :  { %v9529_v35 = vpop.eup %9528 }
0x18fc   :  { %4617 = vrot.lane.b32.xlu0 %v9529_v35, %s9904_s0 }
0x18ff   :  { %v12378_v43 = vpop.permute.xlu0 %4635 }
0x1900   :  { %13956 = vst [vmem:[#allocation14_spill] sm:$0xff] %v12378_v43 }
0x1903   :  { %v4544_v5 = vpop.permute.xlu0 %4543 }
0x1904   :  { %v9531_v1 = vpop.eup %9530  ;;  %v4552_v62 = vmul.f32 %v12312_v61, %v4544_v5 }
0x1905   :  { %4619 = vrot.lane.b32.xlu1 %v9531_v1, %s9904_s0 }
0x1906   :  { %v12383_v48 = vmul.f32 %v12378_v43, %v4552_v62 }
0x1907   :  { %v4546_v22 = vpop.permute.xlu0 %4545 }
0x1908   :  { %v4553_v27 = vmul.f32 %v12321_v32, %v4546_v22  ;;  %4702 = vrot.lane.b32.xlu0 %v12383_v48, %s9906_s3  ;;  %v12388_v24 = vpop.permute.xlu1 %4640 }
0x1909   :  { %13957 = vst [vmem:[#allocation17_spill] sm:$0xff] %v12388_v24 }
0x190a   :  { %v12391_v9 = vmul.f32 %v12388_v24, %v4553_v27 }
0x190b   :  { %v4548_v35 = vpop.permute.xlu0 %4547 }
0x190c   :  { %v4554_v46 = vmul.f32 %v12316_v60, %v4548_v35  ;;  %v12394_v61 = vpop.permute.xlu1 %4645  ;;  %4704 = vrot.lane.b32.xlu1 %v12391_v9, %s9906_s3 }
0x190d   :  { %13958 = vst [vmem:[#allocation16_spill] sm:$0xff] %v12394_v61 }
0x190e   :  { %v12399_v5 = vmul.f32 %v12394_v61, %v4554_v46 }
0x1910   :  { %4706 = vrot.lane.b32.xlu0 %v12399_v5, %s9906_s3  ;;  %v12403_v32 = vpop.permute.xlu1 %4662 }
0x1911   :  { %13959 = vst [vmem:[#allocation18_spill] sm:$0xff] %v12403_v32 }
0x1914   :  { %v12406_v22 = vpop.permute.xlu1 %4667 }
0x1915   :  { %13960 = vst [vmem:[#allocation7_spill] sm:$0xff] %v12406_v22 }
0x1918   :  { %v12417_v54 = vpop.permute.xlu1 %4672 }
0x1919   :  { %13961 = vst [vmem:[#allocation29_spill] sm:$0xff] %v12417_v54 }
0x196a   :  { %v4616_v1 = vpop.permute.xlu0 %4615 }
0x196b   :  { %v4624_v62 = vmul.f32 %v12325_v6, %v4616_v1 }
0x196d   :  { %v12409_v60 = vmul.f32 %v12403_v32, %v4624_v62 }
0x196e   :  { %v4618_v27 = vpop.permute.xlu0 %4617 }
0x196f   :  { %v4625_v35 = vmul.f32 %v12329_v41, %v4618_v27  ;;  %4800 = vrot.lane.b32.xlu1 %v12409_v60, %s9906_s3 }
0x1971   :  { %v12415_v46 = vmul.f32 %v12406_v22, %v4625_v35 }
0x1973   :  { %4802 = vrot.lane.b32.xlu0 %v12415_v46, %s9906_s3 }
0x1977   :  { %v4620_v6 = vpop.permute.xlu1 %4619 }
0x1978   :  { %v4626_v1 = vmul.f32 %v12340_v53, %v4620_v6  ;;  %v4133_v6 = vadd.f32 %v12221_v30, %v12210_v18 }
0x197a   :  { %v12423_v62 = vmul.f32 %v12417_v54, %v4626_v1  ;;  %v4703_v56 = vpop.permute.xlu0 %4702 }
0x197b   :  { %8598 = vmatmul.mubr.msk.f32.vlgmr.msra.gmra.mrb[84].mxu1 %vm111_vm1, %v4703_v56 }
0x197c   :  { %4804 = vrot.lane.b32.xlu1 %v12423_v62, %s9906_s3  ;;  %8600 = vmatprep.mubr.msk.f32.mxu1 %vm9903_vm0, %v13902_v3 }
0x197d   :  { %9001 = vmatpush3.bf16.msra.mxu1 %v12080_v34 }
0x197e   :  { %v4705_v41 = vpop.permute.xlu1 %4704  ;;  %9002 = vmatprep.subr.bf16.mxu1 %v13903_v59 }
0x197f   :  { %8601 = vmatmul.mubr.msk.f32.gmra.mrb[86].mxu1 %vm111_vm1, %v4705_v41 }
0x1980   :  { %8603 = vmatprep.mubr.msk.f32.mxu1 %vm9903_vm0, %v13902_v3 }
0x1981   :  { %9004 = vmatpush3.bf16.msra.mxu1 %v12093_v29 }
0x1982   :  { %v4707_v53 = vpop.permute.xlu0 %4706  ;;  %9005 = vmatprep.subr.bf16.mxu1 %v13903_v59 }
0x1983   :  { %8604 = vmatmul.mubr.msk.f32.gmra.mrb[88].mxu1 %vm111_vm1, %v4707_v53 }
0x1984   :  { %8614 = vmatprep.mubr.msk.f32.mxu1 %vm9903_vm0, %v13902_v3 }
0x19e1   :  { %v4801_v56 = vpop.permute.xlu1 %4800 }
0x19e2   :  { %8615 = vmatmul.mubr.msk.f32.vlgmr.msra.gmra.mrb[90].mxu1 %vm111_vm1, %v4801_v56  ;;  %v4139_v56 = vadd.f32 %v12225_v45, %v12210_v18 }
0x19e3   :  { %8617 = vmatprep.mubr.msk.f32.mxu1 %vm9903_vm0, %v13902_v3  ;;  %9007 = vmatpush3.bf16.msra.mxu1 %v11933_v47 }
0x19e4   :  { %9008 = vmatprep.subr.bf16.mxu1 %v13903_v59 }
0x19e5   :  { %v4803_v27 = vpop.permute.xlu0 %4802 }
0x19e6   :  { %8618 = vmatmul.mubr.msk.f32.gmra.mrb[92].mxu1 %vm111_vm1, %v4803_v27 }
0x19e7   :  { %8620 = vmatprep.mubr.msk.f32.mxu1 %vm9903_vm0, %v13902_v3  ;;  %9010 = vmatpush3.bf16.msra.mxu1 %v11956_v51 }
0x19e8   :  { %9011 = vmatprep.subr.bf16.mxu1 %v13903_v59 }
0x19ee   :  { %v4805_v35 = vpop.permute.xlu1 %4804 }
0x19ef   :  { %8621 = vmatmul.mubr.msk.f32.gmra.mrb[94].mxu1 %vm111_vm1, %v4805_v35 }
0x19f0   :  { %8631 = vmatprep.mubr.msk.f32.mxu1 %vm9903_vm0, %v13902_v3 }
0x1a4e   :  { %v4780_v1 = vpop.f32.mrb[84].mxu1 }
0x1a4f   :  { %v4794_v41 = vadd.f32 %v4780_v1, %v4133_v6  ;;  %v8599_v53 = vpop.f32.mrb[85].mxu1 }
0x1a51   :  { %9532 = vtanh.f32 %v4794_v41  ;;  %v7940_v45 = vmul.f32 -1.442695, %v4794_v41 }
0x1a52   :  { %v4785_v27 = vpop.f32.mrb[86].mxu1 }
0x1a53   :  { %v4795_v40 = vadd.f32 %v4785_v27, %v4139_v56  ;;  %v8602_v8 = vpop.f32.mrb[87].mxu1 }
0x1a55   :  { %9534 = vtanh.f32 %v4795_v40  ;;  %v7941_v8 = vmul.f32 -1.442695, %v4795_v40 }
0x1a56   :  { %v4790_v35 = vpop.f32.mrb[88].mxu1 }
0x1a57   :  { %v4796_v63 = vadd.f32 %v4790_v35, %v4145_v44  ;;  %v8605_v19 = vpop.f32.mrb[89].mxu1 }
0x1a59   :  { %9536 = vtanh.f32 %v4796_v63  ;;  %v7942_v19 = vmul.f32 -1.442695, %v4796_v63 }
0x1a5a   :  { %9538 = vpow2.f32 %v7940_v45 }
0x1a5b   :  { %v9533_v50 = vpop.eup %9532  ;;  %9540 = vpow2.f32 %v7941_v8 }
0x1a5c   :  { %4922 = vrot.lane.b32.xlu0 %v9533_v50, %s9904_s0  ;;  %v4231_v50 = vadd.f32 %v12290_v42, %v12299_v0 }
0x1a5f   :  { %v9535_v30 = vpop.eup %9534 }
0x1a60   :  { %4924 = vrot.lane.b32.xlu1 %v9535_v30, %s9904_s0 }
0x1a63   :  { %v9537_v6 = vpop.eup %9536 }
0x1a64   :  { %4926 = vrot.lane.b32.xlu0 %v9537_v6, %s9904_s0  ;;  %v9539_v41 = vpop.eup %9538 }
0x1a65   :  { %v4904_v30 = vadd.f32 1.0, %v9539_v41  ;;  %v9541_v40 = vpop.eup %9540 }
0x1a66   :  { %v4905_v42 = vadd.f32 1.0, %v9541_v40 }
0x1ab5   :  { %v4878_v1 = vpop.f32.mrb[90].mxu1 }
0x1ab6   :  { %v4892_v53 = vadd.f32 %v4878_v1, %v4225_v15  ;;  %v8616_v44 = vpop.f32.mrb[91].mxu1 }
0x1ab8   :  { %9542 = vtanh.f32 %v4892_v53 }
0x1ab9   :  { %v4883_v56 = vpop.f32.mrb[92].mxu1  ;;  %9544 = vpow2.f32 %v7942_v19 }
0x1aba   :  { %v4893_v27 = vadd.f32 %v4883_v56, %v4231_v50  ;;  %v8619_v35 = vpop.f32.mrb[93].mxu1 }
0x1abc   :  { %9546 = vtanh.f32 %v4893_v27 }
0x1abd   :  { %9548 = vrcp.f32 %v4904_v30 }
0x1ac2   :  { %v9543_v6 = vpop.eup %9542  ;;  %v4888_v45 = vpop.f32.mrb[94].mxu1 }
0x1ac3   :  { %v4894_v15 = vadd.f32 %v4888_v45, %v4237_v49  ;;  %4994 = vrot.lane.b32.xlu1 %v9543_v6, %s9904_s0  ;;  %v8622_v63 = vpop.f32.mrb[95].mxu1  ;;  %v9545_v8 = vpop.eup %9544  ;;  %v7943_v45 = vmul.f32 -1.442695, %v4892_v53 }
0x1ac4   :  { %v4906_v44 = vadd.f32 1.0, %v9545_v8  ;;  %v7944_v63 = vmul.f32 -1.442695, %v4893_v27 }
0x1ac5   :  { %9550 = vtanh.f32 %v4894_v15 }
0x1ac6   :  { %v9547_v1 = vpop.eup %9546  ;;  %9552 = vrcp.f32 %v4905_v42  ;;  %v7945_v42 = vmul.f32 -1.442695, %v4894_v15 }
0x1ac7   :  { %4996 = vrot.lane.b32.xlu0 %v9547_v1, %s9904_s0  ;;  %9554 = vrcp.f32 %v4906_v44  ;;  %v12470_v19 = vpop.eup %9548 }
0x1ac8   :  { %9556 = vpow2.f32 %v7943_v45  ;;  %v12496_v45 = vmul.f32 %v12378_v43, %v12334_v58 }
0x1ac9   :  { %9558 = vpow2.f32 %v7944_v63  ;;  %v7947_v63 = vld [vmem:[%s13839_s1 + $0x20] sm:$0xff] }
0x1aca   :  { %9560 = vpow2.f32 %v7945_v42 }
0x1ace   :  { %v4923_v50 = vpop.permute.xlu0 %4922 }
0x1acf   :  { %v9551_v17 = vpop.eup %9550  ;;  %v4931_v56 = vmul.f32 %v12470_v19, %v4923_v50 }
0x1ad0   :  { %4998 = vrot.lane.b32.xlu1 %v9551_v17, %s9904_s0  ;;  %v12475_v35 = vpop.eup %9552 }
0x1ad1   :  { %4937 = vrot.lane.b32.xlu0 %v4931_v56, %s9906_s3  ;;  %v12479_v40 = vpop.eup %9554 }
0x1ad2   :  { %v4925_v41 = vpop.permute.xlu1 %4924  ;;  %v9557_v8 = vpop.eup %9556 }
0x1ad3   :  { %v4932_v30 = vmul.f32 %v12475_v35, %v4925_v41  ;;  %v4976_v1 = vadd.f32 1.0, %v9557_v8  ;;  %v9559_v44 = vpop.eup %9558 }
0x1ad4   :  { %v4977_v50 = vadd.f32 1.0, %v9559_v44  ;;  %v9561_v17 = vpop.eup %9560 }
0x1ad5   :  { %4939 = vrot.lane.b32.xlu1 %v4932_v30, %s9906_s3  ;;  %9562 = vrcp.f32 %v4976_v1  ;;  %v4978_v56 = vadd.f32 1.0, %v9561_v17  ;;  %v4916_v1 = vmul.f32 %v12470_v19, %v12496_v45  ;;  %v12508_v17 = vmul.f32 %v12388_v24, %v12346_v12 }
0x1ad6   :  { %v4927_v49 = vpop.permute.xlu0 %4926  ;;  %9564 = vrcp.f32 %v4977_v50 }
0x1ad7   :  { %v4933_v6 = vmul.f32 %v12479_v40, %v4927_v49  ;;  %9566 = vrcp.f32 %v4978_v56  ;;  %v7948_v56 = vld [vmem:[%s13839_s1 + $0x28] sm:$0xff] }
0x1ad9   :  { %4941 = vrot.lane.b32.xlu0 %v4933_v6, %s9906_s3  ;;  %v7946_v6 = vld [vmem:[%s13839_s1 + $0x18] sm:$0xff] }
0x1adf   :  { %v12483_v41 = vpop.eup %9562 }
0x1ae0   :  { %v12487_v53 = vpop.eup %9564 }
0x1ae1   :  { %v12501_v42 = vpop.eup %9566 }
0x1b35   :  { %v4995_v30 = vpop.permute.xlu1 %4994 }
0x1b36   :  { %v5003_v49 = vmul.f32 %v12483_v41, %v4995_v30  ;;  %v4917_v30 = vmul.f32 %v12475_v35, %v12508_v17 }
0x1b38   :  { %5009 = vrot.lane.b32.xlu1 %v5003_v49, %s9906_s3 }
0x1b39   :  { %v4997_v27 = vpop.permute.xlu0 %4996 }
0x1b3a   :  { %v5004_v15 = vmul.f32 %v12487_v53, %v4997_v27  ;;  %v12521_v27 = vmul.f32 %v12394_v61, %v12348_v39  ;;  %v7950_v39 = vld [vmem:[%s13839_s1 + $0x98] sm:$0xff] }
0x1b3c   :  { %5011 = vrot.lane.b32.xlu0 %v5004_v15, %s9906_s3  ;;  %v7949_v15 = vld [vmem:[%s13839_s1 + $0x90] sm:$0xff] }
0x1b40   :  { %5050 = vperm.xlu0 %9098, %v7946_v6   ;;  %v4918_v6 = vmul.f32 %v12479_v40, %v12521_v27 }
0x1b42   :  { %v4999_v8 = vpop.permute.xlu1 %4998 }
0x1b43   :  { %v5005_v44 = vmul.f32 %v12501_v42, %v4999_v8  ;;  %v4938_v50 = vpop.permute.xlu0 %4937 }
0x1b44   :  { %v12510_v58 = vadd.f32 %v4938_v50, %v4916_v1  ;;  %5055 = vperm.xlu0 %9098, %v7947_v63  }
0x1b45   :  { %5013 = vrot.lane.b32.xlu1 %v5005_v44, %s9906_s3  ;;  %v7951_v44 = vld [vmem:[%s13839_s1 + $0xa0] sm:$0xff] }
0x1b46   :  { %9568 = vtanh.f32 %v12510_v58 }
0x1b47   :  { %v4940_v49 = vpop.permute.xlu1 %4939 }
0x1b48   :  { %v12523_v12 = vadd.f32 %v4940_v49, %v4917_v30  ;;  %5060 = vperm.xlu0 %9098, %v7948_v56   ;;  %v12545_v30 = vmul.f32 %v12403_v32, %v12365_v13  ;;  %v12563_v13 = vmul.f32 %v12417_v54, %v12373_v52 }
0x1b4a   :  { %9570 = vtanh.f32 %v12523_v12  ;;  %v4988_v49 = vmul.f32 %v12483_v41, %v12545_v30 }
0x1b4b   :  { %v4942_v63 = vpop.permute.xlu0 %4941 }
0x1b4c   :  { %v12531_v8 = vadd.f32 %v4942_v63, %v4918_v6  ;;  %5083 = vperm.xlu0 %9098, %v7949_v15   ;;  %v12551_v6 = vmul.f32 %v12406_v22, %v12369_v11  ;;  %v4990_v11 = vmul.f32 %v12501_v42, %v12563_v13 }
0x1b4e   :  { %9572 = vtanh.f32 %v12531_v8 }
0x1b50   :  { %v9569_v1 = vpop.eup %9568  ;;  %5088 = vperm.xlu0 %9098, %v7950_v39   ;;  %v4989_v39 = vmul.f32 %v12487_v53, %v12551_v6 }
0x1b51   :  { %4955 = vrot.lane.b32.xlu1 %v9569_v1, %s9904_s0 }
0x1b54   :  { %v9571_v50 = vpop.eup %9570  ;;  %5093 = vperm.xlu0 %9098, %v7951_v44  }
0x1b55   :  { %4957 = vrot.lane.b32.xlu1 %v9571_v50, %s9904_s0 }
0x1b58   :  { %v9573_v56 = vpop.eup %9572 }
0x1b59   :  { %4959 = vrot.lane.b32.xlu1 %v9573_v56, %s9904_s0 }
0x1baa   :  { %v5010_v15 = vpop.permute.xlu1 %5009 }
0x1bab   :  { %v12553_v63 = vadd.f32 %v5010_v15, %v4988_v49 }
0x1bad   :  { %9574 = vtanh.f32 %v12553_v63 }
0x1bae   :  { %v5012_v1 = vpop.permute.xlu0 %5011 }
0x1baf   :  { %v12558_v44 = vadd.f32 %v5012_v1, %v4989_v39 }
0x1bb1   :  { %9576 = vtanh.f32 %v12558_v44 }
0x1bb7   :  { %v9575_v50 = vpop.eup %9574  ;;  %v5014_v56 = vpop.permute.xlu1 %5013 }
0x1bb8   :  { %v12567_v49 = vadd.f32 %v5014_v56, %v4990_v11  ;;  %5027 = vrot.lane.b32.xlu1 %v9575_v50, %s9904_s0 }
0x1bba   :  { %9578 = vtanh.f32 %v12567_v49 }
0x1bbb   :  { %v9577_v15 = vpop.eup %9576 }
0x1bbc   :  { %5029 = vrot.lane.b32.xlu1 %v9577_v15, %s9904_s0 }
0x1bbf   :  { %v12572_v39 = vpop.permute.xlu0 %5050 }
0x1bc3   :  { %v4956_v1 = vpop.permute.xlu1 %4955  ;;  %v12579_v56 = vpop.permute.xlu0 %5055 }
0x1bc4   :  { %v9579_v61 = vpop.eup %9578  ;;  %v4964_v52 = vmul.f32 %v12470_v19, %v4956_v1  ;;  %13962 = vst [vmem:[#allocation30_spill] sm:$0xff] %v12579_v56 }
0x1bc5   :  { %5031 = vrot.lane.b32.xlu1 %v9579_v61, %s9904_s0 }
0x1bc6   :  { %v5045_v24 = vsub.f32 %v4964_v52, %v12383_v48 }
0x1bc7   :  { %v4958_v43 = vpop.permute.xlu1 %4957 }
0x1bc8   :  { %v5063_v11 = vmul.f32 %v12572_v39, %v5045_v24  ;;  %v4965_v50 = vmul.f32 %v12475_v35, %v4958_v43  ;;  %v12593_v43 = vpop.permute.xlu0 %5060 }
0x1bc9   :  { %13963 = vst [vmem:[#allocation31_spill] sm:$0xff] %v12593_v43 }
0x1bca   :  { %v5046_v54 = vsub.f32 %v4965_v50, %v12391_v9  ;;  %v12583_v15 = vadd.f32 %v5063_v11, %v12383_v48 }
0x1bcb   :  { %v4960_v22 = vpop.permute.xlu1 %4959 }
0x1bcc   :  { %v5064_v32 = vmul.f32 %v12579_v56, %v5046_v54  ;;  %v4966_v19 = vmul.f32 %v12479_v40, %v4960_v22  ;;  %5126 = vrot.lane.b32.xlu0 %v12583_v15, %s9906_s3  ;;  %v12604_v40 = vpop.permute.xlu0 %5083 }
0x1bce   :  { %v5047_v61 = vsub.f32 %v4966_v19, %v12399_v5  ;;  %v12591_v24 = vadd.f32 %v5064_v32, %v12391_v9 }
0x1bd0   :  { %v5065_v35 = vmul.f32 %v12593_v43, %v5047_v61  ;;  %5128 = vrot.lane.b32.xlu1 %v12591_v24, %s9906_s3  ;;  %v12613_v50 = vpop.permute.xlu0 %5088 }
0x1bd2   :  { %v12599_v48 = vadd.f32 %v5065_v35, %v12399_v5 }
0x1bd4   :  { %5130 = vrot.lane.b32.xlu0 %v12599_v48, %s9906_s3  ;;  %v12624_v35 = vpop.permute.xlu0 %5093 }
0x1c2a   :  { %v5028_v54 = vpop.permute.xlu1 %5027 }
0x1c2b   :  { %v5036_v22 = vmul.f32 %v12483_v41, %v5028_v54 }
0x1c2d   :  { %v5078_v9 = vsub.f32 %v5036_v22, %v12409_v60 }
0x1c2e   :  { %v5030_v32 = vpop.permute.xlu1 %5029 }
0x1c2f   :  { %v5096_v1 = vmul.f32 %v12604_v40, %v5078_v9  ;;  %v5037_v52 = vmul.f32 %v12487_v53, %v5030_v32 }
0x1c31   :  { %v5079_v11 = vsub.f32 %v5037_v52, %v12415_v46  ;;  %v12611_v5 = vadd.f32 %v5096_v1, %v12409_v60  ;;  %v4151_v52 = vadd.f32 %v12236_v28, %v12210_v18 }
0x1c33   :  { %v5097_v19 = vmul.f32 %v12613_v50, %v5079_v11  ;;  %5224 = vrot.lane.b32.xlu1 %v12611_v5, %s9906_s3 }
0x1c35   :  { %v12619_v41 = vadd.f32 %v5097_v19, %v12415_v46 }
0x1c37   :  { %5226 = vrot.lane.b32.xlu0 %v12619_v41, %s9906_s3  ;;  %v5032_v61 = vpop.permute.xlu1 %5031 }
0x1c38   :  { %v5038_v53 = vmul.f32 %v12501_v42, %v5032_v61 }
0x1c3a   :  { %v5080_v60 = vsub.f32 %v5038_v53, %v12423_v62  ;;  %v4157_v53 = vadd.f32 %v12240_v37, %v12210_v18 }
0x1c3c   :  { %v5098_v54 = vmul.f32 %v12624_v35, %v5080_v60 }
0x1c3e   :  { %v5127_v22 = vpop.permute.xlu0 %5126  ;;  %v12629_v9 = vadd.f32 %v5098_v54, %v12423_v62 }
0x1c3f   :  { %8632 = vmatmul.mubr.msk.f32.vlgmr.msra.gmra.mrb[96].mxu1 %vm111_vm1, %v5127_v22 }
0x1c40   :  { %5228 = vrot.lane.b32.xlu1 %v12629_v9, %s9906_s3  ;;  %8634 = vmatprep.mubr.msk.f32.mxu1 %vm9903_vm0, %v13902_v3 }
0x1c41   :  { %9013 = vmatpush3.bf16.msra.mxu1 %v12080_v34 }
0x1c42   :  { %v5129_v46 = vpop.permute.xlu1 %5128  ;;  %9014 = vmatprep.subr.bf16.mxu1 %v13903_v59 }
0x1c43   :  { %8635 = vmatmul.mubr.msk.f32.gmra.mrb[98].mxu1 %vm111_vm1, %v5129_v46  ;;  %v4163_v46 = vadd.f32 %v12244_v33, %v12210_v18  ;;  %v4207_v33 = vadd.f32 %v12274_v14, %v12299_v0  ;;  %v4219_v14 = vadd.f32 %v12282_v10, %v12299_v0 }
0x1c44   :  { %8637 = vmatprep.mubr.msk.f32.mxu1 %vm9903_vm0, %v13902_v3 }
0x1c45   :  { %9016 = vmatpush3.bf16.msra.mxu1 %v12093_v29 }
0x1c46   :  { %v5131_v62 = vpop.permute.xlu0 %5130  ;;  %9017 = vmatprep.subr.bf16.mxu1 %v13903_v59 }
0x1c47   :  { %8638 = vmatmul.mubr.msk.f32.gmra.mrb[100].mxu1 %vm111_vm1, %v5131_v62 }
0x1c48   :  { %8648 = vmatprep.mubr.msk.f32.mxu1 %vm9903_vm0, %v13902_v3 }
0x1ca5   :  { %v5225_v42 = vpop.permute.xlu1 %5224 }
0x1ca6   :  { %8649 = vmatmul.mubr.msk.f32.vlgmr.msra.gmra.mrb[102].mxu1 %vm111_vm1, %v5225_v42 }
0x1ca7   :  { %8651 = vmatprep.mubr.msk.f32.mxu1 %vm9903_vm0, %v13902_v3  ;;  %9019 = vmatpush3.bf16.msra.mxu1 %v11933_v47 }
0x1ca8   :  { %9020 = vmatprep.subr.bf16.mxu1 %v13903_v59 }
0x1ca9   :  { %v5227_v32 = vpop.permute.xlu0 %5226 }
0x1caa   :  { %8652 = vmatmul.mubr.msk.f32.gmra.mrb[104].mxu1 %vm111_vm1, %v5227_v32 }
0x1cab   :  { %8654 = vmatprep.mubr.msk.f32.mxu1 %vm9903_vm0, %v13902_v3  ;;  %9022 = vmatpush3.bf16.msra.mxu1 %v11956_v51 }
0x1cac   :  { %9023 = vmatprep.subr.bf16.mxu1 %v13903_v59 }
0x1cb2   :  { %v5229_v1 = vpop.permute.xlu1 %5228 }
0x1cb3   :  { %8655 = vmatmul.mubr.msk.f32.gmra.mrb[106].mxu1 %vm111_vm1, %v5229_v1 }
0x1cb4   :  { %8665 = vmatprep.mubr.msk.f32.mxu1 %vm9903_vm0, %v13902_v3 }
0x1d12   :  { %v5204_v11 = vpop.f32.mrb[96].mxu1 }
0x1d13   :  { %v5218_v19 = vadd.f32 %v5204_v11, %v4151_v52  ;;  %v8633_v61 = vpop.f32.mrb[97].mxu1 }
0x1d15   :  { %9580 = vtanh.f32 %v5218_v19  ;;  %v7958_v37 = vmul.f32 -1.442695, %v5218_v19 }
0x1d16   :  { %v5209_v60 = vpop.f32.mrb[98].mxu1 }
0x1d17   :  { %v5219_v54 = vadd.f32 %v5209_v60, %v4157_v53  ;;  %v8636_v22 = vpop.f32.mrb[99].mxu1 }
0x1d19   :  { %9582 = vtanh.f32 %v5219_v54  ;;  %v7959_v11 = vmul.f32 -1.442695, %v5219_v54 }
0x1d1a   :  { %v5214_v62 = vpop.f32.mrb[100].mxu1 }
0x1d1b   :  { %v5220_v42 = vadd.f32 %v5214_v62, %v4163_v46  ;;  %v8639_v32 = vpop.f32.mrb[101].mxu1  ;;  %v4213_v46 = vadd.f32 %v12278_v2, %v12299_v0 }
0x1d1d   :  { %9584 = vtanh.f32 %v5220_v42  ;;  %v7960_v22 = vmul.f32 -1.442695, %v5220_v42 }
0x1d1e   :  { %9586 = vpow2.f32 %v7958_v37 }
0x1d1f   :  { %v9581_v1 = vpop.eup %9580  ;;  %9588 = vpow2.f32 %v7959_v11 }
0x1d20   :  { %5346 = vrot.lane.b32.xlu0 %v9581_v1, %s9904_s0 }
0x1d23   :  { %v9583_v28 = vpop.eup %9582 }
0x1d24   :  { %5348 = vrot.lane.b32.xlu1 %v9583_v28, %s9904_s0 }
0x1d27   :  { %v9585_v52 = vpop.eup %9584 }
0x1d28   :  { %5350 = vrot.lane.b32.xlu0 %v9585_v52, %s9904_s0  ;;  %v9587_v19 = vpop.eup %9586 }
0x1d29   :  { %v5328_v28 = vadd.f32 1.0, %v9587_v19  ;;  %v9589_v54 = vpop.eup %9588 }
0x1d2a   :  { %v5329_v2 = vadd.f32 1.0, %v9589_v54 }
0x1d79   :  { %v5302_v61 = vpop.f32.mrb[102].mxu1 }
0x1d7a   :  { %v5316_v53 = vadd.f32 %v5302_v61, %v4207_v33  ;;  %v8650_v60 = vpop.f32.mrb[103].mxu1 }
0x1d7c   :  { %9590 = vtanh.f32 %v5316_v53 }
0x1d7d   :  { %v5307_v62 = vpop.f32.mrb[104].mxu1  ;;  %9592 = vpow2.f32 %v7960_v22 }
0x1d7e   :  { %v5317_v32 = vadd.f32 %v5307_v62, %v4213_v46  ;;  %v8653_v1 = vpop.f32.mrb[105].mxu1 }
0x1d80   :  { %9594 = vtanh.f32 %v5317_v32 }
0x1d81   :  { %9596 = vrcp.f32 %v5328_v28 }
0x1d86   :  { %v9591_v52 = vpop.eup %9590  ;;  %v5312_v37 = vpop.f32.mrb[106].mxu1 }
0x1d87   :  { %v5318_v33 = vadd.f32 %v5312_v37, %v4219_v14  ;;  %5418 = vrot.lane.b32.xlu1 %v9591_v52, %s9904_s0  ;;  %v8656_v42 = vpop.f32.mrb[107].mxu1  ;;  %v9593_v11 = vpop.eup %9592  ;;  %v7961_v37 = vmul.f32 -1.442695, %v5316_v53 }
0x1d88   :  { %v5330_v60 = vadd.f32 1.0, %v9593_v11  ;;  %v7962_v42 = vmul.f32 -1.442695, %v5317_v32 }
0x1d89   :  { %9598 = vtanh.f32 %v5318_v33 }
0x1d8a   :  { %v9595_v61 = vpop.eup %9594  ;;  %9600 = vrcp.f32 %v5329_v2  ;;  %v7963_v2 = vmul.f32 -1.442695, %v5318_v33  ;;  %v5069_v33 = vsub.f32 %v12510_v58, %v12496_v45  ;;  %v7965_v58 = vld [vmem:[%s13839_s1 + $0x38] sm:$0xff] }
0x1d8b   :  { %5420 = vrot.lane.b32.xlu0 %v9595_v61, %s9904_s0  ;;  %9602 = vrcp.f32 %v5330_v60  ;;  %v12676_v22 = vpop.eup %9596 }
0x1d8c   :  { %9604 = vpow2.f32 %v7961_v37  ;;  %v5072_v37 = vmul.f32 %v5069_v33, %v12572_v39 }
0x1d8d   :  { %9606 = vpow2.f32 %v7962_v42  ;;  %v7964_v42 = vld [vmem:[%s13839_s1 + $0x30] sm:$0xff] }
0x1d8e   :  { %9608 = vpow2.f32 %v7963_v2  ;;  %v5070_v2 = vsub.f32 %v12523_v12, %v12508_v17 }
0x1d92   :  { %v5347_v46 = vpop.permute.xlu0 %5346 }
0x1d93   :  { %v9599_v10 = vpop.eup %9598  ;;  %v5355_v62 = vmul.f32 %v12676_v22, %v5347_v46 }
0x1d94   :  { %5422 = vrot.lane.b32.xlu1 %v9599_v10, %s9904_s0  ;;  %v12681_v1 = vpop.eup %9600 }
0x1d95   :  { %5361 = vrot.lane.b32.xlu0 %v5355_v62, %s9906_s3  ;;  %v12685_v54 = vpop.eup %9602 }
0x1d96   :  { %v5349_v19 = vpop.permute.xlu1 %5348  ;;  %v9605_v11 = vpop.eup %9604 }
0x1d97   :  { %v5356_v28 = vmul.f32 %v12681_v1, %v5349_v19  ;;  %v5400_v61 = vadd.f32 1.0, %v9605_v11  ;;  %v9607_v60 = vpop.eup %9606  ;;  %v5073_v11 = vmul.f32 %v5070_v2, %v12579_v56 }
0x1d98   :  { %v5401_v46 = vadd.f32 1.0, %v9607_v60  ;;  %v9609_v10 = vpop.eup %9608 }
0x1d99   :  { %5363 = vrot.lane.b32.xlu1 %v5356_v28, %s9906_s3  ;;  %9610 = vrcp.f32 %v5400_v61  ;;  %v5402_v62 = vadd.f32 1.0, %v9609_v10  ;;  %v12707_v61 = vadd.f32 %v5072_v37, %v12496_v45 }
0x1d9a   :  { %v5351_v14 = vpop.permute.xlu0 %5350  ;;  %9612 = vrcp.f32 %v5401_v46  ;;  %v5071_v46 = vsub.f32 %v12531_v8, %v12521_v27  ;;  %v7966_v8 = vld [vmem:[%s13839_s1 + $0x40] sm:$0xff] }
0x1d9b   :  { %v5357_v52 = vmul.f32 %v12685_v54, %v5351_v14  ;;  %9614 = vrcp.f32 %v5402_v62  ;;  %v5340_v62 = vmul.f32 %v12676_v22, %v12707_v61 }
0x1d9d   :  { %5365 = vrot.lane.b32.xlu0 %v5357_v52, %s9906_s3 }
0x1da3   :  { %v12689_v19 = vpop.eup %9610 }
0x1da4   :  { %v12693_v53 = vpop.eup %9612 }
0x1da5   :  { %v12712_v60 = vpop.eup %9614 }
0x1df9   :  { %v5419_v28 = vpop.permute.xlu1 %5418 }
0x1dfa   :  { %v5427_v14 = vmul.f32 %v12689_v19, %v5419_v28 }
0x1dfc   :  { %5433 = vrot.lane.b32.xlu1 %v5427_v14, %s9906_s3  ;;  %v5074_v14 = vmul.f32 %v5071_v46, %v12593_v43  ;;  %v7968_v46 = vld [vmem:[%s13839_s1 + $0x80] sm:$0xff] }
0x1dfd   :  { %v5421_v32 = vpop.permute.xlu0 %5420 }
0x1dfe   :  { %v5428_v52 = vmul.f32 %v12693_v53, %v5421_v32  ;;  %v12723_v32 = vadd.f32 %v5073_v11, %v12508_v17  ;;  %v7967_v17 = vld [vmem:[%s13839_s1 + $0x78] sm:$0xff] }
0x1e00   :  { %5435 = vrot.lane.b32.xlu0 %v5428_v52, %s9906_s3  ;;  %v5341_v33 = vmul.f32 %v12681_v1, %v12723_v32 }
0x1e04   :  { %5474 = vperm.xlu0 %9098, %v7964_v42   ;;  %v12735_v42 = vadd.f32 %v5074_v14, %v12521_v27 }
0x1e06   :  { %v5423_v10 = vpop.permute.xlu1 %5422  ;;  %v5342_v2 = vmul.f32 %v12685_v54, %v12735_v42 }
0x1e07   :  { %v5429_v12 = vmul.f32 %v12712_v60, %v5423_v10  ;;  %v5362_v28 = vpop.permute.xlu0 %5361  ;;  %v7969_v10 = vld [vmem:[%s13839_s1 + $0x88] sm:$0xff] }
0x1e08   :  { %v12720_v45 = vadd.f32 %v5362_v28, %v5340_v62  ;;  %5479 = vperm.xlu0 %9098, %v7965_v58   ;;  %v5102_v28 = vsub.f32 %v12553_v63, %v12545_v30 }
0x1e09   :  { %5437 = vrot.lane.b32.xlu1 %v5429_v12, %s9906_s3 }
0x1e0a   :  { %9616 = vtanh.f32 %v12720_v45  ;;  %v5105_v14 = vmul.f32 %v5102_v28, %v12604_v40 }
0x1e0b   :  { %v5364_v52 = vpop.permute.xlu1 %5363 }
0x1e0c   :  { %v12732_v37 = vadd.f32 %v5364_v52, %v5341_v33  ;;  %5484 = vperm.xlu0 %9098, %v7966_v8   ;;  %v5103_v8 = vsub.f32 %v12558_v44, %v12551_v6  ;;  %v12762_v52 = vadd.f32 %v5105_v14, %v12545_v30  ;;  %v5104_v44 = vsub.f32 %v12567_v49, %v12563_v13 }
0x1e0e   :  { %9618 = vtanh.f32 %v12732_v37  ;;  %v5106_v33 = vmul.f32 %v5103_v8, %v12613_v50 }
0x1e0f   :  { %v5366_v11 = vpop.permute.xlu0 %5365 }
0x1e10   :  { %v12743_v58 = vadd.f32 %v5366_v11, %v5342_v2  ;;  %5507 = vperm.xlu0 %9098, %v7967_v17   ;;  %v5412_v17 = vmul.f32 %v12689_v19, %v12762_v52 }
0x1e12   :  { %9620 = vtanh.f32 %v12743_v58 }
0x1e14   :  { %v9617_v27 = vpop.eup %9616  ;;  %5512 = vperm.xlu0 %9098, %v7968_v46   ;;  %v12769_v46 = vadd.f32 %v5106_v33, %v12551_v6 }
0x1e15   :  { %5379 = vrot.lane.b32.xlu1 %v9617_v27, %s9904_s0 }
0x1e16   :  { %v5413_v63 = vmul.f32 %v12693_v53, %v12769_v46 }
0x1e18   :  { %v9619_v62 = vpop.eup %9618  ;;  %5517 = vperm.xlu0 %9098, %v7969_v10   ;;  %v5107_v10 = vmul.f32 %v5104_v44, %v12624_v35 }
0x1e19   :  { %5381 = vrot.lane.b32.xlu1 %v9619_v62, %s9904_s0 }
0x1e1a   :  { %v12781_v62 = vadd.f32 %v5107_v10, %v12563_v13 }
0x1e1c   :  { %v9621_v12 = vpop.eup %9620  ;;  %v5414_v6 = vmul.f32 %v12712_v60, %v12781_v62 }
0x1e1d   :  { %5383 = vrot.lane.b32.xlu1 %v9621_v12, %s9904_s0 }
0x1e6e   :  { %v5434_v2 = vpop.permute.xlu1 %5433 }
0x1e6f   :  { %v12766_v11 = vadd.f32 %v5434_v2, %v5412_v17 }
0x1e71   :  { %9622 = vtanh.f32 %v12766_v11 }
0x1e72   :  { %v5436_v27 = vpop.permute.xlu0 %5435 }
0x1e73   :  { %v12776_v30 = vadd.f32 %v5436_v27, %v5413_v63 }
0x1e75   :  { %9624 = vtanh.f32 %v12776_v30 }
0x1e7b   :  { %v9623_v12 = vpop.eup %9622  ;;  %v5438_v28 = vpop.permute.xlu1 %5437 }
0x1e7c   :  { %v12785_v14 = vadd.f32 %v5438_v28, %v5414_v6  ;;  %5451 = vrot.lane.b32.xlu1 %v9623_v12, %s9904_s0 }
0x1e7e   :  { %9626 = vtanh.f32 %v12785_v14 }
0x1e7f   :  { %v9625_v49 = vpop.eup %9624 }
0x1e80   :  { %5453 = vrot.lane.b32.xlu1 %v9625_v49, %s9904_s0 }
0x1e83   :  { %v12790_v8 = vpop.permute.xlu0 %5474 }
0x1e87   :  { %v5380_v33 = vpop.permute.xlu1 %5379  ;;  %v12797_v10 = vpop.permute.xlu0 %5479 }
0x1e88   :  { %v9627_v17 = vpop.eup %9626  ;;  %v5388_v13 = vmul.f32 %v12676_v22, %v5380_v33 }
0x1e89   :  { %5455 = vrot.lane.b32.xlu1 %v9627_v17, %s9904_s0 }
0x1e8a   :  { %v5469_v2 = vsub.f32 %v5388_v13, %v12583_v15 }
0x1e8b   :  { %v5382_v63 = vpop.permute.xlu1 %5381 }
0x1e8c   :  { %v5487_v44 = vmul.f32 %v12790_v8, %v5469_v2  ;;  %v5389_v27 = vmul.f32 %v12681_v1, %v5382_v63  ;;  %v12811_v1 = vpop.permute.xlu0 %5484 }
0x1e8e   :  { %v5470_v6 = vsub.f32 %v5389_v27, %v12591_v24  ;;  %v12801_v12 = vadd.f32 %v5487_v44, %v12583_v15 }
0x1e8f   :  { %v5384_v28 = vpop.permute.xlu1 %5383 }
0x1e90   :  { %v5488_v49 = vmul.f32 %v12797_v10, %v5470_v6  ;;  %v5390_v22 = vmul.f32 %v12685_v54, %v5384_v28  ;;  %5550 = vrot.lane.b32.xlu0 %v12801_v12, %s9906_s3  ;;  %v12822_v63 = vpop.permute.xlu0 %5507 }
0x1e92   :  { %v5471_v33 = vsub.f32 %v5390_v22, %v12599_v48  ;;  %v12809_v17 = vadd.f32 %v5488_v49, %v12591_v24 }
0x1e94   :  { %v5489_v13 = vmul.f32 %v12811_v1, %v5471_v33  ;;  %5552 = vrot.lane.b32.xlu1 %v12809_v17, %s9906_s3  ;;  %v12831_v49 = vpop.permute.xlu0 %5512 }
0x1e96   :  { %v12817_v15 = vadd.f32 %v5489_v13, %v12599_v48 }
0x1e98   :  { %5554 = vrot.lane.b32.xlu0 %v12817_v15, %s9906_s3  ;;  %v12842_v13 = vpop.permute.xlu0 %5517 }
0x1eee   :  { %v5452_v54 = vpop.permute.xlu1 %5451 }
0x1eef   :  { %v5460_v2 = vmul.f32 %v12689_v19, %v5452_v54 }
0x1ef1   :  { %v5502_v24 = vsub.f32 %v5460_v2, %v12611_v5 }
0x1ef2   :  { %v5454_v44 = vpop.permute.xlu1 %5453 }
0x1ef3   :  { %v5520_v27 = vmul.f32 %v12822_v63, %v5502_v24  ;;  %v5461_v6 = vmul.f32 %v12693_v53, %v5454_v44 }
0x1ef5   :  { %v5503_v28 = vsub.f32 %v5461_v6, %v12619_v41  ;;  %v12829_v48 = vadd.f32 %v5520_v27, %v12611_v5  ;;  %v4169_v6 = vadd.f32 %v12248_v55, %v12210_v18 }
0x1ef7   :  { %v5521_v22 = vmul.f32 %v12831_v49, %v5503_v28  ;;  %5648 = vrot.lane.b32.xlu1 %v12829_v48, %s9906_s3 }
0x1ef9   :  { %v12837_v19 = vadd.f32 %v5521_v22, %v12619_v41 }
0x1efb   :  { %5650 = vrot.lane.b32.xlu0 %v12837_v19, %s9906_s3  ;;  %v5456_v33 = vpop.permute.xlu1 %5455 }
0x1efc   :  { %v5462_v53 = vmul.f32 %v12712_v60, %v5456_v33 }
0x1efe   :  { %v5504_v5 = vsub.f32 %v5462_v53, %v12629_v9  ;;  %v4175_v53 = vadd.f32 %v12252_v38, %v12210_v18 }
0x1f00   :  { %v5522_v54 = vmul.f32 %v12842_v13, %v5504_v5 }
0x1f02   :  { %v5551_v2 = vpop.permute.xlu0 %5550  ;;  %v12847_v24 = vadd.f32 %v5522_v54, %v12629_v9 }
0x1f03   :  { %8666 = vmatmul.mubr.msk.f32.vlgmr.msra.gmra.mrb[108].mxu1 %vm111_vm1, %v5551_v2 }
0x1f04   :  { %5652 = vrot.lane.b32.xlu1 %v12847_v24, %s9906_s3  ;;  %8668 = vmatprep.mubr.msk.f32.mxu1 %vm9903_vm0, %v13902_v3 }
0x1f05   :  { %9025 = vmatpush3.bf16.msra.mxu1 %v12080_v34 }
0x1f06   :  { %v5553_v41 = vpop.permute.xlu1 %5552  ;;  %9026 = vmatprep.subr.bf16.mxu1 %v13903_v59 }
0x1f07   :  { %8669 = vmatmul.mubr.msk.f32.gmra.mrb[110].mxu1 %vm111_vm1, %v5553_v41  ;;  %v4181_v41 = vadd.f32 %v12256_v20, %v12210_v18  ;;  %v4189_v20 = vadd.f32 %v12262_v21, %v12299_v0  ;;  %v4201_v21 = vadd.f32 %v12270_v23, %v12299_v0 }
0x1f08   :  { %8671 = vmatprep.mubr.msk.f32.mxu1 %vm9903_vm0, %v13902_v3 }
0x1f09   :  { %9028 = vmatpush3.bf16.msra.mxu1 %v12093_v29 }
0x1f0a   :  { %v5555_v9 = vpop.permute.xlu0 %5554  ;;  %9029 = vmatprep.subr.bf16.mxu1 %v13903_v59 }
0x1f0b   :  { %8672 = vmatmul.mubr.msk.f32.gmra.mrb[112].mxu1 %vm111_vm1, %v5555_v9 }
0x1f0c   :  { %8682 = vmatprep.mubr.msk.f32.mxu1 %vm9903_vm0, %v13902_v3 }
0x1f69   :  { %v5649_v60 = vpop.permute.xlu1 %5648 }
0x1f6a   :  { %8683 = vmatmul.mubr.msk.f32.vlgmr.msra.gmra.mrb[114].mxu1 %vm111_vm1, %v5649_v60 }
0x1f6b   :  { %8685 = vmatprep.mubr.msk.f32.mxu1 %vm9903_vm0, %v13902_v3  ;;  %9031 = vmatpush3.bf16.msra.mxu1 %v11933_v47 }
0x1f6c   :  { %9032 = vmatprep.subr.bf16.mxu1 %v13903_v59 }
0x1f6d   :  { %v5651_v44 = vpop.permute.xlu0 %5650 }
0x1f6e   :  { %8686 = vmatmul.mubr.msk.f32.gmra.mrb[116].mxu1 %vm111_vm1, %v5651_v44 }
0x1f6f   :  { %8688 = vmatprep.mubr.msk.f32.mxu1 %vm9903_vm0, %v13902_v3  ;;  %9034 = vmatpush3.bf16.msra.mxu1 %v11956_v51 }
0x1f70   :  { %9041 = vmatprep.subr.bf16.mxu1 %v13903_v59 }
0x1f76   :  { %v5653_v27 = vpop.permute.xlu1 %5652 }
0x1f77   :  { %8689 = vmatmul.mubr.msk.f32.gmra.mrb[118].mxu1 %vm111_vm1, %v5653_v27 }
0x1f78   :  { %8699 = vmatprep.mubr.msk.f32.mxu1 %vm9903_vm0, %v13902_v3 }
0x1fd6   :  { %v5628_v28 = vpop.f32.mrb[108].mxu1 }
0x1fd7   :  { %v5642_v22 = vadd.f32 %v5628_v28, %v4169_v6  ;;  %v8667_v33 = vpop.f32.mrb[109].mxu1 }
0x1fd9   :  { %9628 = vtanh.f32 %v5642_v22  ;;  %v7976_v38 = vmul.f32 -1.442695, %v5642_v22 }
0x1fda   :  { %v5633_v5 = vpop.f32.mrb[110].mxu1 }
0x1fdb   :  { %v5643_v54 = vadd.f32 %v5633_v5, %v4175_v53  ;;  %v8670_v2 = vpop.f32.mrb[111].mxu1 }
0x1fdd   :  { %9630 = vtanh.f32 %v5643_v54  ;;  %v7977_v28 = vmul.f32 -1.442695, %v5643_v54 }
0x1fde   :  { %v5638_v9 = vpop.f32.mrb[112].mxu1 }
0x1fdf   :  { %v5644_v60 = vadd.f32 %v5638_v9, %v4181_v41  ;;  %v8673_v44 = vpop.f32.mrb[113].mxu1  ;;  %v4195_v41 = vadd.f32 %v12266_v25, %v12299_v0 }
0x1fe1   :  { %9632 = vtanh.f32 %v5644_v60  ;;  %v7978_v2 = vmul.f32 -1.442695, %v5644_v60 }
0x1fe2   :  { %9634 = vpow2.f32 %v7976_v38 }
0x1fe3   :  { %v9629_v27 = vpop.eup %9628  ;;  %9636 = vpow2.f32 %v7977_v28 }
0x1fe4   :  { %5770 = vrot.lane.b32.xlu0 %v9629_v27, %s9904_s0 }
0x1fe7   :  { %v9631_v55 = vpop.eup %9630 }
0x1fe8   :  { %5772 = vrot.lane.b32.xlu0 %v9631_v55, %s9904_s0 }
0x1feb   :  { %v9633_v6 = vpop.eup %9632 }
0x1fec   :  { %5774 = vrot.lane.b32.xlu0 %v9633_v6, %s9904_s0  ;;  %v9635_v22 = vpop.eup %9634 }
0x1fed   :  { %v5752_v55 = vadd.f32 1.0, %v9635_v22  ;;  %v9637_v54 = vpop.eup %9636 }
0x1fee   :  { %v5753_v25 = vadd.f32 1.0, %v9637_v54 }
0x203d   :  { %v5726_v33 = vpop.f32.mrb[114].mxu1 }
0x203e   :  { %v5740_v53 = vadd.f32 %v5726_v33, %v4189_v20  ;;  %v8684_v5 = vpop.f32.mrb[115].mxu1 }
0x2040   :  { %9638 = vtanh.f32 %v5740_v53 }
0x2041   :  { %v5731_v9 = vpop.f32.mrb[116].mxu1  ;;  %9640 = vpow2.f32 %v7978_v2 }
0x2042   :  { %v5741_v44 = vadd.f32 %v5731_v9, %v4195_v41  ;;  %v8687_v27 = vpop.f32.mrb[117].mxu1 }
0x2044   :  { %9642 = vtanh.f32 %v5741_v44 }
0x2045   :  { %9644 = vrcp.f32 %v5752_v55 }
0x204a   :  { %v9639_v6 = vpop.eup %9638  ;;  %v5736_v38 = vpop.f32.mrb[118].mxu1 }
0x204b   :  { %v5742_v20 = vadd.f32 %v5736_v38, %v4201_v21  ;;  %5842 = vrot.lane.b32.xlu1 %v9639_v6, %s9904_s0  ;;  %v8690_v60 = vpop.f32.mrb[119].mxu1  ;;  %v9641_v28 = vpop.eup %9640  ;;  %v7982_v38 = vld [vmem:[%s13839_s1 + $0x48] sm:$0xff] }
0x204c   :  { %v5754_v5 = vadd.f32 1.0, %v9641_v28  ;;  %v7983_v60 = vld [vmem:[%s13839_s1 + $0x50] sm:$0xff]  ;;  %v7979_v28 = vmul.f32 -1.442695, %v5740_v53 }
0x204d   :  { %9646 = vtanh.f32 %v5742_v20 }
0x204e   :  { %v9643_v33 = vpop.eup %9642  ;;  %9648 = vrcp.f32 %v5753_v25  ;;  %v7984_v25 = vld [vmem:[%s13839_s1 + $0x58] sm:$0xff] }
0x204f   :  { %5844 = vrot.lane.b32.xlu1 %v9643_v33, %s9904_s0  ;;  %9650 = vrcp.f32 %v5754_v5  ;;  %v12894_v2 = vpop.eup %9644  ;;  %v7980_v33 = vmul.f32 -1.442695, %v5741_v44  ;;  %v7981_v5 = vmul.f32 -1.442695, %v5742_v20  ;;  %v5493_v20 = vsub.f32 %v12720_v45, %v12707_v61 }
0x2050   :  { %9652 = vpow2.f32 %v7979_v28 }
0x2051   :  { %9654 = vpow2.f32 %v7980_v33  ;;  %v5496_v28 = vmul.f32 %v5493_v20, %v12790_v8  ;;  %v5494_v33 = vsub.f32 %v12732_v37, %v12723_v32 }
0x2052   :  { %9656 = vpow2.f32 %v7981_v5 }
0x2053   :  { %v5497_v5 = vmul.f32 %v5494_v33, %v12797_v10 }
0x2056   :  { %v5771_v41 = vpop.permute.xlu0 %5770 }
0x2057   :  { %v9647_v23 = vpop.eup %9646  ;;  %v5779_v9 = vmul.f32 %v12894_v2, %v5771_v41 }
0x2058   :  { %5846 = vrot.lane.b32.xlu1 %v9647_v23, %s9904_s0  ;;  %v12899_v27 = vpop.eup %9648 }
0x2059   :  { %5785 = vrot.lane.b32.xlu0 %v5779_v9, %s9906_s3  ;;  %v12903_v54 = vpop.eup %9650 }
0x205a   :  { %v5773_v22 = vpop.permute.xlu0 %5772  ;;  %v9653_v41 = vpop.eup %9652 }
0x205b   :  { %v5780_v55 = vmul.f32 %v12899_v27, %v5773_v22  ;;  %v5824_v23 = vadd.f32 1.0, %v9653_v41  ;;  %v9655_v9 = vpop.eup %9654  ;;  %v12931_v41 = vadd.f32 %v5496_v28, %v12707_v61  ;;  %v7986_v28 = vld [vmem:[%s13839_s1 + $0x68] sm:$0xff] }
0x205c   :  { %v5825_v22 = vadd.f32 1.0, %v9655_v9  ;;  %v5495_v9 = vsub.f32 %v12743_v58, %v12735_v42  ;;  %v7985_v58 = vld [vmem:[%s13839_s1 + $0x60] sm:$0xff] }
0x205d   :  { %5787 = vrot.lane.b32.xlu0 %v5780_v55, %s9906_s3  ;;  %9658 = vrcp.f32 %v5824_v23  ;;  %v9657_v55 = vpop.eup %9656 }
0x205e   :  { %v5775_v21 = vpop.permute.xlu0 %5774  ;;  %9660 = vrcp.f32 %v5825_v22  ;;  %v5764_v22 = vmul.f32 %v12894_v2, %v12931_v41 }
0x205f   :  { %v5781_v6 = vmul.f32 %v12903_v54, %v5775_v21  ;;  %v5826_v21 = vadd.f32 1.0, %v9657_v55 }
0x2061   :  { %5789 = vrot.lane.b32.xlu0 %v5781_v6, %s9906_s3  ;;  %9662 = vrcp.f32 %v5826_v21 }
0x2065   :  { %5898 = vperm.xlu0 %9098, %v7982_v38  }
0x2067   :  { %v12916_v6 = vpop.eup %9658 }
0x2068   :  { %v12920_v53 = vpop.eup %9660 }
0x2069   :  { %5903 = vperm.xlu0 %9098, %v7983_v60  }
0x206b   :  { %v12933_v23 = vpop.eup %9662 }
0x206d   :  { %5908 = vperm.xlu0 %9098, %v7984_v25  }
0x20bd   :  { %v5843_v38 = vpop.permute.xlu1 %5842 }
0x20be   :  { %v5851_v60 = vmul.f32 %v12916_v6, %v5843_v38  ;;  %v5498_v38 = vmul.f32 %v5495_v9, %v12811_v1 }
0x20c0   :  { %5857 = vrot.lane.b32.xlu1 %v5851_v60, %s9906_s3  ;;  %v12944_v60 = vadd.f32 %v5497_v5, %v12723_v32 }
0x20c1   :  { %v5845_v44 = vpop.permute.xlu1 %5844 }
0x20c2   :  { %v5852_v25 = vmul.f32 %v12920_v53, %v5845_v44  ;;  %v5765_v61 = vmul.f32 %v12899_v27, %v12944_v60 }
0x20c4   :  { %5859 = vrot.lane.b32.xlu1 %v5852_v25, %s9906_s3  ;;  %v12956_v25 = vadd.f32 %v5498_v38, %v12735_v42  ;;  %v7987_v42 = vld [vmem:[%s13839_s1 + $0x70] sm:$0xff]  ;;  %v5527_v38 = vsub.f32 %v12776_v30, %v12769_v46  ;;  %v5528_v30 = vsub.f32 %v12785_v14, %v12781_v62 }
0x20c6   :  { %v5766_v32 = vmul.f32 %v12903_v54, %v12956_v25 }
0x20ca   :  { %v5847_v45 = vpop.permute.xlu1 %5846 }
0x20cb   :  { %v5853_v55 = vmul.f32 %v12933_v23, %v5847_v45  ;;  %v5786_v21 = vpop.permute.xlu0 %5785 }
0x20cc   :  { %v12941_v37 = vadd.f32 %v5786_v21, %v5764_v22 }
0x20cd   :  { %5861 = vrot.lane.b32.xlu1 %v5853_v55, %s9906_s3  ;;  %v5526_v55 = vsub.f32 %v12766_v11, %v12762_v52 }
0x20ce   :  { %9664 = vtanh.f32 %v12941_v37 }
0x20cf   :  { %v5788_v44 = vpop.permute.xlu0 %5787  ;;  %v5529_v21 = vmul.f32 %v5526_v55, %v12822_v63 }
0x20d0   :  { %v12953_v20 = vadd.f32 %v5788_v44, %v5765_v61  ;;  %v5530_v61 = vmul.f32 %v5527_v38, %v12831_v49 }
0x20d1   :  { %5931 = vperm.xlu1 %9099, %v7985_v58   ;;  %v12980_v58 = vadd.f32 %v5529_v21, %v12762_v52 }
0x20d2   :  { %9666 = vtanh.f32 %v12953_v20 }
0x20d3   :  { %v5790_v33 = vpop.permute.xlu0 %5789  ;;  %v5836_v44 = vmul.f32 %v12916_v6, %v12980_v58 }
0x20d4   :  { %v12964_v5 = vadd.f32 %v5790_v33, %v5766_v32  ;;  %v12987_v33 = vadd.f32 %v5530_v61, %v12769_v46 }
0x20d5   :  { %5936 = vperm.xlu1 %9099, %v7986_v28  }
0x20d6   :  { %9668 = vtanh.f32 %v12964_v5  ;;  %v5837_v11 = vmul.f32 %v12920_v53, %v12987_v33 }
0x20d8   :  { %v9665_v9 = vpop.eup %9664 }
0x20d9   :  { %5803 = vrot.lane.b32.xlu0 %v9665_v9, %s9904_s0  ;;  %5941 = vperm.xlu1 %9099, %v7987_v42   ;;  %v5531_v9 = vmul.f32 %v5528_v30, %v12842_v13 }
0x20db   :  { %v13001_v46 = vadd.f32 %v5531_v9, %v12781_v62 }
0x20dc   :  { %v9667_v45 = vpop.eup %9666 }
0x20dd   :  { %5805 = vrot.lane.b32.xlu0 %v9667_v45, %s9904_s0 }
0x20e0   :  { %v9669_v22 = vpop.eup %9668 }
0x20e1   :  { %5807 = vrot.lane.b32.xlu0 %v9669_v22, %s9904_s0  ;;  %v5838_v22 = vmul.f32 %v12933_v23, %v13001_v46 }
0x20e4   :  { %v12998_v45 = vpop.permute.xlu0 %5898 }
0x20e8   :  { %v13008_v14 = vpop.permute.xlu0 %5903 }
0x2132   :  { %v5858_v32 = vpop.permute.xlu1 %5857 }
0x2133   :  { %v12984_v28 = vadd.f32 %v5858_v32, %v5836_v44  ;;  %v13012_v44 = vpop.permute.xlu0 %5908 }
0x2135   :  { %9670 = vtanh.f32 %v12984_v28 }
0x2136   :  { %v5860_v42 = vpop.permute.xlu1 %5859 }
0x2137   :  { %v12994_v52 = vadd.f32 %v5860_v42, %v5837_v11 }
0x2139   :  { %9672 = vtanh.f32 %v12994_v52 }
0x213f   :  { %v9671_v55 = vpop.eup %9670  ;;  %v5862_v21 = vpop.permute.xlu1 %5861 }
0x2140   :  { %v13005_v38 = vadd.f32 %v5862_v21, %v5838_v22  ;;  %5875 = vrot.lane.b32.xlu1 %v9671_v55, %s9904_s0 }
0x2142   :  { %9674 = vtanh.f32 %v13005_v38 }
0x2143   :  { %v9673_v61 = vpop.eup %9672 }
0x2144   :  { %5877 = vrot.lane.b32.xlu1 %v9673_v61, %s9904_s0 }
0x214b   :  { %v5804_v62 = vpop.permute.xlu0 %5803 }
0x214c   :  { %v9675_v32 = vpop.eup %9674  ;;  %v5812_v11 = vmul.f32 %v12894_v2, %v5804_v62 }
0x214d   :  { %5879 = vrot.lane.b32.xlu1 %v9675_v32, %s9904_s0 }
0x214e   :  { %v5893_v30 = vsub.f32 %v5812_v11, %v12801_v12 }
0x214f   :  { %v5806_v42 = vpop.permute.xlu0 %5805 }
0x2150   :  { %v5911_v9 = vmul.f32 %v12998_v45, %v5893_v30  ;;  %v5813_v22 = vmul.f32 %v12899_v27, %v5806_v42 }
0x2152   :  { %v5894_v55 = vsub.f32 %v5813_v22, %v12809_v17  ;;  %v13021_v21 = vadd.f32 %v5911_v9, %v12801_v12 }
0x2153   :  { %v5808_v61 = vpop.permute.xlu0 %5807 }
0x2154   :  { %v5912_v43 = vmul.f32 %v13008_v14, %v5894_v55  ;;  %v5814_v56 = vmul.f32 %v12903_v54, %v5808_v61  ;;  %5962 = vrot.lane.b32.xlu0 %v13021_v21, %s9906_s3  ;;  %v13039_v54 = vpop.permute.xlu1 %5931 }
0x2156   :  { %v5895_v2 = vsub.f32 %v5814_v56, %v12817_v15  ;;  %v13029_v62 = vadd.f32 %v5912_v43, %v12809_v17 }
0x2158   :  { %v5913_v27 = vmul.f32 %v13012_v44, %v5895_v2  ;;  %5964 = vrot.lane.b32.xlu0 %v13029_v62, %s9906_s3  ;;  %v13041_v32 = vpop.permute.xlu1 %5936 }
0x215a   :  { %v13035_v12 = vadd.f32 %v5913_v27, %v12817_v15 }
0x215c   :  { %5966 = vrot.lane.b32.xlu0 %v13035_v12, %s9906_s3  ;;  %v13043_v11 = vpop.permute.xlu1 %5941 }
0x21b2   :  { %v5876_v56 = vpop.permute.xlu1 %5875 }
0x21b3   :  { %v5884_v43 = vmul.f32 %v12916_v6, %v5876_v56 }
0x21b5   :  { %v5926_v17 = vsub.f32 %v5884_v43, %v12829_v48 }
0x21b6   :  { %v5878_v30 = vpop.permute.xlu1 %5877 }
0x21b7   :  { %v5944_v42 = vmul.f32 %v13039_v54, %v5926_v17  ;;  %v5885_v15 = vmul.f32 %v12920_v53, %v5878_v30  ;;  %v4187_v30 = vadd.f32 %v12260_v36, %v12210_v18 }
0x21b9   :  { %v5927_v9 = vsub.f32 %v5885_v15, %v12837_v19  ;;  %v13051_v22 = vadd.f32 %v5944_v42, %v12829_v48 }
0x21bb   :  { %v5945_v55 = vmul.f32 %v13041_v32, %v5927_v9  ;;  %6060 = vrot.lane.b32.xlu1 %v13051_v22, %s9906_s3 }
0x21bd   :  { %v13057_v61 = vadd.f32 %v5945_v55, %v12837_v19  ;;  %v4193_v55 = vadd.f32 %v12264_v26, %v12210_v18 }
0x21bf   :  { %6062 = vrot.lane.b32.xlu1 %v13057_v61, %s9906_s3  ;;  %v5880_v6 = vpop.permute.xlu1 %5879 }
0x21c0   :  { %v5886_v2 = vmul.f32 %v12933_v23, %v5880_v6 }
0x21c2   :  { %v5928_v53 = vsub.f32 %v5886_v2, %v12847_v24 }
0x21c4   :  { %v5946_v27 = vmul.f32 %v13043_v11, %v5928_v53 }
0x21c6   :  { %v5963_v48 = vpop.permute.xlu0 %5962  ;;  %v13065_v56 = vadd.f32 %v5946_v27, %v12847_v24  ;;  %v4199_v27 = vadd.f32 %v12268_v16, %v12210_v18  ;;  %v4171_v16 = vadd.f32 %v12250_v7, %v12299_v0  ;;  %v4183_v7 = vadd.f32 %v12258_v4, %v12299_v0 }
0x21c7   :  { %8700 = vmatmul.mubr.msk.f32.vlgmr.msra.gmra.mrb[120].mxu1 %vm111_vm1, %v5963_v48 }
0x21c8   :  { %6064 = vrot.lane.b32.xlu1 %v13065_v56, %s9906_s3  ;;  %8702 = vmatprep.mubr.msk.f32.mxu1 %vm9903_vm0, %v13902_v3 }
0x21c9   :  { %9043 = vmatpush3.bf16.msra.mxu1 %v11933_v47 }
0x21ca   :  { %v5965_v19 = vpop.permute.xlu0 %5964  ;;  %9044 = vmatprep.subr.bf16.mxu1 %v13903_v59 }
0x21cb   :  { %8703 = vmatmul.mubr.msk.f32.gmra.mrb[122].mxu1 %vm111_vm1, %v5965_v19 }
0x21cc   :  { %8705 = vmatprep.mubr.msk.f32.mxu1 %vm9903_vm0, %v13902_v3 }
0x21cd   :  { %9046 = vmatpush3.bf16.msra.mxu1 %v11956_v51 }
0x21ce   :  { %v5967_v24 = vpop.permute.xlu0 %5966  ;;  %9053 = vmatprep.subr.bf16.mxu1 %v13903_v59 }
0x21cf   :  { %8706 = vmatmul.mubr.msk.f32.gmra.mrb[124].mxu1 %vm111_vm1, %v5967_v24 }
0x21d0   :  { %8733 = vmatprep.mubr.msk.f32.mxu1 %vm9903_vm0, %v13902_v3 }
0x222d   :  { %v6061_v23 = vpop.permute.xlu1 %6060 }
0x222e   :  { %8717 = vmatmul.mubr.msk.f32.vlgmr.msra.gmra.mrb[120].mxu0 %vm111_vm1, %v6061_v23 }
0x222f   :  { %8719 = vmatprep.mubr.msk.f32.mxu0 %vm9903_vm0, %v13902_v3  ;;  %9049 = vmatpush3.bf16.msra.mxu0 %v12080_v34 }
0x2230   :  { %9050 = vmatprep.subr.bf16.mxu0 %v13903_v59 }
0x2231   :  { %v6063_v43 = vpop.permute.xlu1 %6062 }
0x2232   :  { %8720 = vmatmul.mubr.msk.f32.gmra.mrb[122].mxu0 %vm111_vm1, %v6063_v43 }
0x2233   :  { %8722 = vmatprep.mubr.msk.f32.mxu0 %vm9903_vm0, %v13902_v3  ;;  %9052 = vmatpush3.bf16.msra.mxu0 %v12093_v29 }
0x2234   :  { %9059 = vmatprep.subr.bf16.mxu0 %v13903_v59 }
0x223a   :  { %v6065_v17 = vpop.permute.xlu1 %6064 }
0x223b   :  { %8723 = vmatmul.mubr.msk.f32.gmra.mrb[124].mxu0 %vm111_vm1, %v6065_v17 }
0x223c   :  { %8750 = vmatprep.mubr.msk.f32.mxu0 %vm9903_vm0, %v13902_v3 }
0x229a   :  { %v6040_v42 = vpop.f32.mrb[120].mxu1 }
0x229b   :  { %v6054_v15 = vadd.f32 %v6040_v42, %v4187_v30  ;;  %v8701_v9 = vpop.f32.mrb[121].mxu1 }
0x229d   :  { %9676 = vtanh.f32 %v6054_v15  ;;  %v7994_v26 = vmul.f32 -1.442695, %v6054_v15 }
0x229e   :  { %v6045_v6 = vpop.f32.mrb[122].mxu1 }
0x229f   :  { %v6055_v2 = vadd.f32 %v6045_v6, %v4193_v55  ;;  %v8704_v53 = vpop.f32.mrb[123].mxu1  ;;  %v4177_v6 = vadd.f32 %v12254_v31, %v12299_v0 }
0x22a1   :  { %9678 = vtanh.f32 %v6055_v2  ;;  %v7995_v17 = vmul.f32 -1.442695, %v6055_v2 }
0x22a2   :  { %v6050_v48 = vpop.f32.mrb[124].mxu1 }
0x22a3   :  { %v6056_v19 = vadd.f32 %v6050_v48, %v4199_v27  ;;  %v8707_v24 = vpop.f32.mrb[125].mxu1 }
0x22a5   :  { %9680 = vtanh.f32 %v6056_v19  ;;  %v7996_v55 = vmul.f32 -1.442695, %v6056_v19 }
0x22a6   :  { %9682 = vpow2.f32 %v7994_v26 }
0x22a7   :  { %v9677_v23 = vpop.eup %9676  ;;  %9684 = vpow2.f32 %v7995_v17 }
0x22a8   :  { %6182 = vrot.lane.b32.xlu0 %v9677_v23, %s9904_s0 }
0x22ab   :  { %v9679_v36 = vpop.eup %9678 }
0x22ac   :  { %6184 = vrot.lane.b32.xlu0 %v9679_v36, %s9904_s0 }
0x22af   :  { %v9681_v43 = vpop.eup %9680 }
0x22b0   :  { %6186 = vrot.lane.b32.xlu0 %v9681_v43, %s9904_s0  ;;  %v9683_v15 = vpop.eup %9682 }
0x22b1   :  { %v6164_v24 = vadd.f32 1.0, %v9683_v15  ;;  %v9685_v2 = vpop.eup %9684 }
0x22b2   :  { %v6165_v31 = vadd.f32 1.0, %v9685_v2 }
0x2301   :  { %v6138_v30 = vpop.f32.mrb[120].mxu0 }
0x2302   :  { %v6152_v42 = vadd.f32 %v6138_v30, %v4171_v16  ;;  %v8718_v9 = vpop.f32.mrb[121].mxu0 }
0x2304   :  { %9686 = vtanh.f32 %v6152_v42 }
0x2305   :  { %v6143_v53 = vpop.f32.mrb[122].mxu0  ;;  %9688 = vpow2.f32 %v7996_v55 }
0x2306   :  { %v6153_v27 = vadd.f32 %v6143_v53, %v4177_v6  ;;  %v8721_v48 = vpop.f32.mrb[123].mxu0 }
0x2308   :  { %9690 = vtanh.f32 %v6153_v27 }
0x2309   :  { %9692 = vrcp.f32 %v6164_v24 }
0x230e   :  { %v9687_v23 = vpop.eup %9686  ;;  %v6148_v36 = vpop.f32.mrb[124].mxu0 }
0x230f   :  { %v6154_v43 = vadd.f32 %v6148_v36, %v4183_v7  ;;  %6254 = vrot.lane.b32.xlu1 %v9687_v23, %s9904_s0  ;;  %v8724_v19 = vpop.f32.mrb[125].mxu0  ;;  %v9689_v26 = vpop.eup %9688  ;;  %v7997_v7 = vmul.f32 -1.442695, %v6152_v42  ;;  %v7998_v23 = vmul.f32 -1.442695, %v6153_v27 }
0x2310   :  { %v6166_v16 = vadd.f32 1.0, %v9689_v26 }
0x2311   :  { %9694 = vtanh.f32 %v6154_v43  ;;  %v7999_v36 = vmul.f32 -1.442695, %v6154_v43  ;;  %v5917_v43 = vsub.f32 %v12941_v37, %v12931_v41 }
0x2312   :  { %v9691_v17 = vpop.eup %9690  ;;  %9696 = vrcp.f32 %v6165_v31 }
0x2313   :  { %6256 = vrot.lane.b32.xlu1 %v9691_v17, %s9904_s0  ;;  %9698 = vrcp.f32 %v6166_v16  ;;  %v13112_v30 = vpop.eup %9692 }
0x2314   :  { %9700 = vpow2.f32 %v7997_v7 }
0x2315   :  { %9702 = vpow2.f32 %v7998_v23 }
0x2316   :  { %9704 = vpow2.f32 %v7999_v36 }
0x231a   :  { %v6183_v9 = vpop.permute.xlu0 %6182 }
0x231b   :  { %v9695_v4 = vpop.eup %9694  ;;  %v6191_v55 = vmul.f32 %v13112_v30, %v6183_v9 }
0x231c   :  { %6258 = vrot.lane.b32.xlu1 %v9695_v4, %s9904_s0  ;;  %v13117_v6 = vpop.eup %9696 }
0x231d   :  { %6197 = vrot.lane.b32.xlu0 %v6191_v55, %s9906_s3  ;;  %v13121_v15 = vpop.eup %9698 }
0x231e   :  { %v6185_v53 = vpop.permute.xlu0 %6184  ;;  %v9701_v19 = vpop.eup %9700 }
0x231f   :  { %v6192_v48 = vmul.f32 %v13117_v6, %v6185_v53  ;;  %v6236_v31 = vadd.f32 1.0, %v9701_v19  ;;  %v9703_v26 = vpop.eup %9702  ;;  %v5919_v19 = vsub.f32 %v12964_v5, %v12956_v25 }
0x2320   :  { %v6237_v17 = vadd.f32 1.0, %v9703_v26  ;;  %v9705_v16 = vpop.eup %9704 }
0x2321   :  { %6199 = vrot.lane.b32.xlu0 %v6192_v48, %s9906_s3  ;;  %9706 = vrcp.f32 %v6236_v31  ;;  %v6238_v9 = vadd.f32 1.0, %v9705_v16  ;;  %v5922_v16 = vmul.f32 %v5919_v19, %v13012_v44  ;;  %v5951_v19 = vsub.f32 %v12994_v52, %v12987_v33 }
0x2322   :  { %v6187_v24 = vpop.permute.xlu0 %6186  ;;  %9708 = vrcp.f32 %v6237_v17  ;;  %v5952_v52 = vsub.f32 %v13005_v38, %v13001_v46 }
0x2323   :  { %v6193_v2 = vmul.f32 %v13121_v15, %v6187_v24  ;;  %9710 = vrcp.f32 %v6238_v9  ;;  %v5920_v24 = vmul.f32 %v5917_v43, %v12998_v45 }
0x2325   :  { %6201 = vrot.lane.b32.xlu0 %v6193_v2, %s9906_s3  ;;  %v5918_v2 = vsub.f32 %v12953_v20, %v12944_v60  ;;  %v13140_v23 = vadd.f32 %v5920_v24, %v12931_v41 }
0x2327   :  { %v5921_v7 = vmul.f32 %v5918_v2, %v13008_v14  ;;  %v6176_v31 = vmul.f32 %v13112_v30, %v13140_v23 }
0x2329   :  { %v13153_v9 = vadd.f32 %v5921_v7, %v12944_v60 }
0x232b   :  { %v13125_v4 = vpop.eup %9706  ;;  %v6177_v41 = vmul.f32 %v13117_v6, %v13153_v9 }
0x232c   :  { %v13129_v42 = vpop.eup %9708 }
0x232d   :  { %v13142_v36 = vpop.eup %9710 }
0x2381   :  { %v6255_v55 = vpop.permute.xlu1 %6254 }
0x2382   :  { %v6263_v53 = vmul.f32 %v13125_v4, %v6255_v55 }
0x2384   :  { %6269 = vrot.lane.b32.xlu1 %v6263_v53, %s9906_s3  ;;  %v13162_v53 = vadd.f32 %v5922_v16, %v12956_v25  ;;  %v5950_v25 = vsub.f32 %v12984_v28, %v12980_v58 }
0x2385   :  { %v6257_v27 = vpop.permute.xlu1 %6256 }
0x2386   :  { %v6264_v48 = vmul.f32 %v13129_v42, %v6257_v27  ;;  %v6178_v27 = vmul.f32 %v13121_v15, %v13162_v53  ;;  %v5953_v7 = vmul.f32 %v5950_v25, %v13039_v54 }
0x2388   :  { %6271 = vrot.lane.b32.xlu1 %v6264_v48, %s9906_s3 }
0x238e   :  { %v6259_v37 = vpop.permute.xlu1 %6258 }
0x238f   :  { %v6265_v26 = vmul.f32 %v13142_v36, %v6259_v37  ;;  %v6198_v17 = vpop.permute.xlu0 %6197  ;;  %v5954_v37 = vmul.f32 %v5951_v19, %v13041_v32 }
0x2390   :  { %v13150_v20 = vadd.f32 %v6198_v17, %v6176_v31  ;;  %v13180_v31 = vadd.f32 %v5953_v7, %v12980_v58 }
0x2391   :  { %6273 = vrot.lane.b32.xlu1 %v6265_v26, %s9906_s3 }
0x2392   :  { %9712 = vtanh.f32 %v13150_v20  ;;  %v6248_v26 = vmul.f32 %v13125_v4, %v13180_v31 }
0x2393   :  { %v6200_v5 = vpop.permute.xlu0 %6199 }
0x2394   :  { %v13159_v55 = vadd.f32 %v6200_v5, %v6177_v41  ;;  %v13187_v41 = vadd.f32 %v5954_v37, %v12987_v33 }
0x2396   :  { %9714 = vtanh.f32 %v13159_v55  ;;  %v6249_v28 = vmul.f32 %v13129_v42, %v13187_v41 }
0x2397   :  { %v6202_v60 = vpop.permute.xlu0 %6201 }
0x2398   :  { %v13167_v43 = vadd.f32 %v6202_v60, %v6178_v27  ;;  %v5955_v27 = vmul.f32 %v5952_v52, %v13043_v11 }
0x239a   :  { %9716 = vtanh.f32 %v13167_v43  ;;  %v13199_v60 = vadd.f32 %v5955_v27, %v13001_v46 }
0x239c   :  { %v9713_v48 = vpop.eup %9712  ;;  %v6250_v33 = vmul.f32 %v13142_v36, %v13199_v60 }
0x239d   :  { %6215 = vrot.lane.b32.xlu0 %v9713_v48, %s9904_s0 }
0x23a0   :  { %v9715_v24 = vpop.eup %9714 }
0x23a1   :  { %6217 = vrot.lane.b32.xlu0 %v9715_v24, %s9904_s0 }
0x23a4   :  { %v9717_v2 = vpop.eup %9716 }
0x23a5   :  { %6219 = vrot.lane.b32.xlu0 %v9717_v2, %s9904_s0 }
0x23f6   :  { %v6270_v17 = vpop.permute.xlu1 %6269 }
0x23f7   :  { %v13184_v16 = vadd.f32 %v6270_v17, %v6248_v26 }
0x23f9   :  { %9718 = vtanh.f32 %v13184_v16 }
0x23fa   :  { %v6272_v5 = vpop.permute.xlu1 %6271 }
0x23fb   :  { %v13194_v58 = vadd.f32 %v6272_v5, %v6249_v28 }
0x23fd   :  { %9720 = vtanh.f32 %v13194_v58 }
0x2403   :  { %v9719_v48 = vpop.eup %9718  ;;  %v6274_v24 = vpop.permute.xlu1 %6273 }
0x2404   :  { %v13203_v2 = vadd.f32 %v6274_v24, %v6250_v33  ;;  %6287 = vrot.lane.b32.xlu1 %v9719_v48, %s9904_s0 }
0x2406   :  { %9722 = vtanh.f32 %v13203_v2 }
0x2407   :  { %v9721_v38 = vpop.eup %9720 }
0x2408   :  { %6289 = vrot.lane.b32.xlu1 %v9721_v38, %s9904_s0 }
0x240f   :  { %v6216_v25 = vpop.permute.xlu0 %6215 }
0x2410   :  { %v9723_v7 = vpop.eup %9722  ;;  %v6224_v19 = vmul.f32 %v13112_v30, %v6216_v25 }
0x2411   :  { %6291 = vrot.lane.b32.xlu1 %v9723_v7, %s9904_s0 }
0x2412   :  { %v6299_v46 = vsub.f32 %v6224_v19, %v13021_v21 }
0x2413   :  { %v6218_v37 = vpop.permute.xlu0 %6217 }
0x2414   :  { %v6302_v26 = vmul.f32 %v6299_v46, %v13039_v54  ;;  %v6225_v17 = vmul.f32 %v13117_v6, %v6218_v37 }
0x2416   :  { %v13214_v28 = vadd.f32 %v6302_v26, %v13021_v21  ;;  %v6300_v52 = vsub.f32 %v6225_v17, %v13029_v62 }
0x2417   :  { %v6220_v5 = vpop.permute.xlu0 %6219 }
0x2418   :  { %v6303_v27 = vmul.f32 %v6300_v52, %v13041_v32  ;;  %v6226_v33 = vmul.f32 %v13121_v15, %v6220_v5  ;;  %6338 = vrot.lane.b32.xlu0 %v13214_v28, %s9906_s3 }
0x241a   :  { %v13222_v30 = vadd.f32 %v6303_v27, %v13029_v62  ;;  %v6301_v48 = vsub.f32 %v6226_v33, %v13035_v12  ;;  %v4205_v33 = vadd.f32 %v12272_v57, %v12210_v18 }
0x241c   :  { %v6304_v6 = vmul.f32 %v6301_v48, %v13043_v11  ;;  %6340 = vrot.lane.b32.xlu0 %v13222_v30, %s9906_s3 }
0x241e   :  { %v13229_v21 = vadd.f32 %v6304_v6, %v13035_v12 }
0x2420   :  { %6342 = vrot.lane.b32.xlu0 %v13229_v21, %s9906_s3 }
0x2476   :  { %v6288_v15 = vpop.permute.xlu1 %6287 }
0x2477   :  { %v6296_v24 = vmul.f32 %v13125_v4, %v6288_v15 }
0x2479   :  { %v6317_v38 = vsub.f32 %v6296_v24, %v13051_v22  ;;  %v13964_v24 = vld [vmem:[#allocation22_spill] sm:$0xff] }
0x247a   :  { %v6290_v62 = vpop.permute.xlu1 %6289 }
0x247b   :  { %v6320_v25 = vmul.f32 %v6317_v38, %v12998_v45  ;;  %v6297_v7 = vmul.f32 %v13129_v42, %v6290_v62  ;;  %v4211_v38 = vadd.f32 %v13964_v24, %v12210_v18  ;;  %v13967_v24 = vld [vmem:[#allocation9_spill] sm:$0xff] }
0x247d   :  { %v13238_v19 = vadd.f32 %v6320_v25, %v13051_v22  ;;  %v6318_v46 = vsub.f32 %v6297_v7, %v13057_v61 }
0x247f   :  { %v6321_v12 = vmul.f32 %v6318_v46, %v13008_v14  ;;  %6436 = vrot.lane.b32.xlu1 %v13238_v19, %s9906_s3  ;;  %v13965_v46 = vld [vmem:[#allocation23_spill] sm:$0xff] }
0x2481   :  { %v13245_v37 = vadd.f32 %v6321_v12, %v13057_v61  ;;  %v4217_v12 = vadd.f32 %v13965_v46, %v12210_v18 }
0x2483   :  { %6438 = vrot.lane.b32.xlu1 %v13245_v37, %s9906_s3  ;;  %v6292_v4 = vpop.permute.xlu1 %6291 }
0x2484   :  { %v6298_v26 = vmul.f32 %v13142_v36, %v6292_v4 }
0x2486   :  { %v6319_v42 = vsub.f32 %v6298_v26, %v13065_v56 }
0x2488   :  { %v6322_v22 = vmul.f32 %v6319_v42, %v13012_v44 }
0x248a   :  { %v13253_v17 = vadd.f32 %v6322_v22, %v13065_v56  ;;  %v6339_v52 = vpop.permute.xlu0 %6338 }
0x248b   :  { %8734 = vmatmul.mubr.msk.f32.vlgmr.msra.gmra.mrb[126].mxu1 %vm111_vm1, %v6339_v52 }
0x248c   :  { %6440 = vrot.lane.b32.xlu1 %v13253_v17, %s9906_s3  ;;  %8736 = vmatprep.mubr.msk.f32.mxu1 %vm9903_vm0, %v13902_v3 }
0x248d   :  { %9055 = vmatpush3.bf16.msra.mxu1 %v11933_v47 }
0x248e   :  { %v6341_v61 = vpop.permute.xlu0 %6340  ;;  %9056 = vmatprep.subr.bf16.mxu1 %v13903_v59 }
0x248f   :  { %8737 = vmatmul.mubr.msk.f32.gmra.mrb[128].mxu1 %vm111_vm1, %v6341_v61 }
0x2490   :  { %8739 = vmatprep.mubr.msk.f32.mxu1 %vm9903_vm0, %v13902_v3 }
0x2491   :  { %9058 = vmatpush3.bf16.msra.mxu1 %v11956_v51 }
0x2492   :  { %v6343_v56 = vpop.permute.xlu0 %6342  ;;  %9065 = vmatprep.subr.bf16.mxu1 %v13903_v59 }
0x2493   :  { %8740 = vmatmul.mubr.msk.f32.gmra.mrb[130].mxu1 %vm111_vm1, %v6343_v56 }
0x2494   :  { %8767 = vmatprep.mubr.msk.f32.mxu1 %vm9903_vm0, %v13902_v3 }
0x24f1   :  { %v6437_v36 = vpop.permute.xlu1 %6436 }
0x24f2   :  { %8751 = vmatmul.mubr.msk.f32.vlgmr.msra.gmra.mrb[126].mxu0 %vm111_vm1, %v6437_v36  ;;  %v13966_v36 = vld [vmem:[#allocation8_spill] sm:$0xff] }
0x24f3   :  { %8753 = vmatprep.mubr.msk.f32.mxu0 %vm9903_vm0, %v13902_v3  ;;  %9061 = vmatpush3.bf16.msra.mxu0 %v12080_v34 }
0x24f4   :  { %9062 = vmatprep.subr.bf16.mxu0 %v13903_v59 }
0x24f5   :  { %v6439_v5 = vpop.permute.xlu1 %6438 }
0x24f6   :  { %8754 = vmatmul.mubr.msk.f32.gmra.mrb[128].mxu0 %vm111_vm1, %v6439_v5  ;;  %v4153_v5 = vadd.f32 %v13966_v36, %v12299_v0 }
0x24f7   :  { %8756 = vmatprep.mubr.msk.f32.mxu0 %vm9903_vm0, %v13902_v3  ;;  %9064 = vmatpush3.bf16.msra.mxu0 %v12093_v29 }
0x24f8   :  { %9071 = vmatprep.subr.bf16.mxu0 %v13903_v59 }
0x24fe   :  { %v6441_v27 = vpop.permute.xlu1 %6440 }
0x24ff   :  { %8757 = vmatmul.mubr.msk.f32.gmra.mrb[130].mxu0 %vm111_vm1, %v6441_v27 }
0x2500   :  { %8784 = vmatprep.mubr.msk.f32.mxu0 %vm9903_vm0, %v13902_v3 }
0x255e   :  { %v6416_v48 = vpop.f32.mrb[126].mxu1 }
0x255f   :  { %v6430_v6 = vadd.f32 %v6416_v48, %v4205_v33  ;;  %v8735_v15 = vpop.f32.mrb[127].mxu1 }
0x2561   :  { %9724 = vtanh.f32 %v6430_v6  ;;  %v8006_v61 = vmul.f32 -1.442695, %v6430_v6 }
0x2562   :  { %v6421_v62 = vpop.f32.mrb[128].mxu1 }
0x2563   :  { %v6431_v25 = vadd.f32 %v6421_v62, %v4211_v38  ;;  %v8738_v7 = vpop.f32.mrb[129].mxu1  ;;  %v4159_v38 = vadd.f32 %v13967_v24, %v12299_v0 }
0x2565   :  { %9726 = vtanh.f32 %v6431_v25  ;;  %v8007_v56 = vmul.f32 -1.442695, %v6431_v25 }
0x2566   :  { %v6426_v4 = vpop.f32.mrb[130].mxu1 }
0x2567   :  { %v6432_v26 = vadd.f32 %v6426_v4, %v4217_v12  ;;  %v8741_v42 = vpop.f32.mrb[131].mxu1  ;;  %v13968_v4 = vld [vmem:[#allocation10_spill] sm:$0xff] }
0x2568   :  { %v4165_v42 = vadd.f32 %v13968_v4, %v12299_v0 }
0x2569   :  { %9728 = vtanh.f32 %v6432_v26  ;;  %v8008_v15 = vmul.f32 -1.442695, %v6432_v26 }
0x256a   :  { %9730 = vpow2.f32 %v8006_v61 }
0x256b   :  { %v9725_v22 = vpop.eup %9724  ;;  %9732 = vpow2.f32 %v8007_v56 }
0x256c   :  { %6558 = vrot.lane.b32.xlu0 %v9725_v22, %s9904_s0 }
0x256f   :  { %v9727_v57 = vpop.eup %9726 }
0x2570   :  { %6560 = vrot.lane.b32.xlu0 %v9727_v57, %s9904_s0 }
0x2573   :  { %v9729_v52 = vpop.eup %9728 }
0x2574   :  { %6562 = vrot.lane.b32.xlu0 %v9729_v52, %s9904_s0  ;;  %v9731_v6 = vpop.eup %9730 }
0x2575   :  { %v6540_v12 = vadd.f32 1.0, %v9731_v6  ;;  %v9733_v25 = vpop.eup %9732 }
0x2576   :  { %v6541_v61 = vadd.f32 1.0, %v9733_v25 }
0x25c5   :  { %v6514_v27 = vpop.f32.mrb[126].mxu0 }
0x25c6   :  { %v6528_v33 = vadd.f32 %v6514_v27, %v4153_v5  ;;  %v8752_v48 = vpop.f32.mrb[127].mxu0 }
0x25c8   :  { %9734 = vtanh.f32 %v6528_v33  ;;  %v8009_v4 = vmul.f32 -1.442695, %v6528_v33  ;;  %v6308_v33 = vsub.f32 %v13150_v20, %v13140_v23 }
0x25c9   :  { %v6519_v62 = vpop.f32.mrb[128].mxu0  ;;  %9736 = vpow2.f32 %v8008_v15 }
0x25ca   :  { %v6529_v7 = vadd.f32 %v6519_v62, %v4159_v38  ;;  %v8755_v46 = vpop.f32.mrb[129].mxu0 }
0x25cc   :  { %9738 = vtanh.f32 %v6529_v7 }
0x25cd   :  { %9740 = vrcp.f32 %v6540_v12 }
0x25d2   :  { %v9735_v22 = vpop.eup %9734  ;;  %v6524_v57 = vpop.f32.mrb[130].mxu0 }
0x25d3   :  { %v6530_v52 = vadd.f32 %v6524_v57, %v4165_v42  ;;  %6630 = vrot.lane.b32.xlu1 %v9735_v22, %s9904_s0  ;;  %v8758_v26 = vpop.f32.mrb[131].mxu0  ;;  %v9737_v56 = vpop.eup %9736  ;;  %v8010_v42 = vmul.f32 -1.442695, %v6529_v7 }
0x25d4   :  { %v6542_v5 = vadd.f32 1.0, %v9737_v56 }
0x25d5   :  { %9742 = vtanh.f32 %v6530_v52  ;;  %v8011_v22 = vmul.f32 -1.442695, %v6530_v52 }
0x25d6   :  { %v9739_v36 = vpop.eup %9738  ;;  %9744 = vrcp.f32 %v6541_v61 }
0x25d7   :  { %6632 = vrot.lane.b32.xlu1 %v9739_v36, %s9904_s0  ;;  %9746 = vrcp.f32 %v6542_v5  ;;  %v13300_v27 = vpop.eup %9740 }
0x25d8   :  { %9748 = vpow2.f32 %v8009_v4  ;;  %v6310_v4 = vsub.f32 %v13167_v43, %v13162_v53 }
0x25d9   :  { %9750 = vpow2.f32 %v8010_v42 }
0x25da   :  { %9752 = vpow2.f32 %v8011_v22 }
0x25de   :  { %v6559_v48 = vpop.permute.xlu0 %6558 }
0x25df   :  { %v9743_v15 = vpop.eup %9742  ;;  %v6567_v24 = vmul.f32 %v13300_v27, %v6559_v48 }
0x25e0   :  { %6634 = vrot.lane.b32.xlu1 %v9743_v15, %s9904_s0  ;;  %v13305_v38 = vpop.eup %9744 }
0x25e1   :  { %6573 = vrot.lane.b32.xlu0 %v6567_v24, %s9906_s3  ;;  %v13309_v6 = vpop.eup %9746 }
0x25e2   :  { %v6561_v62 = vpop.permute.xlu0 %6560  ;;  %v9749_v57 = vpop.eup %9748 }
0x25e3   :  { %v6568_v46 = vmul.f32 %v13305_v38, %v6561_v62  ;;  %v6612_v26 = vadd.f32 1.0, %v9749_v57  ;;  %v9751_v61 = vpop.eup %9750 }
0x25e4   :  { %v6613_v56 = vadd.f32 1.0, %v9751_v61  ;;  %v9753_v36 = vpop.eup %9752 }
0x25e5   :  { %6575 = vrot.lane.b32.xlu0 %v6568_v46, %s9906_s3  ;;  %9754 = vrcp.f32 %v6612_v26  ;;  %v6614_v5 = vadd.f32 1.0, %v9753_v36  ;;  %v6311_v46 = vmul.f32 %v6308_v33, %v13039_v54  ;;  %v6326_v33 = vsub.f32 %v13184_v16, %v13180_v31 }
0x25e6   :  { %v6563_v12 = vpop.permute.xlu0 %6562  ;;  %9756 = vrcp.f32 %v6613_v56 }
0x25e7   :  { %v6569_v25 = vmul.f32 %v13309_v6, %v6563_v12  ;;  %9758 = vrcp.f32 %v6614_v5  ;;  %v6309_v12 = vsub.f32 %v13159_v55, %v13153_v9 }
0x25e9   :  { %6577 = vrot.lane.b32.xlu0 %v6569_v25, %s9906_s3  ;;  %v13327_v25 = vadd.f32 %v6311_v46, %v13140_v23  ;;  %v6312_v20 = vmul.f32 %v6309_v12, %v13041_v32  ;;  %v6313_v23 = vmul.f32 %v6310_v4, %v13043_v11 }
0x25eb   :  { %v6552_v57 = vmul.f32 %v13300_v27, %v13327_v25  ;;  %v13338_v55 = vadd.f32 %v6312_v20, %v13153_v9  ;;  %v13348_v56 = vadd.f32 %v6313_v23, %v13162_v53 }
0x25ed   :  { %v6553_v32 = vmul.f32 %v13305_v38, %v13338_v55  ;;  %v6554_v11 = vmul.f32 %v13309_v6, %v13348_v56 }
0x25ef   :  { %v13313_v48 = vpop.eup %9754 }
0x25f0   :  { %v13319_v7 = vpop.eup %9756 }
0x25f1   :  { %v13332_v42 = vpop.eup %9758 }
0x2645   :  { %v6631_v15 = vpop.permute.xlu1 %6630 }
0x2646   :  { %v6639_v24 = vmul.f32 %v13313_v48, %v6631_v15 }
0x2648   :  { %6645 = vrot.lane.b32.xlu1 %v6639_v24, %s9906_s3 }
0x2649   :  { %v6633_v52 = vpop.permute.xlu1 %6632 }
0x264a   :  { %v6640_v62 = vmul.f32 %v13319_v7, %v6633_v52  ;;  %v6329_v52 = vmul.f32 %v6326_v33, %v12998_v45  ;;  %v6328_v45 = vsub.f32 %v13203_v2, %v13199_v60 }
0x264c   :  { %6647 = vrot.lane.b32.xlu1 %v6640_v62, %s9906_s3  ;;  %v6327_v62 = vsub.f32 %v13194_v58, %v13187_v41  ;;  %v13367_v46 = vadd.f32 %v6329_v52, %v13180_v31 }
0x264e   :  { %v6330_v12 = vmul.f32 %v6327_v62, %v13008_v14  ;;  %v6624_v20 = vmul.f32 %v13313_v48, %v13367_v46  ;;  %v6331_v14 = vmul.f32 %v6328_v45, %v13012_v44 }
0x2652   :  { %v6635_v22 = vpop.permute.xlu1 %6634 }
0x2653   :  { %v6641_v54 = vmul.f32 %v13332_v42, %v6635_v22  ;;  %v6574_v26 = vpop.permute.xlu0 %6573  ;;  %v13373_v22 = vadd.f32 %v6330_v12, %v13187_v41  ;;  %v13387_v41 = vadd.f32 %v6331_v14, %v13199_v60 }
0x2654   :  { %v13341_v61 = vadd.f32 %v6574_v26, %v6552_v57 }
0x2655   :  { %6649 = vrot.lane.b32.xlu1 %v6641_v54, %s9906_s3  ;;  %v6625_v31 = vmul.f32 %v13319_v7, %v13373_v22  ;;  %v6626_v54 = vmul.f32 %v13332_v42, %v13387_v41 }
0x2656   :  { %9760 = vtanh.f32 %v13341_v61 }
0x2657   :  { %v6576_v43 = vpop.permute.xlu0 %6575 }
0x2658   :  { %v13350_v36 = vadd.f32 %v6576_v43, %v6553_v32 }
0x265a   :  { %9762 = vtanh.f32 %v13350_v36 }
0x265b   :  { %v6578_v9 = vpop.permute.xlu0 %6577 }
0x265c   :  { %v13355_v5 = vadd.f32 %v6578_v9, %v6554_v11 }
0x265e   :  { %9764 = vtanh.f32 %v13355_v5 }
0x2660   :  { %v9761_v15 = vpop.eup %9760 }
0x2661   :  { %6591 = vrot.lane.b32.xlu0 %v9761_v15, %s9904_s0 }
0x2664   :  { %v9763_v24 = vpop.eup %9762 }
0x2665   :  { %6593 = vrot.lane.b32.xlu0 %v9763_v24, %s9904_s0 }
0x2668   :  { %v9765_v53 = vpop.eup %9764 }
0x2669   :  { %6595 = vrot.lane.b32.xlu0 %v9765_v53, %s9904_s0 }
0x26ba   :  { %v6646_v4 = vpop.permute.xlu1 %6645 }
0x26bb   :  { %v13375_v57 = vadd.f32 %v6646_v4, %v6624_v20 }
0x26bd   :  { %9766 = vtanh.f32 %v13375_v57 }
0x26be   :  { %v6648_v16 = vpop.permute.xlu1 %6647 }
0x26bf   :  { %v13382_v58 = vadd.f32 %v6648_v16, %v6625_v31 }
0x26c1   :  { %9768 = vtanh.f32 %v13382_v58 }
0x26c7   :  { %v9767_v26 = vpop.eup %9766  ;;  %v6650_v2 = vpop.permute.xlu1 %6649 }
0x26c8   :  { %v13391_v23 = vadd.f32 %v6650_v2, %v6626_v54  ;;  %6663 = vrot.lane.b32.xlu1 %v9767_v26, %s9904_s0 }
0x26ca   :  { %9770 = vtanh.f32 %v13391_v23 }
0x26cb   :  { %v9769_v32 = vpop.eup %9768 }
0x26cc   :  { %6665 = vrot.lane.b32.xlu1 %v9769_v32, %s9904_s0 }
0x26d3   :  { %v6592_v44 = vpop.permute.xlu0 %6591 }
0x26d4   :  { %v9771_v43 = vpop.eup %9770  ;;  %v6600_v11 = vmul.f32 %v13300_v27, %v6592_v44 }
0x26d5   :  { %6667 = vrot.lane.b32.xlu1 %v9771_v43, %s9904_s0 }
0x26d6   :  { %v6675_v60 = vsub.f32 %v6600_v11, %v13214_v28 }
0x26d7   :  { %v6594_v9 = vpop.permute.xlu0 %6593 }
0x26d8   :  { %v6678_v15 = vmul.f32 %v6675_v60, %v12822_v63  ;;  %v6601_v24 = vmul.f32 %v13305_v38, %v6594_v9 }
0x26da   :  { %v13402_v53 = vadd.f32 %v6678_v15, %v13214_v28  ;;  %v6676_v33 = vsub.f32 %v6601_v24, %v13222_v30  ;;  %v13970_v15 = vld [vmem:[#allocation25_spill] sm:$0xff] }
0x26db   :  { %v6596_v52 = vpop.permute.xlu0 %6595  ;;  %v4229_v24 = vadd.f32 %v13970_v15, %v12210_v18 }
0x26dc   :  { %v6679_v62 = vmul.f32 %v6676_v33, %v12831_v49  ;;  %v6602_v12 = vmul.f32 %v13309_v6, %v6596_v52  ;;  %6714 = vrot.lane.b32.xlu0 %v13402_v53, %s9906_s3 }
0x26de   :  { %v13410_v27 = vadd.f32 %v6679_v62, %v13222_v30  ;;  %v6677_v20 = vsub.f32 %v6602_v12, %v13229_v21  ;;  %v13971_v62 = vld [vmem:[#allocation26_spill] sm:$0xff] }
0x26df   :  { %v4235_v12 = vadd.f32 %v13971_v62, %v12210_v18 }
0x26e0   :  { %v6680_v38 = vmul.f32 %v6677_v20, %v12842_v13  ;;  %6716 = vrot.lane.b32.xlu0 %v13410_v27, %s9906_s3 }
0x26e2   :  { %v13417_v28 = vadd.f32 %v6680_v38, %v13229_v21 }
0x26e4   :  { %6718 = vrot.lane.b32.xlu0 %v13417_v28, %s9906_s3 }
0x273a   :  { %v6664_v6 = vpop.permute.xlu1 %6663 }
0x273b   :  { %v6672_v4 = vmul.f32 %v13313_v48, %v6664_v6 }
0x273d   :  { %v6693_v45 = vsub.f32 %v6672_v4, %v13238_v19 }
0x273e   :  { %v6666_v30 = vpop.permute.xlu1 %6665 }
0x273f   :  { %v6696_v31 = vmul.f32 %v6693_v45, %v12790_v8  ;;  %v6673_v16 = vmul.f32 %v13319_v7, %v6666_v30 }
0x2741   :  { %v13426_v14 = vadd.f32 %v6696_v31, %v13238_v19  ;;  %v6694_v54 = vsub.f32 %v6673_v16, %v13245_v37 }
0x2743   :  { %v6697_v21 = vmul.f32 %v6694_v54, %v12797_v10  ;;  %6812 = vrot.lane.b32.xlu1 %v13426_v14, %s9906_s3  ;;  %v13972_v54 = vld [vmem:[#allocation19_spill] sm:$0xff] }
0x2745   :  { %v13433_v26 = vadd.f32 %v6697_v21, %v13245_v37  ;;  %v4135_v21 = vadd.f32 %v13972_v54, %v12299_v0 }
0x2747   :  { %6814 = vrot.lane.b32.xlu1 %v13433_v26, %s9906_s3  ;;  %v6668_v48 = vpop.permute.xlu1 %6667 }
0x2748   :  { %v6674_v2 = vmul.f32 %v13332_v42, %v6668_v48 }
0x274a   :  { %v6695_v7 = vsub.f32 %v6674_v2, %v13253_v17 }
0x274c   :  { %v6698_v19 = vmul.f32 %v6695_v7, %v12811_v1 }
0x274e   :  { %v13441_v32 = vadd.f32 %v6698_v19, %v13253_v17  ;;  %v6715_v44 = vpop.permute.xlu0 %6714 }
0x274f   :  { %8768 = vmatmul.mubr.msk.f32.vlgmr.msra.gmra.mrb[132].mxu1 %vm111_vm1, %v6715_v44  ;;  %v13973_v44 = vld [vmem:[#allocation20_spill] sm:$0xff] }
0x2750   :  { %6816 = vrot.lane.b32.xlu1 %v13441_v32, %s9906_s3  ;;  %8770 = vmatprep.mubr.msk.f32.mxu1 %vm9903_vm0, %v13902_v3 }
0x2751   :  { %9067 = vmatpush3.bf16.msra.mxu1 %v11933_v47 }
0x2752   :  { %v6717_v37 = vpop.permute.xlu0 %6716  ;;  %9068 = vmatprep.subr.bf16.mxu1 %v13903_v59 }
0x2753   :  { %8771 = vmatmul.mubr.msk.f32.gmra.mrb[134].mxu1 %vm111_vm1, %v6717_v37  ;;  %v4141_v37 = vadd.f32 %v13973_v44, %v12299_v0 }
0x2754   :  { %8773 = vmatprep.mubr.msk.f32.mxu1 %vm9903_vm0, %v13902_v3 }
0x2755   :  { %9070 = vmatpush3.bf16.msra.mxu1 %v11956_v51 }
0x2756   :  { %v6719_v17 = vpop.permute.xlu0 %6718  ;;  %9077 = vmatprep.subr.bf16.mxu1 %v13903_v59 }
0x2757   :  { %8774 = vmatmul.mubr.msk.f32.gmra.mrb[136].mxu1 %vm111_vm1, %v6719_v17 }
0x2758   :  { %8801 = vmatprep.mubr.msk.f32.mxu1 %vm9903_vm0, %v13902_v3 }
0x27b5   :  { %v6813_v42 = vpop.permute.xlu1 %6812 }
0x27b6   :  { %8785 = vmatmul.mubr.msk.f32.vlgmr.msra.gmra.mrb[132].mxu0 %vm111_vm1, %v6813_v42 }
0x27b7   :  { %8787 = vmatprep.mubr.msk.f32.mxu0 %vm9903_vm0, %v13902_v3  ;;  %9073 = vmatpush3.bf16.msra.mxu0 %v12080_v34  ;;  %v13969_v34 = vld [vmem:[#allocation24_spill] sm:$0xff] }
0x27b8   :  { %9074 = vmatprep.subr.bf16.mxu0 %v13903_v59  ;;  %v4223_v43 = vadd.f32 %v13969_v34, %v12210_v18 }
0x27b9   :  { %v6815_v47 = vpop.permute.xlu1 %6814 }
0x27ba   :  { %8788 = vmatmul.mubr.msk.f32.gmra.mrb[134].mxu0 %vm111_vm1, %v6815_v47 }
0x27bb   :  { %8790 = vmatprep.mubr.msk.f32.mxu0 %vm9903_vm0, %v13902_v3  ;;  %9076 = vmatpush3.bf16.msra.mxu0 %v12093_v29 }
0x27bc   :  { %9083 = vmatprep.subr.bf16.mxu0 %v13903_v59 }
0x27c2   :  { %v6817_v51 = vpop.permute.xlu1 %6816 }
0x27c3   :  { %8791 = vmatmul.mubr.msk.f32.gmra.mrb[136].mxu0 %vm111_vm1, %v6817_v51 }
0x27c4   :  { %8818 = vmatprep.mubr.msk.f32.mxu0 %vm9903_vm0, %v13902_v3 }
0x2822   :  { %v6792_v11 = vpop.f32.mrb[132].mxu1 }
0x2823   :  { %v6806_v60 = vadd.f32 %v6792_v11, %v4223_v43  ;;  %v8769_v9 = vpop.f32.mrb[133].mxu1  ;;  %v13974_v11 = vld [vmem:[#allocation21_spill] sm:$0xff] }
0x2825   :  { %9772 = vtanh.f32 %v6806_v60  ;;  %v8018_v31 = vmul.f32 -1.442695, %v6806_v60  ;;  %v4147_v60 = vadd.f32 %v13974_v11, %v12299_v0 }
0x2826   :  { %v6797_v33 = vpop.f32.mrb[134].mxu1 }
0x2827   :  { %v6807_v29 = vadd.f32 %v6797_v33, %v4229_v24  ;;  %v8772_v52 = vpop.f32.mrb[135].mxu1 }
0x2829   :  { %9774 = vtanh.f32 %v6807_v29  ;;  %v8019_v16 = vmul.f32 -1.442695, %v6807_v29 }
0x282a   :  { %v6802_v20 = vpop.f32.mrb[136].mxu1 }
0x282b   :  { %v6808_v38 = vadd.f32 %v6802_v20, %v4235_v12  ;;  %v8775_v6 = vpop.f32.mrb[137].mxu1 }
0x282d   :  { %9776 = vtanh.f32 %v6808_v38  ;;  %v8020_v19 = vmul.f32 -1.442695, %v6808_v38 }
0x282e   :  { %9778 = vpow2.f32 %v8018_v31 }
0x282f   :  { %v9773_v4 = vpop.eup %9772  ;;  %9780 = vpow2.f32 %v8019_v16 }
0x2830   :  { %6934 = vrot.lane.b32.xlu0 %v9773_v4, %s9904_s0 }
0x2833   :  { %v9775_v45 = vpop.eup %9774 }
0x2834   :  { %6936 = vrot.lane.b32.xlu0 %v9775_v45, %s9904_s0 }
0x2837   :  { %v9777_v30 = vpop.eup %9776 }
0x2838   :  { %6938 = vrot.lane.b32.xlu0 %v9777_v30, %s9904_s0  ;;  %v9779_v51 = vpop.eup %9778 }
0x2839   :  { %v6916_v34 = vadd.f32 1.0, %v9779_v51  ;;  %v9781_v43 = vpop.eup %9780 }
0x283a   :  { %v6917_v29 = vadd.f32 1.0, %v9781_v43 }
0x2889   :  { %v6890_v48 = vpop.f32.mrb[132].mxu0 }
0x288a   :  { %v6904_v2 = vadd.f32 %v6890_v48, %v4135_v21  ;;  %v8786_v7 = vpop.f32.mrb[133].mxu0 }
0x288c   :  { %9782 = vtanh.f32 %v6904_v2  ;;  %v8021_v48 = vmul.f32 -1.442695, %v6904_v2  ;;  %v6684_v2 = vsub.f32 %v13341_v61, %v13327_v25 }
0x288d   :  { %v6895_v17 = vpop.f32.mrb[134].mxu0  ;;  %9784 = vpow2.f32 %v8020_v19 }
0x288e   :  { %v6905_v42 = vadd.f32 %v6895_v17, %v4141_v37  ;;  %v8789_v47 = vpop.f32.mrb[135].mxu0 }
0x2890   :  { %9786 = vtanh.f32 %v6905_v42  ;;  %v8022_v7 = vmul.f32 -1.442695, %v6905_v42 }
0x2891   :  { %9788 = vrcp.f32 %v6916_v34 }
0x2896   :  { %v9783_v9 = vpop.eup %9782  ;;  %v6900_v15 = vpop.f32.mrb[136].mxu0 }
0x2897   :  { %v6906_v24 = vadd.f32 %v6900_v15, %v4147_v60  ;;  %7006 = vrot.lane.b32.xlu1 %v9783_v9, %s9904_s0  ;;  %v8792_v33 = vpop.f32.mrb[137].mxu0  ;;  %v9785_v52 = vpop.eup %9784 }
0x2898   :  { %v6918_v12 = vadd.f32 1.0, %v9785_v52  ;;  %v6685_v33 = vsub.f32 %v13350_v36, %v13338_v55  ;;  %v6686_v52 = vsub.f32 %v13355_v5, %v13348_v56 }
0x2899   :  { %9790 = vtanh.f32 %v6906_v24  ;;  %v8023_v19 = vmul.f32 -1.442695, %v6906_v24  ;;  %v6687_v24 = vmul.f32 %v6684_v2, %v12822_v63 }
0x289a   :  { %v9787_v62 = vpop.eup %9786  ;;  %9792 = vrcp.f32 %v6917_v29  ;;  %v6688_v61 = vmul.f32 %v6685_v33, %v12831_v49 }
0x289b   :  { %7008 = vrot.lane.b32.xlu1 %v9787_v62, %s9904_s0  ;;  %9794 = vrcp.f32 %v6918_v12  ;;  %v13488_v20 = vpop.eup %9788  ;;  %v13515_v29 = vadd.f32 %v6687_v24, %v13327_v25  ;;  %v6689_v25 = vmul.f32 %v6686_v52, %v12842_v13 }
0x289c   :  { %9796 = vpow2.f32 %v8021_v48  ;;  %v13526_v36 = vadd.f32 %v6688_v61, %v13338_v55 }
0x289d   :  { %9798 = vpow2.f32 %v8022_v7  ;;  %v6702_v7 = vsub.f32 %v13375_v57, %v13367_v46 }
0x289e   :  { %9800 = vpow2.f32 %v8023_v19 }
0x289f   :  { %v6705_v19 = vmul.f32 %v6702_v7, %v12790_v8  ;;  %v6704_v8 = vsub.f32 %v13391_v23, %v13387_v41 }
0x28a2   :  { %v6935_v38 = vpop.permute.xlu0 %6934 }
0x28a3   :  { %v9791_v6 = vpop.eup %9790  ;;  %v6943_v4 = vmul.f32 %v13488_v20, %v6935_v38  ;;  %v6928_v38 = vmul.f32 %v13488_v20, %v13515_v29 }
0x28a4   :  { %7010 = vrot.lane.b32.xlu1 %v9791_v6, %s9904_s0  ;;  %v13493_v45 = vpop.eup %9792 }
0x28a5   :  { %6949 = vrot.lane.b32.xlu0 %v6943_v4, %s9906_s3  ;;  %v13497_v16 = vpop.eup %9794  ;;  %v6929_v49 = vmul.f32 %v13493_v45, %v13526_v36 }
0x28a6   :  { %v6937_v30 = vpop.permute.xlu0 %6936  ;;  %v9797_v44 = vpop.eup %9796 }
0x28a7   :  { %v6944_v31 = vmul.f32 %v13493_v45, %v6937_v30  ;;  %v6988_v37 = vadd.f32 1.0, %v9797_v44  ;;  %v9799_v17 = vpop.eup %9798  ;;  %v13536_v30 = vadd.f32 %v6689_v25, %v13348_v56  ;;  %v6703_v44 = vsub.f32 %v13382_v58, %v13373_v22 }
0x28a8   :  { %v6989_v47 = vadd.f32 1.0, %v9799_v17  ;;  %v9801_v51 = vpop.eup %9800 }
0x28a9   :  { %6951 = vrot.lane.b32.xlu0 %v6944_v31, %s9906_s3  ;;  %9802 = vrcp.f32 %v6988_v37  ;;  %v6990_v34 = vadd.f32 1.0, %v9801_v51  ;;  %v6930_v13 = vmul.f32 %v13497_v16, %v13536_v30  ;;  %v13555_v37 = vadd.f32 %v6705_v19, %v13367_v46 }
0x28aa   :  { %v6939_v54 = vpop.permute.xlu0 %6938  ;;  %9804 = vrcp.f32 %v6989_v47  ;;  %v6706_v17 = vmul.f32 %v6703_v44, %v12797_v10  ;;  %v6707_v10 = vmul.f32 %v6704_v8, %v12811_v1 }
0x28ab   :  { %v6945_v21 = vmul.f32 %v13497_v16, %v6939_v54  ;;  %9806 = vrcp.f32 %v6990_v34 }
0x28ac   :  { %v13561_v34 = vadd.f32 %v6706_v17, %v13373_v22  ;;  %v13575_v22 = vadd.f32 %v6707_v10, %v13387_v41  ;;  %v13977_v10 = vld [vmem:[#allocation27_spill] sm:$0xff] }
0x28ad   :  { %6953 = vrot.lane.b32.xlu0 %v6945_v21, %s9906_s3 }
0x28b3   :  { %v13501_v43 = vpop.eup %9802 }
0x28b4   :  { %v13507_v42 = vpop.eup %9804  ;;  %v7000_v47 = vmul.f32 %v13501_v43, %v13555_v37 }
0x28b5   :  { %v13520_v62 = vpop.eup %9806  ;;  %v7001_v46 = vmul.f32 %v13507_v42, %v13561_v34 }
0x2909   :  { %v7007_v11 = vpop.permute.xlu1 %7006 }
0x290a   :  { %v7015_v60 = vmul.f32 %v13501_v43, %v7007_v11 }
0x290c   :  { %7021 = vrot.lane.b32.xlu1 %v7015_v60, %s9906_s3  ;;  %v7002_v60 = vmul.f32 %v13520_v62, %v13575_v22 }
0x290d   :  { %v7009_v9 = vpop.permute.xlu1 %7008 }
0x290e   :  { %v7016_v15 = vmul.f32 %v13507_v42, %v7009_v9 }
0x2910   :  { %7023 = vrot.lane.b32.xlu1 %v7016_v15, %s9906_s3 }
0x2916   :  { %v7011_v12 = vpop.permute.xlu1 %7010 }
0x2917   :  { %v7017_v63 = vmul.f32 %v13520_v62, %v7011_v12  ;;  %v6950_v6 = vpop.permute.xlu0 %6949 }
0x2918   :  { %v13529_v4 = vadd.f32 %v6950_v6, %v6928_v38 }
0x2919   :  { %7025 = vrot.lane.b32.xlu1 %v7017_v63, %s9906_s3 }
0x291a   :  { %9808 = vtanh.f32 %v13529_v4 }
0x291b   :  { %v6952_v5 = vpop.permute.xlu0 %6951 }
0x291c   :  { %v13538_v31 = vadd.f32 %v6952_v5, %v6929_v49 }
0x291e   :  { %9810 = vtanh.f32 %v13538_v31 }
0x291f   :  { %v6954_v55 = vpop.permute.xlu0 %6953 }
0x2920   :  { %v13543_v54 = vadd.f32 %v6954_v55, %v6930_v13 }
0x2922   :  { %9812 = vtanh.f32 %v13543_v54 }
0x2924   :  { %v9809_v21 = vpop.eup %9808 }
0x2925   :  { %6967 = vrot.lane.b32.xlu0 %v9809_v21, %s9904_s0 }
0x2928   :  { %v9811_v48 = vpop.eup %9810 }
0x2929   :  { %6969 = vrot.lane.b32.xlu0 %v9811_v48, %s9904_s0 }
0x292c   :  { %v9813_v56 = vpop.eup %9812 }
0x292d   :  { %6971 = vrot.lane.b32.xlu0 %v9813_v56, %s9904_s0 }
0x297e   :  { %v7022_v51 = vpop.permute.xlu1 %7021 }
0x297f   :  { %v13563_v11 = vadd.f32 %v7022_v51, %v7000_v47 }
0x2981   :  { %9814 = vtanh.f32 %v13563_v11 }
0x2982   :  { %v7024_v57 = vpop.permute.xlu1 %7023 }
0x2983   :  { %v13570_v58 = vadd.f32 %v7024_v57, %v7001_v46 }
0x2985   :  { %9816 = vtanh.f32 %v13570_v58 }
0x298b   :  { %v9815_v2 = vpop.eup %9814  ;;  %v7026_v23 = vpop.permute.xlu1 %7025 }
0x298c   :  { %v13579_v9 = vadd.f32 %v7026_v23, %v7002_v60  ;;  %7039 = vrot.lane.b32.xlu1 %v9815_v2, %s9904_s0  ;;  %v4241_v60 = vadd.f32 %v13977_v10, %v12210_v18 }
0x298e   :  { %9818 = vtanh.f32 %v13579_v9 }
0x298f   :  { %v9817_v15 = vpop.eup %9816 }
0x2990   :  { %7041 = vrot.lane.b32.xlu1 %v9817_v15, %s9904_s0 }
0x2997   :  { %v6968_v1 = vpop.permute.xlu0 %6967 }
0x2998   :  { %v9819_v24 = vpop.eup %9818  ;;  %v6976_v33 = vmul.f32 %v13488_v20, %v6968_v1  ;;  %v13978_v1 = vld [vmem:[#allocation28_spill] sm:$0xff] }
0x2999   :  { %7043 = vrot.lane.b32.xlu1 %v9819_v24, %s9904_s0  ;;  %v4247_v24 = vadd.f32 %v13978_v1, %v12210_v18 }
0x299a   :  { %v7051_v41 = vsub.f32 %v6976_v33, %v13402_v53 }
0x299b   :  { %v6970_v61 = vpop.permute.xlu0 %6969 }
0x299c   :  { %v7054_v52 = vmul.f32 %v7051_v41, %v12604_v40  ;;  %v6977_v12 = vmul.f32 %v13493_v45, %v6970_v61 }
0x299e   :  { %v13590_v38 = vadd.f32 %v7054_v52, %v13402_v53  ;;  %v7052_v63 = vsub.f32 %v6977_v12, %v13410_v27  ;;  %v13979_v52 = vld [vmem:[#allocation15_spill] sm:$0xff] }
0x299f   :  { %v6972_v6 = vpop.permute.xlu0 %6971  ;;  %v4253_v12 = vadd.f32 %v13979_v52, %v12210_v18 }
0x29a0   :  { %v7055_v25 = vmul.f32 %v7052_v63, %v12613_v50  ;;  %v6978_v49 = vmul.f32 %v13497_v16, %v6972_v6  ;;  %7090 = vrot.lane.b32.xlu0 %v13590_v38, %s9906_s3 }
0x29a2   :  { %v13598_v20 = vadd.f32 %v7055_v25, %v13410_v27  ;;  %v7053_v5 = vsub.f32 %v6978_v49, %v13417_v28 }
0x29a4   :  { %v7056_v45 = vmul.f32 %v7053_v5, %v12624_v35  ;;  %7092 = vrot.lane.b32.xlu0 %v13598_v20, %s9906_s3 }
0x29a6   :  { %v13605_v53 = vadd.f32 %v7056_v45, %v13417_v28  ;;  %v13975_v28 = vld [vmem:[#allocation30_spill] sm:$0xff] }
0x29a8   :  { %7094 = vrot.lane.b32.xlu0 %v13605_v53, %s9906_s3 }
0x29fe   :  { %v7040_v16 = vpop.permute.xlu1 %7039 }
0x29ff   :  { %v7048_v13 = vmul.f32 %v13501_v43, %v7040_v16 }
0x2a01   :  { %v7069_v55 = vsub.f32 %v7048_v13, %v13426_v14 }
0x2a02   :  { %v7042_v27 = vpop.permute.xlu1 %7041 }
0x2a03   :  { %v7072_v21 = vmul.f32 %v7069_v55, %v12572_v39  ;;  %v7049_v48 = vmul.f32 %v13507_v42, %v7042_v27  ;;  %v13980_v55 = vld [vmem:[#allocation11_spill] sm:$0xff] }
0x2a04   :  { %v4117_v18 = vadd.f32 %v13980_v55, %v12299_v0 }
0x2a05   :  { %v13614_v56 = vadd.f32 %v7072_v21, %v13426_v14  ;;  %v7070_v7 = vsub.f32 %v7049_v48, %v13433_v26  ;;  %v13976_v14 = vld [vmem:[#allocation31_spill] sm:$0xff] }
0x2a07   :  { %v7073_v19 = vmul.f32 %v7070_v7, %v13975_v28  ;;  %7188 = vrot.lane.b32.xlu1 %v13614_v56, %s9906_s3 }
0x2a09   :  { %v13621_v44 = vadd.f32 %v7073_v19, %v13433_v26  ;;  %v13981_v19 = vld [vmem:[#allocation12_spill] sm:$0xff] }
0x2a0b   :  { %7190 = vrot.lane.b32.xlu1 %v13621_v44, %s9906_s3  ;;  %v7044_v43 = vpop.permute.xlu1 %7043 }
0x2a0c   :  { %v7050_v17 = vmul.f32 %v13520_v62, %v7044_v43  ;;  %v4123_v43 = vadd.f32 %v13981_v19, %v12299_v0 }
0x2a0e   :  { %v7071_v42 = vsub.f32 %v7050_v17, %v13441_v32 }
0x2a10   :  { %v7074_v47 = vmul.f32 %v7071_v42, %v13976_v14 }
0x2a12   :  { %v13629_v51 = vadd.f32 %v7074_v47, %v13441_v32  ;;  %v7091_v8 = vpop.permute.xlu0 %7090 }
0x2a13   :  { %8802 = vmatmul.mubr.msk.f32.vlgmr.msra.gmra.mrb[138].mxu1 %vm111_vm1, %v7091_v8 }
0x2a14   :  { %7192 = vrot.lane.b32.xlu1 %v13629_v51, %s9906_s3  ;;  %8804 = vmatprep.mubr.msk.f32.mxu1 %vm9903_vm0, %v13902_v3 }
0x2a16   :  { %v7093_v26 = vpop.permute.xlu0 %7092 }
0x2a17   :  { %8805 = vmatmul.mubr.msk.f32.gmra.mrb[140].mxu1 %vm111_vm1, %v7093_v26 }
0x2a18   :  { %8807 = vmatprep.mubr.msk.f32.mxu1 %vm9903_vm0, %v13902_v3 }
0x2a1a   :  { %v7095_v62 = vpop.permute.xlu0 %7094 }
0x2a1b   :  { %8808 = vmatmul.mubr.msk.f32.gmra.mrb[142].mxu1 %vm111_vm1, %v7095_v62 }
0x2a1c   :  { %8835 = vmatprep.mubr.msk.f32.mxu1 %vm9903_vm0, %v13902_v3 }
0x2a79   :  { %v7189_v32 = vpop.permute.xlu1 %7188 }
0x2a7a   :  { %8819 = vmatmul.mubr.msk.f32.vlgmr.msra.gmra.mrb[138].mxu0 %vm111_vm1, %v7189_v32  ;;  %v13982_v32 = vld [vmem:[#allocation13_spill] sm:$0xff] }
0x2a7b   :  { %8821 = vmatprep.mubr.msk.f32.mxu0 %vm9903_vm0, %v13902_v3 }
0x2a7d   :  { %v7191_v46 = vpop.permute.xlu1 %7190 }
0x2a7e   :  { %8822 = vmatmul.mubr.msk.f32.gmra.mrb[140].mxu0 %vm111_vm1, %v7191_v46  ;;  %v4129_v46 = vadd.f32 %v13982_v32, %v12299_v0 }
0x2a7f   :  { %8824 = vmatprep.mubr.msk.f32.mxu0 %vm9903_vm0, %v13902_v3 }
0x2a86   :  { %v7193_v57 = vpop.permute.xlu1 %7192 }
0x2a87   :  { %8825 = vmatmul.mubr.msk.f32.gmra.mrb[142].mxu0 %vm111_vm1, %v7193_v57 }
0x2a88   :  { %8852 = vmatprep.mubr.msk.f32.mxu0 %vm9903_vm0, %v13902_v3 }
0x2ae6   :  { %v7168_v2 = vpop.f32.mrb[138].mxu1 }
0x2ae7   :  { %v7182_v23 = vadd.f32 %v7168_v2, %v4241_v60  ;;  %v8803_v15 = vpop.f32.mrb[139].mxu1 }
0x2ae9   :  { %9820 = vtanh.f32 %v7182_v23  ;;  %v8030_v16 = vmul.f32 -1.442695, %v7182_v23 }
0x2aea   :  { %v7173_v33 = vpop.f32.mrb[140].mxu1 }
0x2aeb   :  { %v7183_v41 = vadd.f32 %v7173_v33, %v4247_v24  ;;  %v8806_v61 = vpop.f32.mrb[141].mxu1 }
0x2aed   :  { %9822 = vtanh.f32 %v7183_v41  ;;  %v8031_v13 = vmul.f32 -1.442695, %v7183_v41 }
0x2aee   :  { %v7178_v63 = vpop.f32.mrb[142].mxu1 }
0x2aef   :  { %v7184_v6 = vadd.f32 %v7178_v63, %v4253_v12  ;;  %v8809_v25 = vpop.f32.mrb[143].mxu1 }
0x2af1   :  { %9824 = vtanh.f32 %v7184_v6  ;;  %v8032_v7 = vmul.f32 -1.442695, %v7184_v6 }
0x2af2   :  { %9826 = vpow2.f32 %v8030_v16 }
0x2af3   :  { %v9821_v49 = vpop.eup %9820  ;;  %9828 = vpow2.f32 %v8031_v13 }
0x2af4   :  { %7310 = vrot.lane.b32.xlu0 %v9821_v49, %s9904_s0 }
0x2af7   :  { %v9823_v5 = vpop.eup %9822 }
0x2af8   :  { %7312 = vrot.lane.b32.xlu0 %v9823_v5, %s9904_s0 }
0x2afb   :  { %v9825_v45 = vpop.eup %9824 }
0x2afc   :  { %7314 = vrot.lane.b32.xlu0 %v9825_v45, %s9904_s0  ;;  %v9827_v8 = vpop.eup %9826 }
0x2afd   :  { %v7292_v26 = vadd.f32 1.0, %v9827_v8  ;;  %v9829_v62 = vpop.eup %9828 }
0x2afe   :  { %v7293_v23 = vadd.f32 1.0, %v9829_v62  ;;  %v7061_v62 = vsub.f32 %v13538_v31, %v13526_v36 }
0x2b00   :  { %v7064_v32 = vmul.f32 %v7061_v62, %v12613_v50 }
0x2b4d   :  { %v7266_v27 = vpop.f32.mrb[138].mxu0 }
0x2b4e   :  { %v7280_v21 = vadd.f32 %v7266_v27, %v4117_v18  ;;  %v8820_v48 = vpop.f32.mrb[139].mxu0 }
0x2b50   :  { %9830 = vtanh.f32 %v7280_v21  ;;  %v8033_v5 = vmul.f32 -1.442695, %v7280_v21  ;;  %v7060_v21 = vsub.f32 %v13529_v4, %v13515_v29  ;;  %v7062_v4 = vsub.f32 %v13543_v54, %v13536_v30 }
0x2b51   :  { %v7271_v17 = vpop.f32.mrb[140].mxu0  ;;  %9832 = vpow2.f32 %v8032_v7 }
0x2b52   :  { %v7281_v42 = vadd.f32 %v7271_v17, %v4123_v43  ;;  %v8823_v47 = vpop.f32.mrb[141].mxu0 }
0x2b54   :  { %9834 = vtanh.f32 %v7281_v42  ;;  %v8034_v45 = vmul.f32 -1.442695, %v7281_v42 }
0x2b55   :  { %9836 = vrcp.f32 %v7292_v26  ;;  %v7063_v26 = vmul.f32 %v7060_v21, %v12604_v40 }
0x2b5a   :  { %v9831_v57 = vpop.eup %9830  ;;  %v7276_v10 = vpop.f32.mrb[142].mxu0 }
0x2b5b   :  { %v7282_v60 = vadd.f32 %v7276_v10, %v4129_v46  ;;  %7382 = vrot.lane.b32.xlu1 %v9831_v57, %s9904_s0  ;;  %v8826_v2 = vpop.f32.mrb[143].mxu0  ;;  %v9833_v15 = vpop.eup %9832  ;;  %v7066_v46 = vadd.f32 %v7063_v26, %v13515_v29 }
0x2b5c   :  { %v7294_v24 = vadd.f32 1.0, %v9833_v15  ;;  %v7067_v15 = vadd.f32 %v7064_v32, %v13526_v36 }
0x2b5d   :  { %9838 = vtanh.f32 %v7282_v60  ;;  %v8035_v16 = vmul.f32 -1.442695, %v7282_v60 }
0x2b5e   :  { %v9835_v1 = vpop.eup %9834  ;;  %9840 = vrcp.f32 %v7293_v23  ;;  %v7065_v23 = vmul.f32 %v7062_v4, %v12624_v35  ;;  %v7449_v4 = vld [vmem:[%s13848_s10 + $0x20] sm:$0xff] }
0x2b5f   :  { %7384 = vrot.lane.b32.xlu1 %v9835_v1, %s9904_s0  ;;  %9842 = vrcp.f32 %v7294_v24  ;;  %v13668_v33 = vpop.eup %9836 }
0x2b60   :  { %9844 = vpow2.f32 %v8033_v5  ;;  %v7304_v60 = vmul.f32 %v13668_v33, %v7066_v46  ;;  %v7068_v1 = vadd.f32 %v7065_v23, %v13536_v30  ;;  %v7450_v46 = vld [vmem:[%s13848_s10 + $0x28] sm:$0xff]  ;;  %v7452_v23 = vld [vmem:[%s13848_s10 + $0x38] sm:$0xff] }
0x2b61   :  { %9846 = vpow2.f32 %v8034_v45 }
0x2b62   :  { %9848 = vpow2.f32 %v8035_v16 }
0x2b66   :  { %v7311_v41 = vpop.permute.xlu0 %7310 }
0x2b67   :  { %v9839_v0 = vpop.eup %9838  ;;  %v7319_v61 = vmul.f32 %v13668_v33, %v7311_v41 }
0x2b68   :  { %7386 = vrot.lane.b32.xlu1 %v9839_v0, %s9904_s0  ;;  %v13673_v52 = vpop.eup %9840 }
0x2b69   :  { %7325 = vrot.lane.b32.xlu0 %v7319_v61, %s9906_s3  ;;  %v13677_v6 = vpop.eup %9842  ;;  %v7305_v50 = vmul.f32 %v13673_v52, %v7067_v15 }
0x2b6a   :  { %v7313_v12 = vpop.permute.xlu0 %7312  ;;  %v9845_v13 = vpop.eup %9844  ;;  %v7306_v24 = vmul.f32 %v13677_v6, %v7068_v1 }
0x2b6b   :  { %v7320_v63 = vmul.f32 %v13673_v52, %v7313_v12  ;;  %v7364_v55 = vadd.f32 1.0, %v9845_v13  ;;  %v9847_v18 = vpop.eup %9846  ;;  %v7078_v12 = vsub.f32 %v13563_v11, %v13555_v37 }
0x2b6c   :  { %v7365_v27 = vadd.f32 1.0, %v9847_v18  ;;  %v9849_v48 = vpop.eup %9848 }
0x2b6d   :  { %7327 = vrot.lane.b32.xlu0 %v7320_v63, %s9906_s3  ;;  %9850 = vrcp.f32 %v7364_v55  ;;  %v7366_v7 = vadd.f32 1.0, %v9849_v48  ;;  %v7081_v30 = vmul.f32 %v7078_v12, %v12572_v39  ;;  %v7079_v63 = vsub.f32 %v13570_v58, %v13561_v34  ;;  %v13986_v12 = vld [vmem:[#allocation14_spill] sm:$0xff] }
0x2b6e   :  { %v7315_v25 = vpop.permute.xlu0 %7314  ;;  %9852 = vrcp.f32 %v7365_v27  ;;  %v7080_v55 = vsub.f32 %v13579_v9, %v13575_v22  ;;  %v7445_v27 = vld [vmem:[%s13848_s10] sm:$0xff] }
0x2b6f   :  { %v7321_v49 = vmul.f32 %v13677_v6, %v7315_v25  ;;  %9854 = vrcp.f32 %v7366_v7  ;;  %v7082_v25 = vmul.f32 %v7079_v63, %v13975_v28 }
0x2b70   :  { %v7083_v58 = vmul.f32 %v7080_v55, %v13976_v14  ;;  %v7448_v14 = vld [vmem:[%s13848_s10 + $0x18] sm:$0xff] }
0x2b71   :  { %7329 = vrot.lane.b32.xlu0 %v7321_v49, %s9906_s3  ;;  %v7084_v49 = vadd.f32 %v7081_v30, %v13555_v37  ;;  %v7085_v13 = vadd.f32 %v7082_v25, %v13561_v34  ;;  %v7446_v34 = vld [vmem:[%s13848_s10 + $0x8] sm:$0xff] }
0x2b72   :  { %v7086_v28 = vadd.f32 %v7083_v58, %v13575_v22  ;;  %v9084_v7 = vpack.c.bf16 %v7446_v34, %v7445_v27  ;;  %v7447_v22 = vld [vmem:[%s13848_s10 + $0x10] sm:$0xff] }
0x2b73   :  { %v9087_v21 = vpack.c.bf16 %v7448_v14, %v7447_v22 }
0x2b74   :  { %9085 = vmatpush3.bf16.msra.mxu0 %v9084_v7 }
0x2b75   :  { %9086 = vmatprep.subr.bf16.mxu0 %v13903_v59 }
0x2b77   :  { %v13681_v19 = vpop.eup %9850 }
0x2b78   :  { %v13687_v42 = vpop.eup %9852  ;;  %v7376_v5 = vmul.f32 %v13681_v19, %v7084_v49  ;;  %9088 = vmatpush3.bf16.msra.mxu0 %v9087_v21  ;;  %v13987_v49 = vld [vmem:[#allocation17_spill] sm:$0xff] }
0x2b79   :  { %v13698_v57 = vpop.eup %9854  ;;  %v7377_v11 = vmul.f32 %v13687_v42, %v7085_v13  ;;  %v13988_v13 = vld [vmem:[#allocation16_spill] sm:$0xff] }
0x2b7a   :  { %v7378_v37 = vmul.f32 %v13698_v57, %v7086_v28 }
0x2bcd   :  { %v7383_v43 = vpop.permute.xlu1 %7382 }
0x2bce   :  { %v7391_v17 = vmul.f32 %v13681_v19, %v7383_v43 }
0x2bd0   :  { %7397 = vrot.lane.b32.xlu1 %v7391_v17, %s9906_s3 }
0x2bd1   :  { %v7385_v47 = vpop.permute.xlu1 %7384 }
0x2bd2   :  { %v7392_v8 = vmul.f32 %v13687_v42, %v7385_v47 }
0x2bd4   :  { %7399 = vrot.lane.b32.xlu1 %v7392_v8, %s9906_s3 }
0x2bda   :  { %v7387_v10 = vpop.permute.xlu1 %7386 }
0x2bdb   :  { %v7393_v2 = vmul.f32 %v13698_v57, %v7387_v10  ;;  %v7326_v40 = vpop.permute.xlu0 %7325  ;;  %v7451_v10 = vld [vmem:[%s13848_s10 + $0x30] sm:$0xff] }
0x2bdc   :  { %v7334_v31 = vadd.f32 %v7326_v40, %v7304_v60  ;;  %v13983_v60 = vld [vmem:[#allocation18_spill] sm:$0xff]  ;;  %v9078_v40 = vpack.c.bf16 %v7450_v46, %v7449_v4 }
0x2bdd   :  { %7401 = vrot.lane.b32.xlu1 %v7393_v2, %s9906_s3 }
0x2bde   :  { %9856 = vtanh.f32 %v7334_v31  ;;  %9079 = vmatpush3.bf16.msra.mxu1 %v9078_v40 }
0x2bdf   :  { %v7328_v54 = vpop.permute.xlu0 %7327  ;;  %9080 = vmatprep.subr.bf16.mxu1 %v13903_v59 }
0x2be0   :  { %v7335_v29 = vadd.f32 %v7328_v54, %v7305_v50  ;;  %v9081_v50 = vpack.c.bf16 %v7452_v23, %v7451_v10 }
0x2be2   :  { %9858 = vtanh.f32 %v7335_v29  ;;  %v13984_v29 = vld [vmem:[#allocation7_spill] sm:$0xff]  ;;  %9082 = vmatpush3.bf16.msra.mxu1 %v9081_v50 }
0x2be3   :  { %v7330_v41 = vpop.permute.xlu0 %7329 }
0x2be4   :  { %v7336_v0 = vadd.f32 %v7330_v41, %v7306_v24 }
0x2be6   :  { %9860 = vtanh.f32 %v7336_v0  ;;  %v13985_v0 = vld [vmem:[#allocation29_spill] sm:$0xff] }
0x2be8   :  { %v9857_v61 = vpop.eup %9856 }
0x2be9   :  { %7343 = vrot.lane.b32.xlu0 %v9857_v61, %s9904_s0 }
0x2bec   :  { %v9859_v35 = vpop.eup %9858 }
0x2bed   :  { %7345 = vrot.lane.b32.xlu0 %v9859_v35, %s9904_s0 }
0x2bf0   :  { %v9861_v36 = vpop.eup %9860 }
0x2bf1   :  { %7347 = vrot.lane.b32.xlu0 %v9861_v36, %s9904_s0 }
0x2c42   :  { %v7398_v45 = vpop.permute.xlu1 %7397 }
0x2c43   :  { %v7406_v16 = vadd.f32 %v7398_v45, %v7376_v5 }
0x2c45   :  { %9862 = vtanh.f32 %v7406_v16 }
0x2c46   :  { %v7400_v39 = vpop.permute.xlu1 %7399 }
0x2c47   :  { %v7407_v18 = vadd.f32 %v7400_v39, %v7377_v11 }
0x2c49   :  { %9864 = vtanh.f32 %v7407_v18 }
0x2c4f   :  { %v9863_v9 = vpop.eup %9862  ;;  %v7402_v48 = vpop.permute.xlu1 %7401 }
0x2c50   :  { %v7408_v43 = vadd.f32 %v7402_v48, %v7378_v37  ;;  %7415 = vrot.lane.b32.xlu1 %v9863_v9, %s9904_s0  ;;  %v8042_v48 = vld [vmem:[%s13849_s11] ss:$0 sm:$0xff] }
0x2c52   :  { %9866 = vtanh.f32 %v7408_v43 }
0x2c53   :  { %v9865_v17 = vpop.eup %9864 }
0x2c54   :  { %7417 = vrot.lane.b32.xlu1 %v9865_v17, %s9904_s0 }
0x2c5b   :  { %v7344_v47 = vpop.permute.xlu0 %7343 }
0x2c5c   :  { %v9867_v8 = vpop.eup %9866  ;;  %v7352_v26 = vmul.f32 %v13668_v33, %v7344_v47 }
0x2c5d   :  { %7419 = vrot.lane.b32.xlu1 %v9867_v8, %s9904_s0  ;;  %v7654_v8 = vld [vmem:[%s13850_s12 + $0x8] sm:$0xff] }
0x2c5e   :  { %v7427_v62 = vsub.f32 %v7352_v26, %v13590_v38 }
0x2c5f   :  { %v7346_v32 = vpop.permute.xlu0 %7345 }
0x2c60   :  { %v7430_v2 = vmul.f32 %v7427_v62, %v13983_v60  ;;  %v7353_v33 = vmul.f32 %v13673_v52, %v7346_v32 }
0x2c62   :  { %v7433_v31 = vadd.f32 %v7430_v2, %v13590_v38  ;;  %v7428_v15 = vsub.f32 %v7353_v33, %v13598_v20  ;;  %v7655_v2 = vld [vmem:[%s13850_s12 + $0x10] sm:$0xff] }
0x2c63   :  { %v7348_v54 = vpop.permute.xlu0 %7347 }
0x2c64   :  { %v7431_v1 = vmul.f32 %v7428_v15, %v13984_v29  ;;  %v7354_v24 = vmul.f32 %v13677_v6, %v7348_v54  ;;  %7551 = vrot.lane.b32.xlu1 %v7433_v31, %s9906_s3 }
0x2c66   :  { %v7434_v52 = vadd.f32 %v7431_v1, %v13598_v20  ;;  %v7429_v41 = vsub.f32 %v7354_v24, %v13605_v53 }
0x2c68   :  { %v7432_v38 = vmul.f32 %v7429_v41, %v13985_v0  ;;  %7553 = vrot.lane.b32.xlu1 %v7434_v52, %s9906_s3 }
0x2c6a   :  { %v7435_v61 = vadd.f32 %v7432_v38, %v13605_v53 }
0x2c6c   :  { %7555 = vrot.lane.b32.xlu1 %v7435_v61, %s9906_s3 }
0x2cc2   :  { %v7416_v59 = vpop.permute.xlu1 %7415 }
0x2cc3   :  { %v7424_v35 = vmul.f32 %v13681_v19, %v7416_v59 }
0x2cc5   :  { %v7436_v6 = vsub.f32 %v7424_v35, %v13614_v56 }
0x2cc6   :  { %v7418_v36 = vpop.permute.xlu1 %7417 }
0x2cc7   :  { %v7439_v30 = vmul.f32 %v7436_v6, %v13986_v12  ;;  %v7425_v20 = vmul.f32 %v13687_v42, %v7418_v36 }
0x2cc9   :  { %v7442_v63 = vadd.f32 %v7439_v30, %v13614_v56  ;;  %v7437_v25 = vsub.f32 %v7425_v20, %v13621_v44 }
0x2ccb   :  { %v7440_v5 = vmul.f32 %v7437_v25, %v13987_v49  ;;  %7456 = vrot.lane.b32.xlu0 %v7442_v63, %s9906_s3 }
0x2ccd   :  { %v7443_v53 = vadd.f32 %v7440_v5, %v13621_v44 }
0x2ccf   :  { %v7420_v45 = vpop.permute.xlu1 %7419  ;;  %7458 = vrot.lane.b32.xlu0 %v7443_v53, %s9906_s3 }
0x2cd0   :  { %v7426_v19 = vmul.f32 %v13698_v57, %v7420_v45  ;;  %v8043_v45 = vld [vmem:[%s13851_s13] ss:$0 sm:$0xff]  ;;  %s9907_s13 = smov [#allocation4]  }
0x2cd1   :  { %s7727_s1 = sshll.u32 %s9907_s13, 4  ;;  %s7728_s1 = int_to_ptr.vmem [resolvable:$true] %s7727_s1 }
0x2cd2   :  { %v7438_v16 = vsub.f32 %v7426_v19, %v13629_v51  ;;  %p9882_p1 = scmp.lt.s32.totalorder %s7728_s1, %s7728_s1 }
0x2cd4   :  { %v7441_v55 = vmul.f32 %v7438_v16, %v13988_v13  ;;  %v8044_v13 = vld [vmem:[%s13852_s14] ss:$0 sm:$0xff]  ;;  %s9877_s14 = scalar_lea.vmem %s7728_s1, 384 }
0x2cd5   :  { %p9878_p0 = scmp.ne.s32.totalorder %s7728_s1, %s9877_s14  ;;  %p9883_p2 = scmp.lt.s32.totalorder %s9877_s14, %s9877_s14 }
0x2cd6   :  { %v7444_v42 = vadd.f32 %v7441_v55, %v13629_v51  ;;  %v7552_v56 = vpop.permute.xlu1 %7551 }
0x2cd7   :  { %8853 = vmatmul.mubr.msk.f32.vlgmr.msra.gmra.mrb[144].mxu0 %vm111_vm1, %v7552_v56  ;;  %p9884_p3 = por %p9883_p2, %p9882_p1 }
0x2cd8   :  { %7460 = vrot.lane.b32.xlu0 %v7444_v42, %s9906_s3  ;;  %8855 = vmatprep.mubr.msk.f32.mxu0 %vm9903_vm0, %v13902_v3 }
0x2cd9   :  { %p9885_p4 = pnand %p9884_p3, %p9878_p0 }
0x2cda   :  { %v7554_v44 = vpop.permute.xlu1 %7553 }
0x2cdb   :  { %8856 = vmatmul.mubr.msk.f32.gmra.mrb[146].mxu0 %vm111_vm1, %v7554_v44 }
0x2cdc   :  { %8858 = vmatprep.mubr.msk.f32.mxu0 %vm9903_vm0, %v13902_v3 }
0x2cde   :  { %v7556_v57 = vpop.permute.xlu1 %7555 }
0x2cdf   :  { %8859 = vmatmul.mubr.msk.f32.gmra.mrb[148].mxu0 %vm111_vm1, %v7556_v57 }
0x2d3d   :  { %v7457_v11 = vpop.permute.xlu0 %7456 }
0x2d3e   :  { %8836 = vmatmul.mubr.msk.f32.vlgmr.msra.gmra.mrb[144].mxu1 %vm111_vm1, %v7457_v11 }
0x2d3f   :  { %8838 = vmatprep.mubr.msk.f32.mxu1 %vm9903_vm0, %v13902_v3 }
0x2d41   :  { %v7459_v51 = vpop.permute.xlu0 %7458 }
0x2d42   :  { %8839 = vmatmul.mubr.msk.f32.gmra.mrb[146].mxu1 %vm111_vm1, %v7459_v51 }
0x2d43   :  { %8841 = vmatprep.mubr.msk.f32.mxu1 %vm9903_vm0, %v13902_v3  ;;  %v7653_v3 = vld [vmem:[%s13850_s12] sm:$0xff] }
0x2d4a   :  { %v7461_v39 = vpop.permute.xlu0 %7460 }
0x2d4b   :  { %8842 = vmatmul.mubr.msk.f32.gmra.mrb[148].mxu1 %vm111_vm1, %v7461_v39 }
0x2daa   :  { %v7629_v18 = vpop.f32.mrb[144].mxu0 }
0x2dab   :  { %v8854_v58 = vpop.f32.mrb[145].mxu0 }
0x2dae   :  { %v7634_v28 = vpop.f32.mrb[146].mxu0 }
0x2daf   :  { %v8857_v37 = vpop.f32.mrb[147].mxu0 }
0x2db2   :  { %v7639_v27 = vpop.f32.mrb[148].mxu0 }
0x2db3   :  { %v8860_v34 = vpop.f32.mrb[149].mxu0 }
0x2e11   :  { %v7534_v9 = vpop.f32.mrb[144].mxu1 }
0x2e12   :  { %v7630_v7 = vadd.f32 %v7629_v18, %v7534_v9  ;;  %v8837_v43 = vpop.f32.mrb[145].mxu1 }
0x2e14   :  { %v7650_v22 = vadd.f32 %v8042_v48, %v7630_v7 }
0x2e15   :  { %v7539_v14 = vpop.f32.mrb[146].mxu1 }
0x2e16   :  { %v7635_v17 = vadd.f32 %v7634_v28, %v7539_v14  ;;  %v8840_v21 = vpop.f32.mrb[147].mxu1  ;;  %v7656_v47 = vadd.f32 %v7653_v3, %v7650_v22 }
0x2e18   :  { %v7651_v26 = vadd.f32 %v8042_v48, %v7635_v17  ;;  %v7659_v62 = vsel %vm111_vm1, %v7656_v47, 0.0 }
0x2e19   :  { %7660 = vadd.xlane.f32.xlu0 %v7659_v62 }
0x2e1a   :  { %v7657_v32 = vadd.f32 %v7654_v8, %v7651_v26 }
0x2e1c   :  { %v7662_v4 = vsel %vm111_vm1, %v7657_v32, 0.0 }
0x2e1d   :  { %7663 = vadd.xlane.f32.xlu1 %v7662_v4 }
0x2e1e   :  { %v7544_v46 = vpop.f32.mrb[148].mxu1 }
0x2e1f   :  { %v7640_v10 = vadd.f32 %v7639_v27, %v7544_v46  ;;  %v8843_v60 = vpop.f32.mrb[149].mxu1 }
0x2e21   :  { %v7652_v33 = vadd.f32 %v8042_v48, %v7640_v10 }
0x2e23   :  { %v7658_v40 = vadd.f32 %v7655_v2, %v7652_v33 }
0x2e25   :  { %v7665_v23 = vsel %vm111_vm1, %v7658_v40, 0.0 }
0x2e26   :  { %7666 = vadd.xlane.f32.xlu0 %v7665_v23 }
0x2ea6   :  { %v7661_v31 = vpop.xlane.xlu0 %7660 }
0x2ea7   :  { %v7669_v15 = vmul.f32 0.03125, %v7661_v31 }
0x2ea9   :  { %v7672_v50 = vsub.f32 %v7656_v47, %v7669_v15 }
0x2eaa   :  { %v7664_v54 = vpop.xlane.xlu1 %7663 }
0x2eab   :  { %v7670_v29 = vmul.f32 0.03125, %v7664_v54  ;;  %v7675_v1 = vmul.f32 %v7672_v50, %v7672_v50 }
0x2ead   :  { %v7673_v24 = vsub.f32 %v7657_v32, %v7670_v29  ;;  %v7678_v52 = vsel %vm111_vm1, %v7675_v1, 0.0 }
0x2eae   :  { %7679 = vadd.xlane.f32.xlu0 %v7678_v52 }
0x2eaf   :  { %v7676_v41 = vmul.f32 %v7673_v24, %v7673_v24 }
0x2eb1   :  { %v7681_v0 = vsel %vm111_vm1, %v7676_v41, 0.0 }
0x2eb2   :  { %7682 = vadd.xlane.f32.xlu1 %v7681_v0 }
0x2eb3   :  { %v7667_v38 = vpop.xlane.xlu0 %7666 }
0x2eb4   :  { %v7671_v61 = vmul.f32 0.03125, %v7667_v38 }
0x2eb6   :  { %v7674_v59 = vsub.f32 %v7658_v40, %v7671_v61 }
0x2eb8   :  { %v7677_v35 = vmul.f32 %v7674_v59, %v7674_v59 }
0x2eba   :  { %v7684_v6 = vsel %vm111_vm1, %v7677_v35, 0.0 }
0x2ebb   :  { %7685 = vadd.xlane.f32.xlu0 %v7684_v6 }
0x2f3b   :  { %v7680_v36 = vpop.xlane.xlu0 %7679 }
0x2f3c   :  { %v7687_v12 = vmul.f32 0.03125, %v7680_v36 }
0x2f3e   :  { %v7690_v30 = vadd.f32 1e-05, %v7687_v12 }
0x2f3f   :  { %v7683_v20 = vpop.xlane.xlu1 %7682 }
0x2f40   :  { %9868 = vrsqrt.f32 %v7690_v30  ;;  %v7688_v63 = vmul.f32 0.03125, %v7683_v20 }
0x2f42   :  { %v7691_v25 = vadd.f32 1e-05, %v7688_v63 }
0x2f44   :  { %9870 = vrsqrt.f32 %v7691_v25 }
0x2f48   :  { %v7686_v49 = vpop.xlane.xlu0 %7685 }
0x2f49   :  { %v7689_v5 = vmul.f32 0.03125, %v7686_v49 }
0x2f4a   :  { %v9869_v53 = vpop.eup %9868 }
0x2f4b   :  { %v7696_v19 = vmul.f32 %v9869_v53, %v7672_v50  ;;  %v7692_v16 = vadd.f32 1e-05, %v7689_v5 }
0x2f4d   :  { %v7706_v55 = vmul.f32 %v8043_v45, %v7696_v19  ;;  %9872 = vrsqrt.f32 %v7692_v16 }
0x2f4e   :  { %v9871_v42 = vpop.eup %9870 }
0x2f4f   :  { %v7697_v56 = vmul.f32 %v9871_v42, %v7673_v24  ;;  %v7716_v44 = vadd.f32 %v8044_v13, %v7706_v55 }
0x2f51   :  { %v7707_v57 = vmul.f32 %v8043_v45, %v7697_v56  ;;  %7719 = vst.msk [vmem:[#allocation4] sm:$0xff] %vm111_vm1, %v7716_v44 }
0x2f53   :  { %v7717_v11 = vadd.f32 %v8044_v13, %v7707_v57 }
0x2f55   :  { %7720 = vst.msk [vmem:[#allocation4 + $0x8] sm:$0xff] %vm111_vm1, %v7717_v11 }
0x2f57   :  { %v9873_v51 = vpop.eup %9872 }
0x2f58   :  { %v7698_v39 = vmul.f32 %v9873_v51, %v7674_v59 }
0x2f5a   :  { %v7708_v18 = vmul.f32 %v8043_v45, %v7698_v39 }
0x2f5c   :  { %v7718_v58 = vadd.f32 %v8044_v13, %v7708_v18 }
0x2f5e   :  { %7721 = vst.msk [vmem:[#allocation4 + $0x10] sm:$0xff] %vm111_vm1, %v7718_v58 }
0x2f5f   :  { %9888 = shalt.err (!%p9885_p4)
}
0x2f60   :  { %s9889_s7 = scalar_lea.hbm %s13853_s15, 384 }
0x2f61   :  { %p9890_p5 = scmp.ne.s32.totalorder %s13853_s15, %s9889_s7  ;;  %p9893_p6 = scmp.lt.u32.totalorder %s9889_s7, %s13853_s15 }
0x2f63   :  { %p9895_p7 = pnand %p9893_p6, %p9890_p5 }
0x2f65   :  { %9898 = shalt.err (!%p9895_p7)
}
0x2f66   :  { %s9908_s23 = smov 128   ;;  %s9909_s6 = smov 8  }
0x2f67   :  { %7733 = dma.vmem_to_hbm [thread:$0]  %s7728_s1, 384, %s13853_s15, [#allocation5], %s9908_s23, %s9908_s23, %s9909_s6  }
0x2f68   :  { %9899 = dma.done.wait [#allocation5], 384  }
0x2f69   :  { %9900 = vsyncadd [#allocation5], 4294966912 }
0x2f6a   :  { %7737 = vsyncpa [#allocation5], 1 }

</bundles_post_ra>
